<compile_context>
chip_gen: v6e
topology: v6e:2x2x1
jax: 0.10.0
libtpu: 0.0.40
codegen_flags: <defaults>
</compile_context>

<pallas_src>
import jax
import jax.numpy as jnp
from jax.experimental import pallas as pl
from jax.experimental.pallas import tpu as pltpu


_VMEM_LIMIT = 48 * 1024 * 1024
_TN2 = 512            # layer-2 output tile width -> 4 grid steps over W2/W3


# ---------------------------------------------------------------------------
# Fused kernel:
#   step 0      : feat1 = ReLU(BN1(x @ W1))          (512  -> 4096, resident W1)
#   every step j: feat2[:, tile_j] = ReLU(BN2(feat1 @ W2[:, tile_j]))
#                 f3_acc += feat2[:, tile_j] @ W3[tile_j, :]
#   last step   : feat3 = ReLU(f3_acc + b3)          (Dropout = identity, eval)
#                 code  = tanh(feat3 @ W4 + b4)
# ---------------------------------------------------------------------------
def _imgnet_t_kernel(x_ref, w1_ref, sb1_ref, w2_ref, sb2_ref, w3_ref, b3_ref,
                     w4_ref, b4_ref,
                     feat1_ref, feat2_ref, feat3_ref, code_ref,
                     f1b_ref, f3acc_ref):
    j = pl.program_id(0)

    # ---- grid step 0: layer 1 over all 4096 outputs ----
    @pl.when(j == 0)
    def _():
        acc1 = jnp.dot(x_ref[...].astype(jnp.bfloat16), w1_ref[...],
                       preferred_element_type=jnp.float32)
        f1 = jnp.maximum(acc1 * sb1_ref[0:1, :] + sb1_ref[1:2, :], 0.0)
        feat1_ref[...] = f1.astype(feat1_ref.dtype)
        f1b_ref[...] = f1.astype(jnp.bfloat16)       # layer-2 input, cast once
        f3acc_ref[...] = jnp.zeros_like(f3acc_ref)   # layer-3 accumulator

    # ---- every step: layer-2 output tile j (full-K matmul, folded BN, ReLU) ----
    acc2 = jnp.dot(f1b_ref[...], w2_ref[0], preferred_element_type=jnp.float32)
    f2 = jnp.maximum(acc2 * sb2_ref[0:1, :] + sb2_ref[1:2, :], 0.0)
    feat2_ref[...] = f2.astype(feat2_ref.dtype)

    # fold this feat2 tile straight into layer 3's reduction (rows tile_j of W3)
    f3acc_ref[...] += jnp.dot(f2.astype(jnp.bfloat16), w3_ref[0],
                              preferred_element_type=jnp.float32)

    # ---- last step: finish layer 3 (bias + ReLU) and the tanh hashing layer ----
    @pl.when(j == pl.num_programs(0) - 1)
    def _():
        f3 = jnp.maximum(f3acc_ref[...] + b3_ref[...], 0.0)
        feat3_ref[...] = f3.astype(feat3_ref.dtype)
        code = jnp.dot(f3.astype(jnp.bfloat16), w4_ref[...],
                       preferred_element_type=jnp.float32) + b4_ref[...]
        code_ref[...] = jnp.tanh(code).astype(code_ref.dtype)


def imgnet_t_fused(x, params):
    B, K1 = x.shape
    w1, sb1 = params["w1"], params["sb1"]
    w2b, sb2 = params["w2b"], params["sb2"]
    w3b, b3 = params["w3b"], params["b3"]
    w4, b4 = params["w4"], params["b4"]

    N1 = w1.shape[1]
    NT, K2, TN2 = w2b.shape
    N2 = NT * TN2
    N3 = w3b.shape[2]
    N4 = w4.shape[1]
    assert w1.shape[0] == K1 and K2 == N1 and w3b.shape[1] == TN2
    assert sb2.shape == (2, N2) and w4.shape[0] == N3

    weight_bytes = 2 * (K1 * N1 + N1 * N2 + N2 * N3 + N3 * N4)
    act_bytes = 4 * B * (K1 + N1 + N2 + N3 + N4)
    sb_bytes = 4 * (2 * N1 + 2 * N2 + N3 + N4)

    return pl.pallas_call(
        _imgnet_t_kernel,
        out_shape=(jax.ShapeDtypeStruct((B, N1), x.dtype),   # feat1
                   jax.ShapeDtypeStruct((B, N2), x.dtype),   # feat2
                   jax.ShapeDtypeStruct((B, N3), x.dtype),   # feat3
                   jax.ShapeDtypeStruct((B, N4), x.dtype)),  # code
        grid_spec=pltpu.PrefetchScalarGridSpec(
            num_scalar_prefetch=0,
            grid=(NT,),
            in_specs=[
                pl.BlockSpec((B, K1), lambda j: (0, 0)),        # x (resident)
                pl.BlockSpec((K1, N1), lambda j: (0, 0)),       # W1 (resident)
                pl.BlockSpec((2, N1), lambda j: (0, 0)),        # BN1 scale/bias
                pl.BlockSpec((1, K2, TN2), lambda j: (j, 0, 0)),  # W2 slab (streamed)
                pl.BlockSpec((2, TN2), lambda j: (0, j)),       # BN2 scale/bias tile
                pl.BlockSpec((1, TN2, N3), lambda j: (j, 0, 0)),  # W3 slab (streamed)
                pl.BlockSpec((1, N3), lambda j: (0, 0)),        # b3
                pl.BlockSpec((N3, N4), lambda j: (0, 0)),       # W4 (resident)
                pl.BlockSpec((1, N4), lambda j: (0, 0)),        # b4
            ],
            out_specs=[
                pl.BlockSpec((B, N1), lambda j: (0, 0)),        # feat1 (step 0)
                pl.BlockSpec((B, TN2), lambda j: (0, j)),       # feat2 tile j
                pl.BlockSpec((B, N3), lambda j: (0, 0)),        # feat3 (last step)
                pl.BlockSpec((B, N4), lambda j: (0, 0)),        # code  (last step)
            ],
            scratch_shapes=[
                pltpu.VMEM((B, N1), jnp.bfloat16),   # feat1 in bf16 (layer-2 input)
                pltpu.VMEM((B, N3), jnp.float32),    # layer-3 accumulator
            ]),
        compiler_params=pltpu.CompilerParams(
            dimension_semantics=("arbitrary",),
            vmem_limit_bytes=_VMEM_LIMIT),
        cost_estimate=pl.CostEstimate(
            flops=2 * B * (K1 * N1 + N1 * N2 + N2 * N3 + N3 * N4),
            transcendentals=B * N4,
            bytes_accessed=weight_bytes + sb_bytes + act_bytes),
    )(x, w1, sb1, w2b, sb2, w3b, b3, w4, b4)


@jax.jit
def imgnet_t_forward(x, params):
    return imgnet_t_fused(x, params)


# ---------------------------------------------------------------------------
# Deterministic parameter construction (synthetic; no checkpoint loading).
# Weights stored bf16 in kernel-friendly layouts; eval-mode BN folded to
# per-feature (scale, bias) applied after the f32 matmul accumulation.
# ---------------------------------------------------------------------------
def make_params(code_len=64, key=None):
    if key is None:
        key = jax.random.PRNGKey(42)

    def linear(key, fan_in, fan_out):
        kw, kb = jax.random.split(key)
        lim = 1.0 / jnp.sqrt(fan_in)
        # stored as (in, out): transpose of PyTorch's (out, in)
        w = jax.random.uniform(kw, (fan_in, fan_out), jnp.float32, -lim, lim)
        b = jax.random.uniform(kb, (fan_out,), jnp.float32, -lim, lim)
        return w, b

    def bn(key, n):
        k1, k2, k3 = jax.random.split(key, 3)
        gamma = 1.0 + 0.05 * jax.random.normal(k1, (n,), jnp.float32)
        beta = 0.05 * jax.random.normal(k2, (n,), jnp.float32)
        running_mean = 0.05 * jax.random.normal(k3, (n,), jnp.float32)
        running_var = jnp.ones((n,), jnp.float32)
        return gamma, beta, running_mean, running_var

    keys = jax.random.split(key, 6)
    w1, b1 = linear(keys[0], 512, 4096)
    g1, be1, m1, v1 = bn(keys[1], 4096)
    w2, b2 = linear(keys[2], 4096, 2048)
    g2, be2, m2, v2 = bn(keys[3], 2048)
    w3, b3 = linear(keys[4], 2048, 512)
    w4, b4 = linear(keys[5], 512, code_len)

    eps = 1e-5
    # Fold eval-mode BatchNorm into (scale, bias) applied after the matmul:
    #   BN(xW + b) = (xW) * s + ((b - mean) * s + beta),  s = gamma/sqrt(var+eps)
    s1 = g1 / jnp.sqrt(v1 + eps)
    bias1 = (b1 - m1) * s1 + be1
    s2 = g2 / jnp.sqrt(v2 + eps)
    bias2 = (b2 - m2) * s2 + be2

    # Pre-block W2 / W3 so each grid step streams one contiguous HBM slab.
    nt = 2048 // _TN2
    w2b = w2.reshape(4096, nt, _TN2).transpose(1, 0, 2)   # (NT, 4096, TN2)
    w3b = w3.reshape(nt, _TN2, 512)                       # (NT, TN2, 512)

    return {
        "w1": w1.astype(jnp.bfloat16), "sb1": jnp.stack([s1, bias1]),
        "w2b": w2b.astype(jnp.bfloat16), "sb2": jnp.stack([s2, bias2]),
        "w3b": w3b.astype(jnp.bfloat16), "b3": b3[None, :],
        "w4": w4.astype(jnp.bfloat16), "b4": b4[None, :],
    }


def reference_forward(x, params):
    """Pure-JAX reference mirroring the kernel's bf16-weight / f32-accum math."""
    def dot_bf16(a, w_bf16):
        return jnp.dot(a.astype(jnp.bfloat16), w_bf16,
                       preferred_element_type=jnp.float32)

    nt, k2, tn2 = params["w2b"].shape
    w2 = params["w2b"].transpose(1, 0, 2).reshape(k2, nt * tn2)
    w3 = params["w3b"].reshape(nt * tn2, -1)

    f1 = jnp.maximum(dot_bf16(x, params["w1"]) * params["sb1"][0:1]
                     + params["sb1"][1:2], 0.0)
    f2 = jnp.maximum(dot_bf16(f1, w2) * params["sb2"][0:1]
                     + params["sb2"][1:2], 0.0)
    f3 = jnp.maximum(dot_bf16(f2, w3) + params["b3"], 0.0)
    code = jnp.tanh(dot_bf16(f3, params["w4"]) + params["b4"])
    return f1, f2, f3, code


if __name__ == "__main__":
    B, D_IN, CODE_LEN = 8, 512, 64
    key = jax.random.PRNGKey(0)
    kx, kp = jax.random.split(key)
    x = jax.random.normal(kx, (B, D_IN), jnp.float32)

    params = make_params(code_len=CODE_LEN, key=kp)

    outs = imgnet_t_forward(x, params)
    outs = jax.block_until_ready(outs)

    refs = reference_forward(x, params)
    for o, r in zip(outs, refs):
        assert o.shape == r.shape, (o.shape, r.shape)
        assert jnp.allclose(o, r, atol=2e-3, rtol=2e-3), float(
            jnp.max(jnp.abs(o - r)))

    assert outs[0].shape == (B, 4096)
    assert outs[1].shape == (B, 2048)
    assert outs[2].shape == (B, 512)
    assert outs[3].shape == (B, CODE_LEN)

    print("KERNEL_OK")
</pallas_src>

<mosaic_0001>
module attributes {stable_mosaic.version = 11 : i64} {
  func.func @_imgnet_t_kernel(%arg0: i32, %arg1: memref<8x512xf32, #tpu.memory_space<vmem>>, %arg2: memref<512x4096xbf16, #tpu.memory_space<vmem>>, %arg3: memref<2x4096xf32, #tpu.memory_space<vmem>>, %arg4: memref<1x4096x512xbf16, #tpu.memory_space<vmem>>, %arg5: memref<2x512xf32, #tpu.memory_space<vmem>>, %arg6: memref<1x512x512xbf16, #tpu.memory_space<vmem>>, %arg7: memref<1x512xf32, #tpu.memory_space<vmem>>, %arg8: memref<512x64xbf16, #tpu.memory_space<vmem>>, %arg9: memref<1x64xf32, #tpu.memory_space<vmem>>, %arg10: memref<8x4096xf32, #tpu.memory_space<vmem>>, %arg11: memref<8x512xf32, #tpu.memory_space<vmem>>, %arg12: memref<8x512xf32, #tpu.memory_space<vmem>>, %arg13: memref<8x64xf32, #tpu.memory_space<vmem>>, %arg14: memref<8x4096xbf16, #tpu.memory_space<vmem>>, %arg15: memref<8x512xf32, #tpu.memory_space<vmem>>) attributes {dimension_semantics = [#tpu.dimension_semantics<arbitrary>], iteration_bounds = array<i64: 4>, scalar_prefetch = 0 : i64, scratch_operands = 2 : i64, tpu.core_type = #tpu.core_type<tc>, window_params = [{pipeline_mode = #tpu.pipeline_mode<synchronous>, transform_indices = @transform_0, window_bounds = array<i64: 8, 512>}, {pipeline_mode = #tpu.pipeline_mode<synchronous>, transform_indices = @transform_1, window_bounds = array<i64: 512, 4096>}, {pipeline_mode = #tpu.pipeline_mode<synchronous>, transform_indices = @transform_2, window_bounds = array<i64: 2, 4096>}, {transform_indices = @transform_3, window_bounds = array<i64: 1, 4096, 512>}, {transform_indices = @transform_4, window_bounds = array<i64: 2, 512>}, {transform_indices = @transform_5, window_bounds = array<i64: 1, 512, 512>}, {pipeline_mode = #tpu.pipeline_mode<synchronous>, transform_indices = @transform_6, window_bounds = array<i64: 1, 512>}, {pipeline_mode = #tpu.pipeline_mode<synchronous>, transform_indices = @transform_7, window_bounds = array<i64: 512, 64>}, {pipeline_mode = #tpu.pipeline_mode<synchronous>, transform_indices = @transform_8, window_bounds = array<i64: 1, 64>}, {pipeline_mode = #tpu.pipeline_mode<synchronous>, transform_indices = @transform_9, window_bounds = array<i64: 8, 4096>}, {transform_indices = @transform_10, window_bounds = array<i64: 8, 512>}, {pipeline_mode = #tpu.pipeline_mode<synchronous>, transform_indices = @transform_11, window_bounds = array<i64: 8, 512>}, {pipeline_mode = #tpu.pipeline_mode<synchronous>, transform_indices = @transform_12, window_bounds = array<i64: 8, 64>}]} {
    %c0_i32 = arith.constant 0 : i32
    %0 = arith.cmpi eq, %arg0, %c0_i32 : i32
    %1 = arith.extui %0 : i1 to i32
    %c0_i32_0 = arith.constant 0 : i32
    %2 = arith.cmpi ne, %1, %c0_i32_0 : i32
    scf.if %2 {
      %c0_20 = arith.constant 0 : index
      %c0_21 = arith.constant 0 : index
      %26 = vector.load %arg1[%c0_20, %c0_21] : memref<8x512xf32, #tpu.memory_space<vmem>>, vector<8x512xf32>
      %27 = arith.truncf %26 : vector<8x512xf32> to vector<8x512xbf16>
      %c0_22 = arith.constant 0 : index
      %c0_23 = arith.constant 0 : index
      %28 = vector.load %arg2[%c0_22, %c0_23] : memref<512x4096xbf16, #tpu.memory_space<vmem>>, vector<512x4096xbf16>
      %cst_24 = arith.constant dense<0.000000e+00> : vector<8x4096xf32>
      %29 = tpu.matmul %27, %28, %cst_24 {dimension_numbers = #tpu.dot_dimension_numbers<[1], [0], [0], [1], [0, 0, 1, 1], [], []>} : vector<8x512xbf16>, vector<512x4096xbf16>, vector<8x4096xf32> -> vector<8x4096xf32>
      %c0_25 = arith.constant 0 : index
      %c0_26 = arith.constant 0 : index
      %30 = vector.load %arg3[%c0_25, %c0_26] : memref<2x4096xf32, #tpu.memory_space<vmem>>, vector<1x4096xf32>
      %31 = vector.broadcast %30 : vector<1x4096xf32> to vector<8x4096xf32>
      %32 = arith.mulf %29, %31 : vector<8x4096xf32>
      %c1_27 = arith.constant 1 : index
      %c0_28 = arith.constant 0 : index
      %33 = vector.load %arg3[%c1_27, %c0_28] : memref<2x4096xf32, #tpu.memory_space<vmem>>, vector<1x4096xf32>
      %34 = vector.broadcast %33 : vector<1x4096xf32> to vector<8x4096xf32>
      %35 = arith.addf %32, %34 : vector<8x4096xf32>
      %cst_29 = arith.constant 0.000000e+00 : f32
      %36 = vector.broadcast %cst_29 : f32 to vector<8x4096xf32>
      %37 = arith.maximumf %35, %36 : vector<8x4096xf32>
      %c0_30 = arith.constant 0 : index
      %c0_31 = arith.constant 0 : index
      %38 = vector.load %arg10[%c0_30, %c0_31] : memref<8x4096xf32, #tpu.memory_space<vmem>>, vector<8x4096xf32>
      tpu.vector_store %arg10[%c0_30, %c0_31], %37 {strides = array<i32>} : memref<8x4096xf32, #tpu.memory_space<vmem>>, vector<8x4096xf32>,
      %39 = arith.truncf %37 : vector<8x4096xf32> to vector<8x4096xbf16>
      %c0_32 = arith.constant 0 : index
      %c0_33 = arith.constant 0 : index
      %40 = vector.load %arg14[%c0_32, %c0_33] : memref<8x4096xbf16, #tpu.memory_space<vmem>>, vector<8x4096xbf16>
      tpu.vector_store %arg14[%c0_32, %c0_33], %39 {strides = array<i32>} : memref<8x4096xbf16, #tpu.memory_space<vmem>>, vector<8x4096xbf16>,
      %cst_34 = arith.constant 0.000000e+00 : f32
      %41 = vector.broadcast %cst_34 : f32 to vector<8x512xf32>
      %c0_35 = arith.constant 0 : index
      %c0_36 = arith.constant 0 : index
      %42 = vector.load %arg15[%c0_35, %c0_36] : memref<8x512xf32, #tpu.memory_space<vmem>>, vector<8x512xf32>
      tpu.vector_store %arg15[%c0_35, %c0_36], %41 {strides = array<i32>} : memref<8x512xf32, #tpu.memory_space<vmem>>, vector<8x512xf32>,
    } else {
    }
    %c0 = arith.constant 0 : index
    %c0_1 = arith.constant 0 : index
    %3 = vector.load %arg14[%c0, %c0_1] : memref<8x4096xbf16, #tpu.memory_space<vmem>>, vector<8x4096xbf16>
    %c0_2 = arith.constant 0 : index
    %c0_3 = arith.constant 0 : index
    %c0_4 = arith.constant 0 : index
    %4 = vector.load %arg4[%c0_2, %c0_3, %c0_4] : memref<1x4096x512xbf16, #tpu.memory_space<vmem>>, vector<1x4096x512xbf16>
    %5 = vector.shape_cast %4 : vector<1x4096x512xbf16> to vector<4096x512xbf16>
    %cst = arith.constant dense<0.000000e+00> : vector<8x512xf32>
    %6 = tpu.matmul %3, %5, %cst {dimension_numbers = #tpu.dot_dimension_numbers<[1], [0], [0], [1], [0, 0, 1, 1], [], []>} : vector<8x4096xbf16>, vector<4096x512xbf16>, vector<8x512xf32> -> vector<8x512xf32>
    %c0_5 = arith.constant 0 : index
    %c0_6 = arith.constant 0 : index
    %7 = vector.load %arg5[%c0_5, %c0_6] : memref<2x512xf32, #tpu.memory_space<vmem>>, vector<1x512xf32>
    %8 = vector.broadcast %7 : vector<1x512xf32> to vector<8x512xf32>
    %9 = arith.mulf %6, %8 : vector<8x512xf32>
    %c1 = arith.constant 1 : index
    %c0_7 = arith.constant 0 : index
    %10 = vector.load %arg5[%c1, %c0_7] : memref<2x512xf32, #tpu.memory_space<vmem>>, vector<1x512xf32>
    %11 = vector.broadcast %10 : vector<1x512xf32> to vector<8x512xf32>
    %12 = arith.addf %9, %11 : vector<8x512xf32>
    %cst_8 = arith.constant 0.000000e+00 : f32
    %13 = vector.broadcast %cst_8 : f32 to vector<8x512xf32>
    %14 = arith.maximumf %12, %13 : vector<8x512xf32>
    %c0_9 = arith.constant 0 : index
    %c0_10 = arith.constant 0 : index
    %15 = vector.load %arg11[%c0_9, %c0_10] : memref<8x512xf32, #tpu.memory_space<vmem>>, vector<8x512xf32>
    tpu.vector_store %arg11[%c0_9, %c0_10], %14 {strides = array<i32>} : memref<8x512xf32, #tpu.memory_space<vmem>>, vector<8x512xf32>,
    %c0_11 = arith.constant 0 : index
    %c0_12 = arith.constant 0 : index
    %16 = vector.load %arg15[%c0_11, %c0_12] : memref<8x512xf32, #tpu.memory_space<vmem>>, vector<8x512xf32>
    %17 = arith.truncf %14 : vector<8x512xf32> to vector<8x512xbf16>
    %c0_13 = arith.constant 0 : index
    %c0_14 = arith.constant 0 : index
    %c0_15 = arith.constant 0 : index
    %18 = vector.load %arg6[%c0_13, %c0_14, %c0_15] : memref<1x512x512xbf16, #tpu.memory_space<vmem>>, vector<1x512x512xbf16>
    %19 = vector.shape_cast %18 : vector<1x512x512xbf16> to vector<512x512xbf16>
    %cst_16 = arith.constant dense<0.000000e+00> : vector<8x512xf32>
    %20 = tpu.matmul %17, %19, %cst_16 {dimension_numbers = #tpu.dot_dimension_numbers<[1], [0], [0], [1], [0, 0, 1, 1], [], []>} : vector<8x512xbf16>, vector<512x512xbf16>, vector<8x512xf32> -> vector<8x512xf32>
    %21 = arith.addf %16, %20 : vector<8x512xf32>
    %c0_17 = arith.constant 0 : index
    %c0_18 = arith.constant 0 : index
    %22 = vector.load %arg15[%c0_17, %c0_18] : memref<8x512xf32, #tpu.memory_space<vmem>>, vector<8x512xf32>
    tpu.vector_store %arg15[%c0_17, %c0_18], %21 {strides = array<i32>} : memref<8x512xf32, #tpu.memory_space<vmem>>, vector<8x512xf32>,
    %c3_i32 = arith.constant 3 : i32
    %23 = arith.cmpi eq, %arg0, %c3_i32 : i32
    %24 = arith.extui %23 : i1 to i32
    %c0_i32_19 = arith.constant 0 : i32
    %25 = arith.cmpi ne, %24, %c0_i32_19 : i32
    scf.if %25 {
      %c0_20 = arith.constant 0 : index
      %c0_21 = arith.constant 0 : index
      %26 = vector.load %arg15[%c0_20, %c0_21] : memref<8x512xf32, #tpu.memory_space<vmem>>, vector<8x512xf32>
      %c0_22 = arith.constant 0 : index
      %c0_23 = arith.constant 0 : index
      %27 = vector.load %arg7[%c0_22, %c0_23] : memref<1x512xf32, #tpu.memory_space<vmem>>, vector<1x512xf32>
      %28 = vector.broadcast %27 : vector<1x512xf32> to vector<8x512xf32>
      %29 = arith.addf %26, %28 : vector<8x512xf32>
      %cst_24 = arith.constant 0.000000e+00 : f32
      %30 = vector.broadcast %cst_24 : f32 to vector<8x512xf32>
      %31 = arith.maximumf %29, %30 : vector<8x512xf32>
      %c0_25 = arith.constant 0 : index
      %c0_26 = arith.constant 0 : index
      %32 = vector.load %arg12[%c0_25, %c0_26] : memref<8x512xf32, #tpu.memory_space<vmem>>, vector<8x512xf32>
      tpu.vector_store %arg12[%c0_25, %c0_26], %31 {strides = array<i32>} : memref<8x512xf32, #tpu.memory_space<vmem>>, vector<8x512xf32>,
      %33 = arith.truncf %31 : vector<8x512xf32> to vector<8x512xbf16>
      %c0_27 = arith.constant 0 : index
      %c0_28 = arith.constant 0 : index
      %34 = vector.load %arg8[%c0_27, %c0_28] : memref<512x64xbf16, #tpu.memory_space<vmem>>, vector<512x64xbf16>
      %cst_29 = arith.constant dense<0.000000e+00> : vector<8x64xf32>
      %35 = tpu.matmul %33, %34, %cst_29 {dimension_numbers = #tpu.dot_dimension_numbers<[1], [0], [0], [1], [0, 0, 1, 1], [], []>} : vector<8x512xbf16>, vector<512x64xbf16>, vector<8x64xf32> -> vector<8x64xf32>
      %c0_30 = arith.constant 0 : index
      %c0_31 = arith.constant 0 : index
      %36 = vector.load %arg9[%c0_30, %c0_31] : memref<1x64xf32, #tpu.memory_space<vmem>>, vector<1x64xf32>
      %37 = vector.broadcast %36 : vector<1x64xf32> to vector<8x64xf32>
      %38 = arith.addf %35, %37 : vector<8x64xf32>
      %39 = math.tanh %38 : vector<8x64xf32>
      %c0_32 = arith.constant 0 : index
      %c0_33 = arith.constant 0 : index
      %40 = vector.load %arg13[%c0_32, %c0_33] : memref<8x64xf32, #tpu.memory_space<vmem>>, vector<8x64xf32>
      tpu.vector_store %arg13[%c0_32, %c0_33], %39 {strides = array<i32>} : memref<8x64xf32, #tpu.memory_space<vmem>>, vector<8x64xf32>,
    } else {
    }
    return
  }
  func.func @transform_0(%arg0: i32) -> (i32, i32) {
    %c0_i32 = arith.constant 0 : i32
    %c0_i32_0 = arith.constant 0 : i32
    %c0_i32_1 = arith.constant 0 : i32
    return %c0_i32, %c0_i32_0 : i32, i32
  }
  func.func @transform_1(%arg0: i32) -> (i32, i32) {
    %c0_i32 = arith.constant 0 : i32
    %c0_i32_0 = arith.constant 0 : i32
    %c0_i32_1 = arith.constant 0 : i32
    return %c0_i32, %c0_i32_0 : i32, i32
  }
  func.func @transform_2(%arg0: i32) -> (i32, i32) {
    %c0_i32 = arith.constant 0 : i32
    %c0_i32_0 = arith.constant 0 : i32
    %c0_i32_1 = arith.constant 0 : i32
    return %c0_i32, %c0_i32_0 : i32, i32
  }
  func.func @transform_3(%arg0: i32) -> (i32, i32, i32) {
    %c0_i32 = arith.constant 0 : i32
    %c0_i32_0 = arith.constant 0 : i32
    %c0_i32_1 = arith.constant 0 : i32
    return %arg0, %c0_i32, %c0_i32_0 : i32, i32, i32
  }
  func.func @transform_4(%arg0: i32) -> (i32, i32) {
    %c0_i32 = arith.constant 0 : i32
    %c0_i32_0 = arith.constant 0 : i32
    return %c0_i32, %arg0 : i32, i32
  }
  func.func @transform_5(%arg0: i32) -> (i32, i32, i32) {
    %c0_i32 = arith.constant 0 : i32
    %c0_i32_0 = arith.constant 0 : i32
    %c0_i32_1 = arith.constant 0 : i32
    return %arg0, %c0_i32, %c0_i32_0 : i32, i32, i32
  }
  func.func @transform_6(%arg0: i32) -> (i32, i32) {
    %c0_i32 = arith.constant 0 : i32
    %c0_i32_0 = arith.constant 0 : i32
    %c0_i32_1 = arith.constant 0 : i32
    return %c0_i32, %c0_i32_0 : i32, i32
  }
  func.func @transform_7(%arg0: i32) -> (i32, i32) {
    %c0_i32 = arith.constant 0 : i32
    %c0_i32_0 = arith.constant 0 : i32
    %c0_i32_1 = arith.constant 0 : i32
    return %c0_i32, %c0_i32_0 : i32, i32
  }
  func.func @transform_8(%arg0: i32) -> (i32, i32) {
    %c0_i32 = arith.constant 0 : i32
    %c0_i32_0 = arith.constant 0 : i32
    %c0_i32_1 = arith.constant 0 : i32
    return %c0_i32, %c0_i32_0 : i32, i32
  }
  func.func @transform_9(%arg0: i32) -> (i32, i32) {
    %c0_i32 = arith.constant 0 : i32
    %c0_i32_0 = arith.constant 0 : i32
    %c0_i32_1 = arith.constant 0 : i32
    return %c0_i32, %c0_i32_0 : i32, i32
  }
  func.func @transform_10(%arg0: i32) -> (i32, i32) {
    %c0_i32 = arith.constant 0 : i32
    %c0_i32_0 = arith.constant 0 : i32
    return %c0_i32, %arg0 : i32, i32
  }
  func.func @transform_11(%arg0: i32) -> (i32, i32) {
    %c0_i32 = arith.constant 0 : i32
    %c0_i32_0 = arith.constant 0 : i32
    %c0_i32_1 = arith.constant 0 : i32
    return %c0_i32, %c0_i32_0 : i32, i32
  }
  func.func @transform_12(%arg0: i32) -> (i32, i32) {
    %c0_i32 = arith.constant 0 : i32
    %c0_i32_0 = arith.constant 0 : i32
    %c0_i32_1 = arith.constant 0 : i32
    return %c0_i32, %c0_i32_0 : i32, i32
  }
}

</mosaic_0001>

<bundles_post_ra>
// kernel: imgnet_t_forward.1
= control target key start
LH: loop header
LB: loop body
LE: loop exit
PB: predicated region body
PF: predicated region fallthrough
CT: control target
= control target key end

     0   :  { %s24809_s0 = inlined_call_operand.hbm [shape: f32[8,512], index: 0, kind: input, shape index: {}]   ;;  %s24810_s1 = inlined_call_operand.hbm [shape: bf16[512,4096], index: 1, kind: input, shape index: {}]   ;;  %s24811_s2 = inlined_call_operand.hbm [shape: f32[2,4096], index: 2, kind: input, shape index: {}]   ;;  %s24812_s3 = inlined_call_operand.hbm [shape: bf16[4,4096,512], index: 3, kind: input, shape index: {}]   ;;  %s24813_s4 = inlined_call_operand.hbm [shape: f32[2,2048], index: 4, kind: input, shape index: {}]   ;;  %s24814_s5 = inlined_call_operand.hbm [shape: bf16[4,512,512], index: 5, kind: input, shape index: {}]   ;;  %s24815_s6 = inlined_call_operand.hbm [shape: f32[1,512], index: 6, kind: input, shape index: {}]   ;;  %s24816_s7 = inlined_call_operand.vmem [shape: bf16[512,64], index: 7, kind: input, shape index: {}]   ;;  %s24817_s8 = inlined_call_operand.hbm [shape: f32[1,64], index: 8, kind: input, shape index: {}]   ;;  %s24818_s9 = inlined_call_operand.hbm [shape: f32[8,4096], index: 9, kind: output, shape index: {0}]   ;;  %s24819_s10 = inlined_call_operand.hbm [shape: f32[8,2048], index: 10, kind: output, shape index: {1}]   ;;  %s24820_s11 = inlined_call_operand.hbm [shape: f32[8,512], index: 11, kind: output, shape index: {2}]   ;;  %s24821_s12 = inlined_call_operand.hbm [shape: f32[8,64], index: 12, kind: output, shape index: {3}]  }
   0x1   :  { %24842 = sst [smem:[#allocation38_spill]] %s24809_s0 }
   0x2   :  { %24843 = sst [smem:[#allocation39_spill]] %s24810_s1 }
   0x3   :  { %24844 = sst [smem:[#allocation40_spill]] %s24812_s3 }
   0x4   :  { %24845 = sst [smem:[#allocation41_spill]] %s24815_s6 }
   0x5   :  { %24846 = sst [smem:[#allocation42_spill]] %s24820_s11 }
   0x6   :  { %24847 = sst [smem:[#allocation43_spill]] %s24821_s12 }
   0x7   :  { %18 = vsyncpa [#allocation5], 0 }
   0x8   :  { %19 = vsyncpa [#allocation8], 0 }
   0x9   :  { %20 = vsyncpa [#allocation11], 0 }
   0xa   :  { %22 = vsyncpa [#allocation11 + $0x1], 0 }
   0xb   :  { %23 = vsyncpa [#allocation14], 0 }
   0xc   :  { %25 = vsyncpa [#allocation14 + $0x1], 0 }
   0xd   :  { %26 = vsyncpa [#allocation17], 0 }
   0xe   :  { %27 = vsyncpa [#allocation6], 0 }
   0xf   :  { %28 = vsyncpa [#allocation20], 0 }
  0x10   :  { %30 = vsyncpa [#allocation20 + $0x1], 0 }
  0x11   :  { %31 = vsyncpa [#allocation23], 0  ;;  %s22651_s21 = smov 0   ;;  %s22653_s22 = smov 0  }
  0x12   :  { %s22655_s23 = smov 0   ;;  %s22657_s24 = smov 0  }
  0x13 LB: > { %24848 = sst [smem:[#allocation34_spill]] %s22563_s23  ;;  %s22569_s25 = smov [#allocation7]   ;;  %s22567_s24 = sphi %s22657_s24, %s24903_s24   ;;  %s22563_s23 = sphi %s22655_s23, %s24905_s23   ;;  %s22559_s22 = sphi %s22653_s22, %s24907_s22   ;;  %s22555_s21 = sphi %s22651_s21, %s24906_s21  }
  0x14   : > { %s358_s26 = sshll.u32 %s22569_s25, 4  ;;  %s22672_s27 = sadd.s32 4294967295, %s22567_s24   ;;  %s359_s26 = int_to_ptr.vmem [resolvable:$true] %s358_s26 }
  0x15   : > { %p17887_p0 = scmp.ge.s32.totalorder %s22567_s24, 1  ;;  %p24822_p1 = scmp.eq.s32.totalorder %s22672_s27, 0 }
  0x16   : > { %p335_p2 = scmp.lt.s32.totalorder %s22567_s24, 5  ;;  %s22570_s29 = smov [#allocation15]  }
  0x17   : > { %s383_s30 = sshll.u32 %s22570_s29, 4  ;;  %s22196_s15 = scalar_lea.vmem %s359_s26, 131072  ;;  %s384_s30 = int_to_ptr.vmem [resolvable:$true] %s383_s30 }
  0x18   : > { %p22678_p4 = pnand %p17887_p0, %p335_p2  ;;  %p22197_p8 = scmp.ne.s32.totalorder %s359_s26, %s22196_s15 }
  0x19   : > { %p22204_p11 = scmp.lt.s32.totalorder %s359_s26, %s359_s26  ;;  %p22205_p12 = scmp.lt.s32.totalorder %s22196_s15, %s22196_s15 }
  0x1a   : > { %s24849_s28 = scalar_select %p22678_p4, 1, 0 }
  0x1b   : > { %p20288_p5 = pneg %p22678_p4  ;;  %p22206_p13 = por %p22205_p12, %p22204_p11 }
  0x1d   : > { %p22686_p6 = pnand %p20288_p5, %p24822_p1 }
  0x1f   : > { %s24850_s13 = scalar_select %p22686_p6, 1, 0 }
  0x20   : > { %p22692_p7 = pneg %p22686_p6 }
  0x22   : > { %s24851_s14 = scalar_select %p22692_p7, 1, 0 }
  0x23   : > { %p22199_p9 = pnand %p22197_p8, %p22692_p7 }
  0x25   : > { %p22200_p10 = pneg %p22199_p9 }
  0x27   : > { %p22207_p0 = pnand %p22206_p13, %p22200_p10 }
  0x29   : > { %22210 = shalt.err (!%p22207_p0)
}
  0x2a   : > { %s22571_s16 = smov 2048   ;;  %s22572_s17 = smov 128  }
  0x2b   : > { %s24852_s1 = sld [smem:[#allocation39_spill]]  ;;  %s22222_s20 = scalar_lea.vmem %s384_s30, 64 }
  0x2c   : > { %p22223_p2 = scmp.ne.s32.totalorder %s384_s30, %s22222_s20  ;;  %p22230_p9 = scmp.lt.s32.totalorder %s384_s30, %s384_s30 }
  0x2d   : > { %p22231_p3 = scmp.lt.s32.totalorder %s22222_s20, %s22222_s20 }
  0x2e   : > { %p22225_p5 = pnand %p22223_p2, %p22692_p7 }
  0x2f   : > { %p22232_p1 = por %p22231_p3, %p22230_p9 }
  0x30   : > { %p22226_p8 = pneg %p22225_p5 }
  0x31   : > { %20294 = dma.hbm_to_vmem [thread:$0]  (!%p22686_p6), %s24852_s1, 131072, %s359_s26, [#allocation8], %s22571_s16, %s22571_s16, %s22572_s17  }
  0x32   : > { %p22233_p11 = pnand %p22232_p1, %p22226_p8 }
  0x34   : > { %22236 = shalt.err (!%p22233_p11)
}
  0x35   : > { %s24853_s6 = sld [smem:[#allocation41_spill]]  ;;  %s24823_s26 = sadd.s32 4294967294, %s22567_s24  }
  0x36   : > { %s22712_s15 = sadd.s32 1, %s22567_s24   ;;  %s107_s17 = sadd.s32 1, %s22563_s23 }
  0x37   : > { %24854 = sst [smem:[#allocation35_spill]] %s22712_s15  ;;  %s104_s16 = ssub.s32 %s22567_s24, %s22712_s15 }
  0x38   : > { %p105_p1 = scmp.eq.s32.totalorder %s104_s16, 0  ;;  %p114_p3 = scmp.ne.s32.totalorder %s22563_s23, %s22559_s22 }
  0x39   : > { %p115_p10 = scmp.eq.s32.totalorder %s22567_s24, 0  ;;  %p120_p12 = scmp.ne.s32.totalorder %s22559_s22, %s22555_s21 }
  0x3a   : > { %s22723_s18 = scalar_select %p105_p1, %s22563_s23, %s107_s17  }
  0x3b   : > { %20300 = dma.hbm_to_vmem [thread:$0]  (!%p22686_p6), %s24853_s6, 64, %s384_s30, [#allocation14]  }
  0x3c   : > { %24855 = sst [smem:[#allocation36_spill]] %s22723_s18  ;;  %p22725_p13 = por %p115_p10, %p114_p3 }
  0x3d   : > { %p24857_p0 = scmp.eq.s32.totalorder %s22672_s27, 0  ;;  %p24828_p5 = scmp.eq.s32.totalorder %s22672_s27, 3 }
  0x3e   : > { %p286_p8 = scmp.eq.s32.totalorder %s24823_s26, 3  ;;  %p20323_p9 = scmp.lt.s32.totalorder %s22567_s24, 4 }
  0x3f   : > { %p22731_p2 = por %p24857_p0, %p120_p12  ;;  %p22742_p11 = por %p24828_p5, %p114_p3 }
  0x40   : > { %p22746_p1 = por %p286_p8, %p120_p12  ;;  %s22751_s29 = sand.u32 1, %s22563_s23  }
  0x41   : > { %s24858_s30 = scalar_select %p22731_p2, 1, 0 }
  0x42   : > { %s24859_s21 = scalar_select %p22742_p11, 1, 0 }
  0x43   : > { %s24860_s25 = scalar_select %p22746_p1, 1, 0 }
  0x44   : > { %s17894_s16 = sshll.u32 %s22751_s29, 13  ;;  %s20184_s17 = sshll.u32 %s22567_s24, 17 }
  0x45   : > { %24861 = sst [smem:[#allocation37_spill]] %s24860_s25  ;;  %s412_s20 = scalar_lea.vmem [#allocation10], %s17894_s16 }
  0x46   : > { %s24862_s3 = sld [smem:[#allocation40_spill]]  ;;  %s419_s18 = sshll.u32 %s412_s20, 4  ;;  %s22766_s18 = int_to_ptr.vmem [resolvable:$true] %s419_s18 }
  0x47   : > { %p22762_p3 = pnand %p20323_p9, %p22725_p13  ;;  %s24864_s23 = sand.u32 1, %s22567_s24  }
  0x48   : > { %s22770_s25 = scalar_lea.sflag [#allocation11], %s24864_s23 }
  0x49   : > { %s24863_s15 = scalar_select %p22762_p3, 1, 0 }
  0x4a   : > { %p22776_p12 = pneg %p22762_p3 }
  0x4c   : > { %s22758_s26 = scalar_lea.hbm %s24862_s3, %s20184_s17  ;;  %s22242_s20 = scalar_lea.hbm %s24862_s3, 524288 }
  0x4d   : > { %s22237_s12 = scalar_lea.hbm %s22758_s26, 131072  ;;  %p22243_p8 = scmp.lt.s32.totalorder %s22758_s26, %s24862_s3 }
  0x4e   : > { %p22238_p10 = scmp.ne.s32.totalorder %s22758_s26, %s22237_s12  ;;  %p22244_p9 = scmp.lt.s32.totalorder %s22242_s20, %s22237_s12 }
  0x4f   : > { %s24865_s1 = scalar_select %p22776_p12, 1, 0 }
  0x50   : > { %p22240_p0 = pnand %p22776_p12, %p22238_p10  ;;  %p22245_p5 = por %p22244_p9, %p22243_p8 }
  0x52   : > { %p22241_p13 = pneg %p22240_p0 }
  0x54   : > { %p22246_p1 = pnand %p22245_p5, %p22241_p13 }
  0x56   : > { %22249 = shalt.err (!%p22246_p1)
}
  0x57   : > { %s22250_s23 = scalar_lea.vmem %s22766_s18, 131072  ;;  %s22573_s11 = smov [#allocation10]  }
  0x58   : > { %p22251_p11 = scmp.ne.s32.totalorder %s22766_s18, %s22250_s23  ;;  %s22255_s6 = sshll.u32 %s22573_s11, 4  ;;  %s22256_s6 = int_to_ptr.vmem [resolvable:$false] %s22255_s6 }
  0x59   : > { %s22257_s19 = scalar_lea.vmem %s22256_s6, 262144  ;;  %p22258_p2 = scmp.lt.s32.totalorder %s22766_s18, %s22256_s6 }
  0x5a   : > { %p22253_p10 = pnand %p22251_p11, %p22776_p12  ;;  %p22259_p4 = scmp.lt.s32.totalorder %s22257_s19, %s22250_s23 }
  0x5c   : > { %p22254_p0 = pneg %p22253_p10  ;;  %p22260_p6 = por %p22259_p4, %p22258_p2 }
  0x5e   : > { %p22261_p7 = pnand %p22260_p6, %p22254_p0 }
  0x60   : > { %22264 = shalt.err (!%p22261_p7)
}
  0x61   : > { %s24840_s12 = smov 256   ;;  %s24841_s20 = smov 16  }
  0x62   : > { %20307 = dma.hbm_to_vmem [thread:$0]  (!%p22762_p3), %s22758_s26, 131072, %s22766_s18, %s22770_s25, %s24840_s12, %s24840_s12, %s24841_s20  }
  0x63   : > { %s22576_s11 = smov [#allocation4]   ;;  %s22577_s17 = smov [#allocation9]  }
  0x64   : > { %s348_s16 = sshll.u32 %s22576_s11, 4  ;;  %s372_s23 = sshll.u32 %s22577_s17, 4  ;;  %s349_s16 = int_to_ptr.vmem [resolvable:$true] %s348_s16  ;;  %s373_s23 = int_to_ptr.vmem [resolvable:$true] %s372_s23 }
  0x65   : > { %s22276_s6 = scalar_lea.vmem %s349_s16, 512  ;;  %p24866_p6 = scmp.ne.s32.totalorder %s24851_s14, 0 }
  0x66   : > { %p22277_p4 = scmp.ne.s32.totalorder %s349_s16, %s22276_s6  ;;  %p22284_p5 = scmp.lt.s32.totalorder %s349_s16, %s349_s16 }
  0x67   : > { %p22285_p11 = scmp.lt.s32.totalorder %s22276_s6, %s22276_s6 }
  0x68   : > { %p22279_p7 = pnand %p22277_p4, %p24866_p6 }
  0x69   : > { %p22286_p1 = por %p22285_p11, %p22284_p5 }
  0x6a   : > { %p22280_p2 = pneg %p22279_p7 }
  0x6c   : > { %p22287_p13 = pnand %p22286_p1, %p22280_p2 }
  0x6e   : > { %22290 = shalt.err (!%p22287_p13)
}
  0x6f   : > { %p24867_p8 = scmp.ne.s32.totalorder %s24850_s13, 0  ;;  %s24868_s0 = sld [smem:[#allocation38_spill]] }
  0x70   : > { %s22302_s26 = scalar_lea.vmem %s373_s23, 1024  ;;  %p22310_p4 = scmp.lt.s32.totalorder %s373_s23, %s373_s23 }
  0x71   : > { %p22303_p9 = scmp.ne.s32.totalorder %s373_s23, %s22302_s26  ;;  %p22311_p7 = scmp.lt.s32.totalorder %s22302_s26, %s22302_s26 }
  0x73   : > { %p22305_p10 = pnand %p22303_p9, %p24866_p6  ;;  %p22312_p3 = por %p22311_p7, %p22310_p4 }
  0x75   : > { %20291 = dma.hbm_to_vmem [thread:$0]  (!%p24867_p8), %s24868_s0, 512, %s349_s16, [#allocation5]  }
  0x76   : > { %p22306_p0 = pneg %p22305_p10 }
  0x78   : > { %p22313_p12 = pnand %p22312_p3, %p22306_p0 }
  0x7a   : > { %22316 = shalt.err (!%p22313_p12)
}
  0x7b   : > { %20297 = dma.hbm_to_vmem [thread:$0]  (!%p24867_p8), %s24811_s2, 1024, %s373_s23, [#allocation8]  }
  0x7c   : > { %s22578_s3 = smov [#allocation16]   ;;  %s17897_s17 = sshll.u32 %s22751_s29, 3 }
  0x7d   : > { %s397_s16 = sshll.u32 %s22578_s3, 4  ;;  %s398_s16 = int_to_ptr.vmem [resolvable:$true] %s397_s16 }
  0x7e   : > { %s22328_s6 = scalar_lea.vmem %s398_s16, 16  ;;  %s22335_s19 = scalar_lea.vmem %s398_s16, 32 }
  0x7f   : > { %p22329_p2 = scmp.ne.s32.totalorder %s398_s16, %s22328_s6  ;;  %p22336_p3 = scmp.lt.s32.totalorder %s398_s16, %s398_s16 }
  0x80   : > { %p22337_p12 = scmp.lt.s32.totalorder %s22335_s19, %s22328_s6 }
  0x81   : > { %p22331_p5 = pnand %p22329_p2, %p24866_p6 }
  0x82   : > { %p22338_p1 = por %p22337_p12, %p22336_p3 }
  0x83   : > { %p22332_p11 = pneg %p22331_p5 }
  0x85   : > { %p22339_p13 = pnand %p22338_p1, %p22332_p11 }
  0x87   : > { %22342 = shalt.err (!%p22339_p13)
}
  0x88   : > { %20303 = dma.hbm_to_vmem [thread:$0]  (!%p24867_p8), %s24817_s8, 16, %s398_s16, [#allocation17]  }
  0x89   : > { %s20185_s23 = sshll.u32 %s22567_s24, 7  ;;  %s433_s11 = scalar_lea.vmem [#allocation12], %s17897_s17 }
  0x8a   : > { %s441_s3 = sshll.u32 %s433_s11, 4  ;;  %s439_s20 = scalar_lea.hbm %s24813_s4, %s20185_s23  ;;  %s442_s3 = int_to_ptr.vmem [resolvable:$true] %s441_s3 }
  0x8b   : > { %s22343_s6 = scalar_lea.hbm %s439_s20, 128  ;;  %p24869_p9 = scmp.ne.s32.totalorder %s24865_s1, 0 }
  0x8c   : > { %p22344_p6 = scmp.ne.s32.totalorder %s439_s20, %s22343_s6  ;;  %s22348_s26 = scalar_lea.hbm %s24813_s4, 512 }
  0x8d   : > { %p22349_p8 = scmp.lt.s32.totalorder %s439_s20, %s24813_s4  ;;  %p22350_p4 = scmp.lt.s32.totalorder %s22348_s26, %s22343_s6 }
  0x8e   : > { %p22346_p10 = pnand %p22344_p6, %p24869_p9 }
  0x8f   : > { %p22351_p7 = por %p22350_p4, %p22349_p8 }
  0x90   : > { %p22347_p0 = pneg %p22346_p10 }
  0x92   : > { %p22352_p2 = pnand %p22351_p7, %p22347_p0 }
  0x94   : > { %22355 = shalt.err (!%p22352_p2)
}
  0x95   : > { %s22356_s12 = scalar_lea.vmem %s442_s3, 128  ;;  %s22579_s16 = smov [#allocation12]  }
  0x96   : > { %p22357_p5 = scmp.ne.s32.totalorder %s442_s3, %s22356_s12  ;;  %s22361_s17 = sshll.u32 %s22579_s16, 4  ;;  %s22362_s17 = int_to_ptr.vmem [resolvable:$false] %s22361_s17 }
  0x97   : > { %s22363_s23 = scalar_lea.vmem %s22362_s17, 256  ;;  %p22364_p12 = scmp.lt.s32.totalorder %s442_s3, %s22362_s17 }
  0x98   : > { %p22359_p11 = pnand %p22357_p5, %p24869_p9  ;;  %p22365_p1 = scmp.lt.s32.totalorder %s22363_s23, %s22356_s12 }
  0x9a   : > { %p22360_p3 = pneg %p22359_p11  ;;  %p22366_p13 = por %p22365_p1, %p22364_p12 }
  0x9c   : > { %p22367_p6 = pnand %p22366_p13, %p22360_p3 }
  0x9e   : > { %22370 = shalt.err (!%p22367_p6)
}
  0x9f   : > { %p24870_p10 = scmp.ne.s32.totalorder %s24863_s15, 0  ;;  %s17900_s0 = sshll.u32 %s22751_s29, 10 }
  0xa0   : > { %s20186_s11 = sshll.u32 %s22567_s24, 14  ;;  %s452_s19 = scalar_lea.vmem [#allocation13], %s17900_s0 }
  0xa1   : > { %20310 = dma.hbm_to_vmem [thread:$0]  (!%p24870_p10), %s439_s20, 128, %s442_s3, %s22770_s25  }
  0xa2   : > { %s22846_s13 = scalar_lea.hbm %s24814_s5, %s20186_s11  ;;  %s459_s26 = sshll.u32 %s452_s19, 4  ;;  %s22848_s26 = int_to_ptr.vmem [resolvable:$true] %s459_s26 }
  0xa3   : > { %s24871_s18 = sand.u32 1, %s22567_s24   ;;  %s22371_s16 = scalar_lea.hbm %s22846_s13, 16384 }
  0xa4   : > { %s449_s12 = scalar_lea.sflag [#allocation14], %s24871_s18  ;;  %p22372_p0 = scmp.ne.s32.totalorder %s22846_s13, %s22371_s16 }
  0xa5   : > { %s22376_s20 = scalar_lea.hbm %s24814_s5, 65536  ;;  %p22377_p7 = scmp.lt.s32.totalorder %s22846_s13, %s24814_s5 }
  0xa6   : > { %p22374_p8 = pnand %p22372_p0, %p24869_p9  ;;  %p22378_p2 = scmp.lt.s32.totalorder %s22376_s20, %s22371_s16 }
  0xa8   : > { %p22375_p4 = pneg %p22374_p8  ;;  %p22379_p5 = por %p22378_p2, %p22377_p7 }
  0xaa   : > { %p22380_p11 = pnand %p22379_p5, %p22375_p4 }
  0xac   : > { %22383 = shalt.err (!%p22380_p11)
}
  0xad   : > { %s22384_s23 = scalar_lea.vmem %s22848_s26, 16384  ;;  %s22580_s0 = smov [#allocation13]  }
  0xae   : > { %p22385_p3 = scmp.ne.s32.totalorder %s22848_s26, %s22384_s23  ;;  %s22389_s11 = sshll.u32 %s22580_s0, 4  ;;  %s22390_s11 = int_to_ptr.vmem [resolvable:$false] %s22389_s11 }
  0xaf   : > { %s22391_s14 = scalar_lea.vmem %s22390_s11, 32768  ;;  %p22392_p13 = scmp.lt.s32.totalorder %s22848_s26, %s22390_s11 }
  0xb0   : > { %p22387_p12 = pnand %p22385_p3, %p24869_p9  ;;  %p22393_p6 = scmp.lt.s32.totalorder %s22391_s14, %s22384_s23 }
  0xb2   : > { %p22388_p1 = pneg %p22387_p12  ;;  %p22394_p0 = por %p22393_p6, %p22392_p13 }
  0xb4   : > { %p22395_p8 = pnand %p22394_p0, %p22388_p1 }
  0xb6   : > { %22398 = shalt.err (!%p22395_p8)
}
  0xb7   : > { %s24872_s6 = smov 16   ;;  %s24873_s19 = smov 256  }
  0xb8   : > { %20313 = dma.hbm_to_vmem [thread:$0]  (!%p24870_p10), %s22846_s13, 16384, %s22848_s26, %s449_s12, %s24873_s19, %s24873_s19, %s24872_s6  }
  0xb9   : > { %p24874_p9 = scmp.ne.s32.totalorder %s24849_s28, 0 }
  0xba   : > { %p24875_p4 = scmp.eq.s32.totalorder (!%p24874_p9), %s22672_s27, 0 }
  0xbb   : > { %471 = sbr.rel (%p24874_p9) target bundleno = 3278 (0xcce), region = 56 }
  0xc0   : > { %22514 = dma.done.wait (%p24875_p4), [#allocation5], 512   ;;  %p24876_p7 = pmov %p24875_p4 }
  0xc1   : > { %p24877_p2 = pmov %p24875_p4 }
  0xc2   : > { %22516 = vsyncadd (%p24876_p7), [#allocation5], 4294966784 }
  0xc3   : > { %22518 = dma.done.wait (%p24877_p2), [#allocation8], 132096   ;;  %p24878_p5 = pmov %p24877_p2 }
  0xc4   : > { %s22886_s15 = sand.u32 1, %s22672_s27   ;;  %s487_s28 = sand.u32 1, %s22559_s22  }
  0xc5   : > { %22520 = vsyncadd (%p24878_p5), [#allocation8], 4294835200  ;;  %s17907_s1 = sshll.u32 %s487_s28, 13  ;;  %s486_s13 = scalar_lea.sflag [#allocation11], %s22886_s15 }
  0xc6   : > { %s22890_s26 = scalar_lea.vmem [#allocation10], %s17907_s1  ;;  %p24879_p10 = scmp.ne.s32.totalorder %s24858_s30, 0 }
  0xc8   : > { %22522 = dma.done.wait (%p24879_p10), %s486_s13, 131200  }
  0xc9   : > { %22524 = vsyncadd (%p24879_p10), %s486_s13, 4294836096  ;;  %s17908_s18 = sshll.u32 %s487_s28, 3  ;;  %s17909_s12 = sshll.u32 %s487_s28, 10 }
  0xca   : > { %s22896_s16 = scalar_lea.vmem [#allocation12], %s17908_s18  ;;  %s504_s25 = scalar_lea.sflag [#allocation14], %s22886_s15 }
  0xcb   : > { %s22899_s29 = scalar_lea.vmem [#allocation13], %s17909_s12 }
  0xcc   : > { %22526 = dma.done.wait (%p24879_p10), %s504_s25, 16384  }
  0xcd   : > { %22528 = vsyncadd (%p24879_p10), %s504_s25, 4294950912  ;;  %p24880_p11 = pmov %p24877_p2 }
  0xce   : > { %p24881_p3 = pmov %p24877_p2 }
  0xcf   : > { %22530 = dma.done.wait (%p24880_p11), [#allocation14], 64  }
  0xd0   : > { %22532 = vsyncadd (%p24881_p3), [#allocation14], 4294967232  ;;  %p24882_p12 = pmov %p24877_p2 }
  0xd1   : > { %p24883_p1 = pmov %p24877_p2 }
  0xd2   : > { %22534 = dma.done.wait (%p24882_p12), [#allocation17], 16  }
  0xd3   : > { %22536 = vsyncadd (%p24883_p1), [#allocation17], 4294967280  ;;  %s17912_s20 = sshll.u32 %s487_s28, 5  ;;  %p24884_p13 = scmp.ne.s32.totalorder %s22672_s27, 0 }
  0xd4   : > { %s22913_s3 = scalar_lea.vmem [#allocation19], %s17912_s20 }
  0xd5   : > { %572 = sbr.rel (%p24884_p13) target bundleno = 1454 (0x5ae), region = 92 }
  0xda   : > { %v805_v0 = vld [vmem:[#allocation7 + $0x700] sm:$0xff]  ;;  %v574_v53 = vld [vmem:[#allocation4 + $0x8] sm:$0xff]  ;;  %v576_v54 = vld [vmem:[#allocation4 + $0x18] sm:$0xff] }
  0xdb   : > { %v821_v1 = vld [vmem:[#allocation7 + $0x780] sm:$0xff]  ;;  %v22917_v58 = vpack.c.bf16 %v574_v53, %v574_v53  ;;  %v22919_v59 = vpack.c.bf16 %v576_v54, %v576_v54 }
  0xdc   : > { %v1317_v2 = vld [vmem:[#allocation7 + $0x1700] sm:$0xff]  ;;  %v18139_v3 = vcombine.high %v805_v0, %v821_v1  ;;  %v18138_v5 = vcombine.low %v805_v0, %v821_v1 }
  0xdd   : > { %v1333_v4 = vld [vmem:[#allocation7 + $0x1780] sm:$0xff]  ;;  %6757 = vmatprep.mubr.bf16.mxu0 %v22917_v58  ;;  %6798 = vmatprep.mubr.bf16.mxu1 %v22919_v59 }
  0xde   : > { %v773_v6 = vld [vmem:[#allocation7 + $0x600] sm:$0xff]  ;;  %v18651_v8 = vcombine.high %v1317_v2, %v1333_v4  ;;  %v18650_v9 = vcombine.low %v1317_v2, %v1333_v4  ;;  %6725 = vmatprep.subr.bf16.mxu0 %v18139_v3 }
  0xdf   : > { %v789_v7 = vld [vmem:[#allocation7 + $0x680] sm:$0xff]  ;;  %6726 = vmatpush1.bf16.msra.mxu0 %v18138_v5 }
  0xe0   : > { %v18107_v10 = vcombine.high %v773_v6, %v789_v7  ;;  %v1285_v11 = vld [vmem:[#allocation7 + $0x1600] sm:$0xff]  ;;  %6766 = vmatprep.subr.bf16.mxu1 %v18651_v8  ;;  %v18106_v18 = vcombine.low %v773_v6, %v789_v7 }
  0xe1   : > { %v1301_v12 = vld [vmem:[#allocation7 + $0x1680] sm:$0xff]  ;;  %6767 = vmatpush1.bf16.msra.mxu1 %v18650_v9 }
  0xe2   : > { %v741_v13 = vld [vmem:[#allocation7 + $0x500] sm:$0xff]  ;;  %v18619_v14 = vcombine.high %v1285_v11, %v1301_v12  ;;  %6727 = vmatprep.subr.bf16.mxu0 %v18107_v10  ;;  %v18618_v19 = vcombine.low %v1285_v11, %v1301_v12 }
  0xe3   : > { %v757_v15 = vld [vmem:[#allocation7 + $0x580] sm:$0xff]  ;;  %6728 = vmatpush1.bf16.msra.mxu0 %v18106_v18 }
  0xe4   : > { %v1253_v16 = vld [vmem:[#allocation7 + $0x1500] sm:$0xff]  ;;  %v18075_v20 = vcombine.high %v741_v13, %v757_v15  ;;  %6768 = vmatprep.subr.bf16.mxu1 %v18619_v14  ;;  %v18074_v26 = vcombine.low %v741_v13, %v757_v15 }
  0xe5   : > { %v1269_v17 = vld [vmem:[#allocation7 + $0x1580] sm:$0xff]  ;;  %6769 = vmatpush1.bf16.msra.mxu1 %v18618_v19 }
  0xe6   : > { %v18587_v21 = vcombine.high %v1253_v16, %v1269_v17  ;;  %v709_v22 = vld [vmem:[#allocation7 + $0x400] sm:$0xff]  ;;  %6729 = vmatprep.subr.bf16.mxu0 %v18075_v20  ;;  %v18586_v27 = vcombine.low %v1253_v16, %v1269_v17 }
  0xe7   : > { %v725_v23 = vld [vmem:[#allocation7 + $0x480] sm:$0xff]  ;;  %6730 = vmatpush1.bf16.msra.mxu0 %v18074_v26 }
  0xe8   : > { %v1221_v24 = vld [vmem:[#allocation7 + $0x1400] sm:$0xff]  ;;  %v18043_v28 = vcombine.high %v709_v22, %v725_v23  ;;  %6770 = vmatprep.subr.bf16.mxu1 %v18587_v21  ;;  %v18042_v34 = vcombine.low %v709_v22, %v725_v23 }
  0xe9   : > { %v1237_v25 = vld [vmem:[#allocation7 + $0x1480] sm:$0xff]  ;;  %6771 = vmatpush1.bf16.msra.mxu1 %v18586_v27 }
  0xea   : > { %v18555_v29 = vcombine.high %v1221_v24, %v1237_v25  ;;  %v677_v30 = vld [vmem:[#allocation7 + $0x300] sm:$0xff]  ;;  %6731 = vmatprep.subr.bf16.mxu0 %v18043_v28  ;;  %v18554_v35 = vcombine.low %v1221_v24, %v1237_v25 }
  0xeb   : > { %v693_v31 = vld [vmem:[#allocation7 + $0x380] sm:$0xff]  ;;  %6732 = vmatpush1.bf16.msra.mxu0 %v18042_v34 }
  0xec   : > { %v1189_v32 = vld [vmem:[#allocation7 + $0x1300] sm:$0xff]  ;;  %v18011_v36 = vcombine.high %v677_v30, %v693_v31  ;;  %6772 = vmatprep.subr.bf16.mxu1 %v18555_v29  ;;  %v18010_v42 = vcombine.low %v677_v30, %v693_v31 }
  0xed   : > { %v1205_v33 = vld [vmem:[#allocation7 + $0x1380] sm:$0xff]  ;;  %6773 = vmatpush1.bf16.msra.mxu1 %v18554_v35 }
  0xee   : > { %v18523_v37 = vcombine.high %v1189_v32, %v1205_v33  ;;  %v645_v38 = vld [vmem:[#allocation7 + $0x200] sm:$0xff]  ;;  %6733 = vmatprep.subr.bf16.mxu0 %v18011_v36  ;;  %v18522_v43 = vcombine.low %v1189_v32, %v1205_v33 }
  0xef   : > { %v661_v39 = vld [vmem:[#allocation7 + $0x280] sm:$0xff]  ;;  %6734 = vmatpush1.bf16.msra.mxu0 %v18010_v42 }
  0xf0   : > { %v1157_v40 = vld [vmem:[#allocation7 + $0x1200] sm:$0xff]  ;;  %v17979_v44 = vcombine.high %v645_v38, %v661_v39  ;;  %6774 = vmatprep.subr.bf16.mxu1 %v18523_v37  ;;  %v17978_v50 = vcombine.low %v645_v38, %v661_v39 }
  0xf1   : > { %v1173_v41 = vld [vmem:[#allocation7 + $0x1280] sm:$0xff]  ;;  %6775 = vmatpush1.bf16.msra.mxu1 %v18522_v43 }
  0xf2   : > { %v18491_v45 = vcombine.high %v1157_v40, %v1173_v41  ;;  %v613_v46 = vld [vmem:[#allocation7 + $0x100] sm:$0xff]  ;;  %6735 = vmatprep.subr.bf16.mxu0 %v17979_v44  ;;  %v18490_v51 = vcombine.low %v1157_v40, %v1173_v41 }
  0xf3   : > { %v629_v47 = vld [vmem:[#allocation7 + $0x180] sm:$0xff]  ;;  %6736 = vmatpush1.bf16.msra.mxu0 %v17978_v50 }
  0xf4   : > { %v1125_v48 = vld [vmem:[#allocation7 + $0x1100] sm:$0xff]  ;;  %v17947_v52 = vcombine.high %v613_v46, %v629_v47  ;;  %6776 = vmatprep.subr.bf16.mxu1 %v18491_v45  ;;  %v17946_v62 = vcombine.low %v613_v46, %v629_v47 }
  0xf5   : > { %v1141_v49 = vld [vmem:[#allocation7 + $0x1180] sm:$0xff]  ;;  %6777 = vmatpush1.bf16.msra.mxu1 %v18490_v51 }
  0xf6   : > { %v18459_v55 = vcombine.high %v1125_v48, %v1141_v49  ;;  %v581_v56 = vld [vmem:[#allocation7] sm:$0xff]  ;;  %6737 = vmatprep.subr.bf16.mxu0 %v17947_v52  ;;  %v18458_v63 = vcombine.low %v1125_v48, %v1141_v49 }
  0xf7   : > { %v597_v57 = vld [vmem:[#allocation7 + $0x80] sm:$0xff]  ;;  %6738 = vmatpush1.bf16.msra.mxu0 %v17946_v62 }
  0xf8   : > { %v1093_v60 = vld [vmem:[#allocation7 + $0x1000] sm:$0xff]  ;;  %v17915_v0 = vcombine.high %v581_v56, %v597_v57  ;;  %6778 = vmatprep.subr.bf16.mxu1 %v18459_v55  ;;  %v17914_v6 = vcombine.low %v581_v56, %v597_v57 }
  0xf9   : > { %v1109_v61 = vld [vmem:[#allocation7 + $0x1080] sm:$0xff]  ;;  %6779 = vmatpush1.bf16.msra.mxu1 %v18458_v63 }
  0xfa   : > { %v18427_v1 = vcombine.high %v1093_v60, %v1109_v61  ;;  %v1061_v2 = vld [vmem:[#allocation7 + $0xf00] sm:$0xff]  ;;  %6739 = vmatprep.subr.bf16.mxu0 %v17915_v0  ;;  %v18426_v7 = vcombine.low %v1093_v60, %v1109_v61 }
  0xfb   : > { %v1077_v3 = vld [vmem:[#allocation7 + $0xf80] sm:$0xff]  ;;  %6740 = vmatpush1.bf16.msra.mxu0 %v17914_v6  ;;  %v1318_v6 = vld [vmem:[#allocation7 + $0x1708] sm:$0xff] }
  0xfc   : > { %v1573_v4 = vld [vmem:[#allocation7 + $0x1f00] sm:$0xff]  ;;  %v18395_v8 = vcombine.high %v1061_v2, %v1077_v3  ;;  %6780 = vmatprep.subr.bf16.mxu1 %v18427_v1  ;;  %v18394_v14 = vcombine.low %v1061_v2, %v1077_v3 }
  0xfd   : > { %v1589_v5 = vld [vmem:[#allocation7 + $0x1f80] sm:$0xff]  ;;  %6781 = vmatpush1.bf16.msra.mxu1 %v18426_v7  ;;  %v1334_v7 = vld [vmem:[#allocation7 + $0x1788] sm:$0xff] }
  0xfe   : > { %v18907_v9 = vcombine.high %v1573_v4, %v1589_v5  ;;  %v1029_v10 = vld [vmem:[#allocation7 + $0xe00] sm:$0xff]  ;;  %6741 = vmatprep.subr.bf16.mxu0 %v18395_v8  ;;  %v18906_v15 = vcombine.low %v1573_v4, %v1589_v5  ;;  %v806_v4 = vld [vmem:[#allocation7 + $0x708] sm:$0xff] }
  0xff   : > { %v1045_v11 = vld [vmem:[#allocation7 + $0xe80] sm:$0xff]  ;;  %6742 = vmatpush2.bf16.msra.mxu0 %v18394_v14  ;;  %v822_v5 = vld [vmem:[#allocation7 + $0x788] sm:$0xff] }
 0x100   : > { %v1541_v12 = vld [vmem:[#allocation7 + $0x1e00] sm:$0xff]  ;;  %v18363_v16 = vcombine.high %v1029_v10, %v1045_v11  ;;  %6782 = vmatprep.subr.bf16.mxu1 %v18907_v9  ;;  %v18362_v22 = vcombine.low %v1029_v10, %v1045_v11  ;;  %v575_v11 = vld [vmem:[#allocation4 + $0x10] sm:$0xff]  ;;  %v774_v14 = vld [vmem:[#allocation7 + $0x608] sm:$0xff] }
 0x101   : > { %v1557_v13 = vld [vmem:[#allocation7 + $0x1e80] sm:$0xff]  ;;  %6783 = vmatpush2.bf16.msra.mxu1 %v18906_v15  ;;  %v790_v15 = vld [vmem:[#allocation7 + $0x688] sm:$0xff] }
 0x102   : > { %v18875_v17 = vcombine.high %v1541_v12, %v1557_v13  ;;  %v997_v18 = vld [vmem:[#allocation7 + $0xd00] sm:$0xff]  ;;  %6743 = vmatprep.subr.bf16.mxu0 %v18363_v16  ;;  %v18874_v23 = vcombine.low %v1541_v12, %v1557_v13  ;;  %v18141_v12 = vcombine.high %v806_v4, %v822_v5  ;;  %v18653_v13 = vcombine.high %v1318_v6, %v1334_v7 }
 0x103   : > { %v1013_v19 = vld [vmem:[#allocation7 + $0xd80] sm:$0xff]  ;;  %6744 = vmatpush2.bf16.msra.mxu0 %v18362_v22  ;;  %v18109_v22 = vcombine.high %v774_v14, %v790_v15 }
 0x104   : > { %v1509_v20 = vld [vmem:[#allocation7 + $0x1d00] sm:$0xff]  ;;  %v18331_v24 = vcombine.high %v997_v18, %v1013_v19  ;;  %6784 = vmatprep.subr.bf16.mxu1 %v18875_v17  ;;  %v18330_v30 = vcombine.low %v997_v18, %v1013_v19  ;;  %v1286_v17 = vld [vmem:[#allocation7 + $0x1608] sm:$0xff]  ;;  %v22925_v19 = vpack.c.bf16 %v575_v11, %v575_v11 }
 0x105   : > { %v1525_v21 = vld [vmem:[#allocation7 + $0x1d80] sm:$0xff]  ;;  %6785 = vmatpush2.bf16.msra.mxu1 %v18874_v23  ;;  %v1302_v18 = vld [vmem:[#allocation7 + $0x1688] sm:$0xff] }
 0x106   : > { %v18843_v25 = vcombine.high %v1509_v20, %v1525_v21  ;;  %v965_v26 = vld [vmem:[#allocation7 + $0xc00] sm:$0xff]  ;;  %6745 = vmatprep.subr.bf16.mxu0 %v18331_v24  ;;  %v18842_v31 = vcombine.low %v1509_v20, %v1525_v21  ;;  %v18140_v20 = vcombine.low %v806_v4, %v822_v5  ;;  %v18652_v21 = vcombine.low %v1318_v6, %v1334_v7  ;;  %v742_v24 = vld [vmem:[#allocation7 + $0x508] sm:$0xff] }
 0x107   : > { %v981_v27 = vld [vmem:[#allocation7 + $0xc80] sm:$0xff]  ;;  %6746 = vmatpush2.bf16.msra.mxu0 %v18330_v30  ;;  %v18621_v23 = vcombine.high %v1286_v17, %v1302_v18  ;;  %v1094_v4 = vld [vmem:[#allocation7 + $0x1008] sm:$0xff] }
 0x108   : > { %v1477_v28 = vld [vmem:[#allocation7 + $0x1c00] sm:$0xff]  ;;  %v18299_v32 = vcombine.high %v965_v26, %v981_v27  ;;  %6786 = vmatprep.subr.bf16.mxu1 %v18843_v25  ;;  %v18298_v38 = vcombine.low %v965_v26, %v981_v27  ;;  %v758_v25 = vld [vmem:[#allocation7 + $0x588] sm:$0xff] }
 0x109   : > { %v1493_v29 = vld [vmem:[#allocation7 + $0x1c80] sm:$0xff]  ;;  %6787 = vmatpush2.bf16.msra.mxu1 %v18842_v31  ;;  %v1254_v26 = vld [vmem:[#allocation7 + $0x1508] sm:$0xff]  ;;  %v18077_v30 = vcombine.high %v742_v24, %v758_v25 }
 0x10a   : > { %v18811_v33 = vcombine.high %v1477_v28, %v1493_v29  ;;  %v933_v34 = vld [vmem:[#allocation7 + $0xb00] sm:$0xff]  ;;  %6747 = vmatprep.subr.bf16.mxu0 %v18299_v32  ;;  %v18810_v39 = vcombine.low %v1477_v28, %v1493_v29  ;;  %v1270_v27 = vld [vmem:[#allocation7 + $0x1588] sm:$0xff]  ;;  %v18108_v28 = vcombine.low %v774_v14, %v790_v15  ;;  %v18620_v29 = vcombine.low %v1286_v17, %v1302_v18 }
 0x10b   : > { %v949_v35 = vld [vmem:[#allocation7 + $0xb80] sm:$0xff]  ;;  %6748 = vmatpush2.bf16.msra.mxu0 %v18298_v38  ;;  %v18589_v31 = vcombine.high %v1254_v26, %v1270_v27  ;;  %v710_v32 = vld [vmem:[#allocation7 + $0x408] sm:$0xff] }
 0x10c   : > { %v1445_v36 = vld [vmem:[#allocation7 + $0x1b00] sm:$0xff]  ;;  %v18267_v40 = vcombine.high %v933_v34, %v949_v35  ;;  %6788 = vmatprep.subr.bf16.mxu1 %v18811_v33  ;;  %v18266_v46 = vcombine.low %v933_v34, %v949_v35  ;;  %v726_v33 = vld [vmem:[#allocation7 + $0x488] sm:$0xff] }
 0x10d   : > { %v1461_v37 = vld [vmem:[#allocation7 + $0x1b80] sm:$0xff]  ;;  %6789 = vmatpush2.bf16.msra.mxu1 %v18810_v39  ;;  %v1222_v34 = vld [vmem:[#allocation7 + $0x1408] sm:$0xff]  ;;  %v18045_v38 = vcombine.high %v710_v32, %v726_v33 }
 0x10e   : > { %v18779_v41 = vcombine.high %v1445_v36, %v1461_v37  ;;  %v901_v42 = vld [vmem:[#allocation7 + $0xa00] sm:$0xff]  ;;  %6749 = vmatprep.subr.bf16.mxu0 %v18267_v40  ;;  %v18778_v47 = vcombine.low %v1445_v36, %v1461_v37  ;;  %v1238_v35 = vld [vmem:[#allocation7 + $0x1488] sm:$0xff]  ;;  %v18076_v36 = vcombine.low %v742_v24, %v758_v25  ;;  %v18588_v37 = vcombine.low %v1254_v26, %v1270_v27 }
 0x10f   : > { %v917_v43 = vld [vmem:[#allocation7 + $0xa80] sm:$0xff]  ;;  %6750 = vmatpush2.bf16.msra.mxu0 %v18266_v46  ;;  %v18557_v39 = vcombine.high %v1222_v34, %v1238_v35  ;;  %v678_v40 = vld [vmem:[#allocation7 + $0x308] sm:$0xff] }
 0x110   : > { %v1413_v44 = vld [vmem:[#allocation7 + $0x1a00] sm:$0xff]  ;;  %v18235_v48 = vcombine.high %v901_v42, %v917_v43  ;;  %6790 = vmatprep.subr.bf16.mxu1 %v18779_v41  ;;  %v18234_v54 = vcombine.low %v901_v42, %v917_v43  ;;  %v694_v41 = vld [vmem:[#allocation7 + $0x388] sm:$0xff] }
 0x111   : > { %v1429_v45 = vld [vmem:[#allocation7 + $0x1a80] sm:$0xff]  ;;  %6791 = vmatpush2.bf16.msra.mxu1 %v18778_v47  ;;  %v1190_v42 = vld [vmem:[#allocation7 + $0x1308] sm:$0xff]  ;;  %v18013_v46 = vcombine.high %v678_v40, %v694_v41 }
 0x112   : > { %v18747_v49 = vcombine.high %v1413_v44, %v1429_v45  ;;  %v869_v50 = vld [vmem:[#allocation7 + $0x900] sm:$0xff]  ;;  %6751 = vmatprep.subr.bf16.mxu0 %v18235_v48  ;;  %v18746_v55 = vcombine.low %v1413_v44, %v1429_v45  ;;  %v1206_v43 = vld [vmem:[#allocation7 + $0x1388] sm:$0xff]  ;;  %v18044_v44 = vcombine.low %v710_v32, %v726_v33  ;;  %v18556_v45 = vcombine.low %v1222_v34, %v1238_v35 }
 0x113   : > { %v885_v51 = vld [vmem:[#allocation7 + $0x980] sm:$0xff]  ;;  %6752 = vmatpush2.bf16.msra.mxu0 %v18234_v54  ;;  %v18525_v47 = vcombine.high %v1190_v42, %v1206_v43  ;;  %v646_v48 = vld [vmem:[#allocation7 + $0x208] sm:$0xff] }
 0x114   : > { %v1381_v52 = vld [vmem:[#allocation7 + $0x1900] sm:$0xff]  ;;  %v18203_v56 = vcombine.high %v869_v50, %v885_v51  ;;  %6792 = vmatprep.subr.bf16.mxu1 %v18747_v49  ;;  %v18202_v0 = vcombine.low %v869_v50, %v885_v51  ;;  %v662_v49 = vld [vmem:[#allocation7 + $0x288] sm:$0xff] }
 0x115   : > { %v1397_v53 = vld [vmem:[#allocation7 + $0x1980] sm:$0xff]  ;;  %6793 = vmatpush2.bf16.msra.mxu1 %v18746_v55  ;;  %v1158_v50 = vld [vmem:[#allocation7 + $0x1208] sm:$0xff]  ;;  %v17981_v54 = vcombine.high %v646_v48, %v662_v49 }
 0x116   : > { %v18715_v57 = vcombine.high %v1381_v52, %v1397_v53  ;;  %v837_v60 = vld [vmem:[#allocation7 + $0x800] sm:$0xff]  ;;  %6753 = vmatprep.subr.bf16.mxu0 %v18203_v56  ;;  %v18714_v1 = vcombine.low %v1381_v52, %v1397_v53  ;;  %v1174_v51 = vld [vmem:[#allocation7 + $0x1288] sm:$0xff]  ;;  %v18012_v52 = vcombine.low %v678_v40, %v694_v41  ;;  %v18524_v53 = vcombine.low %v1190_v42, %v1206_v43 }
 0x117   : > { %v853_v61 = vld [vmem:[#allocation7 + $0x880] sm:$0xff]  ;;  %6754 = vmatpush2.bf16.msra.mxu0 %v18202_v0  ;;  %v18493_v55 = vcombine.high %v1158_v50, %v1174_v51  ;;  %v614_v56 = vld [vmem:[#allocation7 + $0x108] sm:$0xff] }
 0x118   : > { %v1349_v62 = vld [vmem:[#allocation7 + $0x1800] sm:$0xff]  ;;  %v18171_v2 = vcombine.high %v837_v60, %v853_v61  ;;  %6794 = vmatprep.subr.bf16.mxu1 %v18715_v57  ;;  %v18170_v8 = vcombine.low %v837_v60, %v853_v61  ;;  %v630_v57 = vld [vmem:[#allocation7 + $0x188] sm:$0xff] }
 0x119   : > { %v1365_v63 = vld [vmem:[#allocation7 + $0x1880] sm:$0xff]  ;;  %6795 = vmatpush2.bf16.msra.mxu1 %v18714_v1  ;;  %v1126_v60 = vld [vmem:[#allocation7 + $0x1108] sm:$0xff]  ;;  %v17949_v0 = vcombine.high %v614_v56, %v630_v57  ;;  %v17948_v6 = vcombine.low %v614_v56, %v630_v57 }
 0x11a   : > { %v18683_v3 = vcombine.high %v1349_v62, %v1365_v63  ;;  %v573_v9 = vld [vmem:[#allocation4] sm:$0xff]  ;;  %6755 = vmatprep.subr.bf16.mxu0 %v18171_v2  ;;  %v18682_v10 = vcombine.low %v1349_v62, %v1365_v63  ;;  %v1142_v61 = vld [vmem:[#allocation7 + $0x1188] sm:$0xff]  ;;  %v17980_v62 = vcombine.low %v646_v48, %v662_v49  ;;  %v18492_v63 = vcombine.low %v1158_v50, %v1174_v51 }
 0x11b   : > { %v22923_v16 = vpack.c.bf16 %v573_v9, %v573_v9  ;;  %6756 = vmatpush2.bf16.msra.mxu0 %v18170_v8  ;;  %v18461_v1 = vcombine.high %v1126_v60, %v1142_v61  ;;  %v582_v2 = vld [vmem:[#allocation7 + $0x8] sm:$0xff]  ;;  %v18460_v7 = vcombine.low %v1126_v60, %v1142_v61 }
 0x11c   : > { %6796 = vmatprep.subr.bf16.mxu1 %v18683_v3  ;;  %6807 = vmatprep.subr.bf16.mxu0 %v18141_v12  ;;  %v598_v3 = vld [vmem:[#allocation7 + $0x88] sm:$0xff] }
 0x11d   : > { %6797 = vmatpush2.bf16.msra.mxu1 %v18682_v10  ;;  %v1110_v5 = vld [vmem:[#allocation7 + $0x1088] sm:$0xff]  ;;  %v17917_v8 = vcombine.high %v582_v2, %v598_v3  ;;  %v17916_v14 = vcombine.low %v582_v2, %v598_v3 }
 0x11e   : > { %6848 = vmatprep.subr.bf16.mxu1 %v18653_v13  ;;  %6758 = vmatmul.mubr.bf16.vlgmr.msra.gmra.mxu0 %v22923_v16  ;;  %v18429_v9 = vcombine.high %v1094_v4, %v1110_v5  ;;  %v1062_v10 = vld [vmem:[#allocation7 + $0xf08] sm:$0xff]  ;;  %v18428_v15 = vcombine.low %v1094_v4, %v1110_v5 }
 0x11f   : > { %6808 = vmatpush1.bf16.msra.mxu0 %v18140_v20  ;;  %6839 = vmatprep.mubr.bf16.mxu0 %v22917_v58  ;;  %v1078_v11 = vld [vmem:[#allocation7 + $0xf88] sm:$0xff] }
 0x120   : > { %6799 = vmatmul.mubr.bf16.vlgmr.msra.gmra.mxu1 %v22925_v19  ;;  %6809 = vmatprep.subr.bf16.mxu0 %v18109_v22  ;;  %v1574_v12 = vld [vmem:[#allocation7 + $0x1f08] sm:$0xff]  ;;  %v18397_v17 = vcombine.high %v1062_v10, %v1078_v11  ;;  %v18396_v24 = vcombine.low %v1062_v10, %v1078_v11 }
 0x121   : > { %6849 = vmatpush1.bf16.msra.mxu1 %v18652_v21  ;;  %6880 = vmatprep.mubr.bf16.mxu1 %v22919_v59  ;;  %v1590_v13 = vld [vmem:[#allocation7 + $0x1f88] sm:$0xff] }
 0x122   : > { %6850 = vmatprep.subr.bf16.mxu1 %v18621_v23  ;;  %v18909_v18 = vcombine.high %v1574_v12, %v1590_v13  ;;  %v1030_v20 = vld [vmem:[#allocation7 + $0xe08] sm:$0xff]  ;;  %v18908_v25 = vcombine.low %v1574_v12, %v1590_v13 }
 0x123   : > { %6810 = vmatpush1.bf16.msra.mxu0 %v18108_v28  ;;  %v1046_v21 = vld [vmem:[#allocation7 + $0xe88] sm:$0xff] }
 0x124   : > { %6811 = vmatprep.subr.bf16.mxu0 %v18077_v30  ;;  %v1542_v22 = vld [vmem:[#allocation7 + $0x1e08] sm:$0xff]  ;;  %v18365_v26 = vcombine.high %v1030_v20, %v1046_v21  ;;  %v18364_v32 = vcombine.low %v1030_v20, %v1046_v21 }
 0x125   : > { %6851 = vmatpush1.bf16.msra.mxu1 %v18620_v29  ;;  %v1558_v23 = vld [vmem:[#allocation7 + $0x1e88] sm:$0xff] }
 0x126   : > { %6852 = vmatprep.subr.bf16.mxu1 %v18589_v31  ;;  %v18877_v27 = vcombine.high %v1542_v22, %v1558_v23  ;;  %v998_v28 = vld [vmem:[#allocation7 + $0xd08] sm:$0xff]  ;;  %v18876_v33 = vcombine.low %v1542_v22, %v1558_v23 }
 0x127   : > { %6812 = vmatpush1.bf16.msra.mxu0 %v18076_v36  ;;  %v1014_v29 = vld [vmem:[#allocation7 + $0xd88] sm:$0xff] }
 0x128   : > { %6813 = vmatprep.subr.bf16.mxu0 %v18045_v38  ;;  %v1510_v30 = vld [vmem:[#allocation7 + $0x1d08] sm:$0xff]  ;;  %v18333_v34 = vcombine.high %v998_v28, %v1014_v29  ;;  %v18332_v40 = vcombine.low %v998_v28, %v1014_v29 }
 0x129   : > { %6853 = vmatpush1.bf16.msra.mxu1 %v18588_v37  ;;  %v1526_v31 = vld [vmem:[#allocation7 + $0x1d88] sm:$0xff] }
 0x12a   : > { %6854 = vmatprep.subr.bf16.mxu1 %v18557_v39  ;;  %v18845_v35 = vcombine.high %v1510_v30, %v1526_v31  ;;  %v966_v36 = vld [vmem:[#allocation7 + $0xc08] sm:$0xff]  ;;  %v18844_v41 = vcombine.low %v1510_v30, %v1526_v31 }
 0x12b   : > { %6814 = vmatpush1.bf16.msra.mxu0 %v18044_v44  ;;  %v982_v37 = vld [vmem:[#allocation7 + $0xc88] sm:$0xff] }
 0x12c   : > { %6815 = vmatprep.subr.bf16.mxu0 %v18013_v46  ;;  %v1478_v38 = vld [vmem:[#allocation7 + $0x1c08] sm:$0xff]  ;;  %v18301_v42 = vcombine.high %v966_v36, %v982_v37  ;;  %v18300_v48 = vcombine.low %v966_v36, %v982_v37 }
 0x12d   : > { %6855 = vmatpush1.bf16.msra.mxu1 %v18556_v45  ;;  %v1494_v39 = vld [vmem:[#allocation7 + $0x1c88] sm:$0xff] }
 0x12e   : > { %6856 = vmatprep.subr.bf16.mxu1 %v18525_v47  ;;  %v18813_v43 = vcombine.high %v1478_v38, %v1494_v39  ;;  %v934_v44 = vld [vmem:[#allocation7 + $0xb08] sm:$0xff]  ;;  %v18812_v49 = vcombine.low %v1478_v38, %v1494_v39 }
 0x12f   : > { %6816 = vmatpush1.bf16.msra.mxu0 %v18012_v52  ;;  %v950_v45 = vld [vmem:[#allocation7 + $0xb88] sm:$0xff] }
 0x130   : > { %6817 = vmatprep.subr.bf16.mxu0 %v17981_v54  ;;  %v1446_v46 = vld [vmem:[#allocation7 + $0x1b08] sm:$0xff]  ;;  %v18269_v50 = vcombine.high %v934_v44, %v950_v45  ;;  %v18268_v56 = vcombine.low %v934_v44, %v950_v45 }
 0x131   : > { %6857 = vmatpush1.bf16.msra.mxu1 %v18524_v53  ;;  %v1462_v47 = vld [vmem:[#allocation7 + $0x1b88] sm:$0xff] }
 0x132   : > { %6858 = vmatprep.subr.bf16.mxu1 %v18493_v55  ;;  %v18781_v51 = vcombine.high %v1446_v46, %v1462_v47  ;;  %v902_v52 = vld [vmem:[#allocation7 + $0xa08] sm:$0xff]  ;;  %v18780_v57 = vcombine.low %v1446_v46, %v1462_v47 }
 0x133   : > { %6818 = vmatpush1.bf16.msra.mxu0 %v17980_v62  ;;  %v918_v53 = vld [vmem:[#allocation7 + $0xa88] sm:$0xff] }
 0x134   : > { %6819 = vmatprep.subr.bf16.mxu0 %v17949_v0  ;;  %v1414_v54 = vld [vmem:[#allocation7 + $0x1a08] sm:$0xff]  ;;  %v18237_v60 = vcombine.high %v902_v52, %v918_v53  ;;  %v18236_v2 = vcombine.low %v902_v52, %v918_v53 }
 0x135   : > { %6859 = vmatpush1.bf16.msra.mxu1 %v18492_v63  ;;  %v1430_v55 = vld [vmem:[#allocation7 + $0x1a88] sm:$0xff] }
 0x136   : > { %6860 = vmatprep.subr.bf16.mxu1 %v18461_v1  ;;  %v18749_v61 = vcombine.high %v1414_v54, %v1430_v55  ;;  %v870_v62 = vld [vmem:[#allocation7 + $0x908] sm:$0xff]  ;;  %v18748_v3 = vcombine.low %v1414_v54, %v1430_v55 }
 0x137   : > { %6820 = vmatpush1.bf16.msra.mxu0 %v17948_v6  ;;  %v886_v63 = vld [vmem:[#allocation7 + $0x988] sm:$0xff] }
 0x138   : > { %6821 = vmatprep.subr.bf16.mxu0 %v17917_v8  ;;  %v1382_v0 = vld [vmem:[#allocation7 + $0x1908] sm:$0xff]  ;;  %v18205_v4 = vcombine.high %v870_v62, %v886_v63  ;;  %v18204_v10 = vcombine.low %v870_v62, %v886_v63 }
 0x139   : > { %6861 = vmatpush1.bf16.msra.mxu1 %v18460_v7  ;;  %v1398_v1 = vld [vmem:[#allocation7 + $0x1988] sm:$0xff] }
 0x13a   : > { %6862 = vmatprep.subr.bf16.mxu1 %v18429_v9  ;;  %v18717_v5 = vcombine.high %v1382_v0, %v1398_v1  ;;  %v838_v6 = vld [vmem:[#allocation7 + $0x808] sm:$0xff]  ;;  %v18716_v11 = vcombine.low %v1382_v0, %v1398_v1 }
 0x13b   : > { %6822 = vmatpush1.bf16.msra.mxu0 %v17916_v14  ;;  %v854_v7 = vld [vmem:[#allocation7 + $0x888] sm:$0xff]  ;;  %v807_v14 = vld [vmem:[#allocation7 + $0x710] sm:$0xff] }
 0x13c   : > { %6823 = vmatprep.subr.bf16.mxu0 %v18397_v17  ;;  %v1350_v8 = vld [vmem:[#allocation7 + $0x1808] sm:$0xff]  ;;  %v18173_v12 = vcombine.high %v838_v6, %v854_v7  ;;  %v1319_v17 = vld [vmem:[#allocation7 + $0x1710] sm:$0xff]  ;;  %v18172_v20 = vcombine.low %v838_v6, %v854_v7 }
 0x13d   : > { %6863 = vmatpush1.bf16.msra.mxu1 %v18428_v15  ;;  %v1366_v9 = vld [vmem:[#allocation7 + $0x1888] sm:$0xff]  ;;  %v823_v15 = vld [vmem:[#allocation7 + $0x790] sm:$0xff] }
 0x13e   : > { %6864 = vmatprep.subr.bf16.mxu1 %v18909_v18  ;;  %v18685_v13 = vcombine.high %v1350_v8, %v1366_v9  ;;  %v1335_v18 = vld [vmem:[#allocation7 + $0x1790] sm:$0xff]  ;;  %v18684_v21 = vcombine.low %v1350_v8, %v1366_v9  ;;  %v18143_v22 = vcombine.high %v807_v14, %v823_v15  ;;  %v18142_v28 = vcombine.low %v807_v14, %v823_v15 }
 0x13f   : > { %6824 = vmatpush2.bf16.msra.mxu0 %v18396_v24  ;;  %v18655_v23 = vcombine.high %v1319_v17, %v1335_v18  ;;  %v775_v24 = vld [vmem:[#allocation7 + $0x610] sm:$0xff]  ;;  %v18654_v29 = vcombine.low %v1319_v17, %v1335_v18 }
 0x140   : > { %6825 = vmatprep.subr.bf16.mxu0 %v18365_v26  ;;  %v1287_v26 = vld [vmem:[#allocation7 + $0x1610] sm:$0xff] }
 0x141   : > { %6865 = vmatpush2.bf16.msra.mxu1 %v18908_v25  ;;  %v791_v25 = vld [vmem:[#allocation7 + $0x690] sm:$0xff] }
 0x142   : > { %6866 = vmatprep.subr.bf16.mxu1 %v18877_v27  ;;  %v1303_v27 = vld [vmem:[#allocation7 + $0x1690] sm:$0xff]  ;;  %v18111_v30 = vcombine.high %v775_v24, %v791_v25  ;;  %v18110_v36 = vcombine.low %v775_v24, %v791_v25 }
 0x143   : > { %6826 = vmatpush2.bf16.msra.mxu0 %v18364_v32  ;;  %v18623_v31 = vcombine.high %v1287_v26, %v1303_v27  ;;  %v743_v32 = vld [vmem:[#allocation7 + $0x510] sm:$0xff]  ;;  %v18622_v37 = vcombine.low %v1287_v26, %v1303_v27 }
 0x144   : > { %6827 = vmatprep.subr.bf16.mxu0 %v18333_v34  ;;  %v1255_v34 = vld [vmem:[#allocation7 + $0x1510] sm:$0xff] }
 0x145   : > { %6867 = vmatpush2.bf16.msra.mxu1 %v18876_v33  ;;  %v759_v33 = vld [vmem:[#allocation7 + $0x590] sm:$0xff] }
 0x146   : > { %6868 = vmatprep.subr.bf16.mxu1 %v18845_v35  ;;  %v1271_v35 = vld [vmem:[#allocation7 + $0x1590] sm:$0xff]  ;;  %v18079_v38 = vcombine.high %v743_v32, %v759_v33  ;;  %v18078_v44 = vcombine.low %v743_v32, %v759_v33 }
 0x147   : > { %6828 = vmatpush2.bf16.msra.mxu0 %v18332_v40  ;;  %v18591_v39 = vcombine.high %v1255_v34, %v1271_v35  ;;  %v711_v40 = vld [vmem:[#allocation7 + $0x410] sm:$0xff]  ;;  %v18590_v45 = vcombine.low %v1255_v34, %v1271_v35 }
 0x148   : > { %6829 = vmatprep.subr.bf16.mxu0 %v18301_v42  ;;  %v1223_v42 = vld [vmem:[#allocation7 + $0x1410] sm:$0xff] }
 0x149   : > { %6869 = vmatpush2.bf16.msra.mxu1 %v18844_v41  ;;  %v727_v41 = vld [vmem:[#allocation7 + $0x490] sm:$0xff] }
 0x14a   : > { %6870 = vmatprep.subr.bf16.mxu1 %v18813_v43  ;;  %v1239_v43 = vld [vmem:[#allocation7 + $0x1490] sm:$0xff]  ;;  %v18047_v46 = vcombine.high %v711_v40, %v727_v41  ;;  %v18046_v52 = vcombine.low %v711_v40, %v727_v41 }
 0x14b   : > { %6830 = vmatpush2.bf16.msra.mxu0 %v18300_v48  ;;  %v18559_v47 = vcombine.high %v1223_v42, %v1239_v43  ;;  %v679_v48 = vld [vmem:[#allocation7 + $0x310] sm:$0xff]  ;;  %v18558_v53 = vcombine.low %v1223_v42, %v1239_v43 }
 0x14c   : > { %6831 = vmatprep.subr.bf16.mxu0 %v18269_v50  ;;  %v1191_v50 = vld [vmem:[#allocation7 + $0x1310] sm:$0xff] }
 0x14d   : > { %6871 = vmatpush2.bf16.msra.mxu1 %v18812_v49  ;;  %v695_v49 = vld [vmem:[#allocation7 + $0x390] sm:$0xff] }
 0x14e   : > { %6872 = vmatprep.subr.bf16.mxu1 %v18781_v51  ;;  %v1207_v51 = vld [vmem:[#allocation7 + $0x1390] sm:$0xff]  ;;  %v18015_v54 = vcombine.high %v679_v48, %v695_v49  ;;  %v18014_v62 = vcombine.low %v679_v48, %v695_v49 }
 0x14f   : > { %6832 = vmatpush2.bf16.msra.mxu0 %v18268_v56  ;;  %v18527_v55 = vcombine.high %v1191_v50, %v1207_v51  ;;  %v647_v56 = vld [vmem:[#allocation7 + $0x210] sm:$0xff]  ;;  %v18526_v63 = vcombine.low %v1191_v50, %v1207_v51 }
 0x150   : > { %6833 = vmatprep.subr.bf16.mxu0 %v18237_v60  ;;  %v1159_v60 = vld [vmem:[#allocation7 + $0x1210] sm:$0xff] }
 0x151   : > { %6873 = vmatpush2.bf16.msra.mxu1 %v18780_v57  ;;  %v663_v57 = vld [vmem:[#allocation7 + $0x290] sm:$0xff] }
 0x152   : > { %6874 = vmatprep.subr.bf16.mxu1 %v18749_v61  ;;  %v1175_v61 = vld [vmem:[#allocation7 + $0x1290] sm:$0xff]  ;;  %v17983_v0 = vcombine.high %v647_v56, %v663_v57  ;;  %v17982_v6 = vcombine.low %v647_v56, %v663_v57 }
 0x153   : > { %6834 = vmatpush2.bf16.msra.mxu0 %v18236_v2  ;;  %v18495_v1 = vcombine.high %v1159_v60, %v1175_v61  ;;  %v615_v2 = vld [vmem:[#allocation7 + $0x110] sm:$0xff]  ;;  %v18494_v7 = vcombine.low %v1159_v60, %v1175_v61 }
 0x154   : > { %6835 = vmatprep.subr.bf16.mxu0 %v18205_v4  ;;  %v1127_v4 = vld [vmem:[#allocation7 + $0x1110] sm:$0xff] }
 0x155   : > { %6875 = vmatpush2.bf16.msra.mxu1 %v18748_v3  ;;  %v631_v3 = vld [vmem:[#allocation7 + $0x190] sm:$0xff] }
 0x156   : > { %6876 = vmatprep.subr.bf16.mxu1 %v18717_v5  ;;  %v1143_v5 = vld [vmem:[#allocation7 + $0x1190] sm:$0xff]  ;;  %v17951_v8 = vcombine.high %v615_v2, %v631_v3  ;;  %v17950_v14 = vcombine.low %v615_v2, %v631_v3 }
 0x157   : > { %6836 = vmatpush2.bf16.msra.mxu0 %v18204_v10  ;;  %v18463_v9 = vcombine.high %v1127_v4, %v1143_v5  ;;  %v583_v10 = vld [vmem:[#allocation7 + $0x10] sm:$0xff]  ;;  %v18462_v15 = vcombine.low %v1127_v4, %v1143_v5 }
 0x158   : > { %6837 = vmatprep.subr.bf16.mxu0 %v18173_v12  ;;  %v1095_v12 = vld [vmem:[#allocation7 + $0x1010] sm:$0xff] }
 0x159   : > { %6877 = vmatpush2.bf16.msra.mxu1 %v18716_v11  ;;  %v599_v11 = vld [vmem:[#allocation7 + $0x90] sm:$0xff] }
 0x15a   : > { %6878 = vmatprep.subr.bf16.mxu1 %v18685_v13  ;;  %v1111_v13 = vld [vmem:[#allocation7 + $0x1090] sm:$0xff]  ;;  %v17919_v17 = vcombine.high %v583_v10, %v599_v11  ;;  %v17918_v24 = vcombine.low %v583_v10, %v599_v11 }
 0x15b   : > { %6838 = vmatpush2.bf16.msra.mxu0 %v18172_v20  ;;  %v18431_v18 = vcombine.high %v1095_v12, %v1111_v13  ;;  %v1063_v20 = vld [vmem:[#allocation7 + $0xf10] sm:$0xff]  ;;  %v18430_v25 = vcombine.low %v1095_v12, %v1111_v13 }
 0x15c   : > { %6889 = vmatprep.subr.bf16.mxu0 %v18143_v22  ;;  %v1575_v22 = vld [vmem:[#allocation7 + $0x1f10] sm:$0xff] }
 0x15d   : > { %6879 = vmatpush2.bf16.msra.mxu1 %v18684_v21  ;;  %v1079_v21 = vld [vmem:[#allocation7 + $0xf90] sm:$0xff] }
 0x15e   : > { %6930 = vmatprep.subr.bf16.mxu1 %v18655_v23  ;;  %6840 = vmatmul.mubr.bf16.vlgmr.msra.gmra.mxu0 %v22923_v16  ;;  %v1591_v23 = vld [vmem:[#allocation7 + $0x1f90] sm:$0xff]  ;;  %v18399_v26 = vcombine.high %v1063_v20, %v1079_v21  ;;  %v18398_v32 = vcombine.low %v1063_v20, %v1079_v21 }
 0x15f   : > { %6890 = vmatpush1.bf16.msra.mxu0 %v18142_v28  ;;  %6921 = vmatprep.mubr.bf16.mxu0 %v22917_v58  ;;  %v18911_v27 = vcombine.high %v1575_v22, %v1591_v23  ;;  %v1031_v28 = vld [vmem:[#allocation7 + $0xe10] sm:$0xff]  ;;  %v18910_v33 = vcombine.low %v1575_v22, %v1591_v23 }
 0x160   : > { %6881 = vmatmul.mubr.bf16.vlgmr.msra.gmra.mxu1 %v22925_v19  ;;  %6891 = vmatprep.subr.bf16.mxu0 %v18111_v30  ;;  %v1543_v30 = vld [vmem:[#allocation7 + $0x1e10] sm:$0xff] }
 0x161   : > { %6931 = vmatpush1.bf16.msra.mxu1 %v18654_v29  ;;  %6962 = vmatprep.mubr.bf16.mxu1 %v22919_v59  ;;  %v1047_v29 = vld [vmem:[#allocation7 + $0xe90] sm:$0xff] }
 0x162   : > { %6932 = vmatprep.subr.bf16.mxu1 %v18623_v31  ;;  %v1559_v31 = vld [vmem:[#allocation7 + $0x1e90] sm:$0xff]  ;;  %v18367_v34 = vcombine.high %v1031_v28, %v1047_v29  ;;  %v18366_v40 = vcombine.low %v1031_v28, %v1047_v29 }
 0x163   : > { %6892 = vmatpush1.bf16.msra.mxu0 %v18110_v36  ;;  %v18879_v35 = vcombine.high %v1543_v30, %v1559_v31  ;;  %v999_v36 = vld [vmem:[#allocation7 + $0xd10] sm:$0xff]  ;;  %v18878_v41 = vcombine.low %v1543_v30, %v1559_v31 }
 0x164   : > { %6893 = vmatprep.subr.bf16.mxu0 %v18079_v38  ;;  %v1511_v38 = vld [vmem:[#allocation7 + $0x1d10] sm:$0xff] }
 0x165   : > { %6933 = vmatpush1.bf16.msra.mxu1 %v18622_v37  ;;  %v1015_v37 = vld [vmem:[#allocation7 + $0xd90] sm:$0xff] }
 0x166   : > { %6934 = vmatprep.subr.bf16.mxu1 %v18591_v39  ;;  %v1527_v39 = vld [vmem:[#allocation7 + $0x1d90] sm:$0xff]  ;;  %v18335_v42 = vcombine.high %v999_v36, %v1015_v37  ;;  %v18334_v48 = vcombine.low %v999_v36, %v1015_v37 }
 0x167   : > { %6894 = vmatpush1.bf16.msra.mxu0 %v18078_v44  ;;  %v18847_v43 = vcombine.high %v1511_v38, %v1527_v39  ;;  %v967_v44 = vld [vmem:[#allocation7 + $0xc10] sm:$0xff]  ;;  %v18846_v49 = vcombine.low %v1511_v38, %v1527_v39 }
 0x168   : > { %6895 = vmatprep.subr.bf16.mxu0 %v18047_v46  ;;  %v1479_v46 = vld [vmem:[#allocation7 + $0x1c10] sm:$0xff] }
 0x169   : > { %6935 = vmatpush1.bf16.msra.mxu1 %v18590_v45  ;;  %v983_v45 = vld [vmem:[#allocation7 + $0xc90] sm:$0xff] }
 0x16a   : > { %6936 = vmatprep.subr.bf16.mxu1 %v18559_v47  ;;  %v1495_v47 = vld [vmem:[#allocation7 + $0x1c90] sm:$0xff]  ;;  %v18303_v50 = vcombine.high %v967_v44, %v983_v45  ;;  %v18302_v56 = vcombine.low %v967_v44, %v983_v45 }
 0x16b   : > { %6896 = vmatpush1.bf16.msra.mxu0 %v18046_v52  ;;  %v18815_v51 = vcombine.high %v1479_v46, %v1495_v47  ;;  %v935_v52 = vld [vmem:[#allocation7 + $0xb10] sm:$0xff]  ;;  %v18814_v57 = vcombine.low %v1479_v46, %v1495_v47 }
 0x16c   : > { %6897 = vmatprep.subr.bf16.mxu0 %v18015_v54  ;;  %v1447_v54 = vld [vmem:[#allocation7 + $0x1b10] sm:$0xff] }
 0x16d   : > { %6937 = vmatpush1.bf16.msra.mxu1 %v18558_v53  ;;  %v951_v53 = vld [vmem:[#allocation7 + $0xb90] sm:$0xff] }
 0x16e   : > { %6938 = vmatprep.subr.bf16.mxu1 %v18527_v55  ;;  %v1463_v55 = vld [vmem:[#allocation7 + $0x1b90] sm:$0xff]  ;;  %v18271_v60 = vcombine.high %v935_v52, %v951_v53  ;;  %v18270_v2 = vcombine.low %v935_v52, %v951_v53 }
 0x16f   : > { %6898 = vmatpush1.bf16.msra.mxu0 %v18014_v62  ;;  %v18783_v61 = vcombine.high %v1447_v54, %v1463_v55  ;;  %v903_v62 = vld [vmem:[#allocation7 + $0xa10] sm:$0xff]  ;;  %v18782_v3 = vcombine.low %v1447_v54, %v1463_v55 }
 0x170   : > { %6899 = vmatprep.subr.bf16.mxu0 %v17983_v0  ;;  %v1415_v0 = vld [vmem:[#allocation7 + $0x1a10] sm:$0xff] }
 0x171   : > { %6939 = vmatpush1.bf16.msra.mxu1 %v18526_v63  ;;  %v919_v63 = vld [vmem:[#allocation7 + $0xa90] sm:$0xff] }
 0x172   : > { %6940 = vmatprep.subr.bf16.mxu1 %v18495_v1  ;;  %v1431_v1 = vld [vmem:[#allocation7 + $0x1a90] sm:$0xff]  ;;  %v18239_v4 = vcombine.high %v903_v62, %v919_v63  ;;  %v18238_v10 = vcombine.low %v903_v62, %v919_v63 }
 0x173   : > { %6900 = vmatpush1.bf16.msra.mxu0 %v17982_v6  ;;  %v18751_v5 = vcombine.high %v1415_v0, %v1431_v1  ;;  %v871_v6 = vld [vmem:[#allocation7 + $0x910] sm:$0xff]  ;;  %v18750_v11 = vcombine.low %v1415_v0, %v1431_v1 }
 0x174   : > { %6901 = vmatprep.subr.bf16.mxu0 %v17951_v8  ;;  %v1383_v8 = vld [vmem:[#allocation7 + $0x1910] sm:$0xff] }
 0x175   : > { %6941 = vmatpush1.bf16.msra.mxu1 %v18494_v7  ;;  %v887_v7 = vld [vmem:[#allocation7 + $0x990] sm:$0xff] }
 0x176   : > { %6942 = vmatprep.subr.bf16.mxu1 %v18463_v9  ;;  %v1399_v9 = vld [vmem:[#allocation7 + $0x1990] sm:$0xff]  ;;  %v18207_v12 = vcombine.high %v871_v6, %v887_v7  ;;  %v18206_v20 = vcombine.low %v871_v6, %v887_v7 }
 0x177   : > { %6902 = vmatpush1.bf16.msra.mxu0 %v17950_v14  ;;  %v18719_v13 = vcombine.high %v1383_v8, %v1399_v9  ;;  %v839_v14 = vld [vmem:[#allocation7 + $0x810] sm:$0xff]  ;;  %v18718_v21 = vcombine.low %v1383_v8, %v1399_v9 }
 0x178   : > { %6903 = vmatprep.subr.bf16.mxu0 %v17919_v17  ;;  %v1351_v17 = vld [vmem:[#allocation7 + $0x1810] sm:$0xff] }
 0x179   : > { %6943 = vmatpush1.bf16.msra.mxu1 %v18462_v15  ;;  %v855_v15 = vld [vmem:[#allocation7 + $0x890] sm:$0xff] }
 0x17a   : > { %6944 = vmatprep.subr.bf16.mxu1 %v18431_v18  ;;  %v1367_v18 = vld [vmem:[#allocation7 + $0x1890] sm:$0xff]  ;;  %v18175_v22 = vcombine.high %v839_v14, %v855_v15  ;;  %v18174_v28 = vcombine.low %v839_v14, %v855_v15 }
 0x17b   : > { %6904 = vmatpush1.bf16.msra.mxu0 %v17918_v24  ;;  %v18687_v23 = vcombine.high %v1351_v17, %v1367_v18  ;;  %v808_v24 = vld [vmem:[#allocation7 + $0x718] sm:$0xff]  ;;  %v18686_v29 = vcombine.low %v1351_v17, %v1367_v18 }
 0x17c   : > { %6905 = vmatprep.subr.bf16.mxu0 %v18399_v26  ;;  %v1320_v26 = vld [vmem:[#allocation7 + $0x1718] sm:$0xff] }
 0x17d   : > { %6945 = vmatpush1.bf16.msra.mxu1 %v18430_v25  ;;  %v824_v25 = vld [vmem:[#allocation7 + $0x798] sm:$0xff] }
 0x17e   : > { %6946 = vmatprep.subr.bf16.mxu1 %v18911_v27  ;;  %v1336_v27 = vld [vmem:[#allocation7 + $0x1798] sm:$0xff]  ;;  %v18145_v30 = vcombine.high %v808_v24, %v824_v25  ;;  %v18144_v36 = vcombine.low %v808_v24, %v824_v25 }
 0x17f   : > { %6906 = vmatpush2.bf16.msra.mxu0 %v18398_v32  ;;  %v18657_v31 = vcombine.high %v1320_v26, %v1336_v27  ;;  %v776_v32 = vld [vmem:[#allocation7 + $0x618] sm:$0xff]  ;;  %v18656_v37 = vcombine.low %v1320_v26, %v1336_v27 }
 0x180   : > { %6907 = vmatprep.subr.bf16.mxu0 %v18367_v34  ;;  %v1288_v34 = vld [vmem:[#allocation7 + $0x1618] sm:$0xff] }
 0x181   : > { %6947 = vmatpush2.bf16.msra.mxu1 %v18910_v33  ;;  %v792_v33 = vld [vmem:[#allocation7 + $0x698] sm:$0xff] }
 0x182   : > { %6948 = vmatprep.subr.bf16.mxu1 %v18879_v35  ;;  %v1304_v35 = vld [vmem:[#allocation7 + $0x1698] sm:$0xff]  ;;  %v18113_v38 = vcombine.high %v776_v32, %v792_v33  ;;  %v18112_v44 = vcombine.low %v776_v32, %v792_v33 }
 0x183   : > { %6908 = vmatpush2.bf16.msra.mxu0 %v18366_v40  ;;  %v18625_v39 = vcombine.high %v1288_v34, %v1304_v35  ;;  %v744_v40 = vld [vmem:[#allocation7 + $0x518] sm:$0xff]  ;;  %v18624_v45 = vcombine.low %v1288_v34, %v1304_v35 }
 0x184   : > { %6909 = vmatprep.subr.bf16.mxu0 %v18335_v42  ;;  %v1256_v42 = vld [vmem:[#allocation7 + $0x1518] sm:$0xff] }
 0x185   : > { %6949 = vmatpush2.bf16.msra.mxu1 %v18878_v41  ;;  %v760_v41 = vld [vmem:[#allocation7 + $0x598] sm:$0xff] }
 0x186   : > { %6950 = vmatprep.subr.bf16.mxu1 %v18847_v43  ;;  %v1272_v43 = vld [vmem:[#allocation7 + $0x1598] sm:$0xff]  ;;  %v18081_v46 = vcombine.high %v744_v40, %v760_v41  ;;  %v18080_v52 = vcombine.low %v744_v40, %v760_v41 }
 0x187   : > { %6910 = vmatpush2.bf16.msra.mxu0 %v18334_v48  ;;  %v18593_v47 = vcombine.high %v1256_v42, %v1272_v43  ;;  %v712_v48 = vld [vmem:[#allocation7 + $0x418] sm:$0xff]  ;;  %v18592_v53 = vcombine.low %v1256_v42, %v1272_v43 }
 0x188   : > { %6911 = vmatprep.subr.bf16.mxu0 %v18303_v50  ;;  %v1224_v50 = vld [vmem:[#allocation7 + $0x1418] sm:$0xff] }
 0x189   : > { %6951 = vmatpush2.bf16.msra.mxu1 %v18846_v49  ;;  %v728_v49 = vld [vmem:[#allocation7 + $0x498] sm:$0xff] }
 0x18a   : > { %6952 = vmatprep.subr.bf16.mxu1 %v18815_v51  ;;  %v1240_v51 = vld [vmem:[#allocation7 + $0x1498] sm:$0xff]  ;;  %v18049_v54 = vcombine.high %v712_v48, %v728_v49  ;;  %v18048_v62 = vcombine.low %v712_v48, %v728_v49 }
 0x18b   : > { %6912 = vmatpush2.bf16.msra.mxu0 %v18302_v56  ;;  %v18561_v55 = vcombine.high %v1224_v50, %v1240_v51  ;;  %v680_v56 = vld [vmem:[#allocation7 + $0x318] sm:$0xff]  ;;  %v18560_v63 = vcombine.low %v1224_v50, %v1240_v51 }
 0x18c   : > { %6913 = vmatprep.subr.bf16.mxu0 %v18271_v60  ;;  %v1192_v60 = vld [vmem:[#allocation7 + $0x1318] sm:$0xff] }
 0x18d   : > { %6953 = vmatpush2.bf16.msra.mxu1 %v18814_v57  ;;  %v696_v57 = vld [vmem:[#allocation7 + $0x398] sm:$0xff] }
 0x18e   : > { %6954 = vmatprep.subr.bf16.mxu1 %v18783_v61  ;;  %v1208_v61 = vld [vmem:[#allocation7 + $0x1398] sm:$0xff]  ;;  %v18017_v0 = vcombine.high %v680_v56, %v696_v57  ;;  %v18016_v6 = vcombine.low %v680_v56, %v696_v57 }
 0x18f   : > { %6914 = vmatpush2.bf16.msra.mxu0 %v18270_v2  ;;  %v18529_v1 = vcombine.high %v1192_v60, %v1208_v61  ;;  %v648_v2 = vld [vmem:[#allocation7 + $0x218] sm:$0xff]  ;;  %v18528_v7 = vcombine.low %v1192_v60, %v1208_v61 }
 0x190   : > { %6915 = vmatprep.subr.bf16.mxu0 %v18239_v4  ;;  %v1160_v4 = vld [vmem:[#allocation7 + $0x1218] sm:$0xff] }
 0x191   : > { %6955 = vmatpush2.bf16.msra.mxu1 %v18782_v3  ;;  %v664_v3 = vld [vmem:[#allocation7 + $0x298] sm:$0xff] }
 0x192   : > { %6956 = vmatprep.subr.bf16.mxu1 %v18751_v5  ;;  %v1176_v5 = vld [vmem:[#allocation7 + $0x1298] sm:$0xff]  ;;  %v17985_v8 = vcombine.high %v648_v2, %v664_v3  ;;  %v17984_v14 = vcombine.low %v648_v2, %v664_v3 }
 0x193   : > { %6916 = vmatpush2.bf16.msra.mxu0 %v18238_v10  ;;  %v18497_v9 = vcombine.high %v1160_v4, %v1176_v5  ;;  %v616_v10 = vld [vmem:[#allocation7 + $0x118] sm:$0xff]  ;;  %v18496_v15 = vcombine.low %v1160_v4, %v1176_v5 }
 0x194   : > { %6917 = vmatprep.subr.bf16.mxu0 %v18207_v12  ;;  %v1128_v12 = vld [vmem:[#allocation7 + $0x1118] sm:$0xff] }
 0x195   : > { %6957 = vmatpush2.bf16.msra.mxu1 %v18750_v11  ;;  %v632_v11 = vld [vmem:[#allocation7 + $0x198] sm:$0xff] }
 0x196   : > { %6958 = vmatprep.subr.bf16.mxu1 %v18719_v13  ;;  %v1144_v13 = vld [vmem:[#allocation7 + $0x1198] sm:$0xff]  ;;  %v17953_v17 = vcombine.high %v616_v10, %v632_v11  ;;  %v17952_v24 = vcombine.low %v616_v10, %v632_v11 }
 0x197   : > { %6918 = vmatpush2.bf16.msra.mxu0 %v18206_v20  ;;  %v18465_v18 = vcombine.high %v1128_v12, %v1144_v13  ;;  %v584_v20 = vld [vmem:[#allocation7 + $0x18] sm:$0xff]  ;;  %v18464_v25 = vcombine.low %v1128_v12, %v1144_v13 }
 0x198   : > { %6919 = vmatprep.subr.bf16.mxu0 %v18175_v22  ;;  %v1096_v22 = vld [vmem:[#allocation7 + $0x1018] sm:$0xff] }
 0x199   : > { %6959 = vmatpush2.bf16.msra.mxu1 %v18718_v21  ;;  %v600_v21 = vld [vmem:[#allocation7 + $0x98] sm:$0xff] }
 0x19a   : > { %6960 = vmatprep.subr.bf16.mxu1 %v18687_v23  ;;  %v1112_v23 = vld [vmem:[#allocation7 + $0x1098] sm:$0xff]  ;;  %v17921_v26 = vcombine.high %v584_v20, %v600_v21  ;;  %v17920_v32 = vcombine.low %v584_v20, %v600_v21 }
 0x19b   : > { %6920 = vmatpush2.bf16.msra.mxu0 %v18174_v28  ;;  %v18433_v27 = vcombine.high %v1096_v22, %v1112_v23  ;;  %v1064_v28 = vld [vmem:[#allocation7 + $0xf18] sm:$0xff]  ;;  %v18432_v33 = vcombine.low %v1096_v22, %v1112_v23 }
 0x19c   : > { %6971 = vmatprep.subr.bf16.mxu0 %v18145_v30  ;;  %v1576_v30 = vld [vmem:[#allocation7 + $0x1f18] sm:$0xff] }
 0x19d   : > { %6961 = vmatpush2.bf16.msra.mxu1 %v18686_v29  ;;  %v1080_v29 = vld [vmem:[#allocation7 + $0xf98] sm:$0xff] }
 0x19e   : > { %7012 = vmatprep.subr.bf16.mxu1 %v18657_v31  ;;  %6922 = vmatmul.mubr.bf16.vlgmr.msra.gmra.mxu0 %v22923_v16  ;;  %v1592_v31 = vld [vmem:[#allocation7 + $0x1f98] sm:$0xff]  ;;  %v18401_v34 = vcombine.high %v1064_v28, %v1080_v29  ;;  %v18400_v40 = vcombine.low %v1064_v28, %v1080_v29  ;;  %v8048_v28 = vlaneseq }
 0x19f   : > { %6972 = vmatpush1.bf16.msra.mxu0 %v18144_v36  ;;  %7003 = vmatprep.mubr.bf16.mxu0 %v22917_v58  ;;  %v18913_v35 = vcombine.high %v1576_v30, %v1592_v31  ;;  %v1032_v36 = vld [vmem:[#allocation7 + $0xe18] sm:$0xff]  ;;  %v18912_v41 = vcombine.low %v1576_v30, %v1592_v31 }
 0x1a0   : > { %6963 = vmatmul.mubr.bf16.vlgmr.msra.gmra.mxu1 %v22925_v19  ;;  %6973 = vmatprep.subr.bf16.mxu0 %v18113_v38  ;;  %v1544_v38 = vld [vmem:[#allocation7 + $0x1e18] sm:$0xff] }
 0x1a1   : > { %7013 = vmatpush1.bf16.msra.mxu1 %v18656_v37  ;;  %7044 = vmatprep.mubr.bf16.mxu1 %v22919_v59  ;;  %v1048_v37 = vld [vmem:[#allocation7 + $0xe98] sm:$0xff] }
 0x1a2   : > { %7014 = vmatprep.subr.bf16.mxu1 %v18625_v39  ;;  %v1560_v39 = vld [vmem:[#allocation7 + $0x1e98] sm:$0xff]  ;;  %v18369_v42 = vcombine.high %v1032_v36, %v1048_v37  ;;  %v18368_v48 = vcombine.low %v1032_v36, %v1048_v37  ;;  %v1321_v36 = vld [vmem:[#allocation7 + $0x1720] sm:$0xff] }
 0x1a3   : > { %6974 = vmatpush1.bf16.msra.mxu0 %v18112_v44  ;;  %v18881_v43 = vcombine.high %v1544_v38, %v1560_v39  ;;  %v1000_v44 = vld [vmem:[#allocation7 + $0xd18] sm:$0xff]  ;;  %v18880_v49 = vcombine.low %v1544_v38, %v1560_v39  ;;  %v1337_v37 = vld [vmem:[#allocation7 + $0x17a0] sm:$0xff] }
 0x1a4   : > { %6975 = vmatprep.subr.bf16.mxu0 %v18081_v46  ;;  %v1512_v46 = vld [vmem:[#allocation7 + $0x1d18] sm:$0xff] }
 0x1a5   : > { %7015 = vmatpush1.bf16.msra.mxu1 %v18624_v45  ;;  %v1016_v45 = vld [vmem:[#allocation7 + $0xd98] sm:$0xff] }
 0x1a6   : > { %7016 = vmatprep.subr.bf16.mxu1 %v18593_v47  ;;  %v1528_v47 = vld [vmem:[#allocation7 + $0x1d98] sm:$0xff]  ;;  %v18337_v50 = vcombine.high %v1000_v44, %v1016_v45  ;;  %v18336_v56 = vcombine.low %v1000_v44, %v1016_v45  ;;  %v1289_v45 = vld [vmem:[#allocation7 + $0x1620] sm:$0xff] }
 0x1a7   : > { %6976 = vmatpush1.bf16.msra.mxu0 %v18080_v52  ;;  %v18849_v51 = vcombine.high %v1512_v46, %v1528_v47  ;;  %v968_v52 = vld [vmem:[#allocation7 + $0xc18] sm:$0xff]  ;;  %v18848_v57 = vcombine.low %v1512_v46, %v1528_v47  ;;  %v1305_v46 = vld [vmem:[#allocation7 + $0x16a0] sm:$0xff] }
 0x1a8   : > { %6977 = vmatprep.subr.bf16.mxu0 %v18049_v54  ;;  %v1480_v54 = vld [vmem:[#allocation7 + $0x1c18] sm:$0xff]  ;;  %v22944_v47 = vld [vmem:[#allocation9] ss:$2 sm:$0xff] }
 0x1a9   : > { %7017 = vmatpush1.bf16.msra.mxu1 %v18592_v53  ;;  %v984_v53 = vld [vmem:[#allocation7 + $0xc98] sm:$0xff] }
 0x1aa   : > { %7018 = vmatprep.subr.bf16.mxu1 %v18561_v55  ;;  %v1496_v55 = vld [vmem:[#allocation7 + $0x1c98] sm:$0xff]  ;;  %v18305_v60 = vcombine.high %v968_v52, %v984_v53  ;;  %v18304_v2 = vcombine.low %v968_v52, %v984_v53  ;;  %v22949_v52 = vld [vmem:[#allocation9 + $0x1] ss:$2 sm:$0xff]  ;;  %v18627_v53 = vcombine.high %v1289_v45, %v1305_v46 }
 0x1ab   : > { %6978 = vmatpush1.bf16.msra.mxu0 %v18048_v62  ;;  %v18817_v61 = vcombine.high %v1480_v54, %v1496_v55  ;;  %v936_v62 = vld [vmem:[#allocation7 + $0xb18] sm:$0xff]  ;;  %v18816_v3 = vcombine.low %v1480_v54, %v1496_v55  ;;  %v745_v54 = vld [vmem:[#allocation7 + $0x520] sm:$0xff] }
 0x1ac   : > { %6979 = vmatprep.subr.bf16.mxu0 %v18017_v0  ;;  %v1448_v0 = vld [vmem:[#allocation7 + $0x1b18] sm:$0xff]  ;;  %v761_v55 = vld [vmem:[#allocation7 + $0x5a0] sm:$0xff] }
 0x1ad   : > { %7019 = vmatpush1.bf16.msra.mxu1 %v18560_v63  ;;  %v952_v63 = vld [vmem:[#allocation7 + $0xb98] sm:$0xff] }
 0x1ae   : > { %7020 = vmatprep.subr.bf16.mxu1 %v18529_v1  ;;  %v1464_v1 = vld [vmem:[#allocation7 + $0x1b98] sm:$0xff]  ;;  %v18273_v4 = vcombine.high %v936_v62, %v952_v63  ;;  %v18272_v10 = vcombine.low %v936_v62, %v952_v63 }
 0x1af   : > { %6980 = vmatpush1.bf16.msra.mxu0 %v18016_v6  ;;  %v18785_v5 = vcombine.high %v1448_v0, %v1464_v1  ;;  %v904_v6 = vld [vmem:[#allocation7 + $0xa18] sm:$0xff]  ;;  %v18784_v11 = vcombine.low %v1448_v0, %v1464_v1  ;;  %v18626_v1 = vcombine.low %v1289_v45, %v1305_v46 }
 0x1b0   : > { %6981 = vmatprep.subr.bf16.mxu0 %v17985_v8  ;;  %v1416_v8 = vld [vmem:[#allocation7 + $0x1a18] sm:$0xff] }
 0x1b1   : > { %7021 = vmatpush1.bf16.msra.mxu1 %v18528_v7  ;;  %v920_v7 = vld [vmem:[#allocation7 + $0xa98] sm:$0xff] }
 0x1b2   : > { %7022 = vmatprep.subr.bf16.mxu1 %v18497_v9  ;;  %v1432_v9 = vld [vmem:[#allocation7 + $0x1a98] sm:$0xff]  ;;  %v18241_v12 = vcombine.high %v904_v6, %v920_v7  ;;  %v18240_v20 = vcombine.low %v904_v6, %v920_v7 }
 0x1b3   : > { %6982 = vmatpush1.bf16.msra.mxu0 %v17984_v14  ;;  %v18753_v13 = vcombine.high %v1416_v8, %v1432_v9  ;;  %v872_v14 = vld [vmem:[#allocation7 + $0x918] sm:$0xff]  ;;  %v18752_v21 = vcombine.low %v1416_v8, %v1432_v9  ;;  %v713_v8 = vld [vmem:[#allocation7 + $0x420] sm:$0xff] }
 0x1b4   : > { %6983 = vmatprep.subr.bf16.mxu0 %v17953_v17  ;;  %v1384_v17 = vld [vmem:[#allocation7 + $0x1918] sm:$0xff]  ;;  %v729_v9 = vld [vmem:[#allocation7 + $0x4a0] sm:$0xff] }
 0x1b5   : > { %7023 = vmatpush1.bf16.msra.mxu1 %v18496_v15  ;;  %v888_v15 = vld [vmem:[#allocation7 + $0x998] sm:$0xff] }
 0x1b6   : > { %7024 = vmatprep.subr.bf16.mxu1 %v18465_v18  ;;  %v1400_v18 = vld [vmem:[#allocation7 + $0x1998] sm:$0xff]  ;;  %v18209_v22 = vcombine.high %v872_v14, %v888_v15  ;;  %v18208_v29 = vcombine.low %v872_v14, %v888_v15  ;;  %v1225_v14 = vld [vmem:[#allocation7 + $0x1420] sm:$0xff] }
 0x1b7   : > { %6984 = vmatpush1.bf16.msra.mxu0 %v17952_v24  ;;  %v18721_v23 = vcombine.high %v1384_v17, %v1400_v18  ;;  %v840_v24 = vld [vmem:[#allocation7 + $0x818] sm:$0xff]  ;;  %v18720_v30 = vcombine.low %v1384_v17, %v1400_v18  ;;  %v1241_v15 = vld [vmem:[#allocation7 + $0x14a0] sm:$0xff]  ;;  %v18082_v18 = vcombine.low %v745_v54, %v761_v55 }
 0x1b8   : > { %6985 = vmatprep.subr.bf16.mxu0 %v17921_v26  ;;  %v1352_v26 = vld [vmem:[#allocation7 + $0x1818] sm:$0xff] }
 0x1b9   : > { %7025 = vmatpush1.bf16.msra.mxu1 %v18464_v25  ;;  %v856_v25 = vld [vmem:[#allocation7 + $0x898] sm:$0xff] }
 0x1ba   : > { %7026 = vmatprep.subr.bf16.mxu1 %v18433_v27  ;;  %v1368_v27 = vld [vmem:[#allocation7 + $0x1898] sm:$0xff]  ;;  %v18177_v31 = vcombine.high %v840_v24, %v856_v25  ;;  %v18176_v38 = vcombine.low %v840_v24, %v856_v25  ;;  %v18051_v24 = vcombine.high %v713_v8, %v729_v9 }
 0x1bb   : > { %6986 = vmatpush1.bf16.msra.mxu0 %v17920_v32  ;;  %v18689_v32 = vcombine.high %v1352_v26, %v1368_v27  ;;  %v18688_v39 = vcombine.low %v1352_v26, %v1368_v27  ;;  %v18563_v26 = vcombine.high %v1225_v14, %v1241_v15  ;;  %v681_v27 = vld [vmem:[#allocation7 + $0x320] sm:$0xff] }
 0x1bc   : > { %6987 = vmatprep.subr.bf16.mxu0 %v18401_v34  ;;  %v825_v34 = vld [vmem:[#allocation7 + $0x7a0] sm:$0xff] }
 0x1bd   : > { %7027 = vmatpush1.bf16.msra.mxu1 %v18432_v33  ;;  %v809_v33 = vld [vmem:[#allocation7 + $0x720] sm:$0xff] }
 0x1be   : > { %7028 = vmatprep.subr.bf16.mxu1 %v18913_v35  ;;  %v22939_v35 = vshrl.u32 %v8048_v28, 7  ;;  %v697_v28 = vld [vmem:[#allocation7 + $0x3a0] sm:$0xff] }
 0x1bf   : > { %6988 = vmatpush2.bf16.msra.mxu0 %v18400_v40  ;;  %v18147_v40 = vcombine.high %v809_v33, %v825_v34  ;;  %v18018_v45 = vcombine.low %v681_v27, %v697_v28 }
 0x1c0   : > { %6989 = vmatprep.subr.bf16.mxu0 %v18369_v42  ;;  %v777_v42 = vld [vmem:[#allocation7 + $0x620] sm:$0xff]  ;;  %v22942_v44 = vsub.s32 0, %v22939_v35 }
 0x1c1   : > { %7029 = vmatpush2.bf16.msra.mxu1 %v18912_v41  ;;  %v18659_v41 = vcombine.high %v1321_v36, %v1337_v37 }
 0x1c2   : > { %7030 = vmatprep.subr.bf16.mxu1 %v18881_v43  ;;  %v793_v43 = vld [vmem:[#allocation7 + $0x6a0] sm:$0xff] }
 0x1c3   : > { %6990 = vmatpush2.bf16.msra.mxu0 %v18368_v48  ;;  %v18146_v48 = vcombine.low %v809_v33, %v825_v34  ;;  %v18114_v0 = vcombine.low %v777_v42, %v793_v43  ;;  %v18050_v33 = vcombine.low %v713_v8, %v729_v9  ;;  %v1577_v8 = vld [vmem:[#allocation7 + $0x1f20] sm:$0xff] }
 0x1c4   : > { %6991 = vmatprep.subr.bf16.mxu0 %v18337_v50  ;;  %v18658_v50 = vcombine.low %v1321_v36, %v1337_v37  ;;  %v18562_v36 = vcombine.low %v1225_v14, %v1241_v15  ;;  %v18019_v37 = vcombine.high %v681_v27, %v697_v28  ;;  %v1593_v9 = vld [vmem:[#allocation7 + $0x1fa0] sm:$0xff] }
 0x1c5   : > { %7031 = vmatpush2.bf16.msra.mxu1 %v18880_v49  ;;  %v22947_v49 = vsub.s32 1, %v22939_v35  ;;  %v1033_v14 = vld [vmem:[#allocation7 + $0xe20] sm:$0xff] }
 0x1c6   : > { %7032 = vmatprep.subr.bf16.mxu1 %v18849_v51  ;;  %v18115_v51 = vcombine.high %v777_v42, %v793_v43  ;;  %v1161_v42 = vld [vmem:[#allocation7 + $0x1220] sm:$0xff] }
 0x1c7   : > { %6992 = vmatpush2.bf16.msra.mxu0 %v18336_v56  ;;  %v8055_v63 = vrot.slane %v22944_v47, %v22947_v49  ;;  %v1177_v43 = vld [vmem:[#allocation7 + $0x12a0] sm:$0xff] }
 0x1c8   : > { %6993 = vmatprep.subr.bf16.mxu0 %v18305_v60  ;;  %v1257_v60 = vld [vmem:[#allocation7 + $0x1520] sm:$0xff] }
 0x1c9   : > { %7033 = vmatpush2.bf16.msra.mxu1 %v18848_v57  ;;  %v8051_v57 = vrot.slane %v22944_v47, %v22942_v44  ;;  %v1049_v15 = vld [vmem:[#allocation7 + $0xea0] sm:$0xff] }
 0x1ca   : > { %7034 = vmatprep.subr.bf16.mxu1 %v18817_v61  ;;  %v1273_v61 = vld [vmem:[#allocation7 + $0x15a0] sm:$0xff]  ;;  %v18370_v28 = vcombine.low %v1033_v14, %v1049_v15 }
 0x1cb   : > { %6994 = vmatpush2.bf16.msra.mxu0 %v18304_v2  ;;  %v18595_v7 = vcombine.high %v1257_v60, %v1273_v61  ;;  %v1529_v27 = vld [vmem:[#allocation7 + $0x1da0] sm:$0xff] }
 0x1cc   : > { %6995 = vmatprep.subr.bf16.mxu0 %v18273_v4 }
 0x1cd   : > { %7035 = vmatpush2.bf16.msra.mxu1 %v18816_v3  ;;  %v8255_v3 = vrot.slane %v22949_v52, %v22942_v44 }
 0x1ce   : > { %7036 = vmatprep.subr.bf16.mxu1 %v18785_v5  ;;  %v18083_v5 = vcombine.high %v745_v54, %v761_v55  ;;  %v1129_v54 = vld [vmem:[#allocation7 + $0x1120] sm:$0xff] }
 0x1cf   : > { %6996 = vmatpush2.bf16.msra.mxu0 %v18272_v10  ;;  %v1145_v55 = vld [vmem:[#allocation7 + $0x11a0] sm:$0xff] }
 0x1d0   : > { %6997 = vmatprep.subr.bf16.mxu0 %v18241_v12  ;;  %v8259_v12 = vrot.slane %v22949_v52, %v22947_v49 }
 0x1d1   : > { %7037 = vmatpush2.bf16.msra.mxu1 %v18784_v11 }
 0x1d2   : > { %7038 = vmatprep.subr.bf16.mxu1 %v18753_v13 }
 0x1d3   : > { %6998 = vmatpush2.bf16.msra.mxu0 %v18240_v20  ;;  %v18594_v20 = vcombine.low %v1257_v60, %v1273_v61  ;;  %v18467_v61 = vcombine.high %v1129_v54, %v1145_v55 }
 0x1d4   : > { %6999 = vmatprep.subr.bf16.mxu0 %v18209_v22 }
 0x1d5   : > { %7039 = vmatpush2.bf16.msra.mxu1 %v18752_v21 }
 0x1d6   : > { %7040 = vmatprep.subr.bf16.mxu1 %v18721_v23 }
 0x1d7   : > { %7000 = vmatpush2.bf16.msra.mxu0 %v18208_v29 }
 0x1d8   : > { %7001 = vmatprep.subr.bf16.mxu0 %v18177_v31  ;;  %v1193_v31 = vld [vmem:[#allocation7 + $0x1320] sm:$0xff] }
 0x1d9   : > { %7041 = vmatpush2.bf16.msra.mxu1 %v18720_v30 }
 0x1da   : > { %7042 = vmatprep.subr.bf16.mxu1 %v18689_v32  ;;  %v1209_v32 = vld [vmem:[#allocation7 + $0x13a0] sm:$0xff] }
 0x1db   : > { %7002 = vmatpush2.bf16.msra.mxu0 %v18176_v38  ;;  %v18531_v38 = vcombine.high %v1193_v31, %v1209_v32  ;;  %v18530_v46 = vcombine.low %v1193_v31, %v1209_v32  ;;  %v969_v32 = vld [vmem:[#allocation7 + $0xc20] sm:$0xff] }
 0x1dc   : > { %7053 = vmatprep.subr.bf16.mxu0 %v18147_v40  ;;  %v665_v40 = vld [vmem:[#allocation7 + $0x2a0] sm:$0xff] }
 0x1dd   : > { %7043 = vmatpush2.bf16.msra.mxu1 %v18688_v39  ;;  %v649_v39 = vld [vmem:[#allocation7 + $0x220] sm:$0xff] }
 0x1de   : > { %7094 = vmatprep.subr.bf16.mxu1 %v18659_v41  ;;  %v6759_v56 = vpop.f32.mrf.mxu0  ;;  %7004 = vmatmul.mubr.bf16.vlgmr.msra.gmra.mxu0 %v22923_v16 }
 0x1df   : > { %7054 = vmatpush1.bf16.msra.mxu0 %v18146_v48  ;;  %7085 = vmatprep.mubr.bf16.mxu0 %v22917_v58  ;;  %v17987_v48 = vcombine.high %v649_v39, %v665_v40 }
 0x1e0   : > { %v6800_v62 = vpop.f32.mrf.mxu1  ;;  %7045 = vmatmul.mubr.bf16.vlgmr.msra.gmra.mxu1 %v22925_v19  ;;  %v6761_v4 = vpop.f32.mrf.mxu0  ;;  %7055 = vmatprep.subr.bf16.mxu0 %v18115_v51  ;;  %v617_v51 = vld [vmem:[#allocation7 + $0x120] sm:$0xff] }
 0x1e1   : > { %v6801_v2 = vadd.f32 %v6800_v62, %v6759_v56  ;;  %7095 = vmatpush1.bf16.msra.mxu1 %v18658_v50  ;;  %7126 = vmatprep.mubr.bf16.mxu1 %v22919_v59  ;;  %v18499_v50 = vcombine.high %v1161_v42, %v1177_v43  ;;  %v17986_v56 = vcombine.low %v649_v39, %v665_v40  ;;  %v585_v62 = vld [vmem:[#allocation7 + $0x20] sm:$0xff] }
 0x1e2   : > { %v6802_v6 = vpop.f32.mrf.mxu1  ;;  %7096 = vmatprep.subr.bf16.mxu1 %v18627_v53  ;;  %v6763_v13 = vpop.f32.mrf.mxu0  ;;  %v633_v53 = vld [vmem:[#allocation7 + $0x1a0] sm:$0xff] }
 0x1e3   : > { %v8208_v10 = vmul.f32 %v8051_v57, %v6801_v2  ;;  %v6803_v11 = vadd.f32 %v6802_v6, %v6761_v4  ;;  %7056 = vmatpush1.bf16.msra.mxu0 %v18114_v0  ;;  %v18498_v57 = vcombine.low %v1161_v42, %v1177_v43  ;;  %v17955_v60 = vcombine.high %v617_v51, %v633_v53  ;;  %v1097_v0 = vld [vmem:[#allocation7 + $0x1020] sm:$0xff] }
 0x1e4   : > { %v6804_v17 = vpop.f32.mrf.mxu1  ;;  %v6764_v23 = vpop.f32.mrf.mxu0  ;;  %7057 = vmatprep.subr.bf16.mxu0 %v18083_v5  ;;  %v17954_v2 = vcombine.low %v617_v51, %v633_v53  ;;  %v1065_v6 = vld [vmem:[#allocation7 + $0xf20] sm:$0xff]  ;;  %v18915_v13 = vcombine.high %v1577_v8, %v1593_v9 }
 0x1e5   : > { %v8412_v21 = vadd.f32 %v8255_v3, %v8208_v10  ;;  %v8209_v22 = vmul.f32 %v8055_v63, %v6803_v11  ;;  %7097 = vmatpush1.bf16.msra.mxu1 %v18626_v1  ;;  %v601_v63 = vld [vmem:[#allocation7 + $0xa0] sm:$0xff]  ;;  %v18466_v3 = vcombine.low %v1129_v54, %v1145_v55 }
 0x1e6   : > { %v6805_v25 = vpop.f32.mrf.mxu1  ;;  %7098 = vmatprep.subr.bf16.mxu1 %v18595_v7  ;;  %v1113_v1 = vld [vmem:[#allocation7 + $0x10a0] sm:$0xff]  ;;  %v17923_v4 = vcombine.high %v585_v62, %v601_v63  ;;  %v17922_v10 = vcombine.low %v585_v62, %v601_v63 }
 0x1e7   : > { %v8444_v29 = vmax.f32 %v8412_v21, 0.0  ;;  %v8413_v30 = vadd.f32 %v8259_v12, %v8209_v22  ;;  %7058 = vmatpush1.bf16.msra.mxu0 %v18082_v18  ;;  %v18435_v5 = vcombine.high %v1097_v0, %v1113_v1  ;;  %v1081_v7 = vld [vmem:[#allocation7 + $0xfa0] sm:$0xff]  ;;  %v18434_v11 = vcombine.low %v1097_v0, %v1113_v1 }
 0x1e8   : > { %7059 = vmatprep.subr.bf16.mxu0 %v18051_v24  ;;  %v18403_v12 = vcombine.high %v1065_v6, %v1081_v7  ;;  %v1545_v17 = vld [vmem:[#allocation7 + $0x1e20] sm:$0xff]  ;;  %v18914_v21 = vcombine.low %v1577_v8, %v1593_v9  ;;  %v18371_v22 = vcombine.high %v1033_v14, %v1049_v15  ;;  %v810_v15 = vld [vmem:[#allocation7 + $0x728] sm:$0xff] }
 0x1e9   : > { %8476 = vst [vmem:[#allocation18] sm:$0xff] %v8444_v29  ;;  %v8445_v34 = vmax.f32 %v8413_v30, 0.0  ;;  %7099 = vmatpush1.bf16.msra.mxu1 %v18594_v20  ;;  %v1561_v18 = vld [vmem:[#allocation7 + $0x1ea0] sm:$0xff]  ;;  %v18402_v20 = vcombine.low %v1065_v6, %v1081_v7 }
 0x1ea   : > { %7100 = vmatprep.subr.bf16.mxu1 %v18563_v26  ;;  %v18883_v23 = vcombine.high %v1545_v17, %v1561_v18  ;;  %v1001_v24 = vld [vmem:[#allocation7 + $0xd20] sm:$0xff] }
 0x1eb   : > { %8477 = vst [vmem:[#allocation18 + $0x8] sm:$0xff] %v8445_v34  ;;  %v20187_v41 = vpack.c.bf16 %v8445_v34, %v8444_v29  ;;  %7060 = vmatpush1.bf16.msra.mxu0 %v18050_v33  ;;  %v1017_v25 = vld [vmem:[#allocation7 + $0xda0] sm:$0xff]  ;;  %v18882_v29 = vcombine.low %v1545_v17, %v1561_v18  ;;  %v826_v17 = vld [vmem:[#allocation7 + $0x7a8] sm:$0xff] }
 0x1ec   : > { %7061 = vmatprep.subr.bf16.mxu0 %v18019_v37  ;;  %v1513_v26 = vld [vmem:[#allocation7 + $0x1d20] sm:$0xff]  ;;  %v18339_v30 = vcombine.high %v1001_v24, %v1017_v25  ;;  %v18338_v37 = vcombine.low %v1001_v24, %v1017_v25  ;;  %v1322_v18 = vld [vmem:[#allocation7 + $0x1728] sm:$0xff] }
 0x1ed   : > { %8636 = vst [vmem:[#allocation2 + $0x30] sm:$0xff] %v20187_v41  ;;  %7101 = vmatpush1.bf16.msra.mxu1 %v18562_v36  ;;  %v18851_v31 = vcombine.high %v1513_v26, %v1529_v27  ;;  %v985_v33 = vld [vmem:[#allocation7 + $0xca0] sm:$0xff]  ;;  %v778_v25 = vld [vmem:[#allocation7 + $0x628] sm:$0xff] }
 0x1ee   : > { %7102 = vmatprep.subr.bf16.mxu1 %v18531_v38  ;;  %v1481_v34 = vld [vmem:[#allocation7 + $0x1c20] sm:$0xff]  ;;  %v18850_v38 = vcombine.low %v1513_v26, %v1529_v27  ;;  %v18307_v39 = vcombine.high %v969_v32, %v985_v33  ;;  %v794_v26 = vld [vmem:[#allocation7 + $0x6a8] sm:$0xff]  ;;  %v22964_v27 = vsub.s32 2, %v22939_v35 }
 0x1ef   : > { %7062 = vmatpush1.bf16.msra.mxu0 %v18018_v45  ;;  %v1497_v36 = vld [vmem:[#allocation7 + $0x1ca0] sm:$0xff] }
 0x1f0   : > { %7063 = vmatprep.subr.bf16.mxu0 %v17987_v48  ;;  %v18819_v40 = vcombine.high %v1481_v34, %v1497_v36  ;;  %v937_v41 = vld [vmem:[#allocation7 + $0xb20] sm:$0xff]  ;;  %v18818_v48 = vcombine.low %v1481_v34, %v1497_v36  ;;  %v746_v36 = vld [vmem:[#allocation7 + $0x528] sm:$0xff] }
 0x1f1   : > { %7103 = vmatpush1.bf16.msra.mxu1 %v18530_v46  ;;  %v953_v42 = vld [vmem:[#allocation7 + $0xba0] sm:$0xff]  ;;  %v18306_v46 = vcombine.low %v969_v32, %v985_v33  ;;  %v18117_v33 = vcombine.high %v778_v25, %v794_v26 }
 0x1f2   : > { %7104 = vmatprep.subr.bf16.mxu1 %v18499_v50  ;;  %v1449_v43 = vld [vmem:[#allocation7 + $0x1b20] sm:$0xff]  ;;  %v18275_v50 = vcombine.high %v937_v41, %v953_v42 }
 0x1f3   : > { %7064 = vmatpush1.bf16.msra.mxu0 %v17986_v56  ;;  %v1465_v45 = vld [vmem:[#allocation7 + $0x1ba0] sm:$0xff] }
 0x1f4   : > { %7065 = vmatprep.subr.bf16.mxu0 %v17955_v60  ;;  %v18787_v51 = vcombine.high %v1449_v43, %v1465_v45  ;;  %v905_v53 = vld [vmem:[#allocation7 + $0xa20] sm:$0xff]  ;;  %v18786_v60 = vcombine.low %v1449_v43, %v1465_v45  ;;  %v8263_v43 = vrot.slane %v22949_v52, %v22964_v27 }
 0x1f5   : > { %7105 = vmatpush1.bf16.msra.mxu1 %v18498_v57  ;;  %v921_v54 = vld [vmem:[#allocation7 + $0xaa0] sm:$0xff]  ;;  %v18274_v57 = vcombine.low %v937_v41, %v953_v42  ;;  %v1274_v41 = vld [vmem:[#allocation7 + $0x15a8] sm:$0xff] }
 0x1f6   : > { %7106 = vmatprep.subr.bf16.mxu1 %v18467_v61  ;;  %v1417_v55 = vld [vmem:[#allocation7 + $0x1a20] sm:$0xff]  ;;  %v18243_v61 = vcombine.high %v905_v53, %v921_v54 }
 0x1f7   : > { %7066 = vmatpush1.bf16.msra.mxu0 %v17954_v2  ;;  %v1433_v56 = vld [vmem:[#allocation7 + $0x1aa0] sm:$0xff] }
 0x1f8   : > { %7067 = vmatprep.subr.bf16.mxu0 %v17923_v4  ;;  %v18755_v62 = vcombine.high %v1417_v55, %v1433_v56  ;;  %v873_v63 = vld [vmem:[#allocation7 + $0x920] sm:$0xff]  ;;  %v18754_v4 = vcombine.low %v1417_v55, %v1433_v56  ;;  %v714_v56 = vld [vmem:[#allocation7 + $0x428] sm:$0xff] }
 0x1f9   : > { %7107 = vmatpush1.bf16.msra.mxu1 %v18466_v3  ;;  %v889_v0 = vld [vmem:[#allocation7 + $0x9a0] sm:$0xff]  ;;  %v18242_v3 = vcombine.low %v905_v53, %v921_v54 }
 0x1fa   : > { %7108 = vmatprep.subr.bf16.mxu1 %v18435_v5  ;;  %v1385_v1 = vld [vmem:[#allocation7 + $0x1920] sm:$0xff]  ;;  %v18211_v5 = vcombine.high %v873_v63, %v889_v0 }
 0x1fb   : > { %7068 = vmatpush1.bf16.msra.mxu0 %v17922_v10  ;;  %v1401_v2 = vld [vmem:[#allocation7 + $0x19a0] sm:$0xff] }
 0x1fc   : > { %7069 = vmatprep.subr.bf16.mxu0 %v18403_v12  ;;  %v18723_v6 = vcombine.high %v1385_v1, %v1401_v2  ;;  %v841_v7 = vld [vmem:[#allocation7 + $0x820] sm:$0xff]  ;;  %v18722_v12 = vcombine.low %v1385_v1, %v1401_v2  ;;  %v1242_v1 = vld [vmem:[#allocation7 + $0x14a8] sm:$0xff] }
 0x1fd   : > { %7109 = vmatpush1.bf16.msra.mxu1 %v18434_v11  ;;  %v857_v8 = vld [vmem:[#allocation7 + $0x8a0] sm:$0xff]  ;;  %v18210_v11 = vcombine.low %v873_v63, %v889_v0  ;;  %v1226_v0 = vld [vmem:[#allocation7 + $0x1428] sm:$0xff] }
 0x1fe   : > { %7110 = vmatprep.subr.bf16.mxu1 %v18915_v13  ;;  %v1353_v9 = vld [vmem:[#allocation7 + $0x1820] sm:$0xff]  ;;  %v18179_v13 = vcombine.high %v841_v7, %v857_v8 }
 0x1ff   : > { %7070 = vmatpush2.bf16.msra.mxu0 %v18402_v20  ;;  %v1369_v10 = vld [vmem:[#allocation7 + $0x18a0] sm:$0xff]  ;;  %v1338_v20 = vld [vmem:[#allocation7 + $0x17a8] sm:$0xff] }
 0x200   : > { %7071 = vmatprep.subr.bf16.mxu0 %v18371_v22  ;;  %v18691_v14 = vcombine.high %v1353_v9, %v1369_v10  ;;  %v18690_v22 = vcombine.low %v1353_v9, %v1369_v10  ;;  %v18661_v24 = vcombine.high %v1322_v18, %v1338_v20  ;;  %v18660_v32 = vcombine.low %v1322_v18, %v1338_v20 }
 0x201   : > { %7111 = vmatpush2.bf16.msra.mxu1 %v18914_v21  ;;  %v18178_v21 = vcombine.low %v841_v7, %v857_v8  ;;  %v18565_v10 = vcombine.high %v1226_v0, %v1242_v1 }
 0x202   : > { %7112 = vmatprep.subr.bf16.mxu1 %v18883_v23  ;;  %v18149_v23 = vcombine.high %v810_v15, %v826_v17 }
 0x203   : > { %7072 = vmatpush2.bf16.msra.mxu0 %v18370_v28  ;;  %v1290_v28 = vld [vmem:[#allocation7 + $0x1628] sm:$0xff] }
 0x204   : > { %7073 = vmatprep.subr.bf16.mxu0 %v18339_v30  ;;  %v18148_v30 = vcombine.low %v810_v15, %v826_v17  ;;  %v1194_v15 = vld [vmem:[#allocation7 + $0x1328] sm:$0xff] }
 0x205   : > { %7113 = vmatpush2.bf16.msra.mxu1 %v18882_v29  ;;  %v1306_v29 = vld [vmem:[#allocation7 + $0x16a8] sm:$0xff] }
 0x206   : > { %7114 = vmatprep.subr.bf16.mxu1 %v18851_v31  ;;  %v22967_v31 = vsub.s32 3, %v22939_v35  ;;  %v18629_v34 = vcombine.high %v1290_v28, %v1306_v29  ;;  %v1210_v17 = vld [vmem:[#allocation7 + $0x13a8] sm:$0xff] }
 0x207   : > { %7074 = vmatpush2.bf16.msra.mxu0 %v18338_v37  ;;  %v762_v37 = vld [vmem:[#allocation7 + $0x5a8] sm:$0xff] }
 0x208   : > { %7075 = vmatprep.subr.bf16.mxu0 %v18307_v39  ;;  %v8059_v39 = vrot.slane %v22944_v47, %v22964_v27  ;;  %v8063_v45 = vrot.slane %v22944_v47, %v22967_v31  ;;  %v18085_v53 = vcombine.high %v746_v36, %v762_v37 }
 0x209   : > { %7115 = vmatpush2.bf16.msra.mxu1 %v18850_v38 }
 0x20a   : > { %7116 = vmatprep.subr.bf16.mxu1 %v18819_v40  ;;  %v1258_v40 = vld [vmem:[#allocation7 + $0x1528] sm:$0xff] }
 0x20b   : > { %7076 = vmatpush2.bf16.msra.mxu0 %v18306_v46  ;;  %v18116_v46 = vcombine.low %v778_v25, %v794_v26  ;;  %v18597_v55 = vcombine.high %v1258_v40, %v1274_v41  ;;  %v666_v25 = vld [vmem:[#allocation7 + $0x2a8] sm:$0xff] }
 0x20c   : > { %7077 = vmatprep.subr.bf16.mxu0 %v18275_v50 }
 0x20d   : > { %7117 = vmatpush2.bf16.msra.mxu1 %v18818_v48 }
 0x20e   : > { %7118 = vmatprep.subr.bf16.mxu1 %v18787_v51  ;;  %v18628_v51 = vcombine.low %v1290_v28, %v1306_v29  ;;  %v1162_v28 = vld [vmem:[#allocation7 + $0x1228] sm:$0xff] }
 0x20f   : > { %7078 = vmatpush2.bf16.msra.mxu0 %v18274_v57  ;;  %v730_v57 = vld [vmem:[#allocation7 + $0x4a8] sm:$0xff] }
 0x210   : > { %7079 = vmatprep.subr.bf16.mxu0 %v18243_v61  ;;  %v18053_v8 = vcombine.high %v714_v56, %v730_v57  ;;  %v18052_v18 = vcombine.low %v714_v56, %v730_v57  ;;  %v1178_v29 = vld [vmem:[#allocation7 + $0x12a8] sm:$0xff] }
 0x211   : > { %7119 = vmatpush2.bf16.msra.mxu1 %v18786_v60  ;;  %v1066_v56 = vld [vmem:[#allocation7 + $0xf28] sm:$0xff] }
 0x212   : > { %7120 = vmatprep.subr.bf16.mxu1 %v18755_v62  ;;  %v8267_v62 = vrot.slane %v22949_v52, %v22967_v31  ;;  %v1082_v57 = vld [vmem:[#allocation7 + $0xfa8] sm:$0xff] }
 0x213   : > { %7080 = vmatpush2.bf16.msra.mxu0 %v18242_v3  ;;  %v18084_v3 = vcombine.low %v746_v36, %v762_v37  ;;  %v618_v36 = vld [vmem:[#allocation7 + $0x128] sm:$0xff] }
 0x214   : > { %7081 = vmatprep.subr.bf16.mxu0 %v18211_v5  ;;  %v634_v37 = vld [vmem:[#allocation7 + $0x1a8] sm:$0xff] }
 0x215   : > { %7121 = vmatpush2.bf16.msra.mxu1 %v18754_v4  ;;  %v18596_v4 = vcombine.low %v1258_v40, %v1274_v41  ;;  %v18500_v41 = vcombine.low %v1162_v28, %v1178_v29 }
 0x216   : > { %7122 = vmatprep.subr.bf16.mxu1 %v18723_v6 }
 0x217   : > { %7082 = vmatpush2.bf16.msra.mxu0 %v18210_v11  ;;  %v682_v11 = vld [vmem:[#allocation7 + $0x328] sm:$0xff] }
 0x218   : > { %7083 = vmatprep.subr.bf16.mxu0 %v18179_v13 }
 0x219   : > { %7123 = vmatpush2.bf16.msra.mxu1 %v18722_v12  ;;  %v698_v12 = vld [vmem:[#allocation7 + $0x3a8] sm:$0xff] }
 0x21a   : > { %7124 = vmatprep.subr.bf16.mxu1 %v18691_v14 }
 0x21b   : > { %7084 = vmatpush2.bf16.msra.mxu0 %v18178_v21  ;;  %v18564_v21 = vcombine.low %v1226_v0, %v1242_v1  ;;  %v18405_v0 = vcombine.high %v1066_v56, %v1082_v57 }
 0x21c   : > { %7135 = vmatprep.subr.bf16.mxu0 %v18149_v23  ;;  %v18533_v23 = vcombine.high %v1194_v15, %v1210_v17 }
 0x21d   : > { %7125 = vmatpush2.bf16.msra.mxu1 %v18690_v22  ;;  %v18021_v22 = vcombine.high %v682_v11, %v698_v12 }
 0x21e   : > { %7176 = vmatprep.subr.bf16.mxu1 %v18661_v24  ;;  %v6841_v38 = vpop.f32.mrf.mxu0  ;;  %7086 = vmatmul.mubr.bf16.vlgmr.msra.gmra.mxu0 %v22923_v16  ;;  %v650_v24 = vld [vmem:[#allocation7 + $0x228] sm:$0xff] }
 0x21f   : > { %7136 = vmatpush1.bf16.msra.mxu0 %v18148_v30  ;;  %7167 = vmatprep.mubr.bf16.mxu0 %v22917_v58  ;;  %v18020_v30 = vcombine.low %v682_v11, %v698_v12  ;;  %v17988_v40 = vcombine.low %v650_v24, %v666_v25  ;;  %v1018_v11 = vld [vmem:[#allocation7 + $0xda8] sm:$0xff] }
 0x220   : > { %v6882_v42 = vpop.f32.mrf.mxu1  ;;  %7127 = vmatmul.mubr.bf16.vlgmr.msra.gmra.mxu1 %v22925_v19  ;;  %v6843_v50 = vpop.f32.mrf.mxu0  ;;  %7137 = vmatprep.subr.bf16.mxu0 %v18117_v33  ;;  %v17989_v33 = vcombine.high %v650_v24, %v666_v25  ;;  %v1514_v12 = vld [vmem:[#allocation7 + $0x1d28] sm:$0xff] }
 0x221   : > { %v6883_v48 = vadd.f32 %v6882_v42, %v6841_v38  ;;  %7177 = vmatpush1.bf16.msra.mxu1 %v18660_v32  ;;  %7208 = vmatprep.mubr.bf16.mxu1 %v22919_v59  ;;  %v18532_v32 = vcombine.low %v1194_v15, %v1210_v17  ;;  %v1130_v38 = vld [vmem:[#allocation7 + $0x1128] sm:$0xff]  ;;  %v17957_v42 = vcombine.high %v618_v36, %v634_v37 }
 0x222   : > { %v6884_v54 = vpop.f32.mrf.mxu1  ;;  %7178 = vmatprep.subr.bf16.mxu1 %v18629_v34  ;;  %v6845_v63 = vpop.f32.mrf.mxu0  ;;  %v18501_v34 = vcombine.high %v1162_v28, %v1178_v29  ;;  %v938_v29 = vld [vmem:[#allocation7 + $0xb28] sm:$0xff] }
 0x223   : > { %v8210_v60 = vmul.f32 %v8059_v39, %v6883_v48  ;;  %v6885_v61 = vadd.f32 %v6884_v54, %v6843_v50  ;;  %7138 = vmatpush1.bf16.msra.mxu0 %v18116_v46  ;;  %v1146_v39 = vld [vmem:[#allocation7 + $0x11a8] sm:$0xff] }
 0x224   : > { %v6886_v2 = vpop.f32.mrf.mxu1  ;;  %v6846_v7 = vpop.f32.mrf.mxu0  ;;  %7139 = vmatprep.subr.bf16.mxu0 %v18085_v53  ;;  %v602_v46 = vld [vmem:[#allocation7 + $0xa8] sm:$0xff]  ;;  %v18468_v53 = vcombine.low %v1130_v38, %v1146_v39 }
 0x225   : > { %v8414_v5 = vadd.f32 %v8263_v43, %v8210_v60  ;;  %v8211_v6 = vmul.f32 %v8063_v45, %v6885_v61  ;;  %7179 = vmatpush1.bf16.msra.mxu1 %v18628_v51  ;;  %v18469_v43 = vcombine.high %v1130_v38, %v1146_v39  ;;  %v586_v45 = vld [vmem:[#allocation7 + $0x28] sm:$0xff]  ;;  %v17956_v51 = vcombine.low %v618_v36, %v634_v37 }
 0x226   : > { %v6887_v9 = vpop.f32.mrf.mxu1  ;;  %7180 = vmatprep.subr.bf16.mxu1 %v18597_v55  ;;  %v1098_v48 = vld [vmem:[#allocation7 + $0x1028] sm:$0xff]  ;;  %v17925_v54 = vcombine.high %v586_v45, %v602_v46 }
 0x227   : > { %v8446_v13 = vmax.f32 %v8414_v5, 0.0  ;;  %v8415_v14 = vadd.f32 %v8267_v62, %v8211_v6  ;;  %7140 = vmatpush1.bf16.msra.mxu0 %v18084_v3  ;;  %v1114_v50 = vld [vmem:[#allocation7 + $0x10a8] sm:$0xff]  ;;  %v17924_v62 = vcombine.low %v586_v45, %v602_v46  ;;  %v18404_v6 = vcombine.low %v1066_v56, %v1082_v57 }
 0x228   : > { %7141 = vmatprep.subr.bf16.mxu0 %v18053_v8  ;;  %v18437_v55 = vcombine.high %v1098_v48, %v1114_v50  ;;  %v1578_v60 = vld [vmem:[#allocation7 + $0x1f28] sm:$0xff]  ;;  %v18436_v63 = vcombine.low %v1098_v48, %v1114_v50 }
 0x229   : > { %8478 = vst [vmem:[#allocation18 + $0x10] sm:$0xff] %v8446_v13  ;;  %v8447_v20 = vmax.f32 %v8415_v14, 0.0  ;;  %7181 = vmatpush1.bf16.msra.mxu1 %v18596_v4  ;;  %v1594_v61 = vld [vmem:[#allocation7 + $0x1fa8] sm:$0xff] }
 0x22a   : > { %7182 = vmatprep.subr.bf16.mxu1 %v18565_v10  ;;  %v18917_v1 = vcombine.high %v1578_v60, %v1594_v61  ;;  %v1034_v2 = vld [vmem:[#allocation7 + $0xe28] sm:$0xff]  ;;  %v18916_v7 = vcombine.low %v1578_v60, %v1594_v61 }
 0x22b   : > { %8479 = vst [vmem:[#allocation18 + $0x18] sm:$0xff] %v8447_v20  ;;  %v20188_v26 = vpack.c.bf16 %v8447_v20, %v8446_v13  ;;  %7142 = vmatpush1.bf16.msra.mxu0 %v18052_v18  ;;  %v1050_v3 = vld [vmem:[#allocation7 + $0xea8] sm:$0xff] }
 0x22c   : > { %7143 = vmatprep.subr.bf16.mxu0 %v18021_v22  ;;  %v1546_v4 = vld [vmem:[#allocation7 + $0x1e28] sm:$0xff]  ;;  %v18373_v8 = vcombine.high %v1034_v2, %v1050_v3  ;;  %v18372_v14 = vcombine.low %v1034_v2, %v1050_v3 }
 0x22d   : > { %8637 = vst [vmem:[#allocation2] sm:$0xff] %v20188_v26  ;;  %7183 = vmatpush1.bf16.msra.mxu1 %v18564_v21  ;;  %v1562_v5 = vld [vmem:[#allocation7 + $0x1ea8] sm:$0xff] }
 0x22e   : > { %7184 = vmatprep.subr.bf16.mxu1 %v18533_v23  ;;  %v18885_v9 = vcombine.high %v1546_v4, %v1562_v5  ;;  %v1002_v10 = vld [vmem:[#allocation7 + $0xd28] sm:$0xff]  ;;  %v18884_v15 = vcombine.low %v1546_v4, %v1562_v5  ;;  %v811_v5 = vld [vmem:[#allocation7 + $0x730] sm:$0xff] }
 0x22f   : > { %7144 = vmatpush1.bf16.msra.mxu0 %v18020_v30  ;;  %v1530_v13 = vld [vmem:[#allocation7 + $0x1da8] sm:$0xff]  ;;  %v18341_v17 = vcombine.high %v1002_v10, %v1018_v11  ;;  %v18340_v24 = vcombine.low %v1002_v10, %v1018_v11 }
 0x230   : > { %7145 = vmatprep.subr.bf16.mxu0 %v17989_v33  ;;  %v18853_v18 = vcombine.high %v1514_v12, %v1530_v13  ;;  %v970_v20 = vld [vmem:[#allocation7 + $0xc28] sm:$0xff]  ;;  %v18852_v25 = vcombine.low %v1514_v12, %v1530_v13  ;;  %v779_v13 = vld [vmem:[#allocation7 + $0x630] sm:$0xff] }
 0x231   : > { %7185 = vmatpush1.bf16.msra.mxu1 %v18532_v32  ;;  %v986_v21 = vld [vmem:[#allocation7 + $0xca8] sm:$0xff] }
 0x232   : > { %7186 = vmatprep.subr.bf16.mxu1 %v18501_v34  ;;  %v1482_v22 = vld [vmem:[#allocation7 + $0x1c28] sm:$0xff]  ;;  %v18309_v26 = vcombine.high %v970_v20, %v986_v21  ;;  %v18308_v34 = vcombine.low %v970_v20, %v986_v21  ;;  %v22985_v21 = vsub.s32 5, %v22939_v35 }
 0x233   : > { %7146 = vmatpush1.bf16.msra.mxu0 %v17988_v40  ;;  %v1498_v23 = vld [vmem:[#allocation7 + $0x1ca8] sm:$0xff] }
 0x234   : > { %7147 = vmatprep.subr.bf16.mxu0 %v17957_v42  ;;  %v18821_v28 = vcombine.high %v1482_v22, %v1498_v23  ;;  %v954_v30 = vld [vmem:[#allocation7 + $0xba8] sm:$0xff]  ;;  %v18820_v36 = vcombine.low %v1482_v22, %v1498_v23 }
 0x235   : > { %7187 = vmatpush1.bf16.msra.mxu1 %v18500_v41  ;;  %v1450_v32 = vld [vmem:[#allocation7 + $0x1b28] sm:$0xff]  ;;  %v18277_v37 = vcombine.high %v938_v29, %v954_v30 }
 0x236   : > { %7188 = vmatprep.subr.bf16.mxu1 %v18469_v43  ;;  %v1466_v33 = vld [vmem:[#allocation7 + $0x1ba8] sm:$0xff]  ;;  %v18276_v43 = vcombine.low %v938_v29, %v954_v30  ;;  %v1259_v30 = vld [vmem:[#allocation7 + $0x1530] sm:$0xff] }
 0x237   : > { %7148 = vmatpush1.bf16.msra.mxu0 %v17956_v51  ;;  %v18789_v38 = vcombine.high %v1450_v32, %v1466_v33  ;;  %v906_v39 = vld [vmem:[#allocation7 + $0xa28] sm:$0xff]  ;;  %v18788_v45 = vcombine.low %v1450_v32, %v1466_v33  ;;  %v1275_v32 = vld [vmem:[#allocation7 + $0x15b0] sm:$0xff] }
 0x238   : > { %7149 = vmatprep.subr.bf16.mxu0 %v17925_v54  ;;  %v922_v40 = vld [vmem:[#allocation7 + $0xaa8] sm:$0xff] }
 0x239   : > { %7189 = vmatpush1.bf16.msra.mxu1 %v18468_v53  ;;  %v1418_v41 = vld [vmem:[#allocation7 + $0x1a28] sm:$0xff]  ;;  %v18245_v46 = vcombine.high %v906_v39, %v922_v40 }
 0x23a   : > { %7190 = vmatprep.subr.bf16.mxu1 %v18437_v55  ;;  %v1434_v42 = vld [vmem:[#allocation7 + $0x1aa8] sm:$0xff]  ;;  %v18244_v55 = vcombine.low %v906_v39, %v922_v40 }
 0x23b   : > { %7150 = vmatpush1.bf16.msra.mxu0 %v17924_v62  ;;  %v18757_v48 = vcombine.high %v1418_v41, %v1434_v42  ;;  %v874_v50 = vld [vmem:[#allocation7 + $0x928] sm:$0xff]  ;;  %v18756_v56 = vcombine.low %v1418_v41, %v1434_v42 }
 0x23c   : > { %7151 = vmatprep.subr.bf16.mxu0 %v18405_v0  ;;  %v890_v51 = vld [vmem:[#allocation7 + $0x9a8] sm:$0xff] }
 0x23d   : > { %7191 = vmatpush1.bf16.msra.mxu1 %v18436_v63  ;;  %v1386_v53 = vld [vmem:[#allocation7 + $0x1928] sm:$0xff]  ;;  %v18213_v57 = vcombine.high %v874_v50, %v890_v51 }
 0x23e   : > { %7192 = vmatprep.subr.bf16.mxu1 %v18917_v1  ;;  %v1402_v54 = vld [vmem:[#allocation7 + $0x19a8] sm:$0xff]  ;;  %v18212_v1 = vcombine.low %v874_v50, %v890_v51  ;;  %v8275_v51 = vrot.slane %v22949_v52, %v22985_v21 }
 0x23f   : > { %7152 = vmatpush2.bf16.msra.mxu0 %v18404_v6  ;;  %v18725_v60 = vcombine.high %v1386_v53, %v1402_v54  ;;  %v842_v61 = vld [vmem:[#allocation7 + $0x828] sm:$0xff]  ;;  %v18724_v2 = vcombine.low %v1386_v53, %v1402_v54  ;;  %v827_v6 = vld [vmem:[#allocation7 + $0x7b0] sm:$0xff] }
 0x240   : > { %7153 = vmatprep.subr.bf16.mxu0 %v18373_v8  ;;  %v858_v62 = vld [vmem:[#allocation7 + $0x8a8] sm:$0xff]  ;;  %v1339_v8 = vld [vmem:[#allocation7 + $0x17b0] sm:$0xff]  ;;  %v18151_v11 = vcombine.high %v811_v5, %v827_v6  ;;  %v18150_v20 = vcombine.low %v811_v5, %v827_v6 }
 0x241   : > { %7193 = vmatpush2.bf16.msra.mxu1 %v18916_v7  ;;  %v1354_v63 = vld [vmem:[#allocation7 + $0x1828] sm:$0xff]  ;;  %v18181_v3 = vcombine.high %v842_v61, %v858_v62  ;;  %v1323_v7 = vld [vmem:[#allocation7 + $0x1730] sm:$0xff] }
 0x242   : > { %7194 = vmatprep.subr.bf16.mxu1 %v18885_v9  ;;  %v1370_v0 = vld [vmem:[#allocation7 + $0x18a8] sm:$0xff]  ;;  %v18180_v9 = vcombine.low %v842_v61, %v858_v62  ;;  %v18663_v12 = vcombine.high %v1323_v7, %v1339_v8  ;;  %v18662_v22 = vcombine.low %v1323_v7, %v1339_v8  ;;  %v1227_v53 = vld [vmem:[#allocation7 + $0x1430] sm:$0xff] }
 0x243   : > { %7154 = vmatpush2.bf16.msra.mxu0 %v18372_v14  ;;  %v18693_v4 = vcombine.high %v1354_v63, %v1370_v0  ;;  %v18692_v10 = vcombine.low %v1354_v63, %v1370_v0  ;;  %v795_v14 = vld [vmem:[#allocation7 + $0x6b0] sm:$0xff] }
 0x244   : > { %7155 = vmatprep.subr.bf16.mxu0 %v18341_v17  ;;  %v1291_v17 = vld [vmem:[#allocation7 + $0x1630] sm:$0xff]  ;;  %v18119_v23 = vcombine.high %v779_v13, %v795_v14 }
 0x245   : > { %7195 = vmatpush2.bf16.msra.mxu1 %v18884_v15  ;;  %v22982_v15 = vsub.s32 4, %v22939_v35  ;;  %v1243_v54 = vld [vmem:[#allocation7 + $0x14b0] sm:$0xff] }
 0x246   : > { %7196 = vmatprep.subr.bf16.mxu1 %v18853_v18  ;;  %v1307_v18 = vld [vmem:[#allocation7 + $0x16b0] sm:$0xff] }
 0x247   : > { %7156 = vmatpush2.bf16.msra.mxu0 %v18340_v24  ;;  %v18631_v24 = vcombine.high %v1291_v17, %v1307_v18  ;;  %v8067_v29 = vrot.slane %v22944_v47, %v22982_v15  ;;  %v18630_v40 = vcombine.low %v1291_v17, %v1307_v18  ;;  %v1195_v5 = vld [vmem:[#allocation7 + $0x1330] sm:$0xff] }
 0x248   : > { %7157 = vmatprep.subr.bf16.mxu0 %v18309_v26  ;;  %v763_v26 = vld [vmem:[#allocation7 + $0x5b0] sm:$0xff] }
 0x249   : > { %7197 = vmatpush2.bf16.msra.mxu1 %v18852_v25  ;;  %v747_v25 = vld [vmem:[#allocation7 + $0x530] sm:$0xff] }
 0x24a   : > { %7198 = vmatprep.subr.bf16.mxu1 %v18821_v28  ;;  %v18087_v41 = vcombine.high %v747_v25, %v763_v26  ;;  %v1211_v6 = vld [vmem:[#allocation7 + $0x13b0] sm:$0xff] }
 0x24b   : > { %7158 = vmatpush2.bf16.msra.mxu0 %v18308_v34  ;;  %v8271_v34 = vrot.slane %v22949_v52, %v22982_v15  ;;  %v699_v52 = vld [vmem:[#allocation7 + $0x3b0] sm:$0xff] }
 0x24c   : > { %7159 = vmatprep.subr.bf16.mxu0 %v18277_v37  ;;  %v18118_v37 = vcombine.low %v779_v13, %v795_v14  ;;  %v667_v13 = vld [vmem:[#allocation7 + $0x2b0] sm:$0xff] }
 0x24d   : > { %7199 = vmatpush2.bf16.msra.mxu1 %v18820_v36  ;;  %v8071_v36 = vrot.slane %v22944_v47, %v22985_v21  ;;  %v1163_v17 = vld [vmem:[#allocation7 + $0x1230] sm:$0xff] }
 0x24e   : > { %7200 = vmatprep.subr.bf16.mxu1 %v18789_v38  ;;  %v1179_v18 = vld [vmem:[#allocation7 + $0x12b0] sm:$0xff] }
 0x24f   : > { %7160 = vmatpush2.bf16.msra.mxu0 %v18276_v43  ;;  %v18599_v43 = vcombine.high %v1259_v30, %v1275_v32 }
 0x250   : > { %7161 = vmatprep.subr.bf16.mxu0 %v18245_v46  ;;  %v731_v46 = vld [vmem:[#allocation7 + $0x4b0] sm:$0xff] }
 0x251   : > { %7201 = vmatpush2.bf16.msra.mxu1 %v18788_v45  ;;  %v715_v45 = vld [vmem:[#allocation7 + $0x430] sm:$0xff] }
 0x252   : > { %7202 = vmatprep.subr.bf16.mxu1 %v18757_v48  ;;  %v18055_v63 = vcombine.high %v715_v45, %v731_v46  ;;  %v18054_v7 = vcombine.low %v715_v45, %v731_v46  ;;  %v1067_v45 = vld [vmem:[#allocation7 + $0xf30] sm:$0xff] }
 0x253   : > { %7162 = vmatpush2.bf16.msra.mxu0 %v18244_v55  ;;  %v1083_v46 = vld [vmem:[#allocation7 + $0xfb0] sm:$0xff] }
 0x254   : > { %7163 = vmatprep.subr.bf16.mxu0 %v18213_v57  ;;  %v18598_v57 = vcombine.low %v1259_v30, %v1275_v32  ;;  %v18502_v32 = vcombine.low %v1163_v17, %v1179_v18 }
 0x255   : > { %7203 = vmatpush2.bf16.msra.mxu1 %v18756_v56  ;;  %v18086_v56 = vcombine.low %v747_v25, %v763_v26  ;;  %v619_v25 = vld [vmem:[#allocation7 + $0x130] sm:$0xff] }
 0x256   : > { %7204 = vmatprep.subr.bf16.mxu1 %v18725_v60  ;;  %v635_v26 = vld [vmem:[#allocation7 + $0x1b0] sm:$0xff] }
 0x257   : > { %7164 = vmatpush2.bf16.msra.mxu0 %v18212_v1  ;;  %v18567_v1 = vcombine.high %v1227_v53, %v1243_v54 }
 0x258   : > { %7165 = vmatprep.subr.bf16.mxu0 %v18181_v3 }
 0x259   : > { %7205 = vmatpush2.bf16.msra.mxu1 %v18724_v2  ;;  %v683_v2 = vld [vmem:[#allocation7 + $0x330] sm:$0xff] }
 0x25a   : > { %7206 = vmatprep.subr.bf16.mxu1 %v18693_v4 }
 0x25b   : > { %7166 = vmatpush2.bf16.msra.mxu0 %v18180_v9  ;;  %v18566_v9 = vcombine.low %v1227_v53, %v1243_v54  ;;  %v18407_v53 = vcombine.high %v1067_v45, %v1083_v46 }
 0x25c   : > { %7217 = vmatprep.subr.bf16.mxu0 %v18151_v11  ;;  %v18535_v11 = vcombine.high %v1195_v5, %v1211_v6 }
 0x25d   : > { %7207 = vmatpush2.bf16.msra.mxu1 %v18692_v10  ;;  %v18023_v10 = vcombine.high %v683_v2, %v699_v52 }
 0x25e   : > { %7258 = vmatprep.subr.bf16.mxu1 %v18663_v12  ;;  %v6923_v28 = vpop.f32.mrf.mxu0  ;;  %7168 = vmatmul.mubr.bf16.vlgmr.msra.gmra.mxu0 %v22923_v16  ;;  %v651_v12 = vld [vmem:[#allocation7 + $0x230] sm:$0xff] }
 0x25f   : > { %7218 = vmatpush1.bf16.msra.mxu0 %v18150_v20  ;;  %7249 = vmatprep.mubr.bf16.mxu0 %v22917_v58  ;;  %v18022_v20 = vcombine.low %v683_v2, %v699_v52  ;;  %v17990_v30 = vcombine.low %v651_v12, %v667_v13  ;;  %v1019_v2 = vld [vmem:[#allocation7 + $0xdb0] sm:$0xff] }
 0x260   : > { %v6964_v33 = vpop.f32.mrf.mxu1  ;;  %7209 = vmatmul.mubr.bf16.vlgmr.msra.gmra.mxu1 %v22925_v19  ;;  %v6925_v39 = vpop.f32.mrf.mxu0  ;;  %7219 = vmatprep.subr.bf16.mxu0 %v18119_v23  ;;  %v17991_v23 = vcombine.high %v651_v12, %v667_v13  ;;  %v1515_v52 = vld [vmem:[#allocation7 + $0x1d30] sm:$0xff] }
 0x261   : > { %v6965_v38 = vadd.f32 %v6964_v33, %v6923_v28  ;;  %7259 = vmatpush1.bf16.msra.mxu1 %v18662_v22  ;;  %7290 = vmatprep.mubr.bf16.mxu1 %v22919_v59  ;;  %v18534_v22 = vcombine.low %v1195_v5, %v1211_v6  ;;  %v1131_v28 = vld [vmem:[#allocation7 + $0x1130] sm:$0xff]  ;;  %v17959_v33 = vcombine.high %v619_v25, %v635_v26 }
 0x262   : > { %v6966_v42 = vpop.f32.mrf.mxu1  ;;  %7260 = vmatprep.subr.bf16.mxu1 %v18631_v24  ;;  %v6927_v47 = vpop.f32.mrf.mxu0  ;;  %v18503_v24 = vcombine.high %v1163_v17, %v1179_v18  ;;  %v939_v18 = vld [vmem:[#allocation7 + $0xb30] sm:$0xff] }
 0x263   : > { %v8212_v48 = vmul.f32 %v8067_v29, %v6965_v38  ;;  %v6967_v50 = vadd.f32 %v6966_v42, %v6925_v39  ;;  %7220 = vmatpush1.bf16.msra.mxu0 %v18118_v37  ;;  %v1147_v29 = vld [vmem:[#allocation7 + $0x11b0] sm:$0xff] }
 0x264   : > { %v6968_v55 = vpop.f32.mrf.mxu1  ;;  %v6928_v62 = vpop.f32.mrf.mxu0  ;;  %7221 = vmatprep.subr.bf16.mxu0 %v18087_v41  ;;  %v603_v37 = vld [vmem:[#allocation7 + $0xb0] sm:$0xff]  ;;  %v18470_v41 = vcombine.low %v1131_v28, %v1147_v29 }
 0x265   : > { %v8416_v60 = vadd.f32 %v8271_v34, %v8212_v48  ;;  %v8213_v61 = vmul.f32 %v8071_v36, %v6967_v50  ;;  %7261 = vmatpush1.bf16.msra.mxu1 %v18630_v40  ;;  %v18471_v34 = vcombine.high %v1131_v28, %v1147_v29  ;;  %v587_v36 = vld [vmem:[#allocation7 + $0x30] sm:$0xff]  ;;  %v17958_v40 = vcombine.low %v619_v25, %v635_v26 }
 0x266   : > { %v6969_v0 = vpop.f32.mrf.mxu1  ;;  %7262 = vmatprep.subr.bf16.mxu1 %v18599_v43  ;;  %v1099_v38 = vld [vmem:[#allocation7 + $0x1030] sm:$0xff]  ;;  %v17927_v42 = vcombine.high %v587_v36, %v603_v37 }
 0x267   : > { %v8448_v3 = vmax.f32 %v8416_v60, 0.0  ;;  %v8417_v4 = vadd.f32 %v8275_v51, %v8213_v61  ;;  %7222 = vmatpush1.bf16.msra.mxu0 %v18086_v56  ;;  %v1115_v39 = vld [vmem:[#allocation7 + $0x10b0] sm:$0xff]  ;;  %v17926_v51 = vcombine.low %v587_v36, %v603_v37  ;;  %v18406_v61 = vcombine.low %v1067_v45, %v1083_v46 }
 0x268   : > { %7223 = vmatprep.subr.bf16.mxu0 %v18055_v63  ;;  %v18439_v43 = vcombine.high %v1099_v38, %v1115_v39  ;;  %v1579_v48 = vld [vmem:[#allocation7 + $0x1f30] sm:$0xff]  ;;  %v18438_v47 = vcombine.low %v1099_v38, %v1115_v39 }
 0x269   : > { %8480 = vst [vmem:[#allocation18 + $0x20] sm:$0xff] %v8448_v3  ;;  %v8449_v8 = vmax.f32 %v8417_v4, 0.0  ;;  %7263 = vmatpush1.bf16.msra.mxu1 %v18598_v57  ;;  %v1595_v50 = vld [vmem:[#allocation7 + $0x1fb0] sm:$0xff] }
 0x26a   : > { %7264 = vmatprep.subr.bf16.mxu1 %v18567_v1  ;;  %v18919_v54 = vcombine.high %v1579_v48, %v1595_v50  ;;  %v1035_v55 = vld [vmem:[#allocation7 + $0xe30] sm:$0xff]  ;;  %v18918_v62 = vcombine.low %v1579_v48, %v1595_v50 }
 0x26b   : > { %8481 = vst [vmem:[#allocation18 + $0x28] sm:$0xff] %v8449_v8  ;;  %v20189_v14 = vpack.c.bf16 %v8449_v8, %v8448_v3  ;;  %7224 = vmatpush1.bf16.msra.mxu0 %v18054_v7  ;;  %v1051_v56 = vld [vmem:[#allocation7 + $0xeb0] sm:$0xff] }
 0x26c   : > { %7225 = vmatprep.subr.bf16.mxu0 %v18023_v10  ;;  %v1547_v57 = vld [vmem:[#allocation7 + $0x1e30] sm:$0xff]  ;;  %v18375_v63 = vcombine.high %v1035_v55, %v1051_v56  ;;  %v18374_v4 = vcombine.low %v1035_v55, %v1051_v56 }
 0x26d   : > { %8638 = vst [vmem:[#allocation2 + $0x58] sm:$0xff] %v20189_v14  ;;  %7265 = vmatpush1.bf16.msra.mxu1 %v18566_v9  ;;  %v1563_v60 = vld [vmem:[#allocation7 + $0x1eb0] sm:$0xff] }
 0x26e   : > { %7266 = vmatprep.subr.bf16.mxu1 %v18535_v11  ;;  %v18887_v0 = vcombine.high %v1547_v57, %v1563_v60  ;;  %v1003_v1 = vld [vmem:[#allocation7 + $0xd30] sm:$0xff]  ;;  %v18886_v5 = vcombine.low %v1547_v57, %v1563_v60  ;;  %v812_v60 = vld [vmem:[#allocation7 + $0x738] sm:$0xff] }
 0x26f   : > { %7226 = vmatpush1.bf16.msra.mxu0 %v18022_v20  ;;  %v1531_v3 = vld [vmem:[#allocation7 + $0x1db0] sm:$0xff]  ;;  %v18343_v6 = vcombine.high %v1003_v1, %v1019_v2  ;;  %v18342_v12 = vcombine.low %v1003_v1, %v1019_v2 }
 0x270   : > { %7227 = vmatprep.subr.bf16.mxu0 %v17991_v23  ;;  %v18855_v7 = vcombine.high %v1515_v52, %v1531_v3  ;;  %v971_v8 = vld [vmem:[#allocation7 + $0xc30] sm:$0xff]  ;;  %v18854_v13 = vcombine.low %v1515_v52, %v1531_v3  ;;  %v780_v3 = vld [vmem:[#allocation7 + $0x638] sm:$0xff] }
 0x271   : > { %7267 = vmatpush1.bf16.msra.mxu1 %v18534_v22  ;;  %v987_v9 = vld [vmem:[#allocation7 + $0xcb0] sm:$0xff] }
 0x272   : > { %7268 = vmatprep.subr.bf16.mxu1 %v18503_v24  ;;  %v1483_v10 = vld [vmem:[#allocation7 + $0x1c30] sm:$0xff]  ;;  %v18311_v14 = vcombine.high %v971_v8, %v987_v9  ;;  %v18310_v24 = vcombine.low %v971_v8, %v987_v9  ;;  %v23003_v9 = vsub.s32 7, %v22939_v35 }
 0x273   : > { %7228 = vmatpush1.bf16.msra.mxu0 %v17990_v30  ;;  %v1499_v11 = vld [vmem:[#allocation7 + $0x1cb0] sm:$0xff] }
 0x274   : > { %7229 = vmatprep.subr.bf16.mxu0 %v17959_v33  ;;  %v18823_v17 = vcombine.high %v1483_v10, %v1499_v11  ;;  %v955_v20 = vld [vmem:[#allocation7 + $0xbb0] sm:$0xff]  ;;  %v18822_v25 = vcombine.low %v1483_v10, %v1499_v11 }
 0x275   : > { %7269 = vmatpush1.bf16.msra.mxu1 %v18502_v32  ;;  %v1451_v22 = vld [vmem:[#allocation7 + $0x1b30] sm:$0xff]  ;;  %v18279_v26 = vcombine.high %v939_v18, %v955_v20 }
 0x276   : > { %7270 = vmatprep.subr.bf16.mxu1 %v18471_v34  ;;  %v1467_v23 = vld [vmem:[#allocation7 + $0x1bb0] sm:$0xff]  ;;  %v18278_v34 = vcombine.low %v939_v18, %v955_v20  ;;  %v20381_v18 = vld [vmem:[#allocation9] ss:$2 sm:$0xff] }
 0x277   : > { %7230 = vmatpush1.bf16.msra.mxu0 %v17958_v40  ;;  %v18791_v28 = vcombine.high %v1451_v22, %v1467_v23  ;;  %v907_v29 = vld [vmem:[#allocation7 + $0xa30] sm:$0xff]  ;;  %v18790_v36 = vcombine.low %v1451_v22, %v1467_v23  ;;  %v1260_v22 = vld [vmem:[#allocation7 + $0x1538] sm:$0xff] }
 0x278   : > { %7231 = vmatprep.subr.bf16.mxu0 %v17927_v42  ;;  %v923_v30 = vld [vmem:[#allocation7 + $0xab0] sm:$0xff]  ;;  %v1276_v23 = vld [vmem:[#allocation7 + $0x15b8] sm:$0xff] }
 0x279   : > { %7271 = vmatpush1.bf16.msra.mxu1 %v18470_v41  ;;  %v1419_v32 = vld [vmem:[#allocation7 + $0x1a30] sm:$0xff]  ;;  %v18247_v37 = vcombine.high %v907_v29, %v923_v30 }
 0x27a   : > { %7272 = vmatprep.subr.bf16.mxu1 %v18439_v43  ;;  %v1435_v33 = vld [vmem:[#allocation7 + $0x1ab0] sm:$0xff]  ;;  %v18246_v43 = vcombine.low %v907_v29, %v923_v30 }
 0x27b   : > { %7232 = vmatpush1.bf16.msra.mxu0 %v17926_v51  ;;  %v18759_v38 = vcombine.high %v1419_v32, %v1435_v33  ;;  %v875_v39 = vld [vmem:[#allocation7 + $0x930] sm:$0xff]  ;;  %v18758_v45 = vcombine.low %v1419_v32, %v1435_v33 }
 0x27c   : > { %7233 = vmatprep.subr.bf16.mxu0 %v18407_v53  ;;  %v891_v40 = vld [vmem:[#allocation7 + $0x9b0] sm:$0xff] }
 0x27d   : > { %7273 = vmatpush1.bf16.msra.mxu1 %v18438_v47  ;;  %v1387_v41 = vld [vmem:[#allocation7 + $0x1930] sm:$0xff]  ;;  %v18215_v46 = vcombine.high %v875_v39, %v891_v40 }
 0x27e   : > { %7274 = vmatprep.subr.bf16.mxu1 %v18919_v54  ;;  %v1403_v42 = vld [vmem:[#allocation7 + $0x19b0] sm:$0xff]  ;;  %v18214_v54 = vcombine.low %v875_v39, %v891_v40 }
 0x27f   : > { %7234 = vmatpush2.bf16.msra.mxu0 %v18406_v61  ;;  %v18727_v48 = vcombine.high %v1387_v41, %v1403_v42  ;;  %v843_v50 = vld [vmem:[#allocation7 + $0x830] sm:$0xff]  ;;  %v18726_v55 = vcombine.low %v1387_v41, %v1403_v42  ;;  %v828_v61 = vld [vmem:[#allocation7 + $0x7b8] sm:$0xff] }
 0x280   : > { %7235 = vmatprep.subr.bf16.mxu0 %v18375_v63  ;;  %v859_v51 = vld [vmem:[#allocation7 + $0x8b0] sm:$0xff]  ;;  %v1340_v63 = vld [vmem:[#allocation7 + $0x17b8] sm:$0xff]  ;;  %v18153_v2 = vcombine.high %v812_v60, %v828_v61  ;;  %v18152_v8 = vcombine.low %v812_v60, %v828_v61 }
 0x281   : > { %7275 = vmatpush2.bf16.msra.mxu1 %v18918_v62  ;;  %v1355_v47 = vld [vmem:[#allocation7 + $0x1830] sm:$0xff]  ;;  %v18183_v56 = vcombine.high %v843_v50, %v859_v51  ;;  %v1324_v62 = vld [vmem:[#allocation7 + $0x1738] sm:$0xff] }
 0x282   : > { %7276 = vmatprep.subr.bf16.mxu1 %v18887_v0  ;;  %v1371_v53 = vld [vmem:[#allocation7 + $0x18b0] sm:$0xff]  ;;  %v18182_v0 = vcombine.low %v843_v50, %v859_v51  ;;  %v18665_v52 = vcombine.high %v1324_v62, %v1340_v63  ;;  %v18664_v10 = vcombine.low %v1324_v62, %v1340_v63  ;;  %v18600_v50 = vcombine.low %v1260_v22, %v1276_v23  ;;  %v700_v60 = vld [vmem:[#allocation7 + $0x3b8] sm:$0xff] }
 0x283   : > { %7236 = vmatpush2.bf16.msra.mxu0 %v18374_v4  ;;  %v18695_v57 = vcombine.high %v1355_v47, %v1371_v53  ;;  %v18694_v1 = vcombine.low %v1355_v47, %v1371_v53  ;;  %v796_v4 = vld [vmem:[#allocation7 + $0x6b8] sm:$0xff] }
 0x284   : > { %7237 = vmatprep.subr.bf16.mxu0 %v18343_v6  ;;  %v1292_v6 = vld [vmem:[#allocation7 + $0x1638] sm:$0xff]  ;;  %v18121_v11 = vcombine.high %v780_v3, %v796_v4 }
 0x285   : > { %7277 = vmatpush2.bf16.msra.mxu1 %v18886_v5  ;;  %v23000_v5 = vsub.s32 6, %v22939_v35  ;;  %v1196_v63 = vld [vmem:[#allocation7 + $0x1338] sm:$0xff] }
 0x286   : > { %7278 = vmatprep.subr.bf16.mxu1 %v18855_v7  ;;  %v1308_v7 = vld [vmem:[#allocation7 + $0x16b8] sm:$0xff] }
 0x287   : > { %7238 = vmatpush2.bf16.msra.mxu0 %v18342_v12  ;;  %v18633_v12 = vcombine.high %v1292_v6, %v1308_v7  ;;  %v8075_v20 = vrot.slane %v20381_v18, %v23000_v5  ;;  %v18632_v32 = vcombine.low %v1292_v6, %v1308_v7  ;;  %v652_v6 = vld [vmem:[#allocation7 + $0x238] sm:$0xff] }
 0x288   : > { %7239 = vmatprep.subr.bf16.mxu0 %v18311_v14  ;;  %v764_v14 = vld [vmem:[#allocation7 + $0x5b8] sm:$0xff] }
 0x289   : > { %7279 = vmatpush2.bf16.msra.mxu1 %v18854_v13  ;;  %v748_v13 = vld [vmem:[#allocation7 + $0x538] sm:$0xff] }
 0x28a   : > { %7280 = vmatprep.subr.bf16.mxu1 %v18823_v17  ;;  %v18089_v33 = vcombine.high %v748_v13, %v764_v14  ;;  %v668_v7 = vld [vmem:[#allocation7 + $0x2b8] sm:$0xff] }
 0x28b   : > { %7240 = vmatpush2.bf16.msra.mxu0 %v18310_v24 }
 0x28c   : > { %7241 = vmatprep.subr.bf16.mxu0 %v18279_v26  ;;  %v8079_v26 = vrot.slane %v20381_v18, %v23003_v9  ;;  %v620_v18 = vld [vmem:[#allocation7 + $0x138] sm:$0xff] }
 0x28d   : > { %7281 = vmatpush2.bf16.msra.mxu1 %v18822_v25  ;;  %v20382_v25 = vld [vmem:[#allocation9 + $0x1] ss:$2 sm:$0xff] }
 0x28e   : > { %7282 = vmatprep.subr.bf16.mxu1 %v18791_v28  ;;  %v8279_v35 = vrot.slane %v20382_v25, %v23000_v5  ;;  %v18120_v28 = vcombine.low %v780_v3, %v796_v4  ;;  %v8283_v41 = vrot.slane %v20382_v25, %v23003_v9 }
 0x28f   : > { %7242 = vmatpush2.bf16.msra.mxu0 %v18278_v34 }
 0x290   : > { %7243 = vmatprep.subr.bf16.mxu0 %v18247_v37  ;;  %v716_v37 = vld [vmem:[#allocation7 + $0x438] sm:$0xff] }
 0x291   : > { %7283 = vmatpush2.bf16.msra.mxu1 %v18790_v36  ;;  %v18601_v36 = vcombine.high %v1260_v22, %v1276_v23  ;;  %v1132_v22 = vld [vmem:[#allocation7 + $0x1138] sm:$0xff] }
 0x292   : > { %7284 = vmatprep.subr.bf16.mxu1 %v18759_v38  ;;  %v732_v38 = vld [vmem:[#allocation7 + $0x4b8] sm:$0xff] }
 0x293   : > { %7244 = vmatpush2.bf16.msra.mxu0 %v18246_v43  ;;  %v1228_v43 = vld [vmem:[#allocation7 + $0x1438] sm:$0xff] }
 0x294   : > { %7245 = vmatprep.subr.bf16.mxu0 %v18215_v46  ;;  %v1148_v23 = vld [vmem:[#allocation7 + $0x11b8] sm:$0xff] }
 0x295   : > { %7285 = vmatpush2.bf16.msra.mxu1 %v18758_v45  ;;  %v1244_v45 = vld [vmem:[#allocation7 + $0x14b8] sm:$0xff] }
 0x296   : > { %7286 = vmatprep.subr.bf16.mxu1 %v18727_v48  ;;  %v18088_v48 = vcombine.low %v748_v13, %v764_v14  ;;  %v17993_v14 = vcombine.high %v652_v6, %v668_v7 }
 0x297   : > { %7246 = vmatpush2.bf16.msra.mxu0 %v18214_v54  ;;  %v18057_v54 = vcombine.high %v716_v37, %v732_v38 }
 0x298   : > { %7247 = vmatprep.subr.bf16.mxu0 %v18183_v56  ;;  %v18569_v56 = vcombine.high %v1228_v43, %v1244_v45 }
 0x299   : > { %7287 = vmatpush2.bf16.msra.mxu1 %v18726_v55 }
 0x29a   : > { %7288 = vmatprep.subr.bf16.mxu1 %v18695_v57  ;;  %v684_v57 = vld [vmem:[#allocation7 + $0x338] sm:$0xff] }
 0x29b   : > { %7248 = vmatpush2.bf16.msra.mxu0 %v18182_v0  ;;  %v1212_v0 = vld [vmem:[#allocation7 + $0x13b8] sm:$0xff]  ;;  %v18025_v3 = vcombine.high %v684_v57, %v700_v60 }
 0x29c   : > { %7299 = vmatprep.subr.bf16.mxu0 %v18153_v2  ;;  %v18537_v4 = vcombine.high %v1196_v63, %v1212_v0  ;;  %v18536_v13 = vcombine.low %v1196_v63, %v1212_v0 }
 0x29d   : > { %7289 = vmatpush2.bf16.msra.mxu1 %v18694_v1  ;;  %v18056_v1 = vcombine.low %v716_v37, %v732_v38  ;;  %v1068_v38 = vld [vmem:[#allocation7 + $0xf38] sm:$0xff] }
 0x29e   : > { %7340 = vmatprep.subr.bf16.mxu1 %v18665_v52  ;;  %v7005_v17 = vpop.f32.mrf.mxu0  ;;  %7250 = vmatmul.mubr.bf16.vlgmr.msra.gmra.mxu0 %v22923_v16  ;;  %v18568_v52 = vcombine.low %v1228_v43, %v1244_v45 }
 0x29f   : > { %7300 = vmatpush1.bf16.msra.mxu0 %v18152_v8  ;;  %7331 = vmatprep.mubr.bf16.mxu0 %v22917_v58 }
 0x2a0   : > { %v7046_v24 = vpop.f32.mrf.mxu1  ;;  %7291 = vmatmul.mubr.bf16.vlgmr.msra.gmra.mxu1 %v22925_v19  ;;  %v7007_v30 = vpop.f32.mrf.mxu0  ;;  %7301 = vmatprep.subr.bf16.mxu0 %v18121_v11  ;;  %v1180_v11 = vld [vmem:[#allocation7 + $0x12b8] sm:$0xff] }
 0x2a1   : > { %v7047_v29 = vadd.f32 %v7046_v24, %v7005_v17  ;;  %7341 = vmatpush1.bf16.msra.mxu1 %v18664_v10  ;;  %7372 = vmatprep.mubr.bf16.mxu1 %v22919_v59  ;;  %v1164_v10 = vld [vmem:[#allocation7 + $0x1238] sm:$0xff]  ;;  %v17992_v24 = vcombine.low %v652_v6, %v668_v7 }
 0x2a2   : > { %v7048_v34 = vpop.f32.mrf.mxu1  ;;  %7342 = vmatprep.subr.bf16.mxu1 %v18633_v12  ;;  %v7009_v42 = vpop.f32.mrf.mxu0  ;;  %v18024_v12 = vcombine.low %v684_v57, %v700_v60  ;;  %v18505_v17 = vcombine.high %v1164_v10, %v1180_v11  ;;  %v18504_v25 = vcombine.low %v1164_v10, %v1180_v11  ;;  %v1004_v57 = vld [vmem:[#allocation7 + $0xd38] sm:$0xff] }
 0x2a3   : > { %v8214_v39 = vmul.f32 %v8075_v20, %v7047_v29  ;;  %v7049_v40 = vadd.f32 %v7048_v34, %v7007_v30  ;;  %7302 = vmatpush1.bf16.msra.mxu0 %v18120_v28  ;;  %v636_v20 = vld [vmem:[#allocation7 + $0x1b8] sm:$0xff]  ;;  %v18472_v34 = vcombine.low %v1132_v22, %v1148_v23 }
 0x2a4   : > { %v7050_v46 = vpop.f32.mrf.mxu1  ;;  %v7010_v53 = vpop.f32.mrf.mxu0  ;;  %7303 = vmatprep.subr.bf16.mxu0 %v18089_v33  ;;  %v588_v28 = vld [vmem:[#allocation7 + $0x38] sm:$0xff]  ;;  %v17960_v33 = vcombine.low %v620_v18, %v636_v20 }
 0x2a5   : > { %v8418_v51 = vadd.f32 %v8279_v35, %v8214_v39  ;;  %v8215_v47 = vmul.f32 %v8079_v26, %v7049_v40  ;;  %7343 = vmatpush1.bf16.msra.mxu1 %v18632_v32  ;;  %v17961_v35 = vcombine.high %v620_v18, %v636_v20  ;;  %v18473_v26 = vcombine.high %v1132_v22, %v1148_v23  ;;  %v604_v29 = vld [vmem:[#allocation7 + $0xb8] sm:$0xff] }
 0x2a6   : > { %v7051_v55 = vpop.f32.mrf.mxu1  ;;  %7344 = vmatprep.subr.bf16.mxu1 %v18601_v36  ;;  %v1100_v30 = vld [vmem:[#allocation7 + $0x1038] sm:$0xff]  ;;  %v17929_v36 = vcombine.high %v588_v28, %v604_v29  ;;  %v17928_v42 = vcombine.low %v588_v28, %v604_v29 }
 0x2a7   : > { %v8450_v61 = vmax.f32 %v8418_v51, 0.0  ;;  %v8419_v62 = vadd.f32 %v8283_v41, %v8215_v47  ;;  %7304 = vmatpush1.bf16.msra.mxu0 %v18088_v48  ;;  %v1116_v32 = vld [vmem:[#allocation7 + $0x10b8] sm:$0xff] }
 0x2a8   : > { %7305 = vmatprep.subr.bf16.mxu0 %v18057_v54  ;;  %v18441_v37 = vcombine.high %v1100_v30, %v1116_v32  ;;  %v1084_v39 = vld [vmem:[#allocation7 + $0xfb8] sm:$0xff]  ;;  %v18440_v43 = vcombine.low %v1100_v30, %v1116_v32 }
 0x2a9   : > { %8482 = vst [vmem:[#allocation18 + $0x30] sm:$0xff] %v8450_v61  ;;  %v8451_v2 = vmax.f32 %v8419_v62, 0.0  ;;  %7345 = vmatpush1.bf16.msra.mxu1 %v18600_v50  ;;  %v1580_v40 = vld [vmem:[#allocation7 + $0x1f38] sm:$0xff]  ;;  %v18409_v45 = vcombine.high %v1068_v38, %v1084_v39  ;;  %v18408_v53 = vcombine.low %v1068_v38, %v1084_v39 }
 0x2aa   : > { %7346 = vmatprep.subr.bf16.mxu1 %v18569_v56  ;;  %v1596_v41 = vld [vmem:[#allocation7 + $0x1fb8] sm:$0xff] }
 0x2ab   : > { %8483 = vst [vmem:[#allocation18 + $0x38] sm:$0xff] %v8451_v2  ;;  %v20190_v8 = vpack.c.bf16 %v8451_v2, %v8450_v61  ;;  %7306 = vmatpush1.bf16.msra.mxu0 %v18056_v1  ;;  %v18921_v46 = vcombine.high %v1580_v40, %v1596_v41  ;;  %v1036_v48 = vld [vmem:[#allocation7 + $0xe38] sm:$0xff]  ;;  %v18920_v54 = vcombine.low %v1580_v40, %v1596_v41 }
 0x2ac   : > { %7307 = vmatprep.subr.bf16.mxu0 %v18025_v3  ;;  %v1052_v50 = vld [vmem:[#allocation7 + $0xeb8] sm:$0xff] }
 0x2ad   : > { %8639 = vst [vmem:[#allocation2 + $0x18] sm:$0xff] %v20190_v8  ;;  %7347 = vmatpush1.bf16.msra.mxu1 %v18568_v52  ;;  %v1548_v51 = vld [vmem:[#allocation7 + $0x1e38] sm:$0xff]  ;;  %v18377_v55 = vcombine.high %v1036_v48, %v1052_v50  ;;  %v18376_v63 = vcombine.low %v1036_v48, %v1052_v50 }
 0x2ae   : > { %7348 = vmatprep.subr.bf16.mxu1 %v18537_v4  ;;  %v1564_v47 = vld [vmem:[#allocation7 + $0x1eb8] sm:$0xff] }
 0x2af   : > { %7308 = vmatpush1.bf16.msra.mxu0 %v18024_v12  ;;  %v18889_v56 = vcombine.high %v1548_v51, %v1564_v47  ;;  %v1020_v60 = vld [vmem:[#allocation7 + $0xdb8] sm:$0xff]  ;;  %v18888_v0 = vcombine.low %v1548_v51, %v1564_v47 }
 0x2b0   : > { %7309 = vmatprep.subr.bf16.mxu0 %v17993_v14  ;;  %v1516_v61 = vld [vmem:[#allocation7 + $0x1d38] sm:$0xff]  ;;  %v18345_v1 = vcombine.high %v1004_v57, %v1020_v60  ;;  %v18344_v7 = vcombine.low %v1004_v57, %v1020_v60 }
 0x2b1   : > { %7349 = vmatpush1.bf16.msra.mxu1 %v18536_v13  ;;  %v1532_v62 = vld [vmem:[#allocation7 + $0x1db8] sm:$0xff] }
 0x2b2   : > { %7350 = vmatprep.subr.bf16.mxu1 %v18505_v17  ;;  %v18857_v2 = vcombine.high %v1516_v61, %v1532_v62  ;;  %v972_v52 = vld [vmem:[#allocation7 + $0xc38] sm:$0xff]  ;;  %v18856_v8 = vcombine.low %v1516_v61, %v1532_v62 }
 0x2b3   : > { %7310 = vmatpush1.bf16.msra.mxu0 %v17992_v24  ;;  %v988_v3 = vld [vmem:[#allocation7 + $0xcb8] sm:$0xff] }
 0x2b4   : > { %7311 = vmatprep.subr.bf16.mxu0 %v17961_v35  ;;  %v1484_v4 = vld [vmem:[#allocation7 + $0x1c38] sm:$0xff]  ;;  %v18313_v10 = vcombine.high %v972_v52, %v988_v3  ;;  %v18312_v18 = vcombine.low %v972_v52, %v988_v3 }
 0x2b5   : > { %7351 = vmatpush1.bf16.msra.mxu1 %v18504_v25  ;;  %v1500_v6 = vld [vmem:[#allocation7 + $0x1cb8] sm:$0xff] }
 0x2b6   : > { %7352 = vmatprep.subr.bf16.mxu1 %v18473_v26  ;;  %v18825_v11 = vcombine.high %v1484_v4, %v1500_v6  ;;  %v940_v12 = vld [vmem:[#allocation7 + $0xb38] sm:$0xff]  ;;  %v18824_v20 = vcombine.low %v1484_v4, %v1500_v6 }
 0x2b7   : > { %7312 = vmatpush1.bf16.msra.mxu0 %v17960_v33  ;;  %v956_v13 = vld [vmem:[#allocation7 + $0xbb8] sm:$0xff] }
 0x2b8   : > { %7313 = vmatprep.subr.bf16.mxu0 %v17929_v36  ;;  %v1452_v14 = vld [vmem:[#allocation7 + $0x1b38] sm:$0xff]  ;;  %v18281_v22 = vcombine.high %v940_v12, %v956_v13  ;;  %v18280_v28 = vcombine.low %v940_v12, %v956_v13 }
 0x2b9   : > { %7353 = vmatpush1.bf16.msra.mxu1 %v18472_v34  ;;  %v1468_v17 = vld [vmem:[#allocation7 + $0x1bb8] sm:$0xff] }
 0x2ba   : > { %7354 = vmatprep.subr.bf16.mxu1 %v18441_v37  ;;  %v18793_v23 = vcombine.high %v1452_v14, %v1468_v17  ;;  %v908_v24 = vld [vmem:[#allocation7 + $0xa38] sm:$0xff]  ;;  %v18792_v29 = vcombine.low %v1452_v14, %v1468_v17  ;;  %v1261_v14 = vld [vmem:[#allocation7 + $0x1540] sm:$0xff] }
 0x2bb   : > { %7314 = vmatpush1.bf16.msra.mxu0 %v17928_v42  ;;  %v924_v25 = vld [vmem:[#allocation7 + $0xab8] sm:$0xff]  ;;  %v1277_v17 = vld [vmem:[#allocation7 + $0x15c0] sm:$0xff] }
 0x2bc   : > { %7315 = vmatprep.subr.bf16.mxu0 %v18409_v45  ;;  %v1420_v35 = vld [vmem:[#allocation7 + $0x1a38] sm:$0xff]  ;;  %v18249_v30 = vcombine.high %v908_v24, %v924_v25  ;;  %v18248_v38 = vcombine.low %v908_v24, %v924_v25 }
 0x2bd   : > { %7355 = vmatpush1.bf16.msra.mxu1 %v18440_v43  ;;  %v1436_v26 = vld [vmem:[#allocation7 + $0x1ab8] sm:$0xff] }
 0x2be   : > { %7356 = vmatprep.subr.bf16.mxu1 %v18921_v46  ;;  %v18761_v32 = vcombine.high %v1420_v35, %v1436_v26  ;;  %v876_v33 = vld [vmem:[#allocation7 + $0x938] sm:$0xff]  ;;  %v18760_v39 = vcombine.low %v1420_v35, %v1436_v26 }
 0x2bf   : > { %7316 = vmatpush2.bf16.msra.mxu0 %v18408_v53  ;;  %v892_v34 = vld [vmem:[#allocation7 + $0x9b8] sm:$0xff]  ;;  %v813_v53 = vld [vmem:[#allocation7 + $0x740] sm:$0xff] }
 0x2c0   : > { %7317 = vmatprep.subr.bf16.mxu0 %v18377_v55  ;;  %v1388_v36 = vld [vmem:[#allocation7 + $0x1938] sm:$0xff]  ;;  %v18217_v40 = vcombine.high %v876_v33, %v892_v34  ;;  %v18216_v48 = vcombine.low %v876_v33, %v892_v34  ;;  %v1325_v55 = vld [vmem:[#allocation7 + $0x1740] sm:$0xff] }
 0x2c1   : > { %7357 = vmatpush2.bf16.msra.mxu1 %v18920_v54  ;;  %v1404_v37 = vld [vmem:[#allocation7 + $0x19b8] sm:$0xff]  ;;  %v829_v54 = vld [vmem:[#allocation7 + $0x7c0] sm:$0xff] }
 0x2c2   : > { %7358 = vmatprep.subr.bf16.mxu1 %v18889_v56  ;;  %v18729_v41 = vcombine.high %v1388_v36, %v1404_v37  ;;  %v844_v42 = vld [vmem:[#allocation7 + $0x838] sm:$0xff]  ;;  %v18728_v50 = vcombine.low %v1388_v36, %v1404_v37  ;;  %v1341_v56 = vld [vmem:[#allocation7 + $0x17c0] sm:$0xff]  ;;  %v18155_v61 = vcombine.high %v813_v53, %v829_v54  ;;  %v18154_v3 = vcombine.low %v813_v53, %v829_v54 }
 0x2c3   : > { %7318 = vmatpush2.bf16.msra.mxu0 %v18376_v63  ;;  %v860_v43 = vld [vmem:[#allocation7 + $0x8b8] sm:$0xff]  ;;  %v18667_v62 = vcombine.high %v1325_v55, %v1341_v56  ;;  %v781_v63 = vld [vmem:[#allocation7 + $0x640] sm:$0xff]  ;;  %v18666_v6 = vcombine.low %v1325_v55, %v1341_v56 }
 0x2c4   : > { %7319 = vmatprep.subr.bf16.mxu0 %v18345_v1  ;;  %v1356_v45 = vld [vmem:[#allocation7 + $0x1838] sm:$0xff]  ;;  %v18185_v51 = vcombine.high %v844_v42, %v860_v43  ;;  %v18184_v57 = vcombine.low %v844_v42, %v860_v43  ;;  %v1293_v1 = vld [vmem:[#allocation7 + $0x1640] sm:$0xff]  ;;  %v18602_v42 = vcombine.low %v1261_v14, %v1277_v17 }
 0x2c5   : > { %7359 = vmatpush2.bf16.msra.mxu1 %v18888_v0  ;;  %v1372_v46 = vld [vmem:[#allocation7 + $0x18b8] sm:$0xff]  ;;  %v797_v0 = vld [vmem:[#allocation7 + $0x6c0] sm:$0xff] }
 0x2c6   : > { %7360 = vmatprep.subr.bf16.mxu1 %v18857_v2  ;;  %v18697_v47 = vcombine.high %v1356_v45, %v1372_v46  ;;  %v18696_v60 = vcombine.low %v1356_v45, %v1372_v46  ;;  %v1309_v2 = vld [vmem:[#allocation7 + $0x16c0] sm:$0xff]  ;;  %v23013_v52 = vld [vmem:[#allocation9 + $0x10] ss:$2 sm:$0xff]  ;;  %v23015_v4 = vld [vmem:[#allocation9 + $0x11] ss:$2 sm:$0xff] }
 0x2c7   : > { %7320 = vmatpush2.bf16.msra.mxu0 %v18344_v7  ;;  %v18123_v7 = vcombine.high %v781_v63, %v797_v0  ;;  %v8083_v13 = vrot.slane %v23013_v52, %v22942_v44  ;;  %v18634_v35 = vcombine.low %v1293_v1, %v1309_v2  ;;  %v8291_v36 = vrot.slane %v23015_v4, %v22947_v49  ;;  %v701_v53 = vld [vmem:[#allocation7 + $0x3c0] sm:$0xff] }
 0x2c8   : > { %7321 = vmatprep.subr.bf16.mxu0 %v18313_v10  ;;  %v749_v10 = vld [vmem:[#allocation7 + $0x540] sm:$0xff] }
 0x2c9   : > { %7361 = vmatpush2.bf16.msra.mxu1 %v18856_v8  ;;  %v18635_v8 = vcombine.high %v1293_v1, %v1309_v2  ;;  %v1197_v56 = vld [vmem:[#allocation7 + $0x1340] sm:$0xff] }
 0x2ca   : > { %7362 = vmatprep.subr.bf16.mxu1 %v18825_v11  ;;  %v765_v11 = vld [vmem:[#allocation7 + $0x5c0] sm:$0xff] }
 0x2cb   : > { %7322 = vmatpush2.bf16.msra.mxu0 %v18312_v18  ;;  %v18091_v26 = vcombine.high %v749_v10, %v765_v11  ;;  %v653_v1 = vld [vmem:[#allocation7 + $0x240] sm:$0xff] }
 0x2cc   : > { %7323 = vmatprep.subr.bf16.mxu0 %v18281_v22  ;;  %v8087_v22 = vrot.slane %v23013_v52, %v22947_v49  ;;  %v669_v2 = vld [vmem:[#allocation7 + $0x2c0] sm:$0xff] }
 0x2cd   : > { %7363 = vmatpush2.bf16.msra.mxu1 %v18824_v20  ;;  %v8287_v20 = vrot.slane %v23015_v4, %v22942_v44 }
 0x2ce   : > { %7364 = vmatprep.subr.bf16.mxu1 %v18793_v23  ;;  %v18122_v23 = vcombine.low %v781_v63, %v797_v0 }
 0x2cf   : > { %7324 = vmatpush2.bf16.msra.mxu0 %v18280_v28 }
 0x2d0   : > { %7325 = vmatprep.subr.bf16.mxu0 %v18249_v30  ;;  %v717_v30 = vld [vmem:[#allocation7 + $0x440] sm:$0xff] }
 0x2d1   : > { %7365 = vmatpush2.bf16.msra.mxu1 %v18792_v29  ;;  %v18603_v29 = vcombine.high %v1261_v14, %v1277_v17  ;;  %v637_v14 = vld [vmem:[#allocation7 + $0x1c0] sm:$0xff] }
 0x2d2   : > { %7366 = vmatprep.subr.bf16.mxu1 %v18761_v32  ;;  %v733_v32 = vld [vmem:[#allocation7 + $0x4c0] sm:$0xff] }
 0x2d3   : > { %7326 = vmatpush2.bf16.msra.mxu0 %v18248_v38  ;;  %v1229_v38 = vld [vmem:[#allocation7 + $0x1440] sm:$0xff] }
 0x2d4   : > { %7327 = vmatprep.subr.bf16.mxu0 %v18217_v40  ;;  %v1133_v17 = vld [vmem:[#allocation7 + $0x1140] sm:$0xff] }
 0x2d5   : > { %7367 = vmatpush2.bf16.msra.mxu1 %v18760_v39  ;;  %v1245_v39 = vld [vmem:[#allocation7 + $0x14c0] sm:$0xff] }
 0x2d6   : > { %7368 = vmatprep.subr.bf16.mxu1 %v18729_v41  ;;  %v18090_v41 = vcombine.low %v749_v10, %v765_v11  ;;  %v17995_v11 = vcombine.high %v653_v1, %v669_v2 }
 0x2d7   : > { %7328 = vmatpush2.bf16.msra.mxu0 %v18216_v48  ;;  %v18059_v48 = vcombine.high %v717_v30, %v733_v32 }
 0x2d8   : > { %7329 = vmatprep.subr.bf16.mxu0 %v18185_v51  ;;  %v18571_v51 = vcombine.high %v1229_v38, %v1245_v39 }
 0x2d9   : > { %7369 = vmatpush2.bf16.msra.mxu1 %v18728_v50 }
 0x2da   : > { %7370 = vmatprep.subr.bf16.mxu1 %v18697_v47  ;;  %v685_v47 = vld [vmem:[#allocation7 + $0x340] sm:$0xff] }
 0x2db   : > { %7330 = vmatpush2.bf16.msra.mxu0 %v18184_v57  ;;  %v1213_v57 = vld [vmem:[#allocation7 + $0x13c0] sm:$0xff]  ;;  %v18027_v63 = vcombine.high %v685_v47, %v701_v53 }
 0x2dc   : > { %7381 = vmatprep.subr.bf16.mxu0 %v18155_v61  ;;  %v18539_v0 = vcombine.high %v1197_v56, %v1213_v57  ;;  %v18538_v10 = vcombine.low %v1197_v56, %v1213_v57  ;;  %v1517_v56 = vld [vmem:[#allocation7 + $0x1d40] sm:$0xff] }
 0x2dd   : > { %7371 = vmatpush2.bf16.msra.mxu1 %v18696_v60  ;;  %v18058_v60 = vcombine.low %v717_v30, %v733_v32  ;;  %v1533_v57 = vld [vmem:[#allocation7 + $0x1dc0] sm:$0xff] }
 0x2de   : > { %7422 = vmatprep.subr.bf16.mxu1 %v18667_v62  ;;  %v7087_v12 = vpop.f32.mrf.mxu0  ;;  %7332 = vmatmul.mubr.bf16.vlgmr.msra.gmra.mxu0 %v22923_v16  ;;  %v18570_v62 = vcombine.low %v1229_v38, %v1245_v39  ;;  %v1597_v38 = vld [vmem:[#allocation7 + $0x1fc0] sm:$0xff] }
 0x2df   : > { %7382 = vmatpush1.bf16.msra.mxu0 %v18154_v3  ;;  %7413 = vmatprep.mubr.bf16.mxu0 %v22917_v58 }
 0x2e0   : > { %v7128_v18 = vpop.f32.mrf.mxu1  ;;  %7373 = vmatmul.mubr.bf16.vlgmr.msra.gmra.mxu1 %v22925_v19  ;;  %v7089_v25 = vpop.f32.mrf.mxu0  ;;  %7383 = vmatprep.subr.bf16.mxu0 %v18123_v7  ;;  %v1181_v7 = vld [vmem:[#allocation7 + $0x12c0] sm:$0xff] }
 0x2e1   : > { %v7129_v24 = vadd.f32 %v7128_v18, %v7087_v12  ;;  %7423 = vmatpush1.bf16.msra.mxu1 %v18666_v6  ;;  %7454 = vmatprep.mubr.bf16.mxu1 %v22919_v59  ;;  %v1165_v6 = vld [vmem:[#allocation7 + $0x1240] sm:$0xff] }
 0x2e2   : > { %v7130_v28 = vpop.f32.mrf.mxu1  ;;  %7424 = vmatprep.subr.bf16.mxu1 %v18635_v8  ;;  %v7091_v37 = vpop.f32.mrf.mxu0  ;;  %v18026_v8 = vcombine.low %v685_v47, %v701_v53  ;;  %v18507_v12 = vcombine.high %v1165_v6, %v1181_v7  ;;  %v1149_v18 = vld [vmem:[#allocation7 + $0x11c0] sm:$0xff] }
 0x2e3   : > { %v8216_v33 = vmul.f32 %v8083_v13, %v7129_v24  ;;  %v7131_v34 = vadd.f32 %v7130_v28, %v7089_v25  ;;  %7384 = vmatpush1.bf16.msra.mxu0 %v18122_v23  ;;  %v621_v13 = vld [vmem:[#allocation7 + $0x140] sm:$0xff]  ;;  %v18475_v24 = vcombine.high %v1133_v17, %v1149_v18  ;;  %v18474_v30 = vcombine.low %v1133_v17, %v1149_v18 }
 0x2e4   : > { %v7132_v40 = vpop.f32.mrf.mxu1  ;;  %v7092_v46 = vpop.f32.mrf.mxu0  ;;  %7385 = vmatprep.subr.bf16.mxu0 %v18091_v26  ;;  %v17963_v23 = vcombine.high %v621_v13, %v637_v14  ;;  %v589_v25 = vld [vmem:[#allocation7 + $0x40] sm:$0xff] }
 0x2e5   : > { %v8420_v43 = vadd.f32 %v8287_v20, %v8216_v33  ;;  %v8217_v45 = vmul.f32 %v8087_v22, %v7131_v34  ;;  %7425 = vmatpush1.bf16.msra.mxu1 %v18634_v35  ;;  %v17994_v20 = vcombine.low %v653_v1, %v669_v2  ;;  %v18506_v22 = vcombine.low %v1165_v6, %v1181_v7  ;;  %v605_v35 = vld [vmem:[#allocation7 + $0xc0] sm:$0xff] }
 0x2e6   : > { %v7133_v50 = vpop.f32.mrf.mxu1  ;;  %7426 = vmatprep.subr.bf16.mxu1 %v18603_v29  ;;  %v1101_v26 = vld [vmem:[#allocation7 + $0x1040] sm:$0xff]  ;;  %v17962_v29 = vcombine.low %v621_v13, %v637_v14  ;;  %v17931_v32 = vcombine.high %v589_v25, %v605_v35  ;;  %v17930_v39 = vcombine.low %v589_v25, %v605_v35  ;;  %v18858_v7 = vcombine.low %v1517_v56, %v1533_v57 }
 0x2e7   : > { %v8452_v54 = vmax.f32 %v8420_v43, 0.0  ;;  %v8421_v55 = vadd.f32 %v8291_v36, %v8217_v45  ;;  %7386 = vmatpush1.bf16.msra.mxu0 %v18090_v41  ;;  %v1117_v28 = vld [vmem:[#allocation7 + $0x10c0] sm:$0xff] }
 0x2e8   : > { %7387 = vmatprep.subr.bf16.mxu0 %v18059_v48  ;;  %v18443_v33 = vcombine.high %v1101_v26, %v1117_v28  ;;  %v1069_v34 = vld [vmem:[#allocation7 + $0xf40] sm:$0xff]  ;;  %v18442_v40 = vcombine.low %v1101_v26, %v1117_v28 }
 0x2e9   : > { %8484 = vst [vmem:[#allocation18 + $0x40] sm:$0xff] %v8452_v54  ;;  %v8453_v61 = vmax.f32 %v8421_v55, 0.0  ;;  %7427 = vmatpush1.bf16.msra.mxu1 %v18602_v42  ;;  %v1085_v36 = vld [vmem:[#allocation7 + $0xfc0] sm:$0xff] }
 0x2ea   : > { %7428 = vmatprep.subr.bf16.mxu1 %v18571_v51  ;;  %v1581_v37 = vld [vmem:[#allocation7 + $0x1f40] sm:$0xff]  ;;  %v18411_v41 = vcombine.high %v1069_v34, %v1085_v36  ;;  %v18410_v50 = vcombine.low %v1069_v34, %v1085_v36 }
 0x2eb   : > { %8485 = vst [vmem:[#allocation18 + $0x48] sm:$0xff] %v8453_v61  ;;  %v20191_v3 = vpack.c.bf16 %v8453_v61, %v8452_v54  ;;  %7388 = vmatpush1.bf16.msra.mxu0 %v18058_v60  ;;  %v18923_v42 = vcombine.high %v1581_v37, %v1597_v38  ;;  %v1037_v43 = vld [vmem:[#allocation7 + $0xe40] sm:$0xff]  ;;  %v18922_v51 = vcombine.low %v1581_v37, %v1597_v38 }
 0x2ec   : > { %7389 = vmatprep.subr.bf16.mxu0 %v18027_v63  ;;  %v1053_v45 = vld [vmem:[#allocation7 + $0xec0] sm:$0xff]  ;;  %v18859_v63 = vcombine.high %v1517_v56, %v1533_v57 }
 0x2ed   : > { %8640 = vst [vmem:[#allocation2 + $0x50] sm:$0xff] %v20191_v3  ;;  %7429 = vmatpush1.bf16.msra.mxu1 %v18570_v62  ;;  %v1549_v46 = vld [vmem:[#allocation7 + $0x1e40] sm:$0xff]  ;;  %v18379_v47 = vcombine.high %v1037_v43, %v1053_v45  ;;  %v18378_v60 = vcombine.low %v1037_v43, %v1053_v45 }
 0x2ee   : > { %7430 = vmatprep.subr.bf16.mxu1 %v18539_v0  ;;  %v1565_v48 = vld [vmem:[#allocation7 + $0x1ec0] sm:$0xff] }
 0x2ef   : > { %7390 = vmatpush1.bf16.msra.mxu0 %v18026_v8  ;;  %v18891_v53 = vcombine.high %v1549_v46, %v1565_v48  ;;  %v1005_v54 = vld [vmem:[#allocation7 + $0xd40] sm:$0xff]  ;;  %v18890_v61 = vcombine.low %v1549_v46, %v1565_v48 }
 0x2f0   : > { %7391 = vmatprep.subr.bf16.mxu0 %v17995_v11  ;;  %v1021_v55 = vld [vmem:[#allocation7 + $0xdc0] sm:$0xff] }
 0x2f1   : > { %7431 = vmatpush1.bf16.msra.mxu1 %v18538_v10  ;;  %v18347_v62 = vcombine.high %v1005_v54, %v1021_v55  ;;  %v973_v0 = vld [vmem:[#allocation7 + $0xc40] sm:$0xff]  ;;  %v18346_v6 = vcombine.low %v1005_v54, %v1021_v55  ;;  %v1326_v54 = vld [vmem:[#allocation7 + $0x1748] sm:$0xff] }
 0x2f2   : > { %7432 = vmatprep.subr.bf16.mxu1 %v18507_v12  ;;  %v989_v1 = vld [vmem:[#allocation7 + $0xcc0] sm:$0xff]  ;;  %v1342_v55 = vld [vmem:[#allocation7 + $0x17c8] sm:$0xff] }
 0x2f3   : > { %7392 = vmatpush1.bf16.msra.mxu0 %v17994_v20  ;;  %v1485_v2 = vld [vmem:[#allocation7 + $0x1c40] sm:$0xff]  ;;  %v18315_v8 = vcombine.high %v973_v0, %v989_v1  ;;  %v18314_v17 = vcombine.low %v973_v0, %v989_v1  ;;  %v1294_v0 = vld [vmem:[#allocation7 + $0x1648] sm:$0xff] }
 0x2f4   : > { %7393 = vmatprep.subr.bf16.mxu0 %v17963_v23  ;;  %v1501_v3 = vld [vmem:[#allocation7 + $0x1cc0] sm:$0xff]  ;;  %v1310_v1 = vld [vmem:[#allocation7 + $0x16c8] sm:$0xff] }
 0x2f5   : > { %7433 = vmatpush1.bf16.msra.mxu1 %v18506_v22  ;;  %v18827_v10 = vcombine.high %v1485_v2, %v1501_v3  ;;  %v941_v11 = vld [vmem:[#allocation7 + $0xb40] sm:$0xff]  ;;  %v18826_v18 = vcombine.low %v1485_v2, %v1501_v3  ;;  %v18668_v3 = vcombine.low %v1326_v54, %v1342_v55 }
 0x2f6   : > { %7434 = vmatprep.subr.bf16.mxu1 %v18475_v24  ;;  %v957_v12 = vld [vmem:[#allocation7 + $0xbc0] sm:$0xff] }
 0x2f7   : > { %7394 = vmatpush1.bf16.msra.mxu0 %v17962_v29  ;;  %v1453_v13 = vld [vmem:[#allocation7 + $0x1b40] sm:$0xff]  ;;  %v18283_v20 = vcombine.high %v941_v11, %v957_v12  ;;  %v18282_v26 = vcombine.low %v941_v11, %v957_v12  ;;  %v8091_v12 = vrot.slane %v23013_v52, %v22964_v27 }
 0x2f8   : > { %7395 = vmatprep.subr.bf16.mxu0 %v17931_v32  ;;  %v1469_v14 = vld [vmem:[#allocation7 + $0x1bc0] sm:$0xff] }
 0x2f9   : > { %7435 = vmatpush1.bf16.msra.mxu1 %v18474_v30  ;;  %v18795_v22 = vcombine.high %v1453_v13, %v1469_v14  ;;  %v909_v23 = vld [vmem:[#allocation7 + $0xa40] sm:$0xff]  ;;  %v18794_v28 = vcombine.low %v1453_v13, %v1469_v14  ;;  %v1262_v13 = vld [vmem:[#allocation7 + $0x1548] sm:$0xff] }
 0x2fa   : > { %7436 = vmatprep.subr.bf16.mxu1 %v18443_v33  ;;  %v925_v24 = vld [vmem:[#allocation7 + $0xac0] sm:$0xff]  ;;  %v1278_v14 = vld [vmem:[#allocation7 + $0x15c8] sm:$0xff] }
 0x2fb   : > { %7396 = vmatpush1.bf16.msra.mxu0 %v17930_v39  ;;  %v1421_v25 = vld [vmem:[#allocation7 + $0x1a40] sm:$0xff]  ;;  %v18251_v29 = vcombine.high %v909_v23, %v925_v24  ;;  %v18250_v37 = vcombine.low %v909_v23, %v925_v24 }
 0x2fc   : > { %7397 = vmatprep.subr.bf16.mxu0 %v18411_v41  ;;  %v1437_v35 = vld [vmem:[#allocation7 + $0x1ac0] sm:$0xff] }
 0x2fd   : > { %7437 = vmatpush1.bf16.msra.mxu1 %v18442_v40  ;;  %v18763_v30 = vcombine.high %v1421_v25, %v1437_v35  ;;  %v877_v32 = vld [vmem:[#allocation7 + $0x940] sm:$0xff]  ;;  %v18762_v38 = vcombine.low %v1421_v25, %v1437_v35  ;;  %v18636_v25 = vcombine.low %v1294_v0, %v1310_v1 }
 0x2fe   : > { %7438 = vmatprep.subr.bf16.mxu1 %v18923_v42  ;;  %v893_v33 = vld [vmem:[#allocation7 + $0x9c0] sm:$0xff] }
 0x2ff   : > { %7398 = vmatpush2.bf16.msra.mxu0 %v18410_v50  ;;  %v1389_v34 = vld [vmem:[#allocation7 + $0x1940] sm:$0xff]  ;;  %v18219_v39 = vcombine.high %v877_v32, %v893_v33  ;;  %v18218_v46 = vcombine.low %v877_v32, %v893_v33 }
 0x300   : > { %7399 = vmatprep.subr.bf16.mxu0 %v18379_v47  ;;  %v1405_v36 = vld [vmem:[#allocation7 + $0x19c0] sm:$0xff]  ;;  %v814_v47 = vld [vmem:[#allocation7 + $0x748] sm:$0xff] }
 0x301   : > { %7439 = vmatpush2.bf16.msra.mxu1 %v18922_v51  ;;  %v18731_v40 = vcombine.high %v1389_v34, %v1405_v36  ;;  %v845_v41 = vld [vmem:[#allocation7 + $0x840] sm:$0xff]  ;;  %v18730_v48 = vcombine.low %v1389_v34, %v1405_v36  ;;  %v8299_v34 = vrot.slane %v23015_v4, %v22967_v31 }
 0x302   : > { %7440 = vmatprep.subr.bf16.mxu1 %v18891_v53  ;;  %v861_v42 = vld [vmem:[#allocation7 + $0x8c0] sm:$0xff]  ;;  %v830_v53 = vld [vmem:[#allocation7 + $0x7c8] sm:$0xff] }
 0x303   : > { %7400 = vmatpush2.bf16.msra.mxu0 %v18378_v60  ;;  %v1357_v43 = vld [vmem:[#allocation7 + $0x1840] sm:$0xff]  ;;  %v18187_v50 = vcombine.high %v845_v41, %v861_v42  ;;  %v18186_v56 = vcombine.low %v845_v41, %v861_v42  ;;  %v18157_v60 = vcombine.high %v814_v47, %v830_v53  ;;  %v18156_v2 = vcombine.low %v814_v47, %v830_v53  ;;  %v702_v47 = vld [vmem:[#allocation7 + $0x3c8] sm:$0xff] }
 0x304   : > { %7401 = vmatprep.subr.bf16.mxu0 %v18347_v62  ;;  %v1373_v45 = vld [vmem:[#allocation7 + $0x18c0] sm:$0xff]  ;;  %v782_v62 = vld [vmem:[#allocation7 + $0x648] sm:$0xff]  ;;  %v18604_v41 = vcombine.low %v1262_v13, %v1278_v14 }
 0x305   : > { %7441 = vmatpush2.bf16.msra.mxu1 %v18890_v61  ;;  %v18699_v51 = vcombine.high %v1357_v43, %v1373_v45  ;;  %v18698_v57 = vcombine.low %v1357_v43, %v1373_v45  ;;  %v18669_v61 = vcombine.high %v1326_v54, %v1342_v55  ;;  %v1198_v55 = vld [vmem:[#allocation7 + $0x1348] sm:$0xff] }
 0x306   : > { %7442 = vmatprep.subr.bf16.mxu1 %v18859_v63  ;;  %v798_v63 = vld [vmem:[#allocation7 + $0x6c8] sm:$0xff] }
 0x307   : > { %7402 = vmatpush2.bf16.msra.mxu0 %v18346_v6  ;;  %v18125_v6 = vcombine.high %v782_v62, %v798_v63 }
 0x308   : > { %7403 = vmatprep.subr.bf16.mxu0 %v18315_v8  ;;  %v750_v8 = vld [vmem:[#allocation7 + $0x548] sm:$0xff] }
 0x309   : > { %7443 = vmatpush2.bf16.msra.mxu1 %v18858_v7  ;;  %v18637_v7 = vcombine.high %v1294_v0, %v1310_v1  ;;  %v654_v0 = vld [vmem:[#allocation7 + $0x248] sm:$0xff] }
 0x30a   : > { %7444 = vmatprep.subr.bf16.mxu1 %v18827_v10  ;;  %v766_v10 = vld [vmem:[#allocation7 + $0x5c8] sm:$0xff] }
 0x30b   : > { %7404 = vmatpush2.bf16.msra.mxu0 %v18314_v17  ;;  %v18093_v35 = vcombine.high %v750_v8, %v766_v10  ;;  %v670_v1 = vld [vmem:[#allocation7 + $0x2c8] sm:$0xff] }
 0x30c   : > { %7405 = vmatprep.subr.bf16.mxu0 %v18283_v20  ;;  %v8095_v20 = vrot.slane %v23013_v52, %v22967_v31 }
 0x30d   : > { %7445 = vmatpush2.bf16.msra.mxu1 %v18826_v18  ;;  %v8295_v18 = vrot.slane %v23015_v4, %v22964_v27 }
 0x30e   : > { %7446 = vmatprep.subr.bf16.mxu1 %v18795_v22  ;;  %v18124_v22 = vcombine.low %v782_v62, %v798_v63 }
 0x30f   : > { %7406 = vmatpush2.bf16.msra.mxu0 %v18282_v26 }
 0x310   : > { %7407 = vmatprep.subr.bf16.mxu0 %v18251_v29  ;;  %v718_v29 = vld [vmem:[#allocation7 + $0x448] sm:$0xff] }
 0x311   : > { %7447 = vmatpush2.bf16.msra.mxu1 %v18794_v28  ;;  %v18605_v28 = vcombine.high %v1262_v13, %v1278_v14  ;;  %v638_v13 = vld [vmem:[#allocation7 + $0x1c8] sm:$0xff] }
 0x312   : > { %7448 = vmatprep.subr.bf16.mxu1 %v18763_v30  ;;  %v734_v30 = vld [vmem:[#allocation7 + $0x4c8] sm:$0xff] }
 0x313   : > { %7408 = vmatpush2.bf16.msra.mxu0 %v18250_v37  ;;  %v1230_v37 = vld [vmem:[#allocation7 + $0x1448] sm:$0xff] }
 0x314   : > { %7409 = vmatprep.subr.bf16.mxu0 %v18219_v39  ;;  %v1134_v14 = vld [vmem:[#allocation7 + $0x1148] sm:$0xff] }
 0x315   : > { %7449 = vmatpush2.bf16.msra.mxu1 %v18762_v38  ;;  %v1246_v38 = vld [vmem:[#allocation7 + $0x14c8] sm:$0xff] }
 0x316   : > { %7450 = vmatprep.subr.bf16.mxu1 %v18731_v40  ;;  %v18092_v40 = vcombine.low %v750_v8, %v766_v10  ;;  %v17997_v10 = vcombine.high %v654_v0, %v670_v1 }
 0x317   : > { %7410 = vmatpush2.bf16.msra.mxu0 %v18218_v46  ;;  %v18061_v46 = vcombine.high %v718_v29, %v734_v30 }
 0x318   : > { %7411 = vmatprep.subr.bf16.mxu0 %v18187_v50  ;;  %v18573_v50 = vcombine.high %v1230_v37, %v1246_v38 }
 0x319   : > { %7451 = vmatpush2.bf16.msra.mxu1 %v18730_v48 }
 0x31a   : > { %7452 = vmatprep.subr.bf16.mxu1 %v18699_v51  ;;  %v686_v51 = vld [vmem:[#allocation7 + $0x348] sm:$0xff] }
 0x31b   : > { %7412 = vmatpush2.bf16.msra.mxu0 %v18186_v56  ;;  %v1214_v56 = vld [vmem:[#allocation7 + $0x13c8] sm:$0xff]  ;;  %v18029_v62 = vcombine.high %v686_v51, %v702_v47 }
 0x31c   : > { %7463 = vmatprep.subr.bf16.mxu0 %v18157_v60  ;;  %v18541_v63 = vcombine.high %v1198_v55, %v1214_v56  ;;  %v18540_v8 = vcombine.low %v1198_v55, %v1214_v56  ;;  %v1518_v55 = vld [vmem:[#allocation7 + $0x1d48] sm:$0xff] }
 0x31d   : > { %7453 = vmatpush2.bf16.msra.mxu1 %v18698_v57  ;;  %v18060_v57 = vcombine.low %v718_v29, %v734_v30  ;;  %v1534_v56 = vld [vmem:[#allocation7 + $0x1dc8] sm:$0xff] }
 0x31e   : > { %7504 = vmatprep.subr.bf16.mxu1 %v18669_v61  ;;  %v7169_v11 = vpop.f32.mrf.mxu0  ;;  %7414 = vmatmul.mubr.bf16.vlgmr.msra.gmra.mxu0 %v22923_v16  ;;  %v18572_v61 = vcombine.low %v1230_v37, %v1246_v38  ;;  %v1598_v37 = vld [vmem:[#allocation7 + $0x1fc8] sm:$0xff] }
 0x31f   : > { %7464 = vmatpush1.bf16.msra.mxu0 %v18156_v2  ;;  %7495 = vmatprep.mubr.bf16.mxu0 %v22917_v58 }
 0x320   : > { %v7210_v17 = vpop.f32.mrf.mxu1  ;;  %7455 = vmatmul.mubr.bf16.vlgmr.msra.gmra.mxu1 %v22925_v19  ;;  %v7171_v24 = vpop.f32.mrf.mxu0  ;;  %7465 = vmatprep.subr.bf16.mxu0 %v18125_v6  ;;  %v1182_v6 = vld [vmem:[#allocation7 + $0x12c8] sm:$0xff] }
 0x321   : > { %v7211_v23 = vadd.f32 %v7210_v17, %v7169_v11  ;;  %7505 = vmatpush1.bf16.msra.mxu1 %v18668_v3  ;;  %7536 = vmatprep.mubr.bf16.mxu1 %v22919_v59  ;;  %v1166_v3 = vld [vmem:[#allocation7 + $0x1248] sm:$0xff] }
 0x322   : > { %v7212_v26 = vpop.f32.mrf.mxu1  ;;  %7506 = vmatprep.subr.bf16.mxu1 %v18637_v7  ;;  %v7173_v36 = vpop.f32.mrf.mxu0  ;;  %v18028_v7 = vcombine.low %v686_v51, %v702_v47  ;;  %v18509_v11 = vcombine.high %v1166_v3, %v1182_v6  ;;  %v1150_v17 = vld [vmem:[#allocation7 + $0x11c8] sm:$0xff] }
 0x323   : > { %v8218_v32 = vmul.f32 %v8091_v12, %v7211_v23  ;;  %v7213_v33 = vadd.f32 %v7212_v26, %v7171_v24  ;;  %7466 = vmatpush1.bf16.msra.mxu0 %v18124_v22  ;;  %v622_v12 = vld [vmem:[#allocation7 + $0x148] sm:$0xff]  ;;  %v18477_v23 = vcombine.high %v1134_v14, %v1150_v17  ;;  %v18476_v29 = vcombine.low %v1134_v14, %v1150_v17 }
 0x324   : > { %v7214_v39 = vpop.f32.mrf.mxu1  ;;  %v7174_v45 = vpop.f32.mrf.mxu0  ;;  %7467 = vmatprep.subr.bf16.mxu0 %v18093_v35  ;;  %v17965_v22 = vcombine.high %v622_v12, %v638_v13  ;;  %v590_v24 = vld [vmem:[#allocation7 + $0x48] sm:$0xff] }
 0x325   : > { %v8422_v42 = vadd.f32 %v8295_v18, %v8218_v32  ;;  %v8219_v43 = vmul.f32 %v8095_v20, %v7213_v33  ;;  %7507 = vmatpush1.bf16.msra.mxu1 %v18636_v25  ;;  %v17996_v18 = vcombine.low %v654_v0, %v670_v1  ;;  %v18508_v20 = vcombine.low %v1166_v3, %v1182_v6  ;;  %v606_v25 = vld [vmem:[#allocation7 + $0xc8] sm:$0xff] }
 0x326   : > { %v7215_v48 = vpop.f32.mrf.mxu1  ;;  %7508 = vmatprep.subr.bf16.mxu1 %v18605_v28  ;;  %v1102_v35 = vld [vmem:[#allocation7 + $0x1048] sm:$0xff]  ;;  %v17964_v28 = vcombine.low %v622_v12, %v638_v13  ;;  %v17933_v30 = vcombine.high %v590_v24, %v606_v25  ;;  %v17932_v38 = vcombine.low %v590_v24, %v606_v25  ;;  %v18860_v6 = vcombine.low %v1518_v55, %v1534_v56 }
 0x327   : > { %v8454_v53 = vmax.f32 %v8422_v42, 0.0  ;;  %v8423_v54 = vadd.f32 %v8299_v34, %v8219_v43  ;;  %7468 = vmatpush1.bf16.msra.mxu0 %v18092_v40  ;;  %v1118_v26 = vld [vmem:[#allocation7 + $0x10c8] sm:$0xff] }
 0x328   : > { %7469 = vmatprep.subr.bf16.mxu0 %v18061_v46  ;;  %v18445_v32 = vcombine.high %v1102_v35, %v1118_v26  ;;  %v1070_v33 = vld [vmem:[#allocation7 + $0xf48] sm:$0xff]  ;;  %v18444_v39 = vcombine.low %v1102_v35, %v1118_v26 }
 0x329   : > { %8486 = vst [vmem:[#allocation18 + $0x50] sm:$0xff] %v8454_v53  ;;  %v8455_v60 = vmax.f32 %v8423_v54, 0.0  ;;  %7509 = vmatpush1.bf16.msra.mxu1 %v18604_v41  ;;  %v1086_v34 = vld [vmem:[#allocation7 + $0xfc8] sm:$0xff] }
 0x32a   : > { %7510 = vmatprep.subr.bf16.mxu1 %v18573_v50  ;;  %v1582_v36 = vld [vmem:[#allocation7 + $0x1f48] sm:$0xff]  ;;  %v18413_v40 = vcombine.high %v1070_v33, %v1086_v34  ;;  %v18412_v48 = vcombine.low %v1070_v33, %v1086_v34 }
 0x32b   : > { %8487 = vst [vmem:[#allocation18 + $0x58] sm:$0xff] %v8455_v60  ;;  %v20192_v2 = vpack.c.bf16 %v8455_v60, %v8454_v53  ;;  %7470 = vmatpush1.bf16.msra.mxu0 %v18060_v57  ;;  %v18925_v41 = vcombine.high %v1582_v36, %v1598_v37  ;;  %v1038_v42 = vld [vmem:[#allocation7 + $0xe48] sm:$0xff]  ;;  %v18924_v50 = vcombine.low %v1582_v36, %v1598_v37 }
 0x32c   : > { %7471 = vmatprep.subr.bf16.mxu0 %v18029_v62  ;;  %v1054_v43 = vld [vmem:[#allocation7 + $0xec8] sm:$0xff]  ;;  %v18861_v62 = vcombine.high %v1518_v55, %v1534_v56 }
 0x32d   : > { %8641 = vst [vmem:[#allocation2 + $0x68] sm:$0xff] %v20192_v2  ;;  %7511 = vmatpush1.bf16.msra.mxu1 %v18572_v61  ;;  %v1550_v45 = vld [vmem:[#allocation7 + $0x1e48] sm:$0xff]  ;;  %v18381_v51 = vcombine.high %v1038_v42, %v1054_v43  ;;  %v18380_v57 = vcombine.low %v1038_v42, %v1054_v43 }
 0x32e   : > { %7512 = vmatprep.subr.bf16.mxu1 %v18541_v63  ;;  %v1566_v46 = vld [vmem:[#allocation7 + $0x1ec8] sm:$0xff] }
 0x32f   : > { %7472 = vmatpush1.bf16.msra.mxu0 %v18028_v7  ;;  %v18893_v47 = vcombine.high %v1550_v45, %v1566_v46  ;;  %v1006_v53 = vld [vmem:[#allocation7 + $0xd48] sm:$0xff]  ;;  %v18892_v60 = vcombine.low %v1550_v45, %v1566_v46 }
 0x330   : > { %7473 = vmatprep.subr.bf16.mxu0 %v17997_v10  ;;  %v1022_v54 = vld [vmem:[#allocation7 + $0xdc8] sm:$0xff] }
 0x331   : > { %7513 = vmatpush1.bf16.msra.mxu1 %v18540_v8  ;;  %v18349_v61 = vcombine.high %v1006_v53, %v1022_v54  ;;  %v974_v63 = vld [vmem:[#allocation7 + $0xc48] sm:$0xff]  ;;  %v18348_v3 = vcombine.low %v1006_v53, %v1022_v54  ;;  %v1327_v53 = vld [vmem:[#allocation7 + $0x1750] sm:$0xff] }
 0x332   : > { %7514 = vmatprep.subr.bf16.mxu1 %v18509_v11  ;;  %v990_v0 = vld [vmem:[#allocation7 + $0xcc8] sm:$0xff]  ;;  %v1343_v54 = vld [vmem:[#allocation7 + $0x17d0] sm:$0xff] }
 0x333   : > { %7474 = vmatpush1.bf16.msra.mxu0 %v17996_v18  ;;  %v1486_v1 = vld [vmem:[#allocation7 + $0x1c48] sm:$0xff]  ;;  %v18317_v7 = vcombine.high %v974_v63, %v990_v0  ;;  %v18316_v14 = vcombine.low %v974_v63, %v990_v0  ;;  %v1295_v63 = vld [vmem:[#allocation7 + $0x1650] sm:$0xff] }
 0x334   : > { %7475 = vmatprep.subr.bf16.mxu0 %v17965_v22  ;;  %v1502_v2 = vld [vmem:[#allocation7 + $0x1cc8] sm:$0xff]  ;;  %v1311_v0 = vld [vmem:[#allocation7 + $0x16d0] sm:$0xff] }
 0x335   : > { %7515 = vmatpush1.bf16.msra.mxu1 %v18508_v20  ;;  %v18829_v8 = vcombine.high %v1486_v1, %v1502_v2  ;;  %v942_v10 = vld [vmem:[#allocation7 + $0xb48] sm:$0xff]  ;;  %v18828_v17 = vcombine.low %v1486_v1, %v1502_v2  ;;  %v18670_v2 = vcombine.low %v1327_v53, %v1343_v54 }
 0x336   : > { %7516 = vmatprep.subr.bf16.mxu1 %v18477_v23  ;;  %v958_v11 = vld [vmem:[#allocation7 + $0xbc8] sm:$0xff] }
 0x337   : > { %7476 = vmatpush1.bf16.msra.mxu0 %v17964_v28  ;;  %v1454_v12 = vld [vmem:[#allocation7 + $0x1b48] sm:$0xff]  ;;  %v18285_v18 = vcombine.high %v942_v10, %v958_v11  ;;  %v18284_v35 = vcombine.low %v942_v10, %v958_v11  ;;  %v8099_v11 = vrot.slane %v23013_v52, %v22982_v15 }
 0x338   : > { %7477 = vmatprep.subr.bf16.mxu0 %v17933_v30  ;;  %v1470_v13 = vld [vmem:[#allocation7 + $0x1bc8] sm:$0xff] }
 0x339   : > { %7517 = vmatpush1.bf16.msra.mxu1 %v18476_v29  ;;  %v18797_v20 = vcombine.high %v1454_v12, %v1470_v13  ;;  %v910_v22 = vld [vmem:[#allocation7 + $0xa48] sm:$0xff]  ;;  %v18796_v26 = vcombine.low %v1454_v12, %v1470_v13  ;;  %v1263_v12 = vld [vmem:[#allocation7 + $0x1550] sm:$0xff] }
 0x33a   : > { %7518 = vmatprep.subr.bf16.mxu1 %v18445_v32  ;;  %v926_v23 = vld [vmem:[#allocation7 + $0xac8] sm:$0xff]  ;;  %v1279_v13 = vld [vmem:[#allocation7 + $0x15d0] sm:$0xff] }
 0x33b   : > { %7478 = vmatpush1.bf16.msra.mxu0 %v17932_v38  ;;  %v1422_v24 = vld [vmem:[#allocation7 + $0x1a48] sm:$0xff]  ;;  %v18253_v28 = vcombine.high %v910_v22, %v926_v23  ;;  %v18252_v36 = vcombine.low %v910_v22, %v926_v23 }
 0x33c   : > { %7479 = vmatprep.subr.bf16.mxu0 %v18413_v40  ;;  %v1438_v25 = vld [vmem:[#allocation7 + $0x1ac8] sm:$0xff] }
 0x33d   : > { %7519 = vmatpush1.bf16.msra.mxu1 %v18444_v39  ;;  %v18765_v29 = vcombine.high %v1422_v24, %v1438_v25  ;;  %v878_v30 = vld [vmem:[#allocation7 + $0x948] sm:$0xff]  ;;  %v18764_v37 = vcombine.low %v1422_v24, %v1438_v25  ;;  %v18638_v24 = vcombine.low %v1295_v63, %v1311_v0 }
 0x33e   : > { %7520 = vmatprep.subr.bf16.mxu1 %v18925_v41  ;;  %v894_v32 = vld [vmem:[#allocation7 + $0x9c8] sm:$0xff] }
 0x33f   : > { %7480 = vmatpush2.bf16.msra.mxu0 %v18412_v48  ;;  %v1390_v33 = vld [vmem:[#allocation7 + $0x1948] sm:$0xff]  ;;  %v18221_v38 = vcombine.high %v878_v30, %v894_v32  ;;  %v18220_v45 = vcombine.low %v878_v30, %v894_v32 }
 0x340   : > { %7481 = vmatprep.subr.bf16.mxu0 %v18381_v51  ;;  %v1406_v34 = vld [vmem:[#allocation7 + $0x19c8] sm:$0xff]  ;;  %v815_v51 = vld [vmem:[#allocation7 + $0x750] sm:$0xff] }
 0x341   : > { %7521 = vmatpush2.bf16.msra.mxu1 %v18924_v50  ;;  %v18733_v39 = vcombine.high %v1390_v33, %v1406_v34  ;;  %v846_v40 = vld [vmem:[#allocation7 + $0x848] sm:$0xff]  ;;  %v18732_v46 = vcombine.low %v1390_v33, %v1406_v34  ;;  %v8307_v33 = vrot.slane %v23015_v4, %v22985_v21  ;;  %v1231_v34 = vld [vmem:[#allocation7 + $0x1450] sm:$0xff] }
 0x342   : > { %7522 = vmatprep.subr.bf16.mxu1 %v18893_v47  ;;  %v862_v41 = vld [vmem:[#allocation7 + $0x8c8] sm:$0xff]  ;;  %v831_v47 = vld [vmem:[#allocation7 + $0x7d0] sm:$0xff] }
 0x343   : > { %7482 = vmatpush2.bf16.msra.mxu0 %v18380_v57  ;;  %v1358_v42 = vld [vmem:[#allocation7 + $0x1848] sm:$0xff]  ;;  %v18189_v48 = vcombine.high %v846_v40, %v862_v41  ;;  %v18188_v55 = vcombine.low %v846_v40, %v862_v41  ;;  %v18159_v57 = vcombine.high %v815_v51, %v831_v47  ;;  %v18158_v1 = vcombine.low %v815_v51, %v831_v47  ;;  %v1199_v47 = vld [vmem:[#allocation7 + $0x1350] sm:$0xff] }
 0x344   : > { %7483 = vmatprep.subr.bf16.mxu0 %v18349_v61  ;;  %v1374_v43 = vld [vmem:[#allocation7 + $0x18c8] sm:$0xff]  ;;  %v783_v61 = vld [vmem:[#allocation7 + $0x650] sm:$0xff] }
 0x345   : > { %7523 = vmatpush2.bf16.msra.mxu1 %v18892_v60  ;;  %v18701_v50 = vcombine.high %v1358_v42, %v1374_v43  ;;  %v18700_v56 = vcombine.low %v1358_v42, %v1374_v43  ;;  %v18671_v60 = vcombine.high %v1327_v53, %v1343_v54  ;;  %v1215_v53 = vld [vmem:[#allocation7 + $0x13d0] sm:$0xff] }
 0x346   : > { %7524 = vmatprep.subr.bf16.mxu1 %v18861_v62  ;;  %v799_v62 = vld [vmem:[#allocation7 + $0x6d0] sm:$0xff] }
 0x347   : > { %7484 = vmatpush2.bf16.msra.mxu0 %v18348_v3  ;;  %v18127_v3 = vcombine.high %v783_v61, %v799_v62 }
 0x348   : > { %7485 = vmatprep.subr.bf16.mxu0 %v18317_v7  ;;  %v751_v7 = vld [vmem:[#allocation7 + $0x550] sm:$0xff] }
 0x349   : > { %7525 = vmatpush2.bf16.msra.mxu1 %v18860_v6  ;;  %v18639_v6 = vcombine.high %v1295_v63, %v1311_v0  ;;  %v1167_v0 = vld [vmem:[#allocation7 + $0x1250] sm:$0xff] }
 0x34a   : > { %7526 = vmatprep.subr.bf16.mxu1 %v18829_v8  ;;  %v767_v8 = vld [vmem:[#allocation7 + $0x5d0] sm:$0xff] }
 0x34b   : > { %7486 = vmatpush2.bf16.msra.mxu0 %v18316_v14  ;;  %v18095_v25 = vcombine.high %v751_v7, %v767_v8 }
 0x34c   : > { %7487 = vmatprep.subr.bf16.mxu0 %v18285_v18  ;;  %v8103_v18 = vrot.slane %v23013_v52, %v22985_v21 }
 0x34d   : > { %7527 = vmatpush2.bf16.msra.mxu1 %v18828_v17  ;;  %v8303_v17 = vrot.slane %v23015_v4, %v22982_v15  ;;  %v703_v4 = vld [vmem:[#allocation7 + $0x3d0] sm:$0xff] }
 0x34e   : > { %7528 = vmatprep.subr.bf16.mxu1 %v18797_v20  ;;  %v18126_v20 = vcombine.low %v783_v61, %v799_v62  ;;  %v655_v61 = vld [vmem:[#allocation7 + $0x250] sm:$0xff] }
 0x34f   : > { %7488 = vmatpush2.bf16.msra.mxu0 %v18284_v35  ;;  %v671_v62 = vld [vmem:[#allocation7 + $0x2d0] sm:$0xff] }
 0x350   : > { %7489 = vmatprep.subr.bf16.mxu0 %v18253_v28  ;;  %v719_v28 = vld [vmem:[#allocation7 + $0x450] sm:$0xff] }
 0x351   : > { %7529 = vmatpush2.bf16.msra.mxu1 %v18796_v26  ;;  %v18607_v26 = vcombine.high %v1263_v12, %v1279_v13 }
 0x352   : > { %7530 = vmatprep.subr.bf16.mxu1 %v18765_v29  ;;  %v735_v29 = vld [vmem:[#allocation7 + $0x4d0] sm:$0xff] }
 0x353   : > { %7490 = vmatpush2.bf16.msra.mxu0 %v18252_v36  ;;  %v1247_v36 = vld [vmem:[#allocation7 + $0x14d0] sm:$0xff]  ;;  %v18063_v43 = vcombine.high %v719_v28, %v735_v29  ;;  %v18062_v54 = vcombine.low %v719_v28, %v735_v29 }
 0x354   : > { %7491 = vmatprep.subr.bf16.mxu0 %v18221_v38  ;;  %v18094_v38 = vcombine.low %v751_v7, %v767_v8  ;;  %v623_v8 = vld [vmem:[#allocation7 + $0x150] sm:$0xff] }
 0x355   : > { %7531 = vmatpush2.bf16.msra.mxu1 %v18764_v37  ;;  %v1071_v29 = vld [vmem:[#allocation7 + $0xf50] sm:$0xff] }
 0x356   : > { %7532 = vmatprep.subr.bf16.mxu1 %v18733_v39  ;;  %v18606_v39 = vcombine.low %v1263_v12, %v1279_v13  ;;  %v1151_v12 = vld [vmem:[#allocation7 + $0x11d0] sm:$0xff]  ;;  %v17998_v13 = vcombine.low %v655_v61, %v671_v62 }
 0x357   : > { %7492 = vmatpush2.bf16.msra.mxu0 %v18220_v45 }
 0x358   : > { %7493 = vmatprep.subr.bf16.mxu0 %v18189_v48  ;;  %v687_v48 = vld [vmem:[#allocation7 + $0x350] sm:$0xff] }
 0x359   : > { %7533 = vmatpush2.bf16.msra.mxu1 %v18732_v46  ;;  %v18575_v46 = vcombine.high %v1231_v34, %v1247_v36 }
 0x35a   : > { %7534 = vmatprep.subr.bf16.mxu1 %v18701_v50 }
 0x35b   : > { %7494 = vmatpush2.bf16.msra.mxu0 %v18188_v55 }
 0x35c   : > { %7545 = vmatprep.subr.bf16.mxu0 %v18159_v57  ;;  %v18031_v57 = vcombine.high %v687_v48, %v703_v4 }
 0x35d   : > { %7535 = vmatpush2.bf16.msra.mxu1 %v18700_v56  ;;  %v18574_v56 = vcombine.low %v1231_v34, %v1247_v36 }
 0x35e   : > { %7586 = vmatprep.subr.bf16.mxu1 %v18671_v60  ;;  %v7251_v10 = vpop.f32.mrf.mxu0  ;;  %7496 = vmatmul.mubr.bf16.vlgmr.msra.gmra.mxu0 %v22923_v16  ;;  %v18543_v60 = vcombine.high %v1199_v47, %v1215_v53 }
 0x35f   : > { %7546 = vmatpush1.bf16.msra.mxu0 %v18158_v1  ;;  %7577 = vmatprep.mubr.bf16.mxu0 %v22917_v58  ;;  %v1183_v1 = vld [vmem:[#allocation7 + $0x12d0] sm:$0xff] }
 0x360   : > { %v7292_v14 = vpop.f32.mrf.mxu1  ;;  %7537 = vmatmul.mubr.bf16.vlgmr.msra.gmra.mxu1 %v22925_v19  ;;  %v7253_v23 = vpop.f32.mrf.mxu0  ;;  %7547 = vmatprep.subr.bf16.mxu0 %v18127_v3  ;;  %v18542_v3 = vcombine.low %v1199_v47, %v1215_v53  ;;  %v18511_v7 = vcombine.high %v1167_v0, %v1183_v1 }
 0x361   : > { %v7293_v22 = vadd.f32 %v7292_v14, %v7251_v10  ;;  %7587 = vmatpush1.bf16.msra.mxu1 %v18670_v2  ;;  %7618 = vmatprep.mubr.bf16.mxu1 %v22919_v59  ;;  %v18030_v2 = vcombine.low %v687_v48, %v703_v4  ;;  %v639_v10 = vld [vmem:[#allocation7 + $0x1d0] sm:$0xff]  ;;  %v18510_v14 = vcombine.low %v1167_v0, %v1183_v1 }
 0x362   : > { %v7294_v35 = vpop.f32.mrf.mxu1  ;;  %7588 = vmatprep.subr.bf16.mxu1 %v18639_v6  ;;  %v7255_v52 = vpop.f32.mrf.mxu0  ;;  %v17999_v6 = vcombine.high %v655_v61, %v671_v62  ;;  %v1007_v48 = vld [vmem:[#allocation7 + $0xd50] sm:$0xff] }
 0x363   : > { %v8220_v30 = vmul.f32 %v8099_v11, %v7293_v22  ;;  %v7295_v32 = vadd.f32 %v7294_v35, %v7253_v23  ;;  %7548 = vmatpush1.bf16.msra.mxu0 %v18126_v20  ;;  %v1135_v11 = vld [vmem:[#allocation7 + $0x1150] sm:$0xff] }
 0x364   : > { %v7296_v37 = vpop.f32.mrf.mxu1  ;;  %v7256_v42 = vpop.f32.mrf.mxu0  ;;  %7549 = vmatprep.subr.bf16.mxu0 %v18095_v25  ;;  %v591_v20 = vld [vmem:[#allocation7 + $0x50] sm:$0xff]  ;;  %v17966_v25 = vcombine.low %v623_v8, %v639_v10  ;;  %v18478_v35 = vcombine.low %v1135_v11, %v1151_v12 }
 0x365   : > { %v8424_v40 = vadd.f32 %v8303_v17, %v8220_v30  ;;  %v8221_v41 = vmul.f32 %v8103_v18, %v7295_v32  ;;  %7589 = vmatpush1.bf16.msra.mxu1 %v18638_v24  ;;  %v17967_v17 = vcombine.high %v623_v8, %v639_v10  ;;  %v18479_v18 = vcombine.high %v1135_v11, %v1151_v12  ;;  %v607_v22 = vld [vmem:[#allocation7 + $0xd0] sm:$0xff] }
 0x366   : > { %v7297_v45 = vpop.f32.mrf.mxu1  ;;  %7590 = vmatprep.subr.bf16.mxu1 %v18607_v26  ;;  %v1103_v23 = vld [vmem:[#allocation7 + $0x1050] sm:$0xff]  ;;  %v17935_v26 = vcombine.high %v591_v20, %v607_v22  ;;  %v17934_v52 = vcombine.low %v591_v20, %v607_v22 }
 0x367   : > { %v8456_v50 = vmax.f32 %v8424_v40, 0.0  ;;  %v8425_v51 = vadd.f32 %v8307_v33, %v8221_v41  ;;  %7550 = vmatpush1.bf16.msra.mxu0 %v18094_v38  ;;  %v1119_v24 = vld [vmem:[#allocation7 + $0x10d0] sm:$0xff] }
 0x368   : > { %7551 = vmatprep.subr.bf16.mxu0 %v18063_v43  ;;  %v18447_v28 = vcombine.high %v1103_v23, %v1119_v24  ;;  %v1087_v30 = vld [vmem:[#allocation7 + $0xfd0] sm:$0xff]  ;;  %v18446_v34 = vcombine.low %v1103_v23, %v1119_v24 }
 0x369   : > { %8488 = vst [vmem:[#allocation18 + $0x60] sm:$0xff] %v8456_v50  ;;  %v8457_v55 = vmax.f32 %v8425_v51, 0.0  ;;  %7591 = vmatpush1.bf16.msra.mxu1 %v18606_v39  ;;  %v1583_v32 = vld [vmem:[#allocation7 + $0x1f50] sm:$0xff]  ;;  %v18415_v36 = vcombine.high %v1071_v29, %v1087_v30  ;;  %v18414_v42 = vcombine.low %v1071_v29, %v1087_v30 }
 0x36a   : > { %7592 = vmatprep.subr.bf16.mxu1 %v18575_v46  ;;  %v1599_v33 = vld [vmem:[#allocation7 + $0x1fd0] sm:$0xff] }
 0x36b   : > { %8489 = vst [vmem:[#allocation18 + $0x68] sm:$0xff] %v8457_v55  ;;  %v20193_v63 = vpack.c.bf16 %v8457_v55, %v8456_v50  ;;  %7552 = vmatpush1.bf16.msra.mxu0 %v18062_v54  ;;  %v18927_v37 = vcombine.high %v1583_v32, %v1599_v33  ;;  %v1039_v38 = vld [vmem:[#allocation7 + $0xe50] sm:$0xff]  ;;  %v18926_v43 = vcombine.low %v1583_v32, %v1599_v33 }
 0x36c   : > { %7553 = vmatprep.subr.bf16.mxu0 %v18031_v57  ;;  %v1055_v39 = vld [vmem:[#allocation7 + $0xed0] sm:$0xff] }
 0x36d   : > { %8642 = vst [vmem:[#allocation2 + $0x8] sm:$0xff] %v20193_v63  ;;  %7593 = vmatpush1.bf16.msra.mxu1 %v18574_v56  ;;  %v1551_v40 = vld [vmem:[#allocation7 + $0x1e50] sm:$0xff]  ;;  %v18383_v45 = vcombine.high %v1039_v38, %v1055_v39  ;;  %v18382_v47 = vcombine.low %v1039_v38, %v1055_v39 }
 0x36e   : > { %7594 = vmatprep.subr.bf16.mxu1 %v18543_v60  ;;  %v1567_v41 = vld [vmem:[#allocation7 + $0x1ed0] sm:$0xff] }
 0x36f   : > { %7554 = vmatpush1.bf16.msra.mxu0 %v18030_v2  ;;  %v18895_v46 = vcombine.high %v1551_v40, %v1567_v41  ;;  %v1023_v4 = vld [vmem:[#allocation7 + $0xdd0] sm:$0xff]  ;;  %v18894_v53 = vcombine.low %v1551_v40, %v1567_v41 }
 0x370   : > { %7555 = vmatprep.subr.bf16.mxu0 %v17999_v6  ;;  %v1519_v50 = vld [vmem:[#allocation7 + $0x1d50] sm:$0xff]  ;;  %v18351_v54 = vcombine.high %v1007_v48, %v1023_v4  ;;  %v18350_v62 = vcombine.low %v1007_v48, %v1023_v4 }
 0x371   : > { %7595 = vmatpush1.bf16.msra.mxu1 %v18542_v3  ;;  %v1535_v51 = vld [vmem:[#allocation7 + $0x1dd0] sm:$0xff] }
 0x372   : > { %7596 = vmatprep.subr.bf16.mxu1 %v18511_v7  ;;  %v18863_v55 = vcombine.high %v1519_v50, %v1535_v51  ;;  %v975_v56 = vld [vmem:[#allocation7 + $0xc50] sm:$0xff]  ;;  %v18862_v63 = vcombine.low %v1519_v50, %v1535_v51 }
 0x373   : > { %7556 = vmatpush1.bf16.msra.mxu0 %v17998_v13  ;;  %v991_v57 = vld [vmem:[#allocation7 + $0xcd0] sm:$0xff] }
 0x374   : > { %7557 = vmatprep.subr.bf16.mxu0 %v17967_v17  ;;  %v1487_v60 = vld [vmem:[#allocation7 + $0x1c50] sm:$0xff]  ;;  %v18319_v0 = vcombine.high %v975_v56, %v991_v57  ;;  %v18318_v8 = vcombine.low %v975_v56, %v991_v57 }
 0x375   : > { %7597 = vmatpush1.bf16.msra.mxu1 %v18510_v14  ;;  %v1503_v61 = vld [vmem:[#allocation7 + $0x1cd0] sm:$0xff] }
 0x376   : > { %7598 = vmatprep.subr.bf16.mxu1 %v18479_v18  ;;  %v18831_v1 = vcombine.high %v1487_v60, %v1503_v61  ;;  %v943_v2 = vld [vmem:[#allocation7 + $0xb50] sm:$0xff]  ;;  %v18830_v10 = vcombine.low %v1487_v60, %v1503_v61 }
 0x377   : > { %7558 = vmatpush1.bf16.msra.mxu0 %v17966_v25  ;;  %v959_v3 = vld [vmem:[#allocation7 + $0xbd0] sm:$0xff] }
 0x378   : > { %7559 = vmatprep.subr.bf16.mxu0 %v17935_v26  ;;  %v1455_v6 = vld [vmem:[#allocation7 + $0x1b50] sm:$0xff]  ;;  %v18287_v11 = vcombine.high %v943_v2, %v959_v3  ;;  %v18286_v20 = vcombine.low %v943_v2, %v959_v3  ;;  %v1264_v3 = vld [vmem:[#allocation7 + $0x1558] sm:$0xff] }
 0x379   : > { %7599 = vmatpush1.bf16.msra.mxu1 %v18478_v35  ;;  %v1471_v7 = vld [vmem:[#allocation7 + $0x1bd0] sm:$0xff] }
 0x37a   : > { %7600 = vmatprep.subr.bf16.mxu1 %v18447_v28  ;;  %v18799_v12 = vcombine.high %v1455_v6, %v1471_v7  ;;  %v911_v13 = vld [vmem:[#allocation7 + $0xa50] sm:$0xff]  ;;  %v18798_v22 = vcombine.low %v1455_v6, %v1471_v7  ;;  %v1280_v6 = vld [vmem:[#allocation7 + $0x15d8] sm:$0xff] }
 0x37b   : > { %7560 = vmatpush1.bf16.msra.mxu0 %v17934_v52  ;;  %v927_v14 = vld [vmem:[#allocation7 + $0xad0] sm:$0xff] }
 0x37c   : > { %7561 = vmatprep.subr.bf16.mxu0 %v18415_v36  ;;  %v1423_v17 = vld [vmem:[#allocation7 + $0x1a50] sm:$0xff]  ;;  %v18255_v23 = vcombine.high %v911_v13, %v927_v14  ;;  %v18254_v29 = vcombine.low %v911_v13, %v927_v14 }
 0x37d   : > { %7601 = vmatpush1.bf16.msra.mxu1 %v18446_v34  ;;  %v1439_v18 = vld [vmem:[#allocation7 + $0x1ad0] sm:$0xff] }
 0x37e   : > { %7602 = vmatprep.subr.bf16.mxu1 %v18927_v37  ;;  %v18767_v24 = vcombine.high %v1423_v17, %v1439_v18  ;;  %v879_v25 = vld [vmem:[#allocation7 + $0x950] sm:$0xff]  ;;  %v18766_v30 = vcombine.low %v1423_v17, %v1439_v18 }
 0x37f   : > { %7562 = vmatpush2.bf16.msra.mxu0 %v18414_v42  ;;  %v895_v35 = vld [vmem:[#allocation7 + $0x9d0] sm:$0xff]  ;;  %v816_v42 = vld [vmem:[#allocation7 + $0x758] sm:$0xff] }
 0x380   : > { %7563 = vmatprep.subr.bf16.mxu0 %v18383_v45  ;;  %v1391_v26 = vld [vmem:[#allocation7 + $0x1950] sm:$0xff]  ;;  %v18223_v32 = vcombine.high %v879_v25, %v895_v35  ;;  %v18222_v38 = vcombine.low %v879_v25, %v895_v35  ;;  %v1328_v45 = vld [vmem:[#allocation7 + $0x1758] sm:$0xff] }
 0x381   : > { %7603 = vmatpush2.bf16.msra.mxu1 %v18926_v43  ;;  %v1407_v28 = vld [vmem:[#allocation7 + $0x19d0] sm:$0xff]  ;;  %v832_v43 = vld [vmem:[#allocation7 + $0x7d8] sm:$0xff] }
 0x382   : > { %7604 = vmatprep.subr.bf16.mxu1 %v18895_v46  ;;  %v18735_v33 = vcombine.high %v1391_v26, %v1407_v28  ;;  %v847_v52 = vld [vmem:[#allocation7 + $0x850] sm:$0xff]  ;;  %v18734_v39 = vcombine.low %v1391_v26, %v1407_v28  ;;  %v1344_v46 = vld [vmem:[#allocation7 + $0x17d8] sm:$0xff]  ;;  %v18161_v50 = vcombine.high %v816_v42, %v832_v43  ;;  %v18160_v56 = vcombine.low %v816_v42, %v832_v43 }
 0x383   : > { %7564 = vmatpush2.bf16.msra.mxu0 %v18382_v47  ;;  %v863_v34 = vld [vmem:[#allocation7 + $0x8d0] sm:$0xff]  ;;  %v18673_v51 = vcombine.high %v1328_v45, %v1344_v46  ;;  %v784_v47 = vld [vmem:[#allocation7 + $0x658] sm:$0xff]  ;;  %v18672_v57 = vcombine.low %v1328_v45, %v1344_v46 }
 0x384   : > { %7565 = vmatprep.subr.bf16.mxu0 %v18351_v54  ;;  %v1359_v36 = vld [vmem:[#allocation7 + $0x1850] sm:$0xff]  ;;  %v18191_v40 = vcombine.high %v847_v52, %v863_v34  ;;  %v18190_v48 = vcombine.low %v847_v52, %v863_v34  ;;  %v1296_v54 = vld [vmem:[#allocation7 + $0x1658] sm:$0xff]  ;;  %v18608_v52 = vcombine.low %v1264_v3, %v1280_v6 }
 0x385   : > { %7605 = vmatpush2.bf16.msra.mxu1 %v18894_v53  ;;  %v1375_v37 = vld [vmem:[#allocation7 + $0x18d0] sm:$0xff]  ;;  %v800_v53 = vld [vmem:[#allocation7 + $0x6d8] sm:$0xff] }
 0x386   : > { %7606 = vmatprep.subr.bf16.mxu1 %v18863_v55  ;;  %v18703_v41 = vcombine.high %v1359_v36, %v1375_v37  ;;  %v18702_v4 = vcombine.low %v1359_v36, %v1375_v37  ;;  %v1312_v55 = vld [vmem:[#allocation7 + $0x16d8] sm:$0xff]  ;;  %v18129_v60 = vcombine.high %v784_v47, %v800_v53 }
 0x387   : > { %7566 = vmatpush2.bf16.msra.mxu0 %v18350_v62  ;;  %v18641_v61 = vcombine.high %v1296_v54, %v1312_v55  ;;  %v752_v62 = vld [vmem:[#allocation7 + $0x558] sm:$0xff]  ;;  %v18640_v17 = vcombine.low %v1296_v54, %v1312_v55 }
 0x388   : > { %7567 = vmatprep.subr.bf16.mxu0 %v18319_v0  ;;  %v704_v42 = vld [vmem:[#allocation7 + $0x3d8] sm:$0xff] }
 0x389   : > { %7607 = vmatpush2.bf16.msra.mxu1 %v18862_v63  ;;  %v768_v63 = vld [vmem:[#allocation7 + $0x5d8] sm:$0xff] }
 0x38a   : > { %7608 = vmatprep.subr.bf16.mxu1 %v18831_v1  ;;  %v20383_v1 = vld [vmem:[#allocation9 + $0x10] ss:$2 sm:$0xff]  ;;  %v18097_v18 = vcombine.high %v752_v62, %v768_v63 }
 0x38b   : > { %7568 = vmatpush2.bf16.msra.mxu0 %v18318_v8  ;;  %v8107_v2 = vrot.slane %v20383_v1, %v23000_v5  ;;  %v20384_v8 = vld [vmem:[#allocation9 + $0x11] ss:$2 sm:$0xff] }
 0x38c   : > { %7569 = vmatprep.subr.bf16.mxu0 %v18287_v11  ;;  %v8111_v11 = vrot.slane %v20383_v1, %v23003_v9  ;;  %v8315_v26 = vrot.slane %v20384_v8, %v23003_v9  ;;  %v1200_v46 = vld [vmem:[#allocation7 + $0x1358] sm:$0xff] }
 0x38d   : > { %7609 = vmatpush2.bf16.msra.mxu1 %v18830_v10  ;;  %v8311_v10 = vrot.slane %v20384_v8, %v23000_v5  ;;  %v656_v54 = vld [vmem:[#allocation7 + $0x258] sm:$0xff] }
 0x38e   : > { %7610 = vmatprep.subr.bf16.mxu1 %v18799_v12  ;;  %v18128_v12 = vcombine.low %v784_v47, %v800_v53  ;;  %v672_v55 = vld [vmem:[#allocation7 + $0x2d8] sm:$0xff] }
 0x38f   : > { %7570 = vmatpush2.bf16.msra.mxu0 %v18286_v20  ;;  %v624_v1 = vld [vmem:[#allocation7 + $0x158] sm:$0xff] }
 0x390   : > { %7571 = vmatprep.subr.bf16.mxu0 %v18255_v23  ;;  %v720_v23 = vld [vmem:[#allocation7 + $0x458] sm:$0xff] }
 0x391   : > { %7611 = vmatpush2.bf16.msra.mxu1 %v18798_v22  ;;  %v18609_v22 = vcombine.high %v1264_v3, %v1280_v6  ;;  %v1136_v3 = vld [vmem:[#allocation7 + $0x1158] sm:$0xff] }
 0x392   : > { %7612 = vmatprep.subr.bf16.mxu1 %v18767_v24  ;;  %v736_v24 = vld [vmem:[#allocation7 + $0x4d8] sm:$0xff] }
 0x393   : > { %7572 = vmatpush2.bf16.msra.mxu0 %v18254_v29  ;;  %v1232_v29 = vld [vmem:[#allocation7 + $0x1458] sm:$0xff] }
 0x394   : > { %7573 = vmatprep.subr.bf16.mxu0 %v18223_v32  ;;  %v1152_v6 = vld [vmem:[#allocation7 + $0x11d8] sm:$0xff] }
 0x395   : > { %7613 = vmatpush2.bf16.msra.mxu1 %v18766_v30  ;;  %v1248_v30 = vld [vmem:[#allocation7 + $0x14d8] sm:$0xff] }
 0x396   : > { %7614 = vmatprep.subr.bf16.mxu1 %v18735_v33  ;;  %v18096_v33 = vcombine.low %v752_v62, %v768_v63  ;;  %v18001_v63 = vcombine.high %v656_v54, %v672_v55 }
 0x397   : > { %7574 = vmatpush2.bf16.msra.mxu0 %v18222_v38  ;;  %v18065_v38 = vcombine.high %v720_v23, %v736_v24 }
 0x398   : > { %7575 = vmatprep.subr.bf16.mxu0 %v18191_v40  ;;  %v18577_v40 = vcombine.high %v1232_v29, %v1248_v30 }
 0x399   : > { %7615 = vmatpush2.bf16.msra.mxu1 %v18734_v39 }
 0x39a   : > { %7616 = vmatprep.subr.bf16.mxu1 %v18703_v41  ;;  %v688_v41 = vld [vmem:[#allocation7 + $0x358] sm:$0xff] }
 0x39b   : > { %7576 = vmatpush2.bf16.msra.mxu0 %v18190_v48  ;;  %v1216_v48 = vld [vmem:[#allocation7 + $0x13d8] sm:$0xff]  ;;  %v18033_v47 = vcombine.high %v688_v41, %v704_v42 }
 0x39c   : > { %7627 = vmatprep.subr.bf16.mxu0 %v18161_v50  ;;  %v18545_v53 = vcombine.high %v1200_v46, %v1216_v48  ;;  %v18544_v62 = vcombine.low %v1200_v46, %v1216_v48 }
 0x39d   : > { %7617 = vmatpush2.bf16.msra.mxu1 %v18702_v4  ;;  %v18064_v4 = vcombine.low %v720_v23, %v736_v24  ;;  %v1072_v24 = vld [vmem:[#allocation7 + $0xf58] sm:$0xff] }
 0x39e   : > { %7668 = vmatprep.subr.bf16.mxu1 %v18673_v51  ;;  %v7333_v0 = vpop.f32.mrf.mxu0  ;;  %7578 = vmatmul.mubr.bf16.vlgmr.msra.gmra.mxu0 %v22923_v16  ;;  %v18576_v51 = vcombine.low %v1232_v29, %v1248_v30 }
 0x39f   : > { %7628 = vmatpush1.bf16.msra.mxu0 %v18160_v56  ;;  %7659 = vmatprep.mubr.bf16.mxu0 %v22917_v58 }
 0x3a0   : > { %v7374_v7 = vpop.f32.mrf.mxu1  ;;  %7619 = vmatmul.mubr.bf16.vlgmr.msra.gmra.mxu1 %v22925_v19  ;;  %v7335_v14 = vpop.f32.mrf.mxu0  ;;  %7629 = vmatprep.subr.bf16.mxu0 %v18129_v60  ;;  %v1184_v60 = vld [vmem:[#allocation7 + $0x12d8] sm:$0xff] }
 0x3a1   : > { %v7375_v13 = vadd.f32 %v7374_v7, %v7333_v0  ;;  %7669 = vmatpush1.bf16.msra.mxu1 %v18672_v57  ;;  %7700 = vmatprep.mubr.bf16.mxu1 %v22919_v59  ;;  %v1168_v57 = vld [vmem:[#allocation7 + $0x1258] sm:$0xff]  ;;  %v18000_v7 = vcombine.low %v656_v54, %v672_v55 }
 0x3a2   : > { %v7376_v20 = vpop.f32.mrf.mxu1  ;;  %7670 = vmatprep.subr.bf16.mxu1 %v18641_v61  ;;  %v7337_v28 = vpop.f32.mrf.mxu0  ;;  %v18032_v61 = vcombine.low %v688_v41, %v704_v42  ;;  %v18513_v0 = vcombine.high %v1168_v57, %v1184_v60  ;;  %v18512_v8 = vcombine.low %v1168_v57, %v1184_v60  ;;  %v1008_v41 = vld [vmem:[#allocation7 + $0xd58] sm:$0xff] }
 0x3a3   : > { %v8222_v25 = vmul.f32 %v8107_v2, %v7375_v13  ;;  %v7377_v35 = vadd.f32 %v7376_v20, %v7335_v14  ;;  %7630 = vmatpush1.bf16.msra.mxu0 %v18128_v12  ;;  %v640_v2 = vld [vmem:[#allocation7 + $0x1d8] sm:$0xff]  ;;  %v18480_v20 = vcombine.low %v1136_v3, %v1152_v6 }
 0x3a4   : > { %v7378_v32 = vpop.f32.mrf.mxu1  ;;  %v7338_v37 = vpop.f32.mrf.mxu0  ;;  %7631 = vmatprep.subr.bf16.mxu0 %v18097_v18  ;;  %v592_v12 = vld [vmem:[#allocation7 + $0x58] sm:$0xff]  ;;  %v17968_v18 = vcombine.low %v624_v1, %v640_v2 }
 0x3a5   : > { %v8426_v34 = vadd.f32 %v8311_v10, %v8222_v25  ;;  %v8223_v36 = vmul.f32 %v8111_v11, %v7377_v35  ;;  %7671 = vmatpush1.bf16.msra.mxu1 %v18640_v17  ;;  %v17969_v10 = vcombine.high %v624_v1, %v640_v2  ;;  %v18481_v11 = vcombine.high %v1136_v3, %v1152_v6  ;;  %v608_v13 = vld [vmem:[#allocation7 + $0xd8] sm:$0xff] }
 0x3a6   : > { %v7379_v39 = vpop.f32.mrf.mxu1  ;;  %7672 = vmatprep.subr.bf16.mxu1 %v18609_v22  ;;  %v1104_v14 = vld [vmem:[#allocation7 + $0x1058] sm:$0xff]  ;;  %v17937_v22 = vcombine.high %v592_v12, %v608_v13  ;;  %v17936_v28 = vcombine.low %v592_v12, %v608_v13 }
 0x3a7   : > { %v8458_v43 = vmax.f32 %v8426_v34, 0.0  ;;  %v8427_v45 = vadd.f32 %v8315_v26, %v8223_v36  ;;  %7632 = vmatpush1.bf16.msra.mxu0 %v18096_v33  ;;  %v1120_v17 = vld [vmem:[#allocation7 + $0x10d8] sm:$0xff] }
 0x3a8   : > { %7633 = vmatprep.subr.bf16.mxu0 %v18065_v38  ;;  %v18449_v23 = vcombine.high %v1104_v14, %v1120_v17  ;;  %v1088_v25 = vld [vmem:[#allocation7 + $0xfd8] sm:$0xff]  ;;  %v18448_v29 = vcombine.low %v1104_v14, %v1120_v17 }
 0x3a9   : > { %8490 = vst [vmem:[#allocation18 + $0x70] sm:$0xff] %v8458_v43  ;;  %v8459_v50 = vmax.f32 %v8427_v45, 0.0  ;;  %7673 = vmatpush1.bf16.msra.mxu1 %v18608_v52  ;;  %v1584_v35 = vld [vmem:[#allocation7 + $0x1f58] sm:$0xff]  ;;  %v18417_v30 = vcombine.high %v1072_v24, %v1088_v25  ;;  %v18416_v37 = vcombine.low %v1072_v24, %v1088_v25 }
 0x3aa   : > { %7674 = vmatprep.subr.bf16.mxu1 %v18577_v40  ;;  %v1600_v26 = vld [vmem:[#allocation7 + $0x1fd8] sm:$0xff] }
 0x3ab   : > { %8491 = vst [vmem:[#allocation18 + $0x78] sm:$0xff] %v8459_v50  ;;  %v20194_v56 = vpack.c.bf16 %v8459_v50, %v8458_v43  ;;  %7634 = vmatpush1.bf16.msra.mxu0 %v18064_v4  ;;  %v18929_v32 = vcombine.high %v1584_v35, %v1600_v26  ;;  %v1040_v33 = vld [vmem:[#allocation7 + $0xe58] sm:$0xff]  ;;  %v18928_v38 = vcombine.low %v1584_v35, %v1600_v26 }
 0x3ac   : > { %7635 = vmatprep.subr.bf16.mxu0 %v18033_v47  ;;  %v1056_v52 = vld [vmem:[#allocation7 + $0xed8] sm:$0xff] }
 0x3ad   : > { %8643 = vst [vmem:[#allocation2 + $0x48] sm:$0xff] %v20194_v56  ;;  %7675 = vmatpush1.bf16.msra.mxu1 %v18576_v51  ;;  %v1552_v34 = vld [vmem:[#allocation7 + $0x1e58] sm:$0xff]  ;;  %v18385_v39 = vcombine.high %v1040_v33, %v1056_v52  ;;  %v18384_v46 = vcombine.low %v1040_v33, %v1056_v52 }
 0x3ae   : > { %7676 = vmatprep.subr.bf16.mxu1 %v18545_v53  ;;  %v1568_v36 = vld [vmem:[#allocation7 + $0x1ed8] sm:$0xff] }
 0x3af   : > { %7636 = vmatpush1.bf16.msra.mxu0 %v18032_v61  ;;  %v18897_v40 = vcombine.high %v1552_v34, %v1568_v36  ;;  %v1024_v42 = vld [vmem:[#allocation7 + $0xdd8] sm:$0xff]  ;;  %v18896_v48 = vcombine.low %v1552_v34, %v1568_v36 }
 0x3b0   : > { %7637 = vmatprep.subr.bf16.mxu0 %v18001_v63  ;;  %v1520_v43 = vld [vmem:[#allocation7 + $0x1d58] sm:$0xff]  ;;  %v18353_v4 = vcombine.high %v1008_v41, %v1024_v42  ;;  %v18352_v55 = vcombine.low %v1008_v41, %v1024_v42 }
 0x3b1   : > { %7677 = vmatpush1.bf16.msra.mxu1 %v18544_v62  ;;  %v1536_v45 = vld [vmem:[#allocation7 + $0x1dd8] sm:$0xff] }
 0x3b2   : > { %7678 = vmatprep.subr.bf16.mxu1 %v18513_v0  ;;  %v18865_v50 = vcombine.high %v1520_v43, %v1536_v45  ;;  %v976_v51 = vld [vmem:[#allocation7 + $0xc58] sm:$0xff]  ;;  %v18864_v56 = vcombine.low %v1520_v43, %v1536_v45 }
 0x3b3   : > { %7638 = vmatpush1.bf16.msra.mxu0 %v18000_v7  ;;  %v992_v47 = vld [vmem:[#allocation7 + $0xcd8] sm:$0xff] }
 0x3b4   : > { %7639 = vmatprep.subr.bf16.mxu0 %v17969_v10  ;;  %v1488_v53 = vld [vmem:[#allocation7 + $0x1c58] sm:$0xff]  ;;  %v18321_v57 = vcombine.high %v976_v51, %v992_v47  ;;  %v18320_v1 = vcombine.low %v976_v51, %v992_v47  ;;  %v23061_v51 = vld [vmem:[#allocation9 + $0x20] ss:$2 sm:$0xff] }
 0x3b5   : > { %7679 = vmatpush1.bf16.msra.mxu1 %v18512_v8  ;;  %v1504_v54 = vld [vmem:[#allocation7 + $0x1cd8] sm:$0xff] }
 0x3b6   : > { %7680 = vmatprep.subr.bf16.mxu1 %v18481_v11  ;;  %v18833_v60 = vcombine.high %v1488_v53, %v1504_v54  ;;  %v944_v61 = vld [vmem:[#allocation7 + $0xb58] sm:$0xff]  ;;  %v18832_v2 = vcombine.low %v1488_v53, %v1504_v54  ;;  %v23063_v53 = vld [vmem:[#allocation9 + $0x21] ss:$2 sm:$0xff] }
 0x3b7   : > { %7640 = vmatpush1.bf16.msra.mxu0 %v17968_v18  ;;  %v960_v62 = vld [vmem:[#allocation7 + $0xbd8] sm:$0xff] }
 0x3b8   : > { %7641 = vmatprep.subr.bf16.mxu0 %v17937_v22  ;;  %v1456_v63 = vld [vmem:[#allocation7 + $0x1b58] sm:$0xff]  ;;  %v18289_v3 = vcombine.high %v944_v61, %v960_v62  ;;  %v18288_v12 = vcombine.low %v944_v61, %v960_v62  ;;  %v8115_v62 = vrot.slane %v23061_v51, %v22942_v44 }
 0x3b9   : > { %7681 = vmatpush1.bf16.msra.mxu1 %v18480_v20  ;;  %v1472_v0 = vld [vmem:[#allocation7 + $0x1bd8] sm:$0xff] }
 0x3ba   : > { %7682 = vmatprep.subr.bf16.mxu1 %v18449_v23  ;;  %v18801_v6 = vcombine.high %v1456_v63, %v1472_v0  ;;  %v912_v7 = vld [vmem:[#allocation7 + $0xa58] sm:$0xff]  ;;  %v18800_v13 = vcombine.low %v1456_v63, %v1472_v0  ;;  %v1265_v63 = vld [vmem:[#allocation7 + $0x1560] sm:$0xff] }
 0x3bb   : > { %7642 = vmatpush1.bf16.msra.mxu0 %v17936_v28  ;;  %v928_v8 = vld [vmem:[#allocation7 + $0xad8] sm:$0xff]  ;;  %v1281_v0 = vld [vmem:[#allocation7 + $0x15e0] sm:$0xff] }
 0x3bc   : > { %7643 = vmatprep.subr.bf16.mxu0 %v18417_v30  ;;  %v1424_v10 = vld [vmem:[#allocation7 + $0x1a58] sm:$0xff]  ;;  %v18257_v14 = vcombine.high %v912_v7, %v928_v8  ;;  %v18256_v24 = vcombine.low %v912_v7, %v928_v8 }
 0x3bd   : > { %7683 = vmatpush1.bf16.msra.mxu1 %v18448_v29  ;;  %v1440_v11 = vld [vmem:[#allocation7 + $0x1ad8] sm:$0xff] }
 0x3be   : > { %7684 = vmatprep.subr.bf16.mxu1 %v18929_v32  ;;  %v18769_v17 = vcombine.high %v1424_v10, %v1440_v11  ;;  %v880_v18 = vld [vmem:[#allocation7 + $0x958] sm:$0xff]  ;;  %v18768_v25 = vcombine.low %v1424_v10, %v1440_v11 }
 0x3bf   : > { %7644 = vmatpush2.bf16.msra.mxu0 %v18416_v37  ;;  %v896_v20 = vld [vmem:[#allocation7 + $0x9d8] sm:$0xff]  ;;  %v817_v37 = vld [vmem:[#allocation7 + $0x760] sm:$0xff] }
 0x3c0   : > { %7645 = vmatprep.subr.bf16.mxu0 %v18385_v39  ;;  %v1392_v22 = vld [vmem:[#allocation7 + $0x1958] sm:$0xff]  ;;  %v18225_v35 = vcombine.high %v880_v18, %v896_v20  ;;  %v18224_v33 = vcombine.low %v880_v18, %v896_v20  ;;  %v1329_v39 = vld [vmem:[#allocation7 + $0x1760] sm:$0xff] }
 0x3c1   : > { %7685 = vmatpush2.bf16.msra.mxu1 %v18928_v38  ;;  %v1408_v23 = vld [vmem:[#allocation7 + $0x19d8] sm:$0xff]  ;;  %v833_v38 = vld [vmem:[#allocation7 + $0x7e0] sm:$0xff] }
 0x3c2   : > { %7686 = vmatprep.subr.bf16.mxu1 %v18897_v40  ;;  %v18737_v26 = vcombine.high %v1392_v22, %v1408_v23  ;;  %v848_v28 = vld [vmem:[#allocation7 + $0x858] sm:$0xff]  ;;  %v18736_v52 = vcombine.low %v1392_v22, %v1408_v23  ;;  %v1345_v40 = vld [vmem:[#allocation7 + $0x17e0] sm:$0xff]  ;;  %v18163_v43 = vcombine.high %v817_v37, %v833_v38  ;;  %v18162_v47 = vcombine.low %v817_v37, %v833_v38 }
 0x3c3   : > { %7646 = vmatpush2.bf16.msra.mxu0 %v18384_v46  ;;  %v864_v29 = vld [vmem:[#allocation7 + $0x8d8] sm:$0xff]  ;;  %v18675_v45 = vcombine.high %v1329_v39, %v1345_v40  ;;  %v785_v46 = vld [vmem:[#allocation7 + $0x660] sm:$0xff]  ;;  %v18674_v54 = vcombine.low %v1329_v39, %v1345_v40  ;;  %v8323_v22 = vrot.slane %v23063_v53, %v22947_v49 }
 0x3c4   : > { %7647 = vmatprep.subr.bf16.mxu0 %v18353_v4  ;;  %v1360_v30 = vld [vmem:[#allocation7 + $0x1858] sm:$0xff]  ;;  %v18193_v34 = vcombine.high %v848_v28, %v864_v29  ;;  %v18192_v41 = vcombine.low %v848_v28, %v864_v29  ;;  %v1297_v4 = vld [vmem:[#allocation7 + $0x1660] sm:$0xff]  ;;  %v18610_v28 = vcombine.low %v1265_v63, %v1281_v0 }
 0x3c5   : > { %7687 = vmatpush2.bf16.msra.mxu1 %v18896_v48  ;;  %v1376_v32 = vld [vmem:[#allocation7 + $0x18d8] sm:$0xff]  ;;  %v801_v48 = vld [vmem:[#allocation7 + $0x6e0] sm:$0xff] }
 0x3c6   : > { %7688 = vmatprep.subr.bf16.mxu1 %v18865_v50  ;;  %v18705_v36 = vcombine.high %v1360_v30, %v1376_v32  ;;  %v18704_v42 = vcombine.low %v1360_v30, %v1376_v32  ;;  %v1313_v50 = vld [vmem:[#allocation7 + $0x16e0] sm:$0xff] }
 0x3c7   : > { %7648 = vmatpush2.bf16.msra.mxu0 %v18352_v55  ;;  %v18131_v55 = vcombine.high %v785_v46, %v801_v48  ;;  %v18642_v10 = vcombine.low %v1297_v4, %v1313_v50  ;;  %v705_v37 = vld [vmem:[#allocation7 + $0x3e0] sm:$0xff] }
 0x3c8   : > { %7649 = vmatprep.subr.bf16.mxu0 %v18321_v57  ;;  %v753_v57 = vld [vmem:[#allocation7 + $0x560] sm:$0xff] }
 0x3c9   : > { %7689 = vmatpush2.bf16.msra.mxu1 %v18864_v56  ;;  %v18643_v56 = vcombine.high %v1297_v4, %v1313_v50  ;;  %v1201_v40 = vld [vmem:[#allocation7 + $0x1360] sm:$0xff] }
 0x3ca   : > { %7690 = vmatprep.subr.bf16.mxu1 %v18833_v60  ;;  %v769_v60 = vld [vmem:[#allocation7 + $0x5e0] sm:$0xff] }
 0x3cb   : > { %7650 = vmatpush2.bf16.msra.mxu0 %v18320_v1  ;;  %v18099_v11 = vcombine.high %v753_v57, %v769_v60  ;;  %v657_v4 = vld [vmem:[#allocation7 + $0x260] sm:$0xff] }
 0x3cc   : > { %7651 = vmatprep.subr.bf16.mxu0 %v18289_v3  ;;  %v8119_v3 = vrot.slane %v23061_v51, %v22947_v49  ;;  %v673_v50 = vld [vmem:[#allocation7 + $0x2e0] sm:$0xff] }
 0x3cd   : > { %7691 = vmatpush2.bf16.msra.mxu1 %v18832_v2  ;;  %v8319_v2 = vrot.slane %v23063_v53, %v22942_v44 }
 0x3ce   : > { %7692 = vmatprep.subr.bf16.mxu1 %v18801_v6  ;;  %v18130_v6 = vcombine.low %v785_v46, %v801_v48 }
 0x3cf   : > { %7652 = vmatpush2.bf16.msra.mxu0 %v18288_v12 }
 0x3d0   : > { %7653 = vmatprep.subr.bf16.mxu0 %v18257_v14  ;;  %v721_v14 = vld [vmem:[#allocation7 + $0x460] sm:$0xff] }
 0x3d1   : > { %7693 = vmatpush2.bf16.msra.mxu1 %v18800_v13  ;;  %v18611_v13 = vcombine.high %v1265_v63, %v1281_v0  ;;  %v641_v63 = vld [vmem:[#allocation7 + $0x1e0] sm:$0xff] }
 0x3d2   : > { %7694 = vmatprep.subr.bf16.mxu1 %v18769_v17  ;;  %v737_v17 = vld [vmem:[#allocation7 + $0x4e0] sm:$0xff] }
 0x3d3   : > { %7654 = vmatpush2.bf16.msra.mxu0 %v18256_v24  ;;  %v1233_v24 = vld [vmem:[#allocation7 + $0x1460] sm:$0xff] }
 0x3d4   : > { %7655 = vmatprep.subr.bf16.mxu0 %v18225_v35  ;;  %v1137_v0 = vld [vmem:[#allocation7 + $0x1160] sm:$0xff] }
 0x3d5   : > { %7695 = vmatpush2.bf16.msra.mxu1 %v18768_v25  ;;  %v1249_v25 = vld [vmem:[#allocation7 + $0x14e0] sm:$0xff] }
 0x3d6   : > { %7696 = vmatprep.subr.bf16.mxu1 %v18737_v26  ;;  %v18098_v26 = vcombine.low %v753_v57, %v769_v60  ;;  %v18003_v60 = vcombine.high %v657_v4, %v673_v50 }
 0x3d7   : > { %7656 = vmatpush2.bf16.msra.mxu0 %v18224_v33  ;;  %v18067_v33 = vcombine.high %v721_v14, %v737_v17 }
 0x3d8   : > { %7657 = vmatprep.subr.bf16.mxu0 %v18193_v34  ;;  %v18579_v34 = vcombine.high %v1233_v24, %v1249_v25 }
 0x3d9   : > { %7697 = vmatpush2.bf16.msra.mxu1 %v18736_v52 }
 0x3da   : > { %7698 = vmatprep.subr.bf16.mxu1 %v18705_v36  ;;  %v689_v36 = vld [vmem:[#allocation7 + $0x360] sm:$0xff] }
 0x3db   : > { %7658 = vmatpush2.bf16.msra.mxu0 %v18192_v41  ;;  %v1217_v41 = vld [vmem:[#allocation7 + $0x13e0] sm:$0xff]  ;;  %v18035_v46 = vcombine.high %v689_v36, %v705_v37 }
 0x3dc   : > { %7709 = vmatprep.subr.bf16.mxu0 %v18163_v43  ;;  %v18547_v48 = vcombine.high %v1201_v40, %v1217_v41  ;;  %v18546_v57 = vcombine.low %v1201_v40, %v1217_v41  ;;  %v1521_v40 = vld [vmem:[#allocation7 + $0x1d60] sm:$0xff] }
 0x3dd   : > { %7699 = vmatpush2.bf16.msra.mxu1 %v18704_v42  ;;  %v18066_v42 = vcombine.low %v721_v14, %v737_v17  ;;  %v1537_v41 = vld [vmem:[#allocation7 + $0x1de0] sm:$0xff] }
 0x3de   : > { %7750 = vmatprep.subr.bf16.mxu1 %v18675_v45  ;;  %v7415_v61 = vpop.f32.mrf.mxu0  ;;  %7660 = vmatmul.mubr.bf16.vlgmr.msra.gmra.mxu0 %v22923_v16  ;;  %v18578_v45 = vcombine.low %v1233_v24, %v1249_v25  ;;  %v1601_v24 = vld [vmem:[#allocation7 + $0x1fe0] sm:$0xff] }
 0x3df   : > { %7710 = vmatpush1.bf16.msra.mxu0 %v18162_v47  ;;  %7741 = vmatprep.mubr.bf16.mxu0 %v22917_v58 }
 0x3e0   : > { %v7456_v1 = vpop.f32.mrf.mxu1  ;;  %7701 = vmatmul.mubr.bf16.vlgmr.msra.gmra.mxu1 %v22925_v19  ;;  %v7417_v8 = vpop.f32.mrf.mxu0  ;;  %7711 = vmatprep.subr.bf16.mxu0 %v18131_v55  ;;  %v1185_v55 = vld [vmem:[#allocation7 + $0x12e0] sm:$0xff] }
 0x3e1   : > { %v7457_v7 = vadd.f32 %v7456_v1, %v7415_v61  ;;  %7751 = vmatpush1.bf16.msra.mxu1 %v18674_v54  ;;  %7782 = vmatprep.mubr.bf16.mxu1 %v22919_v59  ;;  %v1169_v54 = vld [vmem:[#allocation7 + $0x1260] sm:$0xff] }
 0x3e2   : > { %v7458_v12 = vpop.f32.mrf.mxu1  ;;  %7752 = vmatprep.subr.bf16.mxu1 %v18643_v56  ;;  %v7419_v23 = vpop.f32.mrf.mxu0  ;;  %v18034_v56 = vcombine.low %v689_v36, %v705_v37  ;;  %v18515_v61 = vcombine.high %v1169_v54, %v1185_v55  ;;  %v1153_v1 = vld [vmem:[#allocation7 + $0x11e0] sm:$0xff] }
 0x3e3   : > { %v8224_v18 = vmul.f32 %v8115_v62, %v7457_v7  ;;  %v7459_v20 = vadd.f32 %v7458_v12, %v7417_v8  ;;  %7712 = vmatpush1.bf16.msra.mxu0 %v18130_v6  ;;  %v625_v62 = vld [vmem:[#allocation7 + $0x160] sm:$0xff]  ;;  %v18483_v7 = vcombine.high %v1137_v0, %v1153_v1  ;;  %v18482_v14 = vcombine.low %v1137_v0, %v1153_v1 }
 0x3e4   : > { %v7460_v35 = vpop.f32.mrf.mxu1  ;;  %v7420_v32 = vpop.f32.mrf.mxu0  ;;  %7713 = vmatprep.subr.bf16.mxu0 %v18099_v11  ;;  %v17971_v6 = vcombine.high %v625_v62, %v641_v63  ;;  %v593_v8 = vld [vmem:[#allocation7 + $0x60] sm:$0xff] }
 0x3e5   : > { %v8428_v29 = vadd.f32 %v8319_v2, %v8224_v18  ;;  %v8225_v30 = vmul.f32 %v8119_v3, %v7459_v20  ;;  %7753 = vmatpush1.bf16.msra.mxu1 %v18642_v10  ;;  %v18002_v2 = vcombine.low %v657_v4, %v673_v50  ;;  %v18514_v3 = vcombine.low %v1169_v54, %v1185_v55  ;;  %v609_v10 = vld [vmem:[#allocation7 + $0xe0] sm:$0xff] }
 0x3e6   : > { %v7461_v52 = vpop.f32.mrf.mxu1  ;;  %7754 = vmatprep.subr.bf16.mxu1 %v18611_v13  ;;  %v1105_v11 = vld [vmem:[#allocation7 + $0x1060] sm:$0xff]  ;;  %v17970_v13 = vcombine.low %v625_v62, %v641_v63  ;;  %v17939_v17 = vcombine.high %v593_v8, %v609_v10  ;;  %v17938_v25 = vcombine.low %v593_v8, %v609_v10  ;;  %v18866_v55 = vcombine.low %v1521_v40, %v1537_v41 }
 0x3e7   : > { %v8460_v38 = vmax.f32 %v8428_v29, 0.0  ;;  %v8429_v39 = vadd.f32 %v8323_v22, %v8225_v30  ;;  %7714 = vmatpush1.bf16.msra.mxu0 %v18098_v26  ;;  %v1121_v12 = vld [vmem:[#allocation7 + $0x10e0] sm:$0xff] }
 0x3e8   : > { %7715 = vmatprep.subr.bf16.mxu0 %v18067_v33  ;;  %v18451_v18 = vcombine.high %v1105_v11, %v1121_v12  ;;  %v1073_v20 = vld [vmem:[#allocation7 + $0xf60] sm:$0xff]  ;;  %v18450_v35 = vcombine.low %v1105_v11, %v1121_v12 }
 0x3e9   : > { %8492 = vst [vmem:[#allocation18 + $0x80] sm:$0xff] %v8460_v38  ;;  %v8461_v43 = vmax.f32 %v8429_v39, 0.0  ;;  %7755 = vmatpush1.bf16.msra.mxu1 %v18610_v28  ;;  %v1089_v22 = vld [vmem:[#allocation7 + $0xfe0] sm:$0xff] }
 0x3ea   : > { %7756 = vmatprep.subr.bf16.mxu1 %v18579_v34  ;;  %v1585_v23 = vld [vmem:[#allocation7 + $0x1f60] sm:$0xff]  ;;  %v18419_v26 = vcombine.high %v1073_v20, %v1089_v22  ;;  %v18418_v52 = vcombine.low %v1073_v20, %v1089_v22 }
 0x3eb   : > { %8493 = vst [vmem:[#allocation18 + $0x88] sm:$0xff] %v8461_v43  ;;  %v20195_v47 = vpack.c.bf16 %v8461_v43, %v8460_v38  ;;  %7716 = vmatpush1.bf16.msra.mxu0 %v18066_v42  ;;  %v18931_v28 = vcombine.high %v1585_v23, %v1601_v24  ;;  %v1041_v29 = vld [vmem:[#allocation7 + $0xe60] sm:$0xff]  ;;  %v18930_v34 = vcombine.low %v1585_v23, %v1601_v24 }
 0x3ec   : > { %7717 = vmatprep.subr.bf16.mxu0 %v18035_v46  ;;  %v1057_v30 = vld [vmem:[#allocation7 + $0xee0] sm:$0xff]  ;;  %v18867_v46 = vcombine.high %v1521_v40, %v1537_v41 }
 0x3ed   : > { %8644 = vst [vmem:[#allocation2 + $0x40] sm:$0xff] %v20195_v47  ;;  %7757 = vmatpush1.bf16.msra.mxu1 %v18578_v45  ;;  %v1553_v32 = vld [vmem:[#allocation7 + $0x1e60] sm:$0xff]  ;;  %v18387_v36 = vcombine.high %v1041_v29, %v1057_v30  ;;  %v18386_v42 = vcombine.low %v1041_v29, %v1057_v30 }
 0x3ee   : > { %7758 = vmatprep.subr.bf16.mxu1 %v18547_v48  ;;  %v1569_v33 = vld [vmem:[#allocation7 + $0x1ee0] sm:$0xff] }
 0x3ef   : > { %7718 = vmatpush1.bf16.msra.mxu0 %v18034_v56  ;;  %v18899_v37 = vcombine.high %v1553_v32, %v1569_v33  ;;  %v1009_v38 = vld [vmem:[#allocation7 + $0xd60] sm:$0xff]  ;;  %v18898_v43 = vcombine.low %v1553_v32, %v1569_v33 }
 0x3f0   : > { %7719 = vmatprep.subr.bf16.mxu0 %v18003_v60  ;;  %v1025_v39 = vld [vmem:[#allocation7 + $0xde0] sm:$0xff] }
 0x3f1   : > { %7759 = vmatpush1.bf16.msra.mxu1 %v18546_v57  ;;  %v18355_v45 = vcombine.high %v1009_v38, %v1025_v39  ;;  %v977_v48 = vld [vmem:[#allocation7 + $0xc60] sm:$0xff]  ;;  %v18354_v54 = vcombine.low %v1009_v38, %v1025_v39  ;;  %v1330_v38 = vld [vmem:[#allocation7 + $0x1768] sm:$0xff] }
 0x3f2   : > { %7760 = vmatprep.subr.bf16.mxu1 %v18515_v61  ;;  %v993_v4 = vld [vmem:[#allocation7 + $0xce0] sm:$0xff]  ;;  %v1346_v39 = vld [vmem:[#allocation7 + $0x17e8] sm:$0xff] }
 0x3f3   : > { %7720 = vmatpush1.bf16.msra.mxu0 %v18002_v2  ;;  %v1489_v50 = vld [vmem:[#allocation7 + $0x1c60] sm:$0xff]  ;;  %v18323_v56 = vcombine.high %v977_v48, %v993_v4  ;;  %v18322_v0 = vcombine.low %v977_v48, %v993_v4  ;;  %v1298_v48 = vld [vmem:[#allocation7 + $0x1668] sm:$0xff] }
 0x3f4   : > { %7721 = vmatprep.subr.bf16.mxu0 %v17971_v6  ;;  %v1505_v47 = vld [vmem:[#allocation7 + $0x1ce0] sm:$0xff]  ;;  %v1314_v4 = vld [vmem:[#allocation7 + $0x16e8] sm:$0xff] }
 0x3f5   : > { %7761 = vmatpush1.bf16.msra.mxu1 %v18514_v3  ;;  %v18835_v57 = vcombine.high %v1489_v50, %v1505_v47  ;;  %v945_v60 = vld [vmem:[#allocation7 + $0xb60] sm:$0xff]  ;;  %v18834_v1 = vcombine.low %v1489_v50, %v1505_v47  ;;  %v18676_v47 = vcombine.low %v1330_v38, %v1346_v39 }
 0x3f6   : > { %7762 = vmatprep.subr.bf16.mxu1 %v18483_v7  ;;  %v961_v61 = vld [vmem:[#allocation7 + $0xbe0] sm:$0xff] }
 0x3f7   : > { %7722 = vmatpush1.bf16.msra.mxu0 %v17970_v13  ;;  %v1457_v62 = vld [vmem:[#allocation7 + $0x1b60] sm:$0xff]  ;;  %v18291_v2 = vcombine.high %v945_v60, %v961_v61  ;;  %v18290_v11 = vcombine.low %v945_v60, %v961_v61  ;;  %v8123_v61 = vrot.slane %v23061_v51, %v22964_v27 }
 0x3f8   : > { %7723 = vmatprep.subr.bf16.mxu0 %v17939_v17  ;;  %v1473_v63 = vld [vmem:[#allocation7 + $0x1be0] sm:$0xff] }
 0x3f9   : > { %7763 = vmatpush1.bf16.msra.mxu1 %v18482_v14  ;;  %v18803_v3 = vcombine.high %v1457_v62, %v1473_v63  ;;  %v913_v6 = vld [vmem:[#allocation7 + $0xa60] sm:$0xff]  ;;  %v18802_v12 = vcombine.low %v1457_v62, %v1473_v63  ;;  %v1266_v62 = vld [vmem:[#allocation7 + $0x1568] sm:$0xff] }
 0x3fa   : > { %7764 = vmatprep.subr.bf16.mxu1 %v18451_v18  ;;  %v929_v7 = vld [vmem:[#allocation7 + $0xae0] sm:$0xff]  ;;  %v1282_v63 = vld [vmem:[#allocation7 + $0x15e8] sm:$0xff] }
 0x3fb   : > { %7724 = vmatpush1.bf16.msra.mxu0 %v17938_v25  ;;  %v1425_v8 = vld [vmem:[#allocation7 + $0x1a60] sm:$0xff]  ;;  %v18259_v13 = vcombine.high %v913_v6, %v929_v7  ;;  %v18258_v23 = vcombine.low %v913_v6, %v929_v7 }
 0x3fc   : > { %7725 = vmatprep.subr.bf16.mxu0 %v18419_v26  ;;  %v1441_v10 = vld [vmem:[#allocation7 + $0x1ae0] sm:$0xff] }
 0x3fd   : > { %7765 = vmatpush1.bf16.msra.mxu1 %v18450_v35  ;;  %v18771_v14 = vcombine.high %v1425_v8, %v1441_v10  ;;  %v881_v17 = vld [vmem:[#allocation7 + $0x960] sm:$0xff]  ;;  %v18770_v24 = vcombine.low %v1425_v8, %v1441_v10  ;;  %v18644_v8 = vcombine.low %v1298_v48, %v1314_v4 }
 0x3fe   : > { %7766 = vmatprep.subr.bf16.mxu1 %v18931_v28  ;;  %v897_v18 = vld [vmem:[#allocation7 + $0x9e0] sm:$0xff] }
 0x3ff   : > { %7726 = vmatpush2.bf16.msra.mxu0 %v18418_v52  ;;  %v1393_v20 = vld [vmem:[#allocation7 + $0x1960] sm:$0xff]  ;;  %v18227_v25 = vcombine.high %v881_v17, %v897_v18  ;;  %v18226_v32 = vcombine.low %v881_v17, %v897_v18 }
 0x400   : > { %7727 = vmatprep.subr.bf16.mxu0 %v18387_v36  ;;  %v1409_v22 = vld [vmem:[#allocation7 + $0x19e0] sm:$0xff]  ;;  %v818_v36 = vld [vmem:[#allocation7 + $0x768] sm:$0xff] }
 0x401   : > { %7767 = vmatpush2.bf16.msra.mxu1 %v18930_v34  ;;  %v18739_v35 = vcombine.high %v1393_v20, %v1409_v22  ;;  %v849_v26 = vld [vmem:[#allocation7 + $0x860] sm:$0xff]  ;;  %v18738_v33 = vcombine.low %v1393_v20, %v1409_v22  ;;  %v8331_v20 = vrot.slane %v23063_v53, %v22967_v31 }
 0x402   : > { %7768 = vmatprep.subr.bf16.mxu1 %v18899_v37  ;;  %v865_v28 = vld [vmem:[#allocation7 + $0x8e0] sm:$0xff]  ;;  %v834_v37 = vld [vmem:[#allocation7 + $0x7e8] sm:$0xff] }
 0x403   : > { %7728 = vmatpush2.bf16.msra.mxu0 %v18386_v42  ;;  %v1361_v29 = vld [vmem:[#allocation7 + $0x1860] sm:$0xff]  ;;  %v18195_v52 = vcombine.high %v849_v26, %v865_v28  ;;  %v18194_v40 = vcombine.low %v849_v26, %v865_v28  ;;  %v18165_v42 = vcombine.high %v818_v36, %v834_v37  ;;  %v18164_v50 = vcombine.low %v818_v36, %v834_v37  ;;  %v706_v36 = vld [vmem:[#allocation7 + $0x3e8] sm:$0xff] }
 0x404   : > { %7729 = vmatprep.subr.bf16.mxu0 %v18355_v45  ;;  %v1377_v30 = vld [vmem:[#allocation7 + $0x18e0] sm:$0xff]  ;;  %v786_v45 = vld [vmem:[#allocation7 + $0x668] sm:$0xff]  ;;  %v18612_v26 = vcombine.low %v1266_v62, %v1282_v63 }
 0x405   : > { %7769 = vmatpush2.bf16.msra.mxu1 %v18898_v43  ;;  %v18707_v34 = vcombine.high %v1361_v29, %v1377_v30  ;;  %v18706_v41 = vcombine.low %v1361_v29, %v1377_v30  ;;  %v18677_v43 = vcombine.high %v1330_v38, %v1346_v39  ;;  %v1202_v39 = vld [vmem:[#allocation7 + $0x1368] sm:$0xff] }
 0x406   : > { %7770 = vmatprep.subr.bf16.mxu1 %v18867_v46  ;;  %v802_v46 = vld [vmem:[#allocation7 + $0x6e8] sm:$0xff] }
 0x407   : > { %7730 = vmatpush2.bf16.msra.mxu0 %v18354_v54  ;;  %v18133_v54 = vcombine.high %v786_v45, %v802_v46 }
 0x408   : > { %7731 = vmatprep.subr.bf16.mxu0 %v18323_v56  ;;  %v754_v56 = vld [vmem:[#allocation7 + $0x568] sm:$0xff] }
 0x409   : > { %7771 = vmatpush2.bf16.msra.mxu1 %v18866_v55  ;;  %v18645_v55 = vcombine.high %v1298_v48, %v1314_v4  ;;  %v658_v48 = vld [vmem:[#allocation7 + $0x268] sm:$0xff] }
 0x40a   : > { %7772 = vmatprep.subr.bf16.mxu1 %v18835_v57  ;;  %v770_v57 = vld [vmem:[#allocation7 + $0x5e8] sm:$0xff] }
 0x40b   : > { %7732 = vmatpush2.bf16.msra.mxu0 %v18322_v0  ;;  %v18101_v10 = vcombine.high %v754_v56, %v770_v57  ;;  %v674_v4 = vld [vmem:[#allocation7 + $0x2e8] sm:$0xff] }
 0x40c   : > { %7733 = vmatprep.subr.bf16.mxu0 %v18291_v2  ;;  %v8127_v2 = vrot.slane %v23061_v51, %v22967_v31 }
 0x40d   : > { %7773 = vmatpush2.bf16.msra.mxu1 %v18834_v1  ;;  %v8327_v1 = vrot.slane %v23063_v53, %v22964_v27 }
 0x40e   : > { %7774 = vmatprep.subr.bf16.mxu1 %v18803_v3  ;;  %v18132_v3 = vcombine.low %v786_v45, %v802_v46 }
 0x40f   : > { %7734 = vmatpush2.bf16.msra.mxu0 %v18290_v11 }
 0x410   : > { %7735 = vmatprep.subr.bf16.mxu0 %v18259_v13  ;;  %v722_v13 = vld [vmem:[#allocation7 + $0x468] sm:$0xff] }
 0x411   : > { %7775 = vmatpush2.bf16.msra.mxu1 %v18802_v12  ;;  %v18613_v12 = vcombine.high %v1266_v62, %v1282_v63  ;;  %v642_v62 = vld [vmem:[#allocation7 + $0x1e8] sm:$0xff] }
 0x412   : > { %7776 = vmatprep.subr.bf16.mxu1 %v18771_v14  ;;  %v738_v14 = vld [vmem:[#allocation7 + $0x4e8] sm:$0xff] }
 0x413   : > { %7736 = vmatpush2.bf16.msra.mxu0 %v18258_v23  ;;  %v1234_v23 = vld [vmem:[#allocation7 + $0x1468] sm:$0xff] }
 0x414   : > { %7737 = vmatprep.subr.bf16.mxu0 %v18227_v25  ;;  %v1138_v63 = vld [vmem:[#allocation7 + $0x1168] sm:$0xff] }
 0x415   : > { %7777 = vmatpush2.bf16.msra.mxu1 %v18770_v24  ;;  %v1250_v24 = vld [vmem:[#allocation7 + $0x14e8] sm:$0xff] }
 0x416   : > { %7778 = vmatprep.subr.bf16.mxu1 %v18739_v35  ;;  %v18100_v35 = vcombine.low %v754_v56, %v770_v57  ;;  %v18005_v57 = vcombine.high %v658_v48, %v674_v4 }
 0x417   : > { %7738 = vmatpush2.bf16.msra.mxu0 %v18226_v32  ;;  %v18069_v32 = vcombine.high %v722_v13, %v738_v14 }
 0x418   : > { %7739 = vmatprep.subr.bf16.mxu0 %v18195_v52  ;;  %v18581_v52 = vcombine.high %v1234_v23, %v1250_v24 }
 0x419   : > { %7779 = vmatpush2.bf16.msra.mxu1 %v18738_v33 }
 0x41a   : > { %7780 = vmatprep.subr.bf16.mxu1 %v18707_v34  ;;  %v690_v34 = vld [vmem:[#allocation7 + $0x368] sm:$0xff] }
 0x41b   : > { %7740 = vmatpush2.bf16.msra.mxu0 %v18194_v40  ;;  %v1218_v40 = vld [vmem:[#allocation7 + $0x13e8] sm:$0xff]  ;;  %v18037_v45 = vcombine.high %v690_v34, %v706_v36 }
 0x41c   : > { %7791 = vmatprep.subr.bf16.mxu0 %v18165_v42  ;;  %v18549_v46 = vcombine.high %v1202_v39, %v1218_v40  ;;  %v18548_v56 = vcombine.low %v1202_v39, %v1218_v40  ;;  %v1522_v39 = vld [vmem:[#allocation7 + $0x1d68] sm:$0xff] }
 0x41d   : > { %7781 = vmatpush2.bf16.msra.mxu1 %v18706_v41  ;;  %v18068_v41 = vcombine.low %v722_v13, %v738_v14  ;;  %v1538_v40 = vld [vmem:[#allocation7 + $0x1de8] sm:$0xff] }
 0x41e   : > { %7832 = vmatprep.subr.bf16.mxu1 %v18677_v43  ;;  %v7497_v60 = vpop.f32.mrf.mxu0  ;;  %7742 = vmatmul.mubr.bf16.vlgmr.msra.gmra.mxu0 %v22923_v16  ;;  %v18580_v43 = vcombine.low %v1234_v23, %v1250_v24  ;;  %v1602_v23 = vld [vmem:[#allocation7 + $0x1fe8] sm:$0xff] }
 0x41f   : > { %7792 = vmatpush1.bf16.msra.mxu0 %v18164_v50  ;;  %7823 = vmatprep.mubr.bf16.mxu0 %v22917_v58 }
 0x420   : > { %v7538_v0 = vpop.f32.mrf.mxu1  ;;  %7783 = vmatmul.mubr.bf16.vlgmr.msra.gmra.mxu1 %v22925_v19  ;;  %v7499_v7 = vpop.f32.mrf.mxu0  ;;  %7793 = vmatprep.subr.bf16.mxu0 %v18133_v54  ;;  %v1186_v54 = vld [vmem:[#allocation7 + $0x12e8] sm:$0xff] }
 0x421   : > { %v7539_v6 = vadd.f32 %v7538_v0, %v7497_v60  ;;  %7833 = vmatpush1.bf16.msra.mxu1 %v18676_v47  ;;  %7864 = vmatprep.mubr.bf16.mxu1 %v22919_v59  ;;  %v1170_v47 = vld [vmem:[#allocation7 + $0x1268] sm:$0xff] }
 0x422   : > { %v7540_v11 = vpop.f32.mrf.mxu1  ;;  %7834 = vmatprep.subr.bf16.mxu1 %v18645_v55  ;;  %v7501_v22 = vpop.f32.mrf.mxu0  ;;  %v18036_v55 = vcombine.low %v690_v34, %v706_v36  ;;  %v18517_v60 = vcombine.high %v1170_v47, %v1186_v54  ;;  %v1154_v0 = vld [vmem:[#allocation7 + $0x11e8] sm:$0xff] }
 0x423   : > { %v8226_v17 = vmul.f32 %v8123_v61, %v7539_v6  ;;  %v7541_v18 = vadd.f32 %v7540_v11, %v7499_v7  ;;  %7794 = vmatpush1.bf16.msra.mxu0 %v18132_v3  ;;  %v626_v61 = vld [vmem:[#allocation7 + $0x168] sm:$0xff]  ;;  %v18485_v6 = vcombine.high %v1138_v63, %v1154_v0  ;;  %v18484_v13 = vcombine.low %v1138_v63, %v1154_v0 }
 0x424   : > { %v7542_v25 = vpop.f32.mrf.mxu1  ;;  %v7502_v30 = vpop.f32.mrf.mxu0  ;;  %7795 = vmatprep.subr.bf16.mxu0 %v18101_v10  ;;  %v17973_v3 = vcombine.high %v626_v61, %v642_v62  ;;  %v594_v7 = vld [vmem:[#allocation7 + $0x68] sm:$0xff] }
 0x425   : > { %v8430_v28 = vadd.f32 %v8327_v1, %v8226_v17  ;;  %v8227_v29 = vmul.f32 %v8127_v2, %v7541_v18  ;;  %7835 = vmatpush1.bf16.msra.mxu1 %v18644_v8  ;;  %v18004_v1 = vcombine.low %v658_v48, %v674_v4  ;;  %v18516_v2 = vcombine.low %v1170_v47, %v1186_v54  ;;  %v610_v8 = vld [vmem:[#allocation7 + $0xe8] sm:$0xff] }
 0x426   : > { %v7543_v33 = vpop.f32.mrf.mxu1  ;;  %7836 = vmatprep.subr.bf16.mxu1 %v18613_v12  ;;  %v1106_v10 = vld [vmem:[#allocation7 + $0x1068] sm:$0xff]  ;;  %v17972_v12 = vcombine.low %v626_v61, %v642_v62  ;;  %v17941_v14 = vcombine.high %v594_v7, %v610_v8  ;;  %v17940_v24 = vcombine.low %v594_v7, %v610_v8  ;;  %v18868_v54 = vcombine.low %v1522_v39, %v1538_v40 }
 0x427   : > { %v8462_v37 = vmax.f32 %v8430_v28, 0.0  ;;  %v8431_v38 = vadd.f32 %v8331_v20, %v8227_v29  ;;  %7796 = vmatpush1.bf16.msra.mxu0 %v18100_v35  ;;  %v1122_v11 = vld [vmem:[#allocation7 + $0x10e8] sm:$0xff] }
 0x428   : > { %7797 = vmatprep.subr.bf16.mxu0 %v18069_v32  ;;  %v18453_v17 = vcombine.high %v1106_v10, %v1122_v11  ;;  %v1074_v18 = vld [vmem:[#allocation7 + $0xf68] sm:$0xff]  ;;  %v18452_v25 = vcombine.low %v1106_v10, %v1122_v11 }
 0x429   : > { %8494 = vst [vmem:[#allocation18 + $0x90] sm:$0xff] %v8462_v37  ;;  %v8463_v42 = vmax.f32 %v8431_v38, 0.0  ;;  %7837 = vmatpush1.bf16.msra.mxu1 %v18612_v26  ;;  %v1090_v20 = vld [vmem:[#allocation7 + $0xfe8] sm:$0xff] }
 0x42a   : > { %7838 = vmatprep.subr.bf16.mxu1 %v18581_v52  ;;  %v1586_v22 = vld [vmem:[#allocation7 + $0x1f68] sm:$0xff]  ;;  %v18421_v35 = vcombine.high %v1074_v18, %v1090_v20  ;;  %v18420_v33 = vcombine.low %v1074_v18, %v1090_v20 }
 0x42b   : > { %8495 = vst [vmem:[#allocation18 + $0x98] sm:$0xff] %v8463_v42  ;;  %v20196_v50 = vpack.c.bf16 %v8463_v42, %v8462_v37  ;;  %7798 = vmatpush1.bf16.msra.mxu0 %v18068_v41  ;;  %v18933_v26 = vcombine.high %v1586_v22, %v1602_v23  ;;  %v1042_v28 = vld [vmem:[#allocation7 + $0xe68] sm:$0xff]  ;;  %v18932_v52 = vcombine.low %v1586_v22, %v1602_v23 }
 0x42c   : > { %7799 = vmatprep.subr.bf16.mxu0 %v18037_v45  ;;  %v1058_v29 = vld [vmem:[#allocation7 + $0xee8] sm:$0xff]  ;;  %v18869_v45 = vcombine.high %v1522_v39, %v1538_v40 }
 0x42d   : > { %8645 = vst [vmem:[#allocation2 + $0x20] sm:$0xff] %v20196_v50  ;;  %7839 = vmatpush1.bf16.msra.mxu1 %v18580_v43  ;;  %v1554_v30 = vld [vmem:[#allocation7 + $0x1e68] sm:$0xff]  ;;  %v18389_v34 = vcombine.high %v1042_v28, %v1058_v29  ;;  %v18388_v41 = vcombine.low %v1042_v28, %v1058_v29 }
 0x42e   : > { %7840 = vmatprep.subr.bf16.mxu1 %v18549_v46  ;;  %v1570_v32 = vld [vmem:[#allocation7 + $0x1ee8] sm:$0xff] }
 0x42f   : > { %7800 = vmatpush1.bf16.msra.mxu0 %v18036_v55  ;;  %v18901_v36 = vcombine.high %v1554_v30, %v1570_v32  ;;  %v1010_v37 = vld [vmem:[#allocation7 + $0xd68] sm:$0xff]  ;;  %v18900_v42 = vcombine.low %v1554_v30, %v1570_v32 }
 0x430   : > { %7801 = vmatprep.subr.bf16.mxu0 %v18005_v57  ;;  %v1026_v38 = vld [vmem:[#allocation7 + $0xde8] sm:$0xff] }
 0x431   : > { %7841 = vmatpush1.bf16.msra.mxu1 %v18548_v56  ;;  %v18357_v43 = vcombine.high %v1010_v37, %v1026_v38  ;;  %v978_v46 = vld [vmem:[#allocation7 + $0xc68] sm:$0xff]  ;;  %v18356_v47 = vcombine.low %v1010_v37, %v1026_v38  ;;  %v1331_v37 = vld [vmem:[#allocation7 + $0x1770] sm:$0xff] }
 0x432   : > { %7842 = vmatprep.subr.bf16.mxu1 %v18517_v60  ;;  %v994_v48 = vld [vmem:[#allocation7 + $0xce8] sm:$0xff]  ;;  %v1347_v38 = vld [vmem:[#allocation7 + $0x17f0] sm:$0xff] }
 0x433   : > { %7802 = vmatpush1.bf16.msra.mxu0 %v18004_v1  ;;  %v1490_v4 = vld [vmem:[#allocation7 + $0x1c68] sm:$0xff]  ;;  %v18325_v55 = vcombine.high %v978_v46, %v994_v48  ;;  %v18324_v63 = vcombine.low %v978_v46, %v994_v48  ;;  %v1299_v46 = vld [vmem:[#allocation7 + $0x1670] sm:$0xff] }
 0x434   : > { %7803 = vmatprep.subr.bf16.mxu0 %v17973_v3  ;;  %v1506_v50 = vld [vmem:[#allocation7 + $0x1ce8] sm:$0xff]  ;;  %v1315_v48 = vld [vmem:[#allocation7 + $0x16f0] sm:$0xff] }
 0x435   : > { %7843 = vmatpush1.bf16.msra.mxu1 %v18516_v2  ;;  %v18837_v56 = vcombine.high %v1490_v4, %v1506_v50  ;;  %v946_v57 = vld [vmem:[#allocation7 + $0xb68] sm:$0xff]  ;;  %v18836_v0 = vcombine.low %v1490_v4, %v1506_v50  ;;  %v18678_v50 = vcombine.low %v1331_v37, %v1347_v38 }
 0x436   : > { %7844 = vmatprep.subr.bf16.mxu1 %v18485_v6  ;;  %v962_v60 = vld [vmem:[#allocation7 + $0xbe8] sm:$0xff] }
 0x437   : > { %7804 = vmatpush1.bf16.msra.mxu0 %v17972_v12  ;;  %v1458_v61 = vld [vmem:[#allocation7 + $0x1b68] sm:$0xff]  ;;  %v18293_v1 = vcombine.high %v946_v57, %v962_v60  ;;  %v18292_v10 = vcombine.low %v946_v57, %v962_v60  ;;  %v8131_v60 = vrot.slane %v23061_v51, %v22982_v15 }
 0x438   : > { %7805 = vmatprep.subr.bf16.mxu0 %v17941_v14  ;;  %v1474_v62 = vld [vmem:[#allocation7 + $0x1be8] sm:$0xff] }
 0x439   : > { %7845 = vmatpush1.bf16.msra.mxu1 %v18484_v13  ;;  %v18805_v2 = vcombine.high %v1458_v61, %v1474_v62  ;;  %v914_v3 = vld [vmem:[#allocation7 + $0xa68] sm:$0xff]  ;;  %v18804_v11 = vcombine.low %v1458_v61, %v1474_v62  ;;  %v1267_v61 = vld [vmem:[#allocation7 + $0x1570] sm:$0xff] }
 0x43a   : > { %7846 = vmatprep.subr.bf16.mxu1 %v18453_v17  ;;  %v930_v6 = vld [vmem:[#allocation7 + $0xae8] sm:$0xff]  ;;  %v1283_v62 = vld [vmem:[#allocation7 + $0x15f0] sm:$0xff] }
 0x43b   : > { %7806 = vmatpush1.bf16.msra.mxu0 %v17940_v24  ;;  %v1426_v7 = vld [vmem:[#allocation7 + $0x1a68] sm:$0xff]  ;;  %v18261_v12 = vcombine.high %v914_v3, %v930_v6  ;;  %v18260_v22 = vcombine.low %v914_v3, %v930_v6 }
 0x43c   : > { %7807 = vmatprep.subr.bf16.mxu0 %v18421_v35  ;;  %v1442_v8 = vld [vmem:[#allocation7 + $0x1ae8] sm:$0xff] }
 0x43d   : > { %7847 = vmatpush1.bf16.msra.mxu1 %v18452_v25  ;;  %v18773_v13 = vcombine.high %v1426_v7, %v1442_v8  ;;  %v882_v14 = vld [vmem:[#allocation7 + $0x968] sm:$0xff]  ;;  %v18772_v23 = vcombine.low %v1426_v7, %v1442_v8  ;;  %v18646_v7 = vcombine.low %v1299_v46, %v1315_v48 }
 0x43e   : > { %7848 = vmatprep.subr.bf16.mxu1 %v18933_v26  ;;  %v898_v17 = vld [vmem:[#allocation7 + $0x9e8] sm:$0xff] }
 0x43f   : > { %7808 = vmatpush2.bf16.msra.mxu0 %v18420_v33  ;;  %v1394_v18 = vld [vmem:[#allocation7 + $0x1968] sm:$0xff]  ;;  %v18229_v24 = vcombine.high %v882_v14, %v898_v17  ;;  %v18228_v30 = vcombine.low %v882_v14, %v898_v17 }
 0x440   : > { %7809 = vmatprep.subr.bf16.mxu0 %v18389_v34  ;;  %v1410_v20 = vld [vmem:[#allocation7 + $0x19e8] sm:$0xff]  ;;  %v819_v34 = vld [vmem:[#allocation7 + $0x770] sm:$0xff] }
 0x441   : > { %7849 = vmatpush2.bf16.msra.mxu1 %v18932_v52  ;;  %v18741_v25 = vcombine.high %v1394_v18, %v1410_v20  ;;  %v850_v35 = vld [vmem:[#allocation7 + $0x868] sm:$0xff]  ;;  %v18740_v32 = vcombine.low %v1394_v18, %v1410_v20  ;;  %v8339_v18 = vrot.slane %v23063_v53, %v22985_v21  ;;  %v1235_v20 = vld [vmem:[#allocation7 + $0x1470] sm:$0xff] }
 0x442   : > { %7850 = vmatprep.subr.bf16.mxu1 %v18901_v36  ;;  %v866_v26 = vld [vmem:[#allocation7 + $0x8e8] sm:$0xff]  ;;  %v835_v36 = vld [vmem:[#allocation7 + $0x7f0] sm:$0xff] }
 0x443   : > { %7810 = vmatpush2.bf16.msra.mxu0 %v18388_v41  ;;  %v1362_v28 = vld [vmem:[#allocation7 + $0x1868] sm:$0xff]  ;;  %v18197_v33 = vcombine.high %v850_v35, %v866_v26  ;;  %v18196_v39 = vcombine.low %v850_v35, %v866_v26  ;;  %v18167_v41 = vcombine.high %v819_v34, %v835_v36  ;;  %v18166_v4 = vcombine.low %v819_v34, %v835_v36  ;;  %v1203_v36 = vld [vmem:[#allocation7 + $0x1370] sm:$0xff] }
 0x444   : > { %7811 = vmatprep.subr.bf16.mxu0 %v18357_v43  ;;  %v1378_v29 = vld [vmem:[#allocation7 + $0x18e8] sm:$0xff]  ;;  %v787_v43 = vld [vmem:[#allocation7 + $0x670] sm:$0xff] }
 0x445   : > { %7851 = vmatpush2.bf16.msra.mxu1 %v18900_v42  ;;  %v18709_v52 = vcombine.high %v1362_v28, %v1378_v29  ;;  %v18708_v40 = vcombine.low %v1362_v28, %v1378_v29  ;;  %v18679_v42 = vcombine.high %v1331_v37, %v1347_v38  ;;  %v1219_v37 = vld [vmem:[#allocation7 + $0x13f0] sm:$0xff] }
 0x446   : > { %7852 = vmatprep.subr.bf16.mxu1 %v18869_v45  ;;  %v803_v45 = vld [vmem:[#allocation7 + $0x6f0] sm:$0xff] }
 0x447   : > { %7812 = vmatpush2.bf16.msra.mxu0 %v18356_v47  ;;  %v18135_v47 = vcombine.high %v787_v43, %v803_v45 }
 0x448   : > { %7813 = vmatprep.subr.bf16.mxu0 %v18325_v55  ;;  %v755_v55 = vld [vmem:[#allocation7 + $0x570] sm:$0xff] }
 0x449   : > { %7853 = vmatpush2.bf16.msra.mxu1 %v18868_v54  ;;  %v18647_v54 = vcombine.high %v1299_v46, %v1315_v48  ;;  %v1171_v48 = vld [vmem:[#allocation7 + $0x1270] sm:$0xff] }
 0x44a   : > { %7854 = vmatprep.subr.bf16.mxu1 %v18837_v56  ;;  %v771_v56 = vld [vmem:[#allocation7 + $0x5f0] sm:$0xff] }
 0x44b   : > { %7814 = vmatpush2.bf16.msra.mxu0 %v18324_v63  ;;  %v18103_v8 = vcombine.high %v755_v55, %v771_v56 }
 0x44c   : > { %7815 = vmatprep.subr.bf16.mxu0 %v18293_v1  ;;  %v8135_v1 = vrot.slane %v23061_v51, %v22985_v21 }
 0x44d   : > { %7855 = vmatpush2.bf16.msra.mxu1 %v18836_v0  ;;  %v8335_v0 = vrot.slane %v23063_v53, %v22982_v15  ;;  %v707_v53 = vld [vmem:[#allocation7 + $0x3f0] sm:$0xff] }
 0x44e   : > { %7856 = vmatprep.subr.bf16.mxu1 %v18805_v2  ;;  %v18134_v2 = vcombine.low %v787_v43, %v803_v45  ;;  %v659_v43 = vld [vmem:[#allocation7 + $0x270] sm:$0xff] }
 0x44f   : > { %7816 = vmatpush2.bf16.msra.mxu0 %v18292_v10  ;;  %v675_v45 = vld [vmem:[#allocation7 + $0x2f0] sm:$0xff] }
 0x450   : > { %7817 = vmatprep.subr.bf16.mxu0 %v18261_v12  ;;  %v723_v12 = vld [vmem:[#allocation7 + $0x470] sm:$0xff] }
 0x451   : > { %7857 = vmatpush2.bf16.msra.mxu1 %v18804_v11  ;;  %v18615_v11 = vcombine.high %v1267_v61, %v1283_v62 }
 0x452   : > { %7858 = vmatprep.subr.bf16.mxu1 %v18773_v13  ;;  %v739_v13 = vld [vmem:[#allocation7 + $0x4f0] sm:$0xff] }
 0x453   : > { %7818 = vmatpush2.bf16.msra.mxu0 %v18260_v22  ;;  %v1251_v22 = vld [vmem:[#allocation7 + $0x14f0] sm:$0xff]  ;;  %v18071_v29 = vcombine.high %v723_v12, %v739_v13  ;;  %v18070_v38 = vcombine.low %v723_v12, %v739_v13 }
 0x454   : > { %7819 = vmatprep.subr.bf16.mxu0 %v18229_v24  ;;  %v18102_v24 = vcombine.low %v755_v55, %v771_v56  ;;  %v627_v56 = vld [vmem:[#allocation7 + $0x170] sm:$0xff] }
 0x455   : > { %7859 = vmatpush2.bf16.msra.mxu1 %v18772_v23  ;;  %v1075_v13 = vld [vmem:[#allocation7 + $0xf70] sm:$0xff] }
 0x456   : > { %7860 = vmatprep.subr.bf16.mxu1 %v18741_v25  ;;  %v18614_v25 = vcombine.low %v1267_v61, %v1283_v62  ;;  %v1155_v61 = vld [vmem:[#allocation7 + $0x11f0] sm:$0xff]  ;;  %v18006_v62 = vcombine.low %v659_v43, %v675_v45 }
 0x457   : > { %7820 = vmatpush2.bf16.msra.mxu0 %v18228_v30 }
 0x458   : > { %7821 = vmatprep.subr.bf16.mxu0 %v18197_v33  ;;  %v691_v33 = vld [vmem:[#allocation7 + $0x370] sm:$0xff] }
 0x459   : > { %7861 = vmatpush2.bf16.msra.mxu1 %v18740_v32  ;;  %v18583_v32 = vcombine.high %v1235_v20, %v1251_v22 }
 0x45a   : > { %7862 = vmatprep.subr.bf16.mxu1 %v18709_v52 }
 0x45b   : > { %7822 = vmatpush2.bf16.msra.mxu0 %v18196_v39 }
 0x45c   : > { %7873 = vmatprep.subr.bf16.mxu0 %v18167_v41  ;;  %v18039_v41 = vcombine.high %v691_v33, %v707_v53 }
 0x45d   : > { %7863 = vmatpush2.bf16.msra.mxu1 %v18708_v40  ;;  %v18582_v40 = vcombine.low %v1235_v20, %v1251_v22 }
 0x45e   : > { %7914 = vmatprep.subr.bf16.mxu1 %v18679_v42  ;;  %v7579_v57 = vpop.f32.mrf.mxu0  ;;  %7824 = vmatmul.mubr.bf16.vlgmr.msra.gmra.mxu0 %v22923_v16  ;;  %v18551_v42 = vcombine.high %v1203_v36, %v1219_v37 }
 0x45f   : > { %7874 = vmatpush1.bf16.msra.mxu0 %v18166_v4  ;;  %7905 = vmatprep.mubr.bf16.mxu0 %v22917_v58  ;;  %v1187_v4 = vld [vmem:[#allocation7 + $0x12f0] sm:$0xff] }
 0x460   : > { %v7620_v63 = vpop.f32.mrf.mxu1  ;;  %7865 = vmatmul.mubr.bf16.vlgmr.msra.gmra.mxu1 %v22925_v19  ;;  %v7581_v6 = vpop.f32.mrf.mxu0  ;;  %7875 = vmatprep.subr.bf16.mxu0 %v18135_v47  ;;  %v18550_v47 = vcombine.low %v1203_v36, %v1219_v37  ;;  %v18519_v55 = vcombine.high %v1171_v48, %v1187_v4 }
 0x461   : > { %v7621_v3 = vadd.f32 %v7620_v63, %v7579_v57  ;;  %7915 = vmatpush1.bf16.msra.mxu1 %v18678_v50  ;;  %7946 = vmatprep.mubr.bf16.mxu1 %v22919_v59  ;;  %v18038_v50 = vcombine.low %v691_v33, %v707_v53  ;;  %v643_v57 = vld [vmem:[#allocation7 + $0x1f0] sm:$0xff]  ;;  %v18518_v63 = vcombine.low %v1171_v48, %v1187_v4 }
 0x462   : > { %v7622_v10 = vpop.f32.mrf.mxu1  ;;  %7916 = vmatprep.subr.bf16.mxu1 %v18647_v54  ;;  %v7583_v51 = vpop.f32.mrf.mxu0  ;;  %v18007_v54 = vcombine.high %v659_v43, %v675_v45  ;;  %v1011_v33 = vld [vmem:[#allocation7 + $0xd70] sm:$0xff] }
 0x463   : > { %v8228_v14 = vmul.f32 %v8131_v60, %v7621_v3  ;;  %v7623_v17 = vadd.f32 %v7622_v10, %v7581_v6  ;;  %7876 = vmatpush1.bf16.msra.mxu0 %v18134_v2  ;;  %v1139_v60 = vld [vmem:[#allocation7 + $0x1170] sm:$0xff] }
 0x464   : > { %v7624_v23 = vpop.f32.mrf.mxu1  ;;  %v7584_v28 = vpop.f32.mrf.mxu0  ;;  %7877 = vmatprep.subr.bf16.mxu0 %v18103_v8  ;;  %v595_v2 = vld [vmem:[#allocation7 + $0x70] sm:$0xff]  ;;  %v17974_v8 = vcombine.low %v627_v56, %v643_v57  ;;  %v18486_v10 = vcombine.low %v1139_v60, %v1155_v61 }
 0x465   : > { %v8432_v35 = vadd.f32 %v8335_v0, %v8228_v14  ;;  %v8229_v26 = vmul.f32 %v8135_v1, %v7623_v17  ;;  %7917 = vmatpush1.bf16.msra.mxu1 %v18646_v7  ;;  %v17975_v0 = vcombine.high %v627_v56, %v643_v57  ;;  %v18487_v1 = vcombine.high %v1139_v60, %v1155_v61  ;;  %v611_v3 = vld [vmem:[#allocation7 + $0xf0] sm:$0xff] }
 0x466   : > { %v7625_v30 = vpop.f32.mrf.mxu1  ;;  %7918 = vmatprep.subr.bf16.mxu1 %v18615_v11  ;;  %v1107_v6 = vld [vmem:[#allocation7 + $0x1070] sm:$0xff]  ;;  %v17943_v11 = vcombine.high %v595_v2, %v611_v3  ;;  %v17942_v51 = vcombine.low %v595_v2, %v611_v3 }
 0x467   : > { %v8464_v52 = vmax.f32 %v8432_v35, 0.0  ;;  %v8433_v34 = vadd.f32 %v8339_v18, %v8229_v26  ;;  %7878 = vmatpush1.bf16.msra.mxu0 %v18102_v24  ;;  %v1123_v7 = vld [vmem:[#allocation7 + $0x10f0] sm:$0xff] }
 0x468   : > { %7879 = vmatprep.subr.bf16.mxu0 %v18071_v29  ;;  %v18455_v12 = vcombine.high %v1107_v6, %v1123_v7  ;;  %v1091_v14 = vld [vmem:[#allocation7 + $0xff0] sm:$0xff]  ;;  %v18454_v20 = vcombine.low %v1107_v6, %v1123_v7 }
 0x469   : > { %8496 = vst [vmem:[#allocation18 + $0xa0] sm:$0xff] %v8464_v52  ;;  %v8465_v39 = vmax.f32 %v8433_v34, 0.0  ;;  %7919 = vmatpush1.bf16.msra.mxu1 %v18614_v25  ;;  %v1587_v17 = vld [vmem:[#allocation7 + $0x1f70] sm:$0xff]  ;;  %v18423_v22 = vcombine.high %v1075_v13, %v1091_v14  ;;  %v18422_v28 = vcombine.low %v1075_v13, %v1091_v14 }
 0x46a   : > { %7920 = vmatprep.subr.bf16.mxu1 %v18583_v32  ;;  %v1603_v18 = vld [vmem:[#allocation7 + $0x1ff0] sm:$0xff] }
 0x46b   : > { %8497 = vst [vmem:[#allocation18 + $0xa8] sm:$0xff] %v8465_v39  ;;  %v20197_v46 = vpack.c.bf16 %v8465_v39, %v8464_v52  ;;  %7880 = vmatpush1.bf16.msra.mxu0 %v18070_v38  ;;  %v18935_v23 = vcombine.high %v1587_v17, %v1603_v18  ;;  %v1043_v24 = vld [vmem:[#allocation7 + $0xe70] sm:$0xff]  ;;  %v18934_v29 = vcombine.low %v1587_v17, %v1603_v18 }
 0x46c   : > { %7881 = vmatprep.subr.bf16.mxu0 %v18039_v41  ;;  %v1059_v25 = vld [vmem:[#allocation7 + $0xef0] sm:$0xff] }
 0x46d   : > { %8646 = vst [vmem:[#allocation2 + $0x10] sm:$0xff] %v20197_v46  ;;  %7921 = vmatpush1.bf16.msra.mxu1 %v18582_v40  ;;  %v1555_v35 = vld [vmem:[#allocation7 + $0x1e70] sm:$0xff]  ;;  %v18391_v30 = vcombine.high %v1043_v24, %v1059_v25  ;;  %v18390_v36 = vcombine.low %v1043_v24, %v1059_v25 }
 0x46e   : > { %7922 = vmatprep.subr.bf16.mxu1 %v18551_v42  ;;  %v1571_v26 = vld [vmem:[#allocation7 + $0x1ef0] sm:$0xff] }
 0x46f   : > { %7882 = vmatpush1.bf16.msra.mxu0 %v18038_v50  ;;  %v18903_v32 = vcombine.high %v1555_v35, %v1571_v26  ;;  %v1027_v53 = vld [vmem:[#allocation7 + $0xdf0] sm:$0xff]  ;;  %v18902_v37 = vcombine.low %v1555_v35, %v1571_v26 }
 0x470   : > { %7883 = vmatprep.subr.bf16.mxu0 %v18007_v54  ;;  %v1523_v52 = vld [vmem:[#allocation7 + $0x1d70] sm:$0xff]  ;;  %v18359_v38 = vcombine.high %v1011_v33, %v1027_v53  ;;  %v18358_v45 = vcombine.low %v1011_v33, %v1027_v53 }
 0x471   : > { %7923 = vmatpush1.bf16.msra.mxu1 %v18550_v47  ;;  %v1539_v34 = vld [vmem:[#allocation7 + $0x1df0] sm:$0xff] }
 0x472   : > { %7924 = vmatprep.subr.bf16.mxu1 %v18519_v55  ;;  %v18871_v39 = vcombine.high %v1523_v52, %v1539_v34  ;;  %v979_v40 = vld [vmem:[#allocation7 + $0xc70] sm:$0xff]  ;;  %v18870_v46 = vcombine.low %v1523_v52, %v1539_v34 }
 0x473   : > { %7884 = vmatpush1.bf16.msra.mxu0 %v18006_v62  ;;  %v995_v41 = vld [vmem:[#allocation7 + $0xcf0] sm:$0xff] }
 0x474   : > { %7885 = vmatprep.subr.bf16.mxu0 %v17975_v0  ;;  %v1491_v42 = vld [vmem:[#allocation7 + $0x1c70] sm:$0xff]  ;;  %v18327_v48 = vcombine.high %v979_v40, %v995_v41  ;;  %v18326_v56 = vcombine.low %v979_v40, %v995_v41 }
 0x475   : > { %7925 = vmatpush1.bf16.msra.mxu1 %v18518_v63  ;;  %v1507_v43 = vld [vmem:[#allocation7 + $0x1cf0] sm:$0xff] }
 0x476   : > { %7926 = vmatprep.subr.bf16.mxu1 %v18487_v1  ;;  %v18839_v4 = vcombine.high %v1491_v42, %v1507_v43  ;;  %v947_v50 = vld [vmem:[#allocation7 + $0xb70] sm:$0xff]  ;;  %v18838_v57 = vcombine.low %v1491_v42, %v1507_v43 }
 0x477   : > { %7886 = vmatpush1.bf16.msra.mxu0 %v17974_v8  ;;  %v963_v47 = vld [vmem:[#allocation7 + $0xbf0] sm:$0xff] }
 0x478   : > { %7887 = vmatprep.subr.bf16.mxu0 %v17943_v11  ;;  %v1459_v54 = vld [vmem:[#allocation7 + $0x1b70] sm:$0xff]  ;;  %v18295_v60 = vcombine.high %v947_v50, %v963_v47  ;;  %v18294_v2 = vcombine.low %v947_v50, %v963_v47  ;;  %v1268_v47 = vld [vmem:[#allocation7 + $0x1578] sm:$0xff] }
 0x479   : > { %7927 = vmatpush1.bf16.msra.mxu1 %v18486_v10  ;;  %v1475_v55 = vld [vmem:[#allocation7 + $0x1bf0] sm:$0xff] }
 0x47a   : > { %7928 = vmatprep.subr.bf16.mxu1 %v18455_v12  ;;  %v18807_v61 = vcombine.high %v1459_v54, %v1475_v55  ;;  %v915_v62 = vld [vmem:[#allocation7 + $0xa70] sm:$0xff]  ;;  %v18806_v3 = vcombine.low %v1459_v54, %v1475_v55  ;;  %v1284_v54 = vld [vmem:[#allocation7 + $0x15f8] sm:$0xff] }
 0x47b   : > { %7888 = vmatpush1.bf16.msra.mxu0 %v17942_v51  ;;  %v931_v63 = vld [vmem:[#allocation7 + $0xaf0] sm:$0xff] }
 0x47c   : > { %7889 = vmatprep.subr.bf16.mxu0 %v18423_v22  ;;  %v1427_v0 = vld [vmem:[#allocation7 + $0x1a70] sm:$0xff]  ;;  %v18263_v6 = vcombine.high %v915_v62, %v931_v63  ;;  %v18262_v13 = vcombine.low %v915_v62, %v931_v63 }
 0x47d   : > { %7929 = vmatpush1.bf16.msra.mxu1 %v18454_v20  ;;  %v1443_v1 = vld [vmem:[#allocation7 + $0x1af0] sm:$0xff] }
 0x47e   : > { %7930 = vmatprep.subr.bf16.mxu1 %v18935_v23  ;;  %v18775_v7 = vcombine.high %v1427_v0, %v1443_v1  ;;  %v883_v8 = vld [vmem:[#allocation7 + $0x970] sm:$0xff]  ;;  %v18774_v14 = vcombine.low %v1427_v0, %v1443_v1 }
 0x47f   : > { %7890 = vmatpush2.bf16.msra.mxu0 %v18422_v28  ;;  %v899_v10 = vld [vmem:[#allocation7 + $0x9f0] sm:$0xff]  ;;  %v820_v28 = vld [vmem:[#allocation7 + $0x778] sm:$0xff] }
 0x480   : > { %7891 = vmatprep.subr.bf16.mxu0 %v18391_v30  ;;  %v1395_v11 = vld [vmem:[#allocation7 + $0x1970] sm:$0xff]  ;;  %v18231_v17 = vcombine.high %v883_v8, %v899_v10  ;;  %v18230_v24 = vcombine.low %v883_v8, %v899_v10  ;;  %v1332_v30 = vld [vmem:[#allocation7 + $0x1778] sm:$0xff] }
 0x481   : > { %7931 = vmatpush2.bf16.msra.mxu1 %v18934_v29  ;;  %v1411_v12 = vld [vmem:[#allocation7 + $0x19f0] sm:$0xff]  ;;  %v836_v29 = vld [vmem:[#allocation7 + $0x7f8] sm:$0xff] }
 0x482   : > { %7932 = vmatprep.subr.bf16.mxu1 %v18903_v32  ;;  %v18743_v18 = vcombine.high %v1395_v11, %v1411_v12  ;;  %v851_v51 = vld [vmem:[#allocation7 + $0x870] sm:$0xff]  ;;  %v18742_v25 = vcombine.low %v1395_v11, %v1411_v12  ;;  %v1348_v32 = vld [vmem:[#allocation7 + $0x17f8] sm:$0xff]  ;;  %v18169_v52 = vcombine.high %v820_v28, %v836_v29  ;;  %v18168_v40 = vcombine.low %v820_v28, %v836_v29 }
 0x483   : > { %7892 = vmatpush2.bf16.msra.mxu0 %v18390_v36  ;;  %v867_v20 = vld [vmem:[#allocation7 + $0x8f0] sm:$0xff]  ;;  %v18681_v34 = vcombine.high %v1332_v30, %v1348_v32  ;;  %v788_v36 = vld [vmem:[#allocation7 + $0x678] sm:$0xff]  ;;  %v18680_v41 = vcombine.low %v1332_v30, %v1348_v32 }
 0x484   : > { %7893 = vmatprep.subr.bf16.mxu0 %v18359_v38  ;;  %v1363_v22 = vld [vmem:[#allocation7 + $0x1870] sm:$0xff]  ;;  %v18199_v35 = vcombine.high %v851_v51, %v867_v20  ;;  %v18198_v33 = vcombine.low %v851_v51, %v867_v20  ;;  %v1300_v38 = vld [vmem:[#allocation7 + $0x1678] sm:$0xff]  ;;  %v18616_v51 = vcombine.low %v1268_v47, %v1284_v54 }
 0x485   : > { %7933 = vmatpush2.bf16.msra.mxu1 %v18902_v37  ;;  %v1379_v23 = vld [vmem:[#allocation7 + $0x18f0] sm:$0xff]  ;;  %v804_v37 = vld [vmem:[#allocation7 + $0x6f8] sm:$0xff] }
 0x486   : > { %7934 = vmatprep.subr.bf16.mxu1 %v18871_v39  ;;  %v18711_v26 = vcombine.high %v1363_v22, %v1379_v23  ;;  %v18710_v53 = vcombine.low %v1363_v22, %v1379_v23  ;;  %v1316_v39 = vld [vmem:[#allocation7 + $0x16f8] sm:$0xff]  ;;  %v18137_v42 = vcombine.high %v788_v36, %v804_v37 }
 0x487   : > { %7894 = vmatpush2.bf16.msra.mxu0 %v18358_v45  ;;  %v18649_v43 = vcombine.high %v1300_v38, %v1316_v39  ;;  %v756_v45 = vld [vmem:[#allocation7 + $0x578] sm:$0xff]  ;;  %v18648_v0 = vcombine.low %v1300_v38, %v1316_v39 }
 0x488   : > { %7895 = vmatprep.subr.bf16.mxu0 %v18327_v48  ;;  %v1204_v30 = vld [vmem:[#allocation7 + $0x1378] sm:$0xff] }
 0x489   : > { %7935 = vmatpush2.bf16.msra.mxu1 %v18870_v46  ;;  %v772_v46 = vld [vmem:[#allocation7 + $0x5f8] sm:$0xff] }
 0x48a   : > { %7936 = vmatprep.subr.bf16.mxu1 %v18839_v4  ;;  %v20385_v4 = vld [vmem:[#allocation9 + $0x20] ss:$2 sm:$0xff]  ;;  %v18105_v1 = vcombine.high %v756_v45, %v772_v46  ;;  %v1220_v32 = vld [vmem:[#allocation7 + $0x13f8] sm:$0xff] }
 0x48b   : > { %7896 = vmatpush2.bf16.msra.mxu0 %v18326_v56  ;;  %v8139_v50 = vrot.slane %v20385_v4, %v23000_v5  ;;  %v20386_v56 = vld [vmem:[#allocation9 + $0x21] ss:$2 sm:$0xff]  ;;  %v1172_v39 = vld [vmem:[#allocation7 + $0x1278] sm:$0xff] }
 0x48c   : > { %7897 = vmatprep.subr.bf16.mxu0 %v18295_v60  ;;  %v8143_v60 = vrot.slane %v20385_v4, %v23003_v9  ;;  %v8347_v11 = vrot.slane %v20386_v56, %v23003_v9  ;;  %v1140_v4 = vld [vmem:[#allocation7 + $0x1178] sm:$0xff] }
 0x48d   : > { %7937 = vmatpush2.bf16.msra.mxu1 %v18838_v57  ;;  %v8343_v57 = vrot.slane %v20386_v56, %v23000_v5 }
 0x48e   : > { %7938 = vmatprep.subr.bf16.mxu1 %v18807_v61  ;;  %v18136_v61 = vcombine.low %v788_v36, %v804_v37  ;;  %v660_v36 = vld [vmem:[#allocation7 + $0x278] sm:$0xff] }
 0x48f   : > { %7898 = vmatpush2.bf16.msra.mxu0 %v18294_v2  ;;  %v676_v37 = vld [vmem:[#allocation7 + $0x2f8] sm:$0xff] }
 0x490   : > { %7899 = vmatprep.subr.bf16.mxu0 %v18263_v6  ;;  %v724_v6 = vld [vmem:[#allocation7 + $0x478] sm:$0xff] }
 0x491   : > { %7939 = vmatpush2.bf16.msra.mxu1 %v18806_v3  ;;  %v18617_v3 = vcombine.high %v1268_v47, %v1284_v54  ;;  %v18008_v47 = vcombine.low %v660_v36, %v676_v37 }
 0x492   : > { %7940 = vmatprep.subr.bf16.mxu1 %v18775_v7  ;;  %v740_v7 = vld [vmem:[#allocation7 + $0x4f8] sm:$0xff] }
 0x493   : > { %7900 = vmatpush2.bf16.msra.mxu0 %v18262_v13  ;;  %v1236_v13 = vld [vmem:[#allocation7 + $0x1478] sm:$0xff] }
 0x494   : > { %7901 = vmatprep.subr.bf16.mxu0 %v18231_v17 }
 0x495   : > { %7941 = vmatpush2.bf16.msra.mxu1 %v18774_v14  ;;  %v1252_v14 = vld [vmem:[#allocation7 + $0x14f8] sm:$0xff] }
 0x496   : > { %7942 = vmatprep.subr.bf16.mxu1 %v18743_v18  ;;  %v18104_v18 = vcombine.low %v756_v45, %v772_v46  ;;  %v628_v46 = vld [vmem:[#allocation7 + $0x178] sm:$0xff] }
 0x497   : > { %7902 = vmatpush2.bf16.msra.mxu0 %v18230_v24  ;;  %v18073_v24 = vcombine.high %v724_v6, %v740_v7 }
 0x498   : > { %7903 = vmatprep.subr.bf16.mxu0 %v18199_v35  ;;  %v692_v35 = vld [vmem:[#allocation7 + $0x378] sm:$0xff] }
 0x499   : > { %7943 = vmatpush2.bf16.msra.mxu1 %v18742_v25  ;;  %v18585_v25 = vcombine.high %v1236_v13, %v1252_v14 }
 0x49a   : > { %7944 = vmatprep.subr.bf16.mxu1 %v18711_v26  ;;  %v708_v26 = vld [vmem:[#allocation7 + $0x3f8] sm:$0xff] }
 0x49b   : > { %7904 = vmatpush2.bf16.msra.mxu0 %v18198_v33 }
 0x49c   : > { %7955 = vmatprep.subr.bf16.mxu0 %v18169_v52  ;;  %v18041_v52 = vcombine.high %v692_v35, %v708_v26 }
 0x49d   : > { %7945 = vmatpush2.bf16.msra.mxu1 %v18710_v53  ;;  %v18584_v53 = vcombine.low %v1236_v13, %v1252_v14  ;;  %v1044_v14 = vld [vmem:[#allocation7 + $0xe78] sm:$0xff] }
 0x49e   : > { %7996 = vmatprep.subr.bf16.mxu1 %v18681_v34  ;;  %v7661_v48 = vpop.f32.mrf.mxu0  ;;  %7906 = vmatmul.mubr.bf16.vlgmr.msra.gmra.mxu0 %v22923_v16  ;;  %v18553_v34 = vcombine.high %v1204_v30, %v1220_v32 }
 0x49f   : > { %7956 = vmatpush1.bf16.msra.mxu0 %v18168_v40  ;;  %7987 = vmatprep.mubr.bf16.mxu0 %v22917_v58  ;;  %v1188_v40 = vld [vmem:[#allocation7 + $0x12f8] sm:$0xff] }
 0x4a0   : > { %v7702_v55 = vpop.f32.mrf.mxu1  ;;  %7947 = vmatmul.mubr.bf16.vlgmr.msra.gmra.mxu1 %v22925_v19  ;;  %v7663_v63 = vpop.f32.mrf.mxu0  ;;  %7957 = vmatprep.subr.bf16.mxu0 %v18137_v42  ;;  %v18552_v42 = vcombine.low %v1204_v30, %v1220_v32  ;;  %v18521_v45 = vcombine.high %v1172_v39, %v1188_v40  ;;  %v18520_v54 = vcombine.low %v1172_v39, %v1188_v40  ;;  %v948_v39 = vld [vmem:[#allocation7 + $0xb78] sm:$0xff] }
 0x4a1   : > { %v7703_v62 = vadd.f32 %v7702_v55, %v7661_v48  ;;  %7997 = vmatpush1.bf16.msra.mxu1 %v18680_v41  ;;  %8028 = vmatprep.mubr.bf16.mxu1 %v22919_v59  ;;  %v18072_v59 = vcombine.low %v724_v6, %v740_v7  ;;  %v18040_v41 = vcombine.low %v692_v35, %v708_v26  ;;  %v644_v48 = vld [vmem:[#allocation7 + $0x1f8] sm:$0xff] }
 0x4a2   : > { %v7704_v2 = vpop.f32.mrf.mxu1  ;;  %7998 = vmatprep.subr.bf16.mxu1 %v18649_v43  ;;  %v7665_v12 = vpop.f32.mrf.mxu0  ;;  %v18009_v43 = vcombine.high %v660_v36, %v676_v37  ;;  %v17977_v55 = vcombine.high %v628_v46, %v644_v48  ;;  %v1092_v6 = vld [vmem:[#allocation7 + $0xff8] sm:$0xff] }
 0x4a3   : > { %v8230_v8 = vmul.f32 %v8139_v50, %v7703_v62  ;;  %v7705_v10 = vadd.f32 %v7704_v2, %v7663_v63  ;;  %7958 = vmatpush1.bf16.msra.mxu0 %v18136_v61  ;;  %v1156_v50 = vld [vmem:[#allocation7 + $0x11f8] sm:$0xff]  ;;  %v17976_v63 = vcombine.low %v628_v46, %v644_v48 }
 0x4a4   : > { %v7706_v17 = vpop.f32.mrf.mxu1  ;;  %v7666_v23 = vpop.f32.mrf.mxu0  ;;  %7959 = vmatprep.subr.bf16.mxu0 %v18105_v1  ;;  %v18489_v56 = vcombine.high %v1140_v4, %v1156_v50  ;;  %v1108_v61 = vld [vmem:[#allocation7 + $0x1078] sm:$0xff] }
 0x4a5   : > { %v8434_v20 = vadd.f32 %v8343_v57, %v8230_v8  ;;  %v8231_v22 = vmul.f32 %v8143_v60, %v7705_v10  ;;  %7999 = vmatpush1.bf16.msra.mxu1 %v18648_v0  ;;  %v596_v57 = vld [vmem:[#allocation7 + $0x78] sm:$0xff]  ;;  %v18488_v0 = vcombine.low %v1140_v4, %v1156_v50 }
 0x4a6   : > { %v7707_v58 = vpop.f32.mrf.mxu1  ;;  %8000 = vmatprep.subr.bf16.mxu1 %v18617_v3  ;;  %v612_v60 = vld [vmem:[#allocation7 + $0xf8] sm:$0xff] }
 0x4a7   : > { %v8466_v28 = vmax.f32 %v8434_v20, 0.0  ;;  %v8435_v29 = vadd.f32 %v8347_v11, %v8231_v22  ;;  %7960 = vmatpush1.bf16.msra.mxu0 %v18104_v18  ;;  %v1124_v62 = vld [vmem:[#allocation7 + $0x10f8] sm:$0xff]  ;;  %v17945_v1 = vcombine.high %v596_v57, %v612_v60  ;;  %v17944_v10 = vcombine.low %v596_v57, %v612_v60 }
 0x4a8   : > { %7961 = vmatprep.subr.bf16.mxu0 %v18073_v24  ;;  %v18457_v2 = vcombine.high %v1108_v61, %v1124_v62  ;;  %v1076_v3 = vld [vmem:[#allocation7 + $0xf78] sm:$0xff]  ;;  %v18456_v11 = vcombine.low %v1108_v61, %v1124_v62 }
 0x4a9   : > { %8498 = vst [vmem:[#allocation18 + $0xb0] sm:$0xff] %v8466_v28  ;;  %v8467_v33 = vmax.f32 %v8435_v29, 0.0  ;;  %8001 = vmatpush1.bf16.msra.mxu1 %v18616_v51  ;;  %v1588_v7 = vld [vmem:[#allocation7 + $0x1f78] sm:$0xff]  ;;  %v18425_v12 = vcombine.high %v1076_v3, %v1092_v6  ;;  %v18424_v20 = vcombine.low %v1076_v3, %v1092_v6 }
 0x4aa   : > { %8002 = vmatprep.subr.bf16.mxu1 %v18585_v25  ;;  %v1604_v8 = vld [vmem:[#allocation7 + $0x1ff8] sm:$0xff] }
 0x4ab   : > { %8499 = vst [vmem:[#allocation18 + $0xb8] sm:$0xff] %v8467_v33  ;;  %v20198_v38 = vpack.c.bf16 %v8467_v33, %v8466_v28  ;;  %7962 = vmatpush1.bf16.msra.mxu0 %v18072_v59  ;;  %v18937_v13 = vcombine.high %v1588_v7, %v1604_v8  ;;  %v1060_v17 = vld [vmem:[#allocation7 + $0xef8] sm:$0xff]  ;;  %v18936_v22 = vcombine.low %v1588_v7, %v1604_v8 }
 0x4ac   : > { %7963 = vmatprep.subr.bf16.mxu0 %v18041_v52  ;;  %v1556_v18 = vld [vmem:[#allocation7 + $0x1e78] sm:$0xff]  ;;  %v18393_v23 = vcombine.high %v1044_v14, %v1060_v17  ;;  %v18392_v28 = vcombine.low %v1044_v14, %v1060_v17 }
 0x4ad   : > { %8647 = vst [vmem:[#allocation2 + $0x38] sm:$0xff] %v20198_v38  ;;  %8003 = vmatpush1.bf16.msra.mxu1 %v18584_v53  ;;  %v1572_v51 = vld [vmem:[#allocation7 + $0x1ef8] sm:$0xff] }
 0x4ae   : > { %8004 = vmatprep.subr.bf16.mxu1 %v18553_v34  ;;  %v18905_v24 = vcombine.high %v1556_v18, %v1572_v51  ;;  %v1012_v58 = vld [vmem:[#allocation7 + $0xd78] sm:$0xff]  ;;  %v18904_v29 = vcombine.low %v1556_v18, %v1572_v51 }
 0x4af   : > { %7964 = vmatpush1.bf16.msra.mxu0 %v18040_v41  ;;  %v1028_v25 = vld [vmem:[#allocation7 + $0xdf8] sm:$0xff] }
 0x4b0   : > { %7965 = vmatprep.subr.bf16.mxu0 %v18009_v43  ;;  %v1524_v35 = vld [vmem:[#allocation7 + $0x1d78] sm:$0xff]  ;;  %v18361_v30 = vcombine.high %v1012_v58, %v1028_v25  ;;  %v18360_v34 = vcombine.low %v1012_v58, %v1028_v25 }
 0x4b1   : > { %8005 = vmatpush1.bf16.msra.mxu1 %v18552_v42  ;;  %v1540_v26 = vld [vmem:[#allocation7 + $0x1df8] sm:$0xff] }
 0x4b2   : > { %8006 = vmatprep.subr.bf16.mxu1 %v18521_v45  ;;  %v18873_v32 = vcombine.high %v1524_v35, %v1540_v26  ;;  %v980_v59 = vld [vmem:[#allocation7 + $0xc78] sm:$0xff]  ;;  %v18872_v36 = vcombine.low %v1524_v35, %v1540_v26 }
 0x4b3   : > { %7966 = vmatpush1.bf16.msra.mxu0 %v18008_v47  ;;  %v996_v33 = vld [vmem:[#allocation7 + $0xcf8] sm:$0xff] }
 0x4b4   : > { %7967 = vmatprep.subr.bf16.mxu0 %v17977_v55  ;;  %v1492_v53 = vld [vmem:[#allocation7 + $0x1c78] sm:$0xff]  ;;  %v18329_v37 = vcombine.high %v980_v59, %v996_v33  ;;  %v18328_v43 = vcombine.low %v980_v59, %v996_v33 }
 0x4b5   : > { %8007 = vmatpush1.bf16.msra.mxu1 %v18520_v54  ;;  %v1508_v52 = vld [vmem:[#allocation7 + $0x1cf8] sm:$0xff] }
 0x4b6   : > { %8008 = vmatprep.subr.bf16.mxu1 %v18489_v56  ;;  %v18841_v38 = vcombine.high %v1492_v53, %v1508_v52  ;;  %v964_v40 = vld [vmem:[#allocation7 + $0xbf8] sm:$0xff]  ;;  %v18840_v45 = vcombine.low %v1492_v53, %v1508_v52 }
 0x4b7   : > { %7968 = vmatpush1.bf16.msra.mxu0 %v17976_v63  ;;  %v1460_v41 = vld [vmem:[#allocation7 + $0x1b78] sm:$0xff]  ;;  %v18297_v46 = vcombine.high %v948_v39, %v964_v40  ;;  %v18296_v55 = vcombine.low %v948_v39, %v964_v40 }
 0x4b8   : > { %7969 = vmatprep.subr.bf16.mxu0 %v17945_v1  ;;  %v1476_v42 = vld [vmem:[#allocation7 + $0x1bf8] sm:$0xff] }
 0x4b9   : > { %8009 = vmatpush1.bf16.msra.mxu1 %v18488_v0  ;;  %v18809_v48 = vcombine.high %v1460_v41, %v1476_v42  ;;  %v916_v4 = vld [vmem:[#allocation7 + $0xa78] sm:$0xff]  ;;  %v18808_v56 = vcombine.low %v1460_v41, %v1476_v42 }
 0x4ba   : > { %8010 = vmatprep.subr.bf16.mxu1 %v18457_v2  ;;  %v932_v50 = vld [vmem:[#allocation7 + $0xaf8] sm:$0xff] }
 0x4bb   : > { %7970 = vmatpush1.bf16.msra.mxu0 %v17944_v10  ;;  %v1428_v47 = vld [vmem:[#allocation7 + $0x1a78] sm:$0xff]  ;;  %v18265_v57 = vcombine.high %v916_v4, %v932_v50  ;;  %v18264_v1 = vcombine.low %v916_v4, %v932_v50 }
 0x4bc   : > { %7971 = vmatprep.subr.bf16.mxu0 %v18425_v12  ;;  %v1444_v54 = vld [vmem:[#allocation7 + $0x1af8] sm:$0xff] }
 0x4bd   : > { %8011 = vmatpush1.bf16.msra.mxu1 %v18456_v11  ;;  %v18777_v60 = vcombine.high %v1428_v47, %v1444_v54  ;;  %v884_v61 = vld [vmem:[#allocation7 + $0x978] sm:$0xff]  ;;  %v18776_v2 = vcombine.low %v1428_v47, %v1444_v54 }
 0x4be   : > { %8012 = vmatprep.subr.bf16.mxu1 %v18937_v13  ;;  %v900_v62 = vld [vmem:[#allocation7 + $0x9f8] sm:$0xff] }
 0x4bf   : > { %7972 = vmatpush2.bf16.msra.mxu0 %v18424_v20  ;;  %v1396_v63 = vld [vmem:[#allocation7 + $0x1978] sm:$0xff]  ;;  %v18233_v3 = vcombine.high %v884_v61, %v900_v62  ;;  %v18232_v12 = vcombine.low %v884_v61, %v900_v62 }
 0x4c0   : > { %7973 = vmatprep.subr.bf16.mxu0 %v18393_v23  ;;  %v1412_v0 = vld [vmem:[#allocation7 + $0x19f8] sm:$0xff] }
 0x4c1   : > { %8013 = vmatpush2.bf16.msra.mxu1 %v18936_v22  ;;  %v18745_v6 = vcombine.high %v1396_v63, %v1412_v0  ;;  %v852_v7 = vld [vmem:[#allocation7 + $0x878] sm:$0xff]  ;;  %v18744_v13 = vcombine.low %v1396_v63, %v1412_v0  ;;  %v22581_v0 = vmov 0.0  }
 0x4c2   : > { %8014 = vmatprep.subr.bf16.mxu1 %v18905_v24  ;;  %v868_v8 = vld [vmem:[#allocation7 + $0x8f8] sm:$0xff]  ;;  %8652 = vst [vmem:[#allocation3 + $0x8] sm:$0xff] %v22581_v0  ;;  %8653 = vst [vmem:[#allocation3] sm:$0xff] %v22581_v0 }
 0x4c3   : > { %7974 = vmatpush2.bf16.msra.mxu0 %v18392_v28  ;;  %v1364_v10 = vld [vmem:[#allocation7 + $0x1878] sm:$0xff]  ;;  %v18201_v14 = vcombine.high %v852_v7, %v868_v8  ;;  %v18200_v18 = vcombine.low %v852_v7, %v868_v8  ;;  %8654 = vst [vmem:[#allocation3 + $0x10] sm:$0xff] %v22581_v0  ;;  %8655 = vst [vmem:[#allocation3 + $0x18] sm:$0xff] %v22581_v0 }
 0x4c4   : > { %7975 = vmatprep.subr.bf16.mxu0 %v18361_v30  ;;  %v1380_v11 = vld [vmem:[#allocation7 + $0x18f8] sm:$0xff] }
 0x4c5   : > { %8015 = vmatpush2.bf16.msra.mxu1 %v18904_v29  ;;  %v18713_v17 = vcombine.high %v1364_v10, %v1380_v11  ;;  %v18712_v51 = vcombine.low %v1364_v10, %v1380_v11  ;;  %v23109_v20 = vld [vmem:[#allocation9 + $0x30] ss:$2 sm:$0xff]  ;;  %v23111_v22 = vld [vmem:[#allocation9 + $0x31] ss:$2 sm:$0xff] }
 0x4c6   : > { %8016 = vmatprep.subr.bf16.mxu1 %v18873_v32  ;;  %v8147_v24 = vrot.slane %v23109_v20, %v22942_v44  ;;  %v8351_v35 = vrot.slane %v23111_v22, %v22942_v44  ;;  %v8151_v28 = vrot.slane %v23109_v20, %v22947_v49  ;;  %v8355_v59 = vrot.slane %v23111_v22, %v22947_v49 }
 0x4c7   : > { %7976 = vmatpush2.bf16.msra.mxu0 %v18360_v34  ;;  %v8155_v40 = vrot.slane %v23109_v20, %v22964_v27  ;;  %v8359_v49 = vrot.slane %v23111_v22, %v22964_v27  ;;  %v8363_v50 = vrot.slane %v23111_v22, %v22967_v31  ;;  %v8167_v8 = vrot.slane %v23109_v20, %v22985_v21 }
 0x4c8   : > { %7977 = vmatprep.subr.bf16.mxu0 %v18329_v37 }
 0x4c9   : > { %8017 = vmatpush2.bf16.msra.mxu1 %v18872_v36 }
 0x4ca   : > { %8018 = vmatprep.subr.bf16.mxu1 %v18841_v38 }
 0x4cb   : > { %7978 = vmatpush2.bf16.msra.mxu0 %v18328_v43 }
 0x4cc   : > { %7979 = vmatprep.subr.bf16.mxu0 %v18297_v46 }
 0x4cd   : > { %8019 = vmatpush2.bf16.msra.mxu1 %v18840_v45  ;;  %v8159_v45 = vrot.slane %v23109_v20, %v22967_v31  ;;  %v8163_v31 = vrot.slane %v23109_v20, %v22982_v15 }
 0x4ce   : > { %8020 = vmatprep.subr.bf16.mxu1 %v18809_v48 }
 0x4cf   : > { %7980 = vmatpush2.bf16.msra.mxu0 %v18296_v55 }
 0x4d0   : > { %7981 = vmatprep.subr.bf16.mxu0 %v18265_v57 }
 0x4d1   : > { %8021 = vmatpush2.bf16.msra.mxu1 %v18808_v56 }
 0x4d2   : > { %8022 = vmatprep.subr.bf16.mxu1 %v18777_v60 }
 0x4d3   : > { %7982 = vmatpush2.bf16.msra.mxu0 %v18264_v1 }
 0x4d4   : > { %7983 = vmatprep.subr.bf16.mxu0 %v18233_v3 }
 0x4d5   : > { %8023 = vmatpush2.bf16.msra.mxu1 %v18776_v2 }
 0x4d6   : > { %8024 = vmatprep.subr.bf16.mxu1 %v18745_v6  ;;  %v8367_v6 = vrot.slane %v23111_v22, %v22982_v15 }
 0x4d7   : > { %7984 = vmatpush2.bf16.msra.mxu0 %v18232_v12 }
 0x4d8   : > { %7985 = vmatprep.subr.bf16.mxu0 %v18201_v14 }
 0x4d9   : > { %8025 = vmatpush2.bf16.msra.mxu1 %v18744_v13  ;;  %v8371_v13 = vrot.slane %v23111_v22, %v22985_v21  ;;  %v8375_v21 = vrot.slane %v23111_v22, %v23000_v5 }
 0x4da   : > { %8026 = vmatprep.subr.bf16.mxu1 %v18713_v17 }
 0x4db   : > { %7986 = vmatpush2.bf16.msra.mxu0 %v18200_v18 }
 0x4dd   : > { %8027 = vmatpush2.bf16.msra.mxu1 %v18712_v51 }
 0x4de   : > { %v7743_v23 = vpop.f32.mrf.mxu0  ;;  %7988 = vmatmul.mubr.bf16.vlgmr.msra.gmra.mxu0 %v22923_v16 }
 0x4e0   : > { %v7784_v58 = vpop.f32.mrf.mxu1  ;;  %8029 = vmatmul.mubr.bf16.vlgmr.msra.gmra.mxu1 %v22925_v19  ;;  %v7745_v26 = vpop.f32.mrf.mxu0 }
 0x4e1   : > { %v7785_v25 = vadd.f32 %v7784_v58, %v7743_v23 }
 0x4e2   : > { %v7786_v29 = vpop.f32.mrf.mxu1  ;;  %v7747_v33 = vpop.f32.mrf.mxu0 }
 0x4e3   : > { %v8232_v30 = vmul.f32 %v8147_v24, %v7785_v25  ;;  %v7787_v32 = vadd.f32 %v7786_v29, %v7745_v26 }
 0x4e4   : > { %v7788_v53 = vpop.f32.mrf.mxu1  ;;  %v7748_v34 = vpop.f32.mrf.mxu0 }
 0x4e5   : > { %v8436_v16 = vadd.f32 %v8351_v35, %v8232_v30  ;;  %v8233_v52 = vmul.f32 %v8151_v28, %v7787_v32  ;;  %v8171_v28 = vrot.slane %v23109_v20, %v23000_v5 }
 0x4e6   : > { %v7789_v19 = vpop.f32.mrf.mxu1 }
 0x4e7   : > { %v8468_v36 = vmax.f32 %v8436_v16, 0.0  ;;  %v8437_v37 = vadd.f32 %v8355_v59, %v8233_v52  ;;  %v8175_v59 = vrot.slane %v23109_v20, %v23003_v9  ;;  %v8379_v52 = vrot.slane %v23111_v22, %v23003_v9 }
 0x4e9   : > { %8500 = vst [vmem:[#allocation18 + $0xc0] sm:$0xff] %v8468_v36  ;;  %v8469_v44 = vmax.f32 %v8437_v37, 0.0 }
 0x4eb   : > { %8501 = vst [vmem:[#allocation18 + $0xc8] sm:$0xff] %v8469_v44  ;;  %v20199_v38 = vpack.c.bf16 %v8469_v44, %v8468_v36 }
 0x4ed   : > { %8648 = vst [vmem:[#allocation2 + $0x60] sm:$0xff] %v20199_v38 }
 0x51e   : > { %v7825_v39 = vpop.f32.mrf.mxu0 }
 0x520   : > { %v7866_v41 = vpop.f32.mrf.mxu1  ;;  %v7827_v43 = vpop.f32.mrf.mxu0 }
 0x521   : > { %v7867_v42 = vadd.f32 %v7866_v41, %v7825_v39 }
 0x522   : > { %v7868_v46 = vpop.f32.mrf.mxu1  ;;  %v7829_v47 = vpop.f32.mrf.mxu0 }
 0x523   : > { %v8234_v48 = vmul.f32 %v8155_v40, %v7867_v42  ;;  %v7869_v4 = vadd.f32 %v7868_v46, %v7827_v43 }
 0x524   : > { %v7870_v54 = vpop.f32.mrf.mxu1  ;;  %v7830_v57 = vpop.f32.mrf.mxu0 }
 0x525   : > { %v8438_v55 = vadd.f32 %v8359_v49, %v8234_v48  ;;  %v8235_v56 = vmul.f32 %v8159_v45, %v7869_v4 }
 0x526   : > { %v7871_v60 = vpop.f32.mrf.mxu1 }
 0x527   : > { %v8470_v61 = vmax.f32 %v8438_v55, 0.0  ;;  %v8439_v62 = vadd.f32 %v8363_v50, %v8235_v56 }
 0x529   : > { %8502 = vst [vmem:[#allocation18 + $0xd0] sm:$0xff] %v8470_v61  ;;  %v8471_v27 = vmax.f32 %v8439_v62, 0.0 }
 0x52b   : > { %8503 = vst [vmem:[#allocation18 + $0xd8] sm:$0xff] %v8471_v27  ;;  %v20200_v63 = vpack.c.bf16 %v8471_v27, %v8470_v61 }
 0x52d   : > { %8649 = vst [vmem:[#allocation2 + $0x70] sm:$0xff] %v20200_v63 }
 0x55e   : > { %v7907_v1 = vpop.f32.mrf.mxu0 }
 0x560   : > { %v7948_v2 = vpop.f32.mrf.mxu1  ;;  %v7909_v7 = vpop.f32.mrf.mxu0 }
 0x561   : > { %v7949_v3 = vadd.f32 %v7948_v2, %v7907_v1 }
 0x562   : > { %v7950_v10 = vpop.f32.mrf.mxu1  ;;  %v7911_v14 = vpop.f32.mrf.mxu0 }
 0x563   : > { %v8236_v11 = vmul.f32 %v8163_v31, %v7949_v3  ;;  %v7951_v12 = vadd.f32 %v7950_v10, %v7909_v7 }
 0x564   : > { %v7952_v17 = vpop.f32.mrf.mxu1  ;;  %v7912_v23 = vpop.f32.mrf.mxu0 }
 0x565   : > { %v8440_v18 = vadd.f32 %v8367_v6, %v8236_v11  ;;  %v8237_v51 = vmul.f32 %v8167_v8, %v7951_v12 }
 0x566   : > { %v7953_v24 = vpop.f32.mrf.mxu1 }
 0x567   : > { %v8472_v58 = vmax.f32 %v8440_v18, 0.0  ;;  %v8441_v25 = vadd.f32 %v8371_v13, %v8237_v51 }
 0x569   : > { %8504 = vst [vmem:[#allocation18 + $0xe0] sm:$0xff] %v8472_v58  ;;  %v8473_v15 = vmax.f32 %v8441_v25, 0.0 }
 0x56b   : > { %8505 = vst [vmem:[#allocation18 + $0xe8] sm:$0xff] %v8473_v15  ;;  %v20201_v35 = vpack.c.bf16 %v8473_v15, %v8472_v58 }
 0x56d   : > { %8650 = vst [vmem:[#allocation2 + $0x78] sm:$0xff] %v20201_v35 }
 0x59e   : > { %v7989_v26 = vpop.f32.mrf.mxu0 }
 0x5a0   : > { %v8030_v29 = vpop.f32.mrf.mxu1  ;;  %v7991_v32 = vpop.f32.mrf.mxu0 }
 0x5a1   : > { %v8031_v30 = vadd.f32 %v8030_v29, %v7989_v26 }
 0x5a2   : > { %v8032_v33 = vpop.f32.mrf.mxu1  ;;  %v7993_v34 = vpop.f32.mrf.mxu0 }
 0x5a3   : > { %v8238_v53 = vmul.f32 %v8171_v28, %v8031_v30  ;;  %v8033_v16 = vadd.f32 %v8032_v33, %v7991_v32 }
 0x5a4   : > { %v8034_v19 = vpop.f32.mrf.mxu1  ;;  %v7994_v44 = vpop.f32.mrf.mxu0 }
 0x5a5   : > { %v8442_v36 = vadd.f32 %v8375_v21, %v8238_v53  ;;  %v8239_v37 = vmul.f32 %v8175_v59, %v8033_v16 }
 0x5a6   : > { %v8035_v38 = vpop.f32.mrf.mxu1 }
 0x5a7   : > { %v8474_v39 = vmax.f32 %v8442_v36, 0.0  ;;  %v8443_v40 = vadd.f32 %v8379_v52, %v8239_v37 }
 0x5a9   : > { %8506 = vst [vmem:[#allocation18 + $0xf0] sm:$0xff] %v8474_v39  ;;  %v8475_v5 = vmax.f32 %v8443_v40, 0.0 }
 0x5ab   : > { %8507 = vst [vmem:[#allocation18 + $0xf8] sm:$0xff] %v8475_v5  ;;  %v20202_v41 = vpack.c.bf16 %v8475_v5, %v8474_v39 }
 0x5ad   : > { %8651 = vst [vmem:[#allocation2 + $0x28] sm:$0xff] %v20202_v41 }
 0x5ae PF: > { %v20387_v9 = vld [vmem:[%s22890_s26 + $0xe4] ss:$16 sps:$4 sm:$0xff]   ;;  %v20391_v22 = vld [vmem:[%s22890_s26 + $0xe0] ss:$16 sps:$4 sm:$0xff]   ;;  %p20139_p6 = scmp.ne.s32.totalorder %s22672_s27, 3 }
 0x5af   : > { %v20389_v20 = vld [vmem:[%s22890_s26 + $0x2e4] ss:$16 sps:$4 sm:$0xff]   ;;  %14928 = vmatprep.subr.bf16.mxu0 %v20387_v9  ;;  %v20392_v42 = vld [vmem:[%s22890_s26 + $0x2e0] ss:$16 sps:$4 sm:$0xff]  }
 0x5b0   : > { %14969 = vmatprep.subr.bf16.mxu1 %v20389_v20  ;;  %v20393_v49 = vld [vmem:[%s22890_s26 + $0xc4] ss:$16 sps:$4 sm:$0xff]   ;;  %14929 = vmatpush1.bf16.msra.mxu0 %v20391_v22  ;;  %v20397_v45 = vld [vmem:[%s22890_s26 + $0xc0] ss:$16 sps:$4 sm:$0xff]  }
 0x5b1   : > { %14970 = vmatpush1.bf16.msra.mxu1 %v20392_v42  ;;  %v20395_v43 = vld [vmem:[%s22890_s26 + $0x2c4] ss:$16 sps:$4 sm:$0xff]   ;;  %14930 = vmatprep.subr.bf16.mxu0 %v20393_v49  ;;  %v20398_v46 = vld [vmem:[%s22890_s26 + $0x2c0] ss:$16 sps:$4 sm:$0xff]  }
 0x5b2   : > { %14971 = vmatprep.subr.bf16.mxu1 %v20395_v43  ;;  %v20399_v48 = vld [vmem:[%s22890_s26 + $0xa4] ss:$16 sps:$4 sm:$0xff]   ;;  %v20403_v50 = vld [vmem:[%s22890_s26 + $0xa0] ss:$16 sps:$4 sm:$0xff]  }
 0x5b3   : > { %v20401_v4 = vld [vmem:[%s22890_s26 + $0x2a4] ss:$16 sps:$4 sm:$0xff]   ;;  %v20404_v47 = vld [vmem:[%s22890_s26 + $0x2a0] ss:$16 sps:$4 sm:$0xff]  }
 0x5b4   : > { %14931 = vmatpush1.bf16.msra.mxu0 %v20397_v45  ;;  %v20405_v54 = vld [vmem:[%s22890_s26 + $0x84] ss:$16 sps:$4 sm:$0xff]   ;;  %v20409_v56 = vld [vmem:[%s22890_s26 + $0x80] ss:$16 sps:$4 sm:$0xff]  }
 0x5b5   : > { %14972 = vmatpush1.bf16.msra.mxu1 %v20398_v46  ;;  %14932 = vmatprep.subr.bf16.mxu0 %v20399_v48  ;;  %v20407_v55 = vld [vmem:[%s22890_s26 + $0x284] ss:$16 sps:$4 sm:$0xff]   ;;  %v20410_v57 = vld [vmem:[%s22890_s26 + $0x280] ss:$16 sps:$4 sm:$0xff]  }
 0x5b6   : > { %14973 = vmatprep.subr.bf16.mxu1 %v20401_v4  ;;  %v20411_v60 = vld [vmem:[%s22890_s26 + $0x64] ss:$16 sps:$4 sm:$0xff]   ;;  %v20415_v62 = vld [vmem:[%s22890_s26 + $0x60] ss:$16 sps:$4 sm:$0xff]  }
 0x5b7   : > { %v20413_v61 = vld [vmem:[%s22890_s26 + $0x264] ss:$16 sps:$4 sm:$0xff]   ;;  %v20416_v27 = vld [vmem:[%s22890_s26 + $0x260] ss:$16 sps:$4 sm:$0xff]  }
 0x5b8   : > { %14933 = vmatpush1.bf16.msra.mxu0 %v20403_v50  ;;  %v20417_v63 = vld [vmem:[%s22890_s26 + $0x44] ss:$16 sps:$4 sm:$0xff]   ;;  %v20421_v1 = vld [vmem:[%s22890_s26 + $0x40] ss:$16 sps:$4 sm:$0xff]  }
 0x5b9   : > { %14974 = vmatpush1.bf16.msra.mxu1 %v20404_v47  ;;  %14934 = vmatprep.subr.bf16.mxu0 %v20405_v54  ;;  %v20419_v0 = vld [vmem:[%s22890_s26 + $0x244] ss:$16 sps:$4 sm:$0xff]   ;;  %v20422_v31 = vld [vmem:[%s22890_s26 + $0x240] ss:$16 sps:$4 sm:$0xff]  }
 0x5ba   : > { %14975 = vmatprep.subr.bf16.mxu1 %v20407_v55  ;;  %v20423_v2 = vld [vmem:[%s22890_s26 + $0x24] ss:$16 sps:$4 sm:$0xff]   ;;  %v20427_v6 = vld [vmem:[%s22890_s26 + $0x20] ss:$16 sps:$4 sm:$0xff]  }
 0x5bb   : > { %v20425_v3 = vld [vmem:[%s22890_s26 + $0x224] ss:$16 sps:$4 sm:$0xff]   ;;  %v20428_v7 = vld [vmem:[%s22890_s26 + $0x220] ss:$16 sps:$4 sm:$0xff]  }
 0x5bc   : > { %14935 = vmatpush1.bf16.msra.mxu0 %v20409_v56  ;;  %v20429_v8 = vld [vmem:[%s22890_s26 + $0x4] ss:$16 sps:$4 sm:$0xff]   ;;  %v20433_v11 = vld [vmem:[%s22890_s26] ss:$16 sps:$4 sm:$0xff]  }
 0x5bd   : > { %14976 = vmatpush1.bf16.msra.mxu1 %v20410_v57  ;;  %14936 = vmatprep.subr.bf16.mxu0 %v20411_v60  ;;  %v20431_v10 = vld [vmem:[%s22890_s26 + $0x204] ss:$16 sps:$4 sm:$0xff]   ;;  %v20434_v12 = vld [vmem:[%s22890_s26 + $0x200] ss:$16 sps:$4 sm:$0xff]  }
 0x5be   : > { %14977 = vmatprep.subr.bf16.mxu1 %v20413_v61  ;;  %v20435_v13 = vld [vmem:[%s22890_s26 + $0x1e4] ss:$16 sps:$4 sm:$0xff]   ;;  %v20439_v17 = vld [vmem:[%s22890_s26 + $0x1e0] ss:$16 sps:$4 sm:$0xff]  }
 0x5bf   : > { %v20437_v14 = vld [vmem:[%s22890_s26 + $0x3e4] ss:$16 sps:$4 sm:$0xff]   ;;  %v20440_v18 = vld [vmem:[%s22890_s26 + $0x3e0] ss:$16 sps:$4 sm:$0xff]  }
 0x5c0   : > { %14937 = vmatpush1.bf16.msra.mxu0 %v20415_v62  ;;  %v20441_v51 = vld [vmem:[%s22890_s26 + $0x1c4] ss:$16 sps:$4 sm:$0xff]   ;;  %v20445_v24 = vld [vmem:[%s22890_s26 + $0x1c0] ss:$16 sps:$4 sm:$0xff]  }
 0x5c1   : > { %14978 = vmatpush1.bf16.msra.mxu1 %v20416_v27  ;;  %14938 = vmatprep.subr.bf16.mxu0 %v20417_v63  ;;  %v20443_v23 = vld [vmem:[%s22890_s26 + $0x3c4] ss:$16 sps:$4 sm:$0xff]   ;;  %v20446_v58 = vld [vmem:[%s22890_s26 + $0x3c0] ss:$16 sps:$4 sm:$0xff]  }
 0x5c2   : > { %14979 = vmatprep.subr.bf16.mxu1 %v20419_v0  ;;  %v20447_v25 = vld [vmem:[%s22890_s26 + $0x1a4] ss:$16 sps:$4 sm:$0xff]   ;;  %v20451_v35 = vld [vmem:[%s22890_s26 + $0x1a0] ss:$16 sps:$4 sm:$0xff]  }
 0x5c3   : > { %v20449_v15 = vld [vmem:[%s22890_s26 + $0x3a4] ss:$16 sps:$4 sm:$0xff]   ;;  %v20452_v26 = vld [vmem:[%s22890_s26 + $0x3a0] ss:$16 sps:$4 sm:$0xff]  }
 0x5c4   : > { %14939 = vmatpush1.bf16.msra.mxu0 %v20421_v1  ;;  %v20453_v28 = vld [vmem:[%s22890_s26 + $0x184] ss:$16 sps:$4 sm:$0xff]   ;;  %v20457_v59 = vld [vmem:[%s22890_s26 + $0x180] ss:$16 sps:$4 sm:$0xff]  }
 0x5c5   : > { %14980 = vmatpush1.bf16.msra.mxu1 %v20422_v31  ;;  %14940 = vmatprep.subr.bf16.mxu0 %v20423_v2  ;;  %v20455_v29 = vld [vmem:[%s22890_s26 + $0x384] ss:$16 sps:$4 sm:$0xff]   ;;  %v20458_v33 = vld [vmem:[%s22890_s26 + $0x380] ss:$16 sps:$4 sm:$0xff]  }
 0x5c6   : > { %14981 = vmatprep.subr.bf16.mxu1 %v20425_v3  ;;  %v8656_v30 = vld [vmem:[#allocation2 + $0x30] sm:$0xff]  ;;  %v8657_v32 = vld [vmem:[#allocation2] sm:$0xff] }
 0x5c7   : > { %v23193_v21 = vcombine.high %v8656_v30, %v8656_v30  ;;  %v23197_v53 = vcombine.high %v8657_v32, %v8657_v32  ;;  %v20459_v16 = vld [vmem:[%s22890_s26 + $0x164] ss:$16 sps:$4 sm:$0xff]   ;;  %v20463_v34 = vld [vmem:[%s22890_s26 + $0x160] ss:$16 sps:$4 sm:$0xff]   ;;  %v23219_v45 = vcombine.low %v8656_v30, %v8656_v30  ;;  %v23221_v46 = vcombine.low %v8657_v32, %v8657_v32 }
 0x5c8   : > { %14941 = vmatpush1.bf16.msra.mxu0 %v20427_v6  ;;  %v20461_v52 = vld [vmem:[%s22890_s26 + $0x364] ss:$16 sps:$4 sm:$0xff]   ;;  %v20464_v19 = vld [vmem:[%s22890_s26 + $0x360] ss:$16 sps:$4 sm:$0xff]  }
 0x5c9   : > { %14982 = vmatpush1.bf16.msra.mxu1 %v20428_v7  ;;  %14942 = vmatprep.subr.bf16.mxu0 %v20429_v8  ;;  %v20465_v36 = vld [vmem:[%s22890_s26 + $0x144] ss:$16 sps:$4 sm:$0xff]   ;;  %v20469_v44 = vld [vmem:[%s22890_s26 + $0x140] ss:$16 sps:$4 sm:$0xff]  }
 0x5ca   : > { %14983 = vmatprep.subr.bf16.mxu1 %v20431_v10  ;;  %14960 = vmatprep.mubr.bf16.mxu0 %v23193_v21  ;;  %v20467_v37 = vld [vmem:[%s22890_s26 + $0x344] ss:$16 sps:$4 sm:$0xff]   ;;  %v20470_v38 = vld [vmem:[%s22890_s26 + $0x340] ss:$16 sps:$4 sm:$0xff]  }
 0x5cb   : > { %15001 = vmatprep.mubr.bf16.mxu1 %v23197_v53  ;;  %v20471_v39 = vld [vmem:[%s22890_s26 + $0x124] ss:$16 sps:$4 sm:$0xff]   ;;  %v20475_v5 = vld [vmem:[%s22890_s26 + $0x120] ss:$16 sps:$4 sm:$0xff]  }
 0x5cc   : > { %14943 = vmatpush1.bf16.msra.mxu0 %v20433_v11  ;;  %v20473_v40 = vld [vmem:[%s22890_s26 + $0x324] ss:$16 sps:$4 sm:$0xff]   ;;  %v20476_v41 = vld [vmem:[%s22890_s26 + $0x320] ss:$16 sps:$4 sm:$0xff]  }
 0x5cd   : > { %14984 = vmatpush1.bf16.msra.mxu1 %v20434_v12  ;;  %14944 = vmatprep.subr.bf16.mxu0 %v20435_v13  ;;  %v20477_v9 = vld [vmem:[%s22890_s26 + $0x104] ss:$16 sps:$4 sm:$0xff]   ;;  %v20481_v22 = vld [vmem:[%s22890_s26 + $0x100] ss:$16 sps:$4 sm:$0xff]   ;;  %v23249_v13 = vld [vmem:[#allocation2 + $0x58] sm:$0xff] }
 0x5ce   : > { %14985 = vmatprep.subr.bf16.mxu1 %v20437_v14  ;;  %v20479_v20 = vld [vmem:[%s22890_s26 + $0x304] ss:$16 sps:$4 sm:$0xff]   ;;  %v20482_v42 = vld [vmem:[%s22890_s26 + $0x300] ss:$16 sps:$4 sm:$0xff]   ;;  %v23251_v14 = vld [vmem:[#allocation2 + $0x18] sm:$0xff] }
 0x5cf   : > { %v20489_v49 = vld [vmem:[%s22890_s26 + $0x4e4] ss:$16 sps:$4 sm:$0xff]   ;;  %v20487_v48 = vld [vmem:[%s22890_s26 + $0x4e0] ss:$16 sps:$4 sm:$0xff]  }
 0x5d0   : > { %14945 = vmatpush2.bf16.msra.mxu0 %v20439_v17  ;;  %v20492_v43 = vld [vmem:[%s22890_s26 + $0x6e4] ss:$16 sps:$4 sm:$0xff]   ;;  %v20490_v4 = vld [vmem:[%s22890_s26 + $0x6e0] ss:$16 sps:$4 sm:$0xff]  }
 0x5d1   : > { %14986 = vmatpush2.bf16.msra.mxu1 %v20440_v18  ;;  %14946 = vmatprep.subr.bf16.mxu0 %v20441_v51  ;;  %v20495_v50 = vld [vmem:[%s22890_s26 + $0x4c4] ss:$16 sps:$4 sm:$0xff]   ;;  %v20493_v54 = vld [vmem:[%s22890_s26 + $0x4c0] ss:$16 sps:$4 sm:$0xff]   ;;  %v23257_v51 = vcombine.high %v23249_v13, %v23249_v13 }
 0x5d2   : > { %14987 = vmatprep.subr.bf16.mxu1 %v20443_v23  ;;  %v20498_v47 = vld [vmem:[%s22890_s26 + $0x6c4] ss:$16 sps:$4 sm:$0xff]   ;;  %v20496_v55 = vld [vmem:[%s22890_s26 + $0x6c0] ss:$16 sps:$4 sm:$0xff]   ;;  %v23261_v23 = vcombine.high %v23251_v14, %v23251_v14 }
 0x5d3   : > { %v20501_v56 = vld [vmem:[%s22890_s26 + $0x4a4] ss:$16 sps:$4 sm:$0xff]   ;;  %v20499_v60 = vld [vmem:[%s22890_s26 + $0x4a0] ss:$16 sps:$4 sm:$0xff]  }
 0x5d4   : > { %14947 = vmatpush2.bf16.msra.mxu0 %v20445_v24  ;;  %v20504_v57 = vld [vmem:[%s22890_s26 + $0x6a4] ss:$16 sps:$4 sm:$0xff]   ;;  %v20502_v61 = vld [vmem:[%s22890_s26 + $0x6a0] ss:$16 sps:$4 sm:$0xff]  }
 0x5d5   : > { %14988 = vmatpush2.bf16.msra.mxu1 %v20446_v58  ;;  %14948 = vmatprep.subr.bf16.mxu0 %v20447_v25  ;;  %v20507_v62 = vld [vmem:[%s22890_s26 + $0x484] ss:$16 sps:$4 sm:$0xff]   ;;  %v20505_v63 = vld [vmem:[%s22890_s26 + $0x480] ss:$16 sps:$4 sm:$0xff]  }
 0x5d6   : > { %14989 = vmatprep.subr.bf16.mxu1 %v20449_v15  ;;  %v20510_v27 = vld [vmem:[%s22890_s26 + $0x684] ss:$16 sps:$4 sm:$0xff]   ;;  %v20508_v0 = vld [vmem:[%s22890_s26 + $0x680] ss:$16 sps:$4 sm:$0xff]  }
 0x5d7   : > { %v20513_v1 = vld [vmem:[%s22890_s26 + $0x464] ss:$16 sps:$4 sm:$0xff]   ;;  %v20511_v2 = vld [vmem:[%s22890_s26 + $0x460] ss:$16 sps:$4 sm:$0xff]  }
 0x5d8   : > { %14949 = vmatpush2.bf16.msra.mxu0 %v20451_v35  ;;  %v20516_v31 = vld [vmem:[%s22890_s26 + $0x664] ss:$16 sps:$4 sm:$0xff]   ;;  %v20514_v3 = vld [vmem:[%s22890_s26 + $0x660] ss:$16 sps:$4 sm:$0xff]  }
 0x5d9   : > { %14990 = vmatpush2.bf16.msra.mxu1 %v20452_v26  ;;  %14950 = vmatprep.subr.bf16.mxu0 %v20453_v28  ;;  %v20519_v6 = vld [vmem:[%s22890_s26 + $0x444] ss:$16 sps:$4 sm:$0xff]   ;;  %v20517_v8 = vld [vmem:[%s22890_s26 + $0x440] ss:$16 sps:$4 sm:$0xff]  }
 0x5da   : > { %14991 = vmatprep.subr.bf16.mxu1 %v20455_v29  ;;  %v20522_v7 = vld [vmem:[%s22890_s26 + $0x644] ss:$16 sps:$4 sm:$0xff]   ;;  %v20520_v10 = vld [vmem:[%s22890_s26 + $0x640] ss:$16 sps:$4 sm:$0xff]  }
 0x5db   : > { %v20525_v11 = vld [vmem:[%s22890_s26 + $0x424] ss:$16 sps:$4 sm:$0xff]   ;;  %v20523_v17 = vld [vmem:[%s22890_s26 + $0x420] ss:$16 sps:$4 sm:$0xff]  }
 0x5dc   : > { %14951 = vmatpush2.bf16.msra.mxu0 %v20457_v59  ;;  %v20528_v12 = vld [vmem:[%s22890_s26 + $0x624] ss:$16 sps:$4 sm:$0xff]   ;;  %v20526_v18 = vld [vmem:[%s22890_s26 + $0x620] ss:$16 sps:$4 sm:$0xff]  }
 0x5dd   : > { %14992 = vmatpush2.bf16.msra.mxu1 %v20458_v33  ;;  %14952 = vmatprep.subr.bf16.mxu0 %v20459_v16  ;;  %v20531_v24 = vld [vmem:[%s22890_s26 + $0x404] ss:$16 sps:$4 sm:$0xff]   ;;  %v20529_v25 = vld [vmem:[%s22890_s26 + $0x400] ss:$16 sps:$4 sm:$0xff]  }
 0x5de   : > { %14993 = vmatprep.subr.bf16.mxu1 %v20461_v52  ;;  %v20534_v58 = vld [vmem:[%s22890_s26 + $0x604] ss:$16 sps:$4 sm:$0xff]   ;;  %v20532_v15 = vld [vmem:[%s22890_s26 + $0x600] ss:$16 sps:$4 sm:$0xff]  }
 0x5df   : > { %v20537_v35 = vld [vmem:[%s22890_s26 + $0x5e4] ss:$16 sps:$4 sm:$0xff]   ;;  %v20535_v28 = vld [vmem:[%s22890_s26 + $0x5e0] ss:$16 sps:$4 sm:$0xff]  }
 0x5e0   : > { %14953 = vmatpush2.bf16.msra.mxu0 %v20463_v34  ;;  %v20540_v26 = vld [vmem:[%s22890_s26 + $0x7e4] ss:$16 sps:$4 sm:$0xff]   ;;  %v20538_v29 = vld [vmem:[%s22890_s26 + $0x7e0] ss:$16 sps:$4 sm:$0xff]  }
 0x5e1   : > { %14994 = vmatpush2.bf16.msra.mxu1 %v20464_v19  ;;  %14954 = vmatprep.subr.bf16.mxu0 %v20465_v36  ;;  %v20543_v30 = vld [vmem:[%s22890_s26 + $0x5c4] ss:$16 sps:$4 sm:$0xff]   ;;  %v20541_v59 = vld [vmem:[%s22890_s26 + $0x5c0] ss:$16 sps:$4 sm:$0xff]  }
 0x5e2   : > { %14995 = vmatprep.subr.bf16.mxu1 %v20467_v37  ;;  %v20546_v32 = vld [vmem:[%s22890_s26 + $0x7c4] ss:$16 sps:$4 sm:$0xff]   ;;  %v20544_v33 = vld [vmem:[%s22890_s26 + $0x7c0] ss:$16 sps:$4 sm:$0xff]  }
 0x5e3   : > { %v20549_v16 = vld [vmem:[%s22890_s26 + $0x5a4] ss:$16 sps:$4 sm:$0xff]   ;;  %v20547_v34 = vld [vmem:[%s22890_s26 + $0x5a0] ss:$16 sps:$4 sm:$0xff]  }
 0x5e4   : > { %14955 = vmatpush2.bf16.msra.mxu0 %v20469_v44  ;;  %v20552_v52 = vld [vmem:[%s22890_s26 + $0x7a4] ss:$16 sps:$4 sm:$0xff]   ;;  %v20550_v19 = vld [vmem:[%s22890_s26 + $0x7a0] ss:$16 sps:$4 sm:$0xff]  }
 0x5e5   : > { %14996 = vmatpush2.bf16.msra.mxu1 %v20470_v38  ;;  %14956 = vmatprep.subr.bf16.mxu0 %v20471_v39  ;;  %v20555_v36 = vld [vmem:[%s22890_s26 + $0x584] ss:$16 sps:$4 sm:$0xff]   ;;  %v20553_v44 = vld [vmem:[%s22890_s26 + $0x580] ss:$16 sps:$4 sm:$0xff]  }
 0x5e6   : > { %14997 = vmatprep.subr.bf16.mxu1 %v20473_v40  ;;  %v20558_v37 = vld [vmem:[%s22890_s26 + $0x784] ss:$16 sps:$4 sm:$0xff]   ;;  %v20556_v38 = vld [vmem:[%s22890_s26 + $0x780] ss:$16 sps:$4 sm:$0xff]  }
 0x5e7   : > { %v20561_v39 = vld [vmem:[%s22890_s26 + $0x564] ss:$16 sps:$4 sm:$0xff]  }
 0x5e8   : > { %14957 = vmatpush2.bf16.msra.mxu0 %v20475_v5  ;;  %v20564_v40 = vld [vmem:[%s22890_s26 + $0x764] ss:$16 sps:$4 sm:$0xff]   ;;  %v20559_v5 = vld [vmem:[%s22890_s26 + $0x560] ss:$16 sps:$4 sm:$0xff]  }
 0x5e9   : > { %14998 = vmatpush2.bf16.msra.mxu1 %v20476_v41  ;;  %14958 = vmatprep.subr.bf16.mxu0 %v20477_v9  ;;  %v20562_v41 = vld [vmem:[%s22890_s26 + $0x760] ss:$16 sps:$4 sm:$0xff]   ;;  %v20567_v9 = vld [vmem:[%s22890_s26 + $0x544] ss:$16 sps:$4 sm:$0xff]  }
 0x5ea   : > { %14999 = vmatprep.subr.bf16.mxu1 %v20479_v20  ;;  %v20570_v20 = vld [vmem:[%s22890_s26 + $0x744] ss:$16 sps:$4 sm:$0xff]  }
 0x5ec   : > { %14959 = vmatpush2.bf16.msra.mxu0 %v20481_v22  ;;  %v20565_v22 = vld [vmem:[%s22890_s26 + $0x540] ss:$16 sps:$4 sm:$0xff]  }
 0x5ed   : > { %15000 = vmatpush2.bf16.msra.mxu1 %v20482_v42  ;;  %15010 = vmatprep.subr.bf16.mxu0 %v20489_v49  ;;  %v20568_v42 = vld [vmem:[%s22890_s26 + $0x740] ss:$16 sps:$4 sm:$0xff]   ;;  %v20573_v49 = vld [vmem:[%s22890_s26 + $0x524] ss:$16 sps:$4 sm:$0xff]  }
 0x5ee   : > { %15051 = vmatprep.subr.bf16.mxu1 %v20492_v43  ;;  %v20576_v43 = vld [vmem:[%s22890_s26 + $0x724] ss:$16 sps:$4 sm:$0xff]  }
 0x5ef   : > { %14961 = vmatmul.mubr.bf16.vlgmr.msra.gmra.mxu0 %v23219_v45 }
 0x5f0   : > { %15002 = vmatmul.mubr.bf16.vlgmr.msra.gmra.mxu1 %v23221_v46  ;;  %15011 = vmatpush1.bf16.msra.mxu0 %v20487_v48  ;;  %v20571_v48 = vld [vmem:[%s22890_s26 + $0x520] ss:$16 sps:$4 sm:$0xff]  }
 0x5f1   : > { %15052 = vmatpush1.bf16.msra.mxu1 %v20490_v4  ;;  %15012 = vmatprep.subr.bf16.mxu0 %v20495_v50  ;;  %v20574_v4 = vld [vmem:[%s22890_s26 + $0x720] ss:$16 sps:$4 sm:$0xff]   ;;  %v20579_v50 = vld [vmem:[%s22890_s26 + $0x504] ss:$16 sps:$4 sm:$0xff]  }
 0x5f2   : > { %15053 = vmatprep.subr.bf16.mxu1 %v20498_v47  ;;  %15042 = vmatprep.mubr.bf16.mxu0 %v23257_v51  ;;  %v20582_v47 = vld [vmem:[%s22890_s26 + $0x704] ss:$16 sps:$4 sm:$0xff]  }
 0x5f3   : > { %15083 = vmatprep.mubr.bf16.mxu1 %v23261_v23 }
 0x5f4   : > { %15013 = vmatpush1.bf16.msra.mxu0 %v20493_v54  ;;  %v20577_v54 = vld [vmem:[%s22890_s26 + $0x500] ss:$16 sps:$4 sm:$0xff]  }
 0x5f5   : > { %15054 = vmatpush1.bf16.msra.mxu1 %v20496_v55  ;;  %15014 = vmatprep.subr.bf16.mxu0 %v20501_v56  ;;  %v20580_v55 = vld [vmem:[%s22890_s26 + $0x700] ss:$16 sps:$4 sm:$0xff]   ;;  %v20589_v56 = vld [vmem:[%s22890_s26 + $0x8e4] ss:$16 sps:$4 sm:$0xff]  }
 0x5f6   : > { %15055 = vmatprep.subr.bf16.mxu1 %v20504_v57  ;;  %v20592_v57 = vld [vmem:[%s22890_s26 + $0xae4] ss:$16 sps:$4 sm:$0xff]  }
 0x5f8   : > { %15015 = vmatpush1.bf16.msra.mxu0 %v20499_v60  ;;  %v23305_v60 = vcombine.low %v23249_v13, %v23249_v13  ;;  %v20607_v13 = vld [vmem:[%s22890_s26 + $0x884] ss:$16 sps:$4 sm:$0xff]  }
 0x5f9   : > { %15056 = vmatpush1.bf16.msra.mxu1 %v20502_v61  ;;  %15016 = vmatprep.subr.bf16.mxu0 %v20507_v62  ;;  %v23309_v61 = vcombine.low %v23251_v14, %v23251_v14  ;;  %v20587_v62 = vld [vmem:[%s22890_s26 + $0x8e0] ss:$16 sps:$4 sm:$0xff]   ;;  %v20610_v14 = vld [vmem:[%s22890_s26 + $0xa84] ss:$16 sps:$4 sm:$0xff]  }
 0x5fa   : > { %15057 = vmatprep.subr.bf16.mxu1 %v20510_v27  ;;  %v20590_v27 = vld [vmem:[%s22890_s26 + $0xae0] ss:$16 sps:$4 sm:$0xff]  }
 0x5fc   : > { %15017 = vmatpush1.bf16.msra.mxu0 %v20505_v63  ;;  %v20595_v63 = vld [vmem:[%s22890_s26 + $0x8c4] ss:$16 sps:$4 sm:$0xff]  }
 0x5fd   : > { %15058 = vmatpush1.bf16.msra.mxu1 %v20508_v0  ;;  %15018 = vmatprep.subr.bf16.mxu0 %v20513_v1  ;;  %v20598_v0 = vld [vmem:[%s22890_s26 + $0xac4] ss:$16 sps:$4 sm:$0xff]  }
 0x5fe   : > { %15059 = vmatprep.subr.bf16.mxu1 %v20516_v31  ;;  %v23315_v1 = vld [vmem:[#allocation2 + $0x50] sm:$0xff]  ;;  %v23317_v31 = vld [vmem:[#allocation2 + $0x68] sm:$0xff] }
 0x600   : > { %15019 = vmatpush1.bf16.msra.mxu0 %v20511_v2  ;;  %v23321_v2 = vcombine.high %v23315_v1, %v23315_v1 }
 0x601   : > { %15060 = vmatpush1.bf16.msra.mxu1 %v20514_v3  ;;  %15020 = vmatprep.subr.bf16.mxu0 %v20519_v6  ;;  %v23325_v3 = vcombine.high %v23317_v31, %v23317_v31  ;;  %v20593_v6 = vld [vmem:[%s22890_s26 + $0x8c0] ss:$16 sps:$4 sm:$0xff]  }
 0x602   : > { %15061 = vmatprep.subr.bf16.mxu1 %v20522_v7  ;;  %v20596_v7 = vld [vmem:[%s22890_s26 + $0xac0] ss:$16 sps:$4 sm:$0xff]  }
 0x604   : > { %15021 = vmatpush1.bf16.msra.mxu0 %v20517_v8  ;;  %v20601_v8 = vld [vmem:[%s22890_s26 + $0x8a4] ss:$16 sps:$4 sm:$0xff]  }
 0x605   : > { %15062 = vmatpush1.bf16.msra.mxu1 %v20520_v10  ;;  %15022 = vmatprep.subr.bf16.mxu0 %v20525_v11  ;;  %v20604_v10 = vld [vmem:[%s22890_s26 + $0xaa4] ss:$16 sps:$4 sm:$0xff]   ;;  %v20599_v11 = vld [vmem:[%s22890_s26 + $0x8a0] ss:$16 sps:$4 sm:$0xff]  }
 0x606   : > { %15063 = vmatprep.subr.bf16.mxu1 %v20528_v12  ;;  %v20602_v12 = vld [vmem:[%s22890_s26 + $0xaa0] ss:$16 sps:$4 sm:$0xff]  }
 0x608   : > { %15023 = vmatpush1.bf16.msra.mxu0 %v20523_v17  ;;  %v20605_v17 = vld [vmem:[%s22890_s26 + $0x880] ss:$16 sps:$4 sm:$0xff]  }
 0x609   : > { %15064 = vmatpush1.bf16.msra.mxu1 %v20526_v18  ;;  %15024 = vmatprep.subr.bf16.mxu0 %v20531_v24  ;;  %v20608_v18 = vld [vmem:[%s22890_s26 + $0xa80] ss:$16 sps:$4 sm:$0xff]   ;;  %v20613_v24 = vld [vmem:[%s22890_s26 + $0x864] ss:$16 sps:$4 sm:$0xff]  }
 0x60a   : > { %15065 = vmatprep.subr.bf16.mxu1 %v20534_v58  ;;  %v20616_v58 = vld [vmem:[%s22890_s26 + $0xa64] ss:$16 sps:$4 sm:$0xff]  }
 0x60c   : > { %15025 = vmatpush1.bf16.msra.mxu0 %v20529_v25  ;;  %v20611_v25 = vld [vmem:[%s22890_s26 + $0x860] ss:$16 sps:$4 sm:$0xff]  }
 0x60d   : > { %15066 = vmatpush1.bf16.msra.mxu1 %v20532_v15  ;;  %15026 = vmatprep.subr.bf16.mxu0 %v20537_v35  ;;  %v20614_v15 = vld [vmem:[%s22890_s26 + $0xa60] ss:$16 sps:$4 sm:$0xff]   ;;  %v20619_v35 = vld [vmem:[%s22890_s26 + $0x844] ss:$16 sps:$4 sm:$0xff]  }
 0x60e   : > { %15067 = vmatprep.subr.bf16.mxu1 %v20540_v26  ;;  %v20622_v26 = vld [vmem:[%s22890_s26 + $0xa44] ss:$16 sps:$4 sm:$0xff]  }
 0x610   : > { %15027 = vmatpush2.bf16.msra.mxu0 %v20535_v28  ;;  %v20617_v28 = vld [vmem:[%s22890_s26 + $0x840] ss:$16 sps:$4 sm:$0xff]  }
 0x611   : > { %15068 = vmatpush2.bf16.msra.mxu1 %v20538_v29  ;;  %15028 = vmatprep.subr.bf16.mxu0 %v20543_v30  ;;  %v20620_v29 = vld [vmem:[%s22890_s26 + $0xa40] ss:$16 sps:$4 sm:$0xff]   ;;  %v20625_v30 = vld [vmem:[%s22890_s26 + $0x824] ss:$16 sps:$4 sm:$0xff]  }
 0x612   : > { %15069 = vmatprep.subr.bf16.mxu1 %v20546_v32  ;;  %v20628_v32 = vld [vmem:[%s22890_s26 + $0xa24] ss:$16 sps:$4 sm:$0xff]  }
 0x614   : > { %15029 = vmatpush2.bf16.msra.mxu0 %v20541_v59  ;;  %v20623_v59 = vld [vmem:[%s22890_s26 + $0x820] ss:$16 sps:$4 sm:$0xff]  }
 0x615   : > { %15070 = vmatpush2.bf16.msra.mxu1 %v20544_v33  ;;  %15030 = vmatprep.subr.bf16.mxu0 %v20549_v16  ;;  %v20626_v33 = vld [vmem:[%s22890_s26 + $0xa20] ss:$16 sps:$4 sm:$0xff]   ;;  %v20631_v16 = vld [vmem:[%s22890_s26 + $0x804] ss:$16 sps:$4 sm:$0xff]  }
 0x616   : > { %15071 = vmatprep.subr.bf16.mxu1 %v20552_v52  ;;  %v20634_v52 = vld [vmem:[%s22890_s26 + $0xa04] ss:$16 sps:$4 sm:$0xff]  }
 0x618   : > { %15031 = vmatpush2.bf16.msra.mxu0 %v20547_v34  ;;  %v20629_v34 = vld [vmem:[%s22890_s26 + $0x800] ss:$16 sps:$4 sm:$0xff]  }
 0x619   : > { %15072 = vmatpush2.bf16.msra.mxu1 %v20550_v19  ;;  %15032 = vmatprep.subr.bf16.mxu0 %v20555_v36  ;;  %v20632_v19 = vld [vmem:[%s22890_s26 + $0xa00] ss:$16 sps:$4 sm:$0xff]   ;;  %v20637_v36 = vld [vmem:[%s22890_s26 + $0x9e4] ss:$16 sps:$4 sm:$0xff]  }
 0x61a   : > { %15073 = vmatprep.subr.bf16.mxu1 %v20558_v37  ;;  %v20640_v37 = vld [vmem:[%s22890_s26 + $0xbe4] ss:$16 sps:$4 sm:$0xff]  }
 0x61c   : > { %15033 = vmatpush2.bf16.msra.mxu0 %v20553_v44  ;;  %v20635_v44 = vld [vmem:[%s22890_s26 + $0x9e0] ss:$16 sps:$4 sm:$0xff]  }
 0x61d   : > { %15074 = vmatpush2.bf16.msra.mxu1 %v20556_v38  ;;  %15034 = vmatprep.subr.bf16.mxu0 %v20561_v39  ;;  %v20638_v38 = vld [vmem:[%s22890_s26 + $0xbe0] ss:$16 sps:$4 sm:$0xff]   ;;  %v20643_v39 = vld [vmem:[%s22890_s26 + $0x9c4] ss:$16 sps:$4 sm:$0xff]  }
 0x61e   : > { %15075 = vmatprep.subr.bf16.mxu1 %v20564_v40  ;;  %v20646_v40 = vld [vmem:[%s22890_s26 + $0xbc4] ss:$16 sps:$4 sm:$0xff]  }
 0x620   : > { %15035 = vmatpush2.bf16.msra.mxu0 %v20559_v5  ;;  %v20641_v5 = vld [vmem:[%s22890_s26 + $0x9c0] ss:$16 sps:$4 sm:$0xff]  }
 0x621   : > { %15076 = vmatpush2.bf16.msra.mxu1 %v20562_v41  ;;  %15036 = vmatprep.subr.bf16.mxu0 %v20567_v9  ;;  %v20644_v41 = vld [vmem:[%s22890_s26 + $0xbc0] ss:$16 sps:$4 sm:$0xff]   ;;  %v20649_v9 = vld [vmem:[%s22890_s26 + $0x9a4] ss:$16 sps:$4 sm:$0xff]  }
 0x622   : > { %15077 = vmatprep.subr.bf16.mxu1 %v20570_v20  ;;  %v20652_v20 = vld [vmem:[%s22890_s26 + $0xba4] ss:$16 sps:$4 sm:$0xff]  }
 0x624   : > { %15037 = vmatpush2.bf16.msra.mxu0 %v20565_v22  ;;  %v20647_v22 = vld [vmem:[%s22890_s26 + $0x9a0] ss:$16 sps:$4 sm:$0xff]  }
 0x625   : > { %15078 = vmatpush2.bf16.msra.mxu1 %v20568_v42  ;;  %15038 = vmatprep.subr.bf16.mxu0 %v20573_v49  ;;  %v20650_v42 = vld [vmem:[%s22890_s26 + $0xba0] ss:$16 sps:$4 sm:$0xff]   ;;  %v20655_v49 = vld [vmem:[%s22890_s26 + $0x984] ss:$16 sps:$4 sm:$0xff]  }
 0x626   : > { %15079 = vmatprep.subr.bf16.mxu1 %v20576_v43  ;;  %v20658_v43 = vld [vmem:[%s22890_s26 + $0xb84] ss:$16 sps:$4 sm:$0xff]  }
 0x628   : > { %15039 = vmatpush2.bf16.msra.mxu0 %v20571_v48  ;;  %v20653_v48 = vld [vmem:[%s22890_s26 + $0x980] ss:$16 sps:$4 sm:$0xff]  }
 0x629   : > { %15080 = vmatpush2.bf16.msra.mxu1 %v20574_v4  ;;  %15040 = vmatprep.subr.bf16.mxu0 %v20579_v50  ;;  %v20656_v4 = vld [vmem:[%s22890_s26 + $0xb80] ss:$16 sps:$4 sm:$0xff]   ;;  %v20661_v50 = vld [vmem:[%s22890_s26 + $0x964] ss:$16 sps:$4 sm:$0xff]  }
 0x62a   : > { %15081 = vmatprep.subr.bf16.mxu1 %v20582_v47  ;;  %v20664_v47 = vld [vmem:[%s22890_s26 + $0xb64] ss:$16 sps:$4 sm:$0xff]  }
 0x62c   : > { %15041 = vmatpush2.bf16.msra.mxu0 %v20577_v54  ;;  %v20659_v54 = vld [vmem:[%s22890_s26 + $0x960] ss:$16 sps:$4 sm:$0xff]  }
 0x62d   : > { %15082 = vmatpush2.bf16.msra.mxu1 %v20580_v55  ;;  %15092 = vmatprep.subr.bf16.mxu0 %v20589_v56  ;;  %v20662_v55 = vld [vmem:[%s22890_s26 + $0xb60] ss:$16 sps:$4 sm:$0xff]   ;;  %v20667_v56 = vld [vmem:[%s22890_s26 + $0x944] ss:$16 sps:$4 sm:$0xff]  }
 0x62e   : > { %15133 = vmatprep.subr.bf16.mxu1 %v20592_v57  ;;  %v20670_v57 = vld [vmem:[%s22890_s26 + $0xb44] ss:$16 sps:$4 sm:$0xff]  }
 0x62f   : > { %15043 = vmatmul.mubr.bf16.vlgmr.msra.gmra.mxu0 %v23305_v60 }
 0x630   : > { %15084 = vmatmul.mubr.bf16.vlgmr.msra.gmra.mxu1 %v23309_v61  ;;  %15093 = vmatpush1.bf16.msra.mxu0 %v20587_v62  ;;  %v20665_v62 = vld [vmem:[%s22890_s26 + $0x940] ss:$16 sps:$4 sm:$0xff]  }
 0x631   : > { %15134 = vmatpush1.bf16.msra.mxu1 %v20590_v27  ;;  %15094 = vmatprep.subr.bf16.mxu0 %v20595_v63  ;;  %v20668_v27 = vld [vmem:[%s22890_s26 + $0xb40] ss:$16 sps:$4 sm:$0xff]   ;;  %v20673_v63 = vld [vmem:[%s22890_s26 + $0x924] ss:$16 sps:$4 sm:$0xff]  }
 0x632   : > { %15135 = vmatprep.subr.bf16.mxu1 %v20598_v0  ;;  %15124 = vmatprep.mubr.bf16.mxu0 %v23321_v2  ;;  %v20676_v0 = vld [vmem:[%s22890_s26 + $0xb24] ss:$16 sps:$4 sm:$0xff]  }
 0x633   : > { %15165 = vmatprep.mubr.bf16.mxu1 %v23325_v3 }
 0x634   : > { %15095 = vmatpush1.bf16.msra.mxu0 %v20593_v6  ;;  %v20671_v6 = vld [vmem:[%s22890_s26 + $0x920] ss:$16 sps:$4 sm:$0xff]  }
 0x635   : > { %15136 = vmatpush1.bf16.msra.mxu1 %v20596_v7  ;;  %15096 = vmatprep.subr.bf16.mxu0 %v20601_v8  ;;  %v20674_v7 = vld [vmem:[%s22890_s26 + $0xb20] ss:$16 sps:$4 sm:$0xff]   ;;  %v20679_v8 = vld [vmem:[%s22890_s26 + $0x904] ss:$16 sps:$4 sm:$0xff]  }
 0x636   : > { %15137 = vmatprep.subr.bf16.mxu1 %v20604_v10  ;;  %v20682_v10 = vld [vmem:[%s22890_s26 + $0xb04] ss:$16 sps:$4 sm:$0xff]  }
 0x638   : > { %15097 = vmatpush1.bf16.msra.mxu0 %v20599_v11  ;;  %v20677_v11 = vld [vmem:[%s22890_s26 + $0x900] ss:$16 sps:$4 sm:$0xff]  }
 0x639   : > { %15138 = vmatpush1.bf16.msra.mxu1 %v20602_v12  ;;  %15098 = vmatprep.subr.bf16.mxu0 %v20607_v13  ;;  %v20680_v12 = vld [vmem:[%s22890_s26 + $0xb00] ss:$16 sps:$4 sm:$0xff]   ;;  %v20689_v13 = vld [vmem:[%s22890_s26 + $0xce4] ss:$16 sps:$4 sm:$0xff]  }
 0x63a   : > { %15139 = vmatprep.subr.bf16.mxu1 %v20610_v14  ;;  %v20692_v14 = vld [vmem:[%s22890_s26 + $0xee4] ss:$16 sps:$4 sm:$0xff]  }
 0x63c   : > { %15099 = vmatpush1.bf16.msra.mxu0 %v20605_v17  ;;  %v20687_v17 = vld [vmem:[%s22890_s26 + $0xce0] ss:$16 sps:$4 sm:$0xff]  }
 0x63d   : > { %15140 = vmatpush1.bf16.msra.mxu1 %v20608_v18  ;;  %15100 = vmatprep.subr.bf16.mxu0 %v20613_v24  ;;  %v20690_v18 = vld [vmem:[%s22890_s26 + $0xee0] ss:$16 sps:$4 sm:$0xff]   ;;  %v23395_v24 = vcombine.low %v23315_v1, %v23315_v1 }
 0x63e   : > { %15141 = vmatprep.subr.bf16.mxu1 %v20616_v58  ;;  %v23399_v58 = vcombine.low %v23317_v31, %v23317_v31 }
 0x640   : > { %15101 = vmatpush1.bf16.msra.mxu0 %v20611_v25  ;;  %v23401_v25 = vld [vmem:[#allocation2 + $0x8] sm:$0xff] }
 0x641   : > { %15142 = vmatpush1.bf16.msra.mxu1 %v20614_v15  ;;  %15102 = vmatprep.subr.bf16.mxu0 %v20619_v35  ;;  %v23403_v15 = vld [vmem:[#allocation2 + $0x48] sm:$0xff]  ;;  %v20695_v35 = vld [vmem:[%s22890_s26 + $0xcc4] ss:$16 sps:$4 sm:$0xff]   ;;  %v23409_v1 = vcombine.high %v23401_v25, %v23401_v25 }
 0x642   : > { %15143 = vmatprep.subr.bf16.mxu1 %v20622_v26  ;;  %v20698_v26 = vld [vmem:[%s22890_s26 + $0xec4] ss:$16 sps:$4 sm:$0xff]   ;;  %v23413_v31 = vcombine.high %v23403_v15, %v23403_v15 }
 0x644   : > { %15103 = vmatpush1.bf16.msra.mxu0 %v20617_v28  ;;  %v20693_v28 = vld [vmem:[%s22890_s26 + $0xcc0] ss:$16 sps:$4 sm:$0xff]  }
 0x645   : > { %15144 = vmatpush1.bf16.msra.mxu1 %v20620_v29  ;;  %15104 = vmatprep.subr.bf16.mxu0 %v20625_v30  ;;  %v20696_v29 = vld [vmem:[%s22890_s26 + $0xec0] ss:$16 sps:$4 sm:$0xff]   ;;  %v20701_v30 = vld [vmem:[%s22890_s26 + $0xca4] ss:$16 sps:$4 sm:$0xff]  }
 0x646   : > { %15145 = vmatprep.subr.bf16.mxu1 %v20628_v32  ;;  %v20704_v32 = vld [vmem:[%s22890_s26 + $0xea4] ss:$16 sps:$4 sm:$0xff]  }
 0x648   : > { %15105 = vmatpush1.bf16.msra.mxu0 %v20623_v59  ;;  %v20699_v59 = vld [vmem:[%s22890_s26 + $0xca0] ss:$16 sps:$4 sm:$0xff]  }
 0x649   : > { %15146 = vmatpush1.bf16.msra.mxu1 %v20626_v33  ;;  %15106 = vmatprep.subr.bf16.mxu0 %v20631_v16  ;;  %v20702_v33 = vld [vmem:[%s22890_s26 + $0xea0] ss:$16 sps:$4 sm:$0xff]   ;;  %v20707_v16 = vld [vmem:[%s22890_s26 + $0xc84] ss:$16 sps:$4 sm:$0xff]  }
 0x64a   : > { %15147 = vmatprep.subr.bf16.mxu1 %v20634_v52  ;;  %v20710_v52 = vld [vmem:[%s22890_s26 + $0xe84] ss:$16 sps:$4 sm:$0xff]  }
 0x64c   : > { %15107 = vmatpush1.bf16.msra.mxu0 %v20629_v34  ;;  %v20705_v34 = vld [vmem:[%s22890_s26 + $0xc80] ss:$16 sps:$4 sm:$0xff]  }
 0x64d   : > { %15148 = vmatpush1.bf16.msra.mxu1 %v20632_v19  ;;  %15108 = vmatprep.subr.bf16.mxu0 %v20637_v36  ;;  %v20708_v19 = vld [vmem:[%s22890_s26 + $0xe80] ss:$16 sps:$4 sm:$0xff]   ;;  %v20713_v36 = vld [vmem:[%s22890_s26 + $0xc64] ss:$16 sps:$4 sm:$0xff]  }
 0x64e   : > { %15149 = vmatprep.subr.bf16.mxu1 %v20640_v37  ;;  %v20716_v37 = vld [vmem:[%s22890_s26 + $0xe64] ss:$16 sps:$4 sm:$0xff]  }
 0x650   : > { %15109 = vmatpush2.bf16.msra.mxu0 %v20635_v44  ;;  %v20711_v44 = vld [vmem:[%s22890_s26 + $0xc60] ss:$16 sps:$4 sm:$0xff]  }
 0x651   : > { %15150 = vmatpush2.bf16.msra.mxu1 %v20638_v38  ;;  %15110 = vmatprep.subr.bf16.mxu0 %v20643_v39  ;;  %v20714_v38 = vld [vmem:[%s22890_s26 + $0xe60] ss:$16 sps:$4 sm:$0xff]   ;;  %v20719_v39 = vld [vmem:[%s22890_s26 + $0xc44] ss:$16 sps:$4 sm:$0xff]  }
 0x652   : > { %15151 = vmatprep.subr.bf16.mxu1 %v20646_v40  ;;  %v20722_v40 = vld [vmem:[%s22890_s26 + $0xe44] ss:$16 sps:$4 sm:$0xff]  }
 0x654   : > { %15111 = vmatpush2.bf16.msra.mxu0 %v20641_v5  ;;  %v20717_v5 = vld [vmem:[%s22890_s26 + $0xc40] ss:$16 sps:$4 sm:$0xff]  }
 0x655   : > { %15152 = vmatpush2.bf16.msra.mxu1 %v20644_v41  ;;  %15112 = vmatprep.subr.bf16.mxu0 %v20649_v9  ;;  %v20720_v41 = vld [vmem:[%s22890_s26 + $0xe40] ss:$16 sps:$4 sm:$0xff]   ;;  %v20725_v9 = vld [vmem:[%s22890_s26 + $0xc24] ss:$16 sps:$4 sm:$0xff]  }
 0x656   : > { %15153 = vmatprep.subr.bf16.mxu1 %v20652_v20  ;;  %v20728_v20 = vld [vmem:[%s22890_s26 + $0xe24] ss:$16 sps:$4 sm:$0xff]  }
 0x658   : > { %15113 = vmatpush2.bf16.msra.mxu0 %v20647_v22  ;;  %v20723_v22 = vld [vmem:[%s22890_s26 + $0xc20] ss:$16 sps:$4 sm:$0xff]  }
 0x659   : > { %15154 = vmatpush2.bf16.msra.mxu1 %v20650_v42  ;;  %15114 = vmatprep.subr.bf16.mxu0 %v20655_v49  ;;  %v20726_v42 = vld [vmem:[%s22890_s26 + $0xe20] ss:$16 sps:$4 sm:$0xff]   ;;  %v20731_v49 = vld [vmem:[%s22890_s26 + $0xc04] ss:$16 sps:$4 sm:$0xff]  }
 0x65a   : > { %15155 = vmatprep.subr.bf16.mxu1 %v20658_v43  ;;  %v20734_v43 = vld [vmem:[%s22890_s26 + $0xe04] ss:$16 sps:$4 sm:$0xff]  }
 0x65c   : > { %15115 = vmatpush2.bf16.msra.mxu0 %v20653_v48  ;;  %v20729_v48 = vld [vmem:[%s22890_s26 + $0xc00] ss:$16 sps:$4 sm:$0xff]  }
 0x65d   : > { %15156 = vmatpush2.bf16.msra.mxu1 %v20656_v4  ;;  %15116 = vmatprep.subr.bf16.mxu0 %v20661_v50  ;;  %v20732_v4 = vld [vmem:[%s22890_s26 + $0xe00] ss:$16 sps:$4 sm:$0xff]   ;;  %v20737_v50 = vld [vmem:[%s22890_s26 + $0xde4] ss:$16 sps:$4 sm:$0xff]  }
 0x65e   : > { %15157 = vmatprep.subr.bf16.mxu1 %v20664_v47  ;;  %v20740_v47 = vld [vmem:[%s22890_s26 + $0xfe4] ss:$16 sps:$4 sm:$0xff]  }
 0x660   : > { %15117 = vmatpush2.bf16.msra.mxu0 %v20659_v54  ;;  %v20735_v54 = vld [vmem:[%s22890_s26 + $0xde0] ss:$16 sps:$4 sm:$0xff]  }
 0x661   : > { %15158 = vmatpush2.bf16.msra.mxu1 %v20662_v55  ;;  %15118 = vmatprep.subr.bf16.mxu0 %v20667_v56  ;;  %v20738_v55 = vld [vmem:[%s22890_s26 + $0xfe0] ss:$16 sps:$4 sm:$0xff]   ;;  %v20743_v56 = vld [vmem:[%s22890_s26 + $0xdc4] ss:$16 sps:$4 sm:$0xff]  }
 0x662   : > { %15159 = vmatprep.subr.bf16.mxu1 %v20670_v57  ;;  %v20746_v57 = vld [vmem:[%s22890_s26 + $0xfc4] ss:$16 sps:$4 sm:$0xff]  }
 0x664   : > { %15119 = vmatpush2.bf16.msra.mxu0 %v20665_v62  ;;  %v20741_v62 = vld [vmem:[%s22890_s26 + $0xdc0] ss:$16 sps:$4 sm:$0xff]  }
 0x665   : > { %15160 = vmatpush2.bf16.msra.mxu1 %v20668_v27  ;;  %15120 = vmatprep.subr.bf16.mxu0 %v20673_v63  ;;  %v20744_v27 = vld [vmem:[%s22890_s26 + $0xfc0] ss:$16 sps:$4 sm:$0xff]   ;;  %v20749_v63 = vld [vmem:[%s22890_s26 + $0xda4] ss:$16 sps:$4 sm:$0xff]  }
 0x666   : > { %15161 = vmatprep.subr.bf16.mxu1 %v20676_v0  ;;  %v20752_v0 = vld [vmem:[%s22890_s26 + $0xfa4] ss:$16 sps:$4 sm:$0xff]  }
 0x668   : > { %15121 = vmatpush2.bf16.msra.mxu0 %v20671_v6  ;;  %v20747_v6 = vld [vmem:[%s22890_s26 + $0xda0] ss:$16 sps:$4 sm:$0xff]  }
 0x669   : > { %15162 = vmatpush2.bf16.msra.mxu1 %v20674_v7  ;;  %15122 = vmatprep.subr.bf16.mxu0 %v20679_v8  ;;  %v20750_v7 = vld [vmem:[%s22890_s26 + $0xfa0] ss:$16 sps:$4 sm:$0xff]   ;;  %v20755_v8 = vld [vmem:[%s22890_s26 + $0xd84] ss:$16 sps:$4 sm:$0xff]  }
 0x66a   : > { %15163 = vmatprep.subr.bf16.mxu1 %v20682_v10  ;;  %v20758_v10 = vld [vmem:[%s22890_s26 + $0xf84] ss:$16 sps:$4 sm:$0xff]  }
 0x66c   : > { %15123 = vmatpush2.bf16.msra.mxu0 %v20677_v11  ;;  %v20753_v11 = vld [vmem:[%s22890_s26 + $0xd80] ss:$16 sps:$4 sm:$0xff]  }
 0x66d   : > { %15164 = vmatpush2.bf16.msra.mxu1 %v20680_v12  ;;  %15174 = vmatprep.subr.bf16.mxu0 %v20689_v13  ;;  %v20756_v12 = vld [vmem:[%s22890_s26 + $0xf80] ss:$16 sps:$4 sm:$0xff]   ;;  %v20761_v13 = vld [vmem:[%s22890_s26 + $0xd64] ss:$16 sps:$4 sm:$0xff]  }
 0x66e   : > { %15215 = vmatprep.subr.bf16.mxu1 %v20692_v14  ;;  %v20764_v14 = vld [vmem:[%s22890_s26 + $0xf64] ss:$16 sps:$4 sm:$0xff]  }
 0x66f   : > { %15125 = vmatmul.mubr.bf16.vlgmr.msra.gmra.mxu0 %v23395_v24 }
 0x670   : > { %15166 = vmatmul.mubr.bf16.vlgmr.msra.gmra.mxu1 %v23399_v58  ;;  %15175 = vmatpush1.bf16.msra.mxu0 %v20687_v17  ;;  %v20759_v17 = vld [vmem:[%s22890_s26 + $0xd60] ss:$16 sps:$4 sm:$0xff]  }
 0x671   : > { %15216 = vmatpush1.bf16.msra.mxu1 %v20690_v18  ;;  %15176 = vmatprep.subr.bf16.mxu0 %v20695_v35  ;;  %v20762_v18 = vld [vmem:[%s22890_s26 + $0xf60] ss:$16 sps:$4 sm:$0xff]   ;;  %v20767_v35 = vld [vmem:[%s22890_s26 + $0xd44] ss:$16 sps:$4 sm:$0xff]  }
 0x672   : > { %15217 = vmatprep.subr.bf16.mxu1 %v20698_v26  ;;  %15206 = vmatprep.mubr.bf16.mxu0 %v23409_v1  ;;  %v20770_v26 = vld [vmem:[%s22890_s26 + $0xf44] ss:$16 sps:$4 sm:$0xff]  }
 0x673   : > { %15247 = vmatprep.mubr.bf16.mxu1 %v23413_v31 }
 0x674   : > { %15177 = vmatpush1.bf16.msra.mxu0 %v20693_v28  ;;  %v20765_v28 = vld [vmem:[%s22890_s26 + $0xd40] ss:$16 sps:$4 sm:$0xff]  }
 0x675   : > { %15218 = vmatpush1.bf16.msra.mxu1 %v20696_v29  ;;  %15178 = vmatprep.subr.bf16.mxu0 %v20701_v30  ;;  %v20768_v29 = vld [vmem:[%s22890_s26 + $0xf40] ss:$16 sps:$4 sm:$0xff]   ;;  %v20773_v30 = vld [vmem:[%s22890_s26 + $0xd24] ss:$16 sps:$4 sm:$0xff]  }
 0x676   : > { %15219 = vmatprep.subr.bf16.mxu1 %v20704_v32  ;;  %v20776_v32 = vld [vmem:[%s22890_s26 + $0xf24] ss:$16 sps:$4 sm:$0xff]  }
 0x678   : > { %15179 = vmatpush1.bf16.msra.mxu0 %v20699_v59  ;;  %v20771_v59 = vld [vmem:[%s22890_s26 + $0xd20] ss:$16 sps:$4 sm:$0xff]  }
 0x679   : > { %15220 = vmatpush1.bf16.msra.mxu1 %v20702_v33  ;;  %15180 = vmatprep.subr.bf16.mxu0 %v20707_v16  ;;  %v20774_v33 = vld [vmem:[%s22890_s26 + $0xf20] ss:$16 sps:$4 sm:$0xff]   ;;  %v20779_v16 = vld [vmem:[%s22890_s26 + $0xd04] ss:$16 sps:$4 sm:$0xff]  }
 0x67a   : > { %15221 = vmatprep.subr.bf16.mxu1 %v20710_v52  ;;  %v20782_v52 = vld [vmem:[%s22890_s26 + $0xf04] ss:$16 sps:$4 sm:$0xff]  }
 0x67c   : > { %15181 = vmatpush1.bf16.msra.mxu0 %v20705_v34  ;;  %v20777_v34 = vld [vmem:[%s22890_s26 + $0xd00] ss:$16 sps:$4 sm:$0xff]  }
 0x67d   : > { %15222 = vmatpush1.bf16.msra.mxu1 %v20708_v19  ;;  %15182 = vmatprep.subr.bf16.mxu0 %v20713_v36  ;;  %v20780_v19 = vld [vmem:[%s22890_s26 + $0xf00] ss:$16 sps:$4 sm:$0xff]   ;;  %v20789_v36 = vld [vmem:[%s22890_s26 + $0x10e4] ss:$16 sps:$4 sm:$0xff]  }
 0x67e   : > { %15223 = vmatprep.subr.bf16.mxu1 %v20716_v37  ;;  %v20792_v37 = vld [vmem:[%s22890_s26 + $0x12e4] ss:$16 sps:$4 sm:$0xff]  }
 0x680   : > { %15183 = vmatpush1.bf16.msra.mxu0 %v20711_v44  ;;  %v23479_v44 = vld [vmem:[#allocation2 + $0x40] sm:$0xff] }
 0x681   : > { %15224 = vmatpush1.bf16.msra.mxu1 %v20714_v38  ;;  %15184 = vmatprep.subr.bf16.mxu0 %v20719_v39  ;;  %v23483_v38 = vcombine.low %v23401_v25, %v23401_v25  ;;  %v23487_v39 = vcombine.low %v23403_v15, %v23403_v15  ;;  %v23497_v25 = vcombine.high %v23479_v44, %v23479_v44 }
 0x682   : > { %15225 = vmatprep.subr.bf16.mxu1 %v20722_v40  ;;  %v23489_v40 = vld [vmem:[#allocation2 + $0x20] sm:$0xff] }
 0x683   : > { %v23501_v15 = vcombine.high %v23489_v40, %v23489_v40 }
 0x684   : > { %15185 = vmatpush1.bf16.msra.mxu0 %v20717_v5  ;;  %v20787_v5 = vld [vmem:[%s22890_s26 + $0x10e0] ss:$16 sps:$4 sm:$0xff]  }
 0x685   : > { %15226 = vmatpush1.bf16.msra.mxu1 %v20720_v41  ;;  %15186 = vmatprep.subr.bf16.mxu0 %v20725_v9  ;;  %v20790_v41 = vld [vmem:[%s22890_s26 + $0x12e0] ss:$16 sps:$4 sm:$0xff]   ;;  %v20795_v9 = vld [vmem:[%s22890_s26 + $0x10c4] ss:$16 sps:$4 sm:$0xff]  }
 0x686   : > { %15227 = vmatprep.subr.bf16.mxu1 %v20728_v20  ;;  %v20798_v20 = vld [vmem:[%s22890_s26 + $0x12c4] ss:$16 sps:$4 sm:$0xff]  }
 0x688   : > { %15187 = vmatpush1.bf16.msra.mxu0 %v20723_v22 }
 0x689   : > { %15228 = vmatpush1.bf16.msra.mxu1 %v20726_v42  ;;  %15188 = vmatprep.subr.bf16.mxu0 %v20731_v49  ;;  %v20793_v49 = vld [vmem:[%s22890_s26 + $0x10c0] ss:$16 sps:$4 sm:$0xff]  }
 0x68a   : > { %15229 = vmatprep.subr.bf16.mxu1 %v20734_v43  ;;  %v20796_v43 = vld [vmem:[%s22890_s26 + $0x12c0] ss:$16 sps:$4 sm:$0xff]  }
 0x68c   : > { %15189 = vmatpush1.bf16.msra.mxu0 %v20729_v48 }
 0x68d   : > { %15230 = vmatpush1.bf16.msra.mxu1 %v20732_v4  ;;  %15190 = vmatprep.subr.bf16.mxu0 %v20737_v50  ;;  %v20801_v4 = vld [vmem:[%s22890_s26 + $0x10a4] ss:$16 sps:$4 sm:$0xff]  }
 0x68e   : > { %15231 = vmatprep.subr.bf16.mxu1 %v20740_v47 }
 0x690   : > { %15191 = vmatpush2.bf16.msra.mxu0 %v20735_v54  ;;  %v20804_v54 = vld [vmem:[%s22890_s26 + $0x12a4] ss:$16 sps:$4 sm:$0xff]  }
 0x691   : > { %15232 = vmatpush2.bf16.msra.mxu1 %v20738_v55  ;;  %15192 = vmatprep.subr.bf16.mxu0 %v20743_v56 }
 0x692   : > { %15233 = vmatprep.subr.bf16.mxu1 %v20746_v57 }
 0x694   : > { %15193 = vmatpush2.bf16.msra.mxu0 %v20741_v62  ;;  %v20799_v62 = vld [vmem:[%s22890_s26 + $0x10a0] ss:$16 sps:$4 sm:$0xff]  }
 0x695   : > { %15234 = vmatpush2.bf16.msra.mxu1 %v20744_v27  ;;  %15194 = vmatprep.subr.bf16.mxu0 %v20749_v63  ;;  %v20802_v27 = vld [vmem:[%s22890_s26 + $0x12a0] ss:$16 sps:$4 sm:$0xff]   ;;  %v20807_v63 = vld [vmem:[%s22890_s26 + $0x1084] ss:$16 sps:$4 sm:$0xff]  }
 0x696   : > { %15235 = vmatprep.subr.bf16.mxu1 %v20752_v0 }
 0x698   : > { %15195 = vmatpush2.bf16.msra.mxu0 %v20747_v6 }
 0x699   : > { %15236 = vmatpush2.bf16.msra.mxu1 %v20750_v7  ;;  %15196 = vmatprep.subr.bf16.mxu0 %v20755_v8  ;;  %v20810_v7 = vld [vmem:[%s22890_s26 + $0x1284] ss:$16 sps:$4 sm:$0xff]   ;;  %v20805_v8 = vld [vmem:[%s22890_s26 + $0x1080] ss:$16 sps:$4 sm:$0xff]  }
 0x69a   : > { %15237 = vmatprep.subr.bf16.mxu1 %v20758_v10  ;;  %v20808_v10 = vld [vmem:[%s22890_s26 + $0x1280] ss:$16 sps:$4 sm:$0xff]  }
 0x69c   : > { %15197 = vmatpush2.bf16.msra.mxu0 %v20753_v11  ;;  %v20813_v11 = vld [vmem:[%s22890_s26 + $0x1064] ss:$16 sps:$4 sm:$0xff]  }
 0x69d   : > { %15238 = vmatpush2.bf16.msra.mxu1 %v20756_v12  ;;  %15198 = vmatprep.subr.bf16.mxu0 %v20761_v13  ;;  %v20816_v12 = vld [vmem:[%s22890_s26 + $0x1264] ss:$16 sps:$4 sm:$0xff]   ;;  %v20811_v13 = vld [vmem:[%s22890_s26 + $0x1060] ss:$16 sps:$4 sm:$0xff]  }
 0x69e   : > { %15239 = vmatprep.subr.bf16.mxu1 %v20764_v14  ;;  %v20814_v14 = vld [vmem:[%s22890_s26 + $0x1260] ss:$16 sps:$4 sm:$0xff]  }
 0x6a0   : > { %15199 = vmatpush2.bf16.msra.mxu0 %v20759_v17  ;;  %v20819_v17 = vld [vmem:[%s22890_s26 + $0x1044] ss:$16 sps:$4 sm:$0xff]  }
 0x6a1   : > { %15240 = vmatpush2.bf16.msra.mxu1 %v20762_v18  ;;  %15200 = vmatprep.subr.bf16.mxu0 %v20767_v35  ;;  %v20822_v18 = vld [vmem:[%s22890_s26 + $0x1244] ss:$16 sps:$4 sm:$0xff]   ;;  %v20817_v35 = vld [vmem:[%s22890_s26 + $0x1040] ss:$16 sps:$4 sm:$0xff]  }
 0x6a2   : > { %15241 = vmatprep.subr.bf16.mxu1 %v20770_v26  ;;  %v20820_v26 = vld [vmem:[%s22890_s26 + $0x1240] ss:$16 sps:$4 sm:$0xff]  }
 0x6a4   : > { %15201 = vmatpush2.bf16.msra.mxu0 %v20765_v28  ;;  %v20825_v28 = vld [vmem:[%s22890_s26 + $0x1024] ss:$16 sps:$4 sm:$0xff]  }
 0x6a5   : > { %15242 = vmatpush2.bf16.msra.mxu1 %v20768_v29  ;;  %15202 = vmatprep.subr.bf16.mxu0 %v20773_v30  ;;  %v20828_v29 = vld [vmem:[%s22890_s26 + $0x1224] ss:$16 sps:$4 sm:$0xff]   ;;  %v20823_v30 = vld [vmem:[%s22890_s26 + $0x1020] ss:$16 sps:$4 sm:$0xff]  }
 0x6a6   : > { %15243 = vmatprep.subr.bf16.mxu1 %v20776_v32  ;;  %v20826_v32 = vld [vmem:[%s22890_s26 + $0x1220] ss:$16 sps:$4 sm:$0xff]  }
 0x6a8   : > { %15203 = vmatpush2.bf16.msra.mxu0 %v20771_v59  ;;  %v20831_v59 = vld [vmem:[%s22890_s26 + $0x1004] ss:$16 sps:$4 sm:$0xff]  }
 0x6a9   : > { %15244 = vmatpush2.bf16.msra.mxu1 %v20774_v33  ;;  %15204 = vmatprep.subr.bf16.mxu0 %v20779_v16  ;;  %v20834_v33 = vld [vmem:[%s22890_s26 + $0x1204] ss:$16 sps:$4 sm:$0xff]   ;;  %v20829_v16 = vld [vmem:[%s22890_s26 + $0x1000] ss:$16 sps:$4 sm:$0xff]  }
 0x6aa   : > { %15245 = vmatprep.subr.bf16.mxu1 %v20782_v52  ;;  %v20832_v52 = vld [vmem:[%s22890_s26 + $0x1200] ss:$16 sps:$4 sm:$0xff]  }
 0x6ac   : > { %15205 = vmatpush2.bf16.msra.mxu0 %v20777_v34  ;;  %v20837_v34 = vld [vmem:[%s22890_s26 + $0x11e4] ss:$16 sps:$4 sm:$0xff]  }
 0x6ad   : > { %15246 = vmatpush2.bf16.msra.mxu1 %v20780_v19  ;;  %15256 = vmatprep.subr.bf16.mxu0 %v20789_v36  ;;  %v20840_v19 = vld [vmem:[%s22890_s26 + $0x13e4] ss:$16 sps:$4 sm:$0xff]   ;;  %v20835_v36 = vld [vmem:[%s22890_s26 + $0x11e0] ss:$16 sps:$4 sm:$0xff]  }
 0x6ae   : > { %15297 = vmatprep.subr.bf16.mxu1 %v20792_v37  ;;  %v20838_v37 = vld [vmem:[%s22890_s26 + $0x13e0] ss:$16 sps:$4 sm:$0xff]  }
 0x6af   : > { %v14962_v22 = vpop.f32.mrf.mxu0  ;;  %15207 = vmatmul.mubr.bf16.vlgmr.msra.gmra.mxu0 %v23483_v38 }
 0x6b0   : > { %v15003_v42 = vpop.f32.mrf.mxu1  ;;  %15248 = vmatmul.mubr.bf16.vlgmr.msra.gmra.mxu1 %v23487_v39  ;;  %15257 = vmatpush1.bf16.msra.mxu0 %v20787_v5  ;;  %v20843_v5 = vld [vmem:[%s22890_s26 + $0x11c4] ss:$16 sps:$4 sm:$0xff]  }
 0x6b1   : > { %v23507_v48 = vadd.f32 %v15003_v42, %v14962_v22  ;;  %15298 = vmatpush1.bf16.msra.mxu1 %v20790_v41  ;;  %v14964_v50 = vpop.f32.mrf.mxu0  ;;  %15258 = vmatprep.subr.bf16.mxu0 %v20795_v9  ;;  %v20846_v41 = vld [vmem:[%s22890_s26 + $0x13c4] ss:$16 sps:$4 sm:$0xff]   ;;  %v20841_v9 = vld [vmem:[%s22890_s26 + $0x11c0] ss:$16 sps:$4 sm:$0xff]  }
 0x6b2   : > { %v15005_v47 = vpop.f32.mrf.mxu1  ;;  %15299 = vmatprep.subr.bf16.mxu1 %v20798_v20  ;;  %15288 = vmatprep.mubr.bf16.mxu0 %v23497_v25  ;;  %v20844_v20 = vld [vmem:[%s22890_s26 + $0x13c0] ss:$16 sps:$4 sm:$0xff]   ;;  %v20849_v22 = vld [vmem:[%s22890_s26 + $0x11a4] ss:$16 sps:$4 sm:$0xff]  }
 0x6b3   : > { %v23511_v55 = vadd.f32 %v15005_v47, %v14964_v50  ;;  %15329 = vmatprep.mubr.bf16.mxu1 %v23501_v15  ;;  %v14966_v56 = vpop.f32.mrf.mxu0  ;;  %v20852_v42 = vld [vmem:[%s22890_s26 + $0x13a4] ss:$16 sps:$4 sm:$0xff]   ;;  %v20853_v47 = vld [vmem:[%s22890_s26 + $0x1180] ss:$16 sps:$4 sm:$0xff]  }
 0x6b4   : > { %v15007_v57 = vpop.f32.mrf.mxu1  ;;  %15259 = vmatpush1.bf16.msra.mxu0 %v20793_v49  ;;  %v20847_v49 = vld [vmem:[%s22890_s26 + $0x11a0] ss:$16 sps:$4 sm:$0xff]   ;;  %v20858_v50 = vld [vmem:[%s22890_s26 + $0x1384] ss:$16 sps:$4 sm:$0xff]  }
 0x6b5   : > { %15300 = vmatpush1.bf16.msra.mxu1 %v20796_v43  ;;  %v14967_v0 = vpop.f32.mrf.mxu0  ;;  %15260 = vmatprep.subr.bf16.mxu0 %v20801_v4  ;;  %v20850_v43 = vld [vmem:[%s22890_s26 + $0x13a0] ss:$16 sps:$4 sm:$0xff]   ;;  %v20855_v4 = vld [vmem:[%s22890_s26 + $0x1184] ss:$16 sps:$4 sm:$0xff]  }
 0x6b6   : > { %v15008_v6 = vpop.f32.mrf.mxu1  ;;  %15301 = vmatprep.subr.bf16.mxu1 %v20804_v54  ;;  %v20856_v54 = vld [vmem:[%s22890_s26 + $0x1380] ss:$16 sps:$4 sm:$0xff]   ;;  %v20861_v56 = vld [vmem:[%s22890_s26 + $0x1164] ss:$16 sps:$4 sm:$0xff]  }
 0x6b7   : > { %v20864_v57 = vld [vmem:[%s22890_s26 + $0x1364] ss:$16 sps:$4 sm:$0xff]   ;;  %v20865_v6 = vld [vmem:[%s22890_s26 + $0x1140] ss:$16 sps:$4 sm:$0xff]  }
 0x6b8   : > { %15261 = vmatpush1.bf16.msra.mxu0 %v20799_v62  ;;  %v20859_v62 = vld [vmem:[%s22890_s26 + $0x1160] ss:$16 sps:$4 sm:$0xff]   ;;  %v20870_v0 = vld [vmem:[%s22890_s26 + $0x1344] ss:$16 sps:$4 sm:$0xff]  }
 0x6b9   : > { %15302 = vmatpush1.bf16.msra.mxu1 %v20802_v27  ;;  %15262 = vmatprep.subr.bf16.mxu0 %v20807_v63  ;;  %v20862_v27 = vld [vmem:[%s22890_s26 + $0x1360] ss:$16 sps:$4 sm:$0xff]   ;;  %v20867_v63 = vld [vmem:[%s22890_s26 + $0x1144] ss:$16 sps:$4 sm:$0xff]  }
 0x6ba   : > { %15303 = vmatprep.subr.bf16.mxu1 %v20810_v7  ;;  %v20868_v7 = vld [vmem:[%s22890_s26 + $0x1340] ss:$16 sps:$4 sm:$0xff]  }
 0x6bc   : > { %15263 = vmatpush1.bf16.msra.mxu0 %v20805_v8  ;;  %v20873_v8 = vld [vmem:[%s22890_s26 + $0x1124] ss:$16 sps:$4 sm:$0xff]  }
 0x6bd   : > { %15304 = vmatpush1.bf16.msra.mxu1 %v20808_v10  ;;  %15264 = vmatprep.subr.bf16.mxu0 %v20813_v11  ;;  %v20876_v10 = vld [vmem:[%s22890_s26 + $0x1324] ss:$16 sps:$4 sm:$0xff]   ;;  %v20871_v11 = vld [vmem:[%s22890_s26 + $0x1120] ss:$16 sps:$4 sm:$0xff]  }
 0x6be   : > { %15305 = vmatprep.subr.bf16.mxu1 %v20816_v12  ;;  %v20874_v12 = vld [vmem:[%s22890_s26 + $0x1320] ss:$16 sps:$4 sm:$0xff]  }
 0x6c0   : > { %15265 = vmatpush1.bf16.msra.mxu0 %v20811_v13  ;;  %v20879_v13 = vld [vmem:[%s22890_s26 + $0x1104] ss:$16 sps:$4 sm:$0xff]  }
 0x6c1   : > { %15306 = vmatpush1.bf16.msra.mxu1 %v20814_v14  ;;  %15266 = vmatprep.subr.bf16.mxu0 %v20819_v17  ;;  %v20882_v14 = vld [vmem:[%s22890_s26 + $0x1304] ss:$16 sps:$4 sm:$0xff]   ;;  %v20877_v17 = vld [vmem:[%s22890_s26 + $0x1100] ss:$16 sps:$4 sm:$0xff]  }
 0x6c2   : > { %15307 = vmatprep.subr.bf16.mxu1 %v20822_v18  ;;  %v20880_v18 = vld [vmem:[%s22890_s26 + $0x1300] ss:$16 sps:$4 sm:$0xff]  }
 0x6c4   : > { %15267 = vmatpush1.bf16.msra.mxu0 %v20817_v35  ;;  %v20889_v35 = vld [vmem:[%s22890_s26 + $0x14e4] ss:$16 sps:$4 sm:$0xff]  }
 0x6c5   : > { %15308 = vmatpush1.bf16.msra.mxu1 %v20820_v26  ;;  %15268 = vmatprep.subr.bf16.mxu0 %v20825_v28  ;;  %v20892_v26 = vld [vmem:[%s22890_s26 + $0x16e4] ss:$16 sps:$4 sm:$0xff]   ;;  %v20887_v28 = vld [vmem:[%s22890_s26 + $0x14e0] ss:$16 sps:$4 sm:$0xff]  }
 0x6c6   : > { %15309 = vmatprep.subr.bf16.mxu1 %v20828_v29  ;;  %v20890_v29 = vld [vmem:[%s22890_s26 + $0x16e0] ss:$16 sps:$4 sm:$0xff]  }
 0x6c8   : > { %15269 = vmatpush1.bf16.msra.mxu0 %v20823_v30  ;;  %v23575_v30 = vcombine.low %v23479_v44, %v23479_v44 }
 0x6c9   : > { %15310 = vmatpush1.bf16.msra.mxu1 %v20826_v32  ;;  %15270 = vmatprep.subr.bf16.mxu0 %v20831_v59  ;;  %v23579_v32 = vcombine.low %v23489_v40, %v23489_v40  ;;  %v23581_v59 = vld [vmem:[#allocation2 + $0x10] sm:$0xff] }
 0x6ca   : > { %15311 = vmatprep.subr.bf16.mxu1 %v20834_v33  ;;  %v23583_v33 = vld [vmem:[#allocation2 + $0x38] sm:$0xff]  ;;  %v23591_v44 = vcombine.high %v23581_v59, %v23581_v59 }
 0x6cb   : > { %v23595_v40 = vcombine.high %v23583_v33, %v23583_v33 }
 0x6cc   : > { %15271 = vmatpush1.bf16.msra.mxu0 %v20829_v16  ;;  %v20895_v16 = vld [vmem:[%s22890_s26 + $0x14c4] ss:$16 sps:$4 sm:$0xff]  }
 0x6cd   : > { %15312 = vmatpush1.bf16.msra.mxu1 %v20832_v52  ;;  %15272 = vmatprep.subr.bf16.mxu0 %v20837_v34  ;;  %v20898_v52 = vld [vmem:[%s22890_s26 + $0x16c4] ss:$16 sps:$4 sm:$0xff]   ;;  %v20893_v34 = vld [vmem:[%s22890_s26 + $0x14c0] ss:$16 sps:$4 sm:$0xff]  }
 0x6ce   : > { %15313 = vmatprep.subr.bf16.mxu1 %v20840_v19  ;;  %v20896_v19 = vld [vmem:[%s22890_s26 + $0x16c0] ss:$16 sps:$4 sm:$0xff]  }
 0x6d0   : > { %15273 = vmatpush2.bf16.msra.mxu0 %v20835_v36 }
 0x6d1   : > { %15314 = vmatpush2.bf16.msra.mxu1 %v20838_v37  ;;  %15274 = vmatprep.subr.bf16.mxu0 %v20843_v5 }
 0x6d2   : > { %15315 = vmatprep.subr.bf16.mxu1 %v20846_v41 }
 0x6d4   : > { %15275 = vmatpush2.bf16.msra.mxu0 %v20841_v9 }
 0x6d5   : > { %15316 = vmatpush2.bf16.msra.mxu1 %v20844_v20  ;;  %15276 = vmatprep.subr.bf16.mxu0 %v20849_v22  ;;  %v20901_v20 = vld [vmem:[%s22890_s26 + $0x14a4] ss:$16 sps:$4 sm:$0xff]  }
 0x6d6   : > { %15317 = vmatprep.subr.bf16.mxu1 %v20852_v42  ;;  %v20904_v22 = vld [vmem:[%s22890_s26 + $0x16a4] ss:$16 sps:$4 sm:$0xff]  }
 0x6d8   : > { %15277 = vmatpush2.bf16.msra.mxu0 %v20847_v49 }
 0x6d9   : > { %15318 = vmatpush2.bf16.msra.mxu1 %v20850_v43  ;;  %15278 = vmatprep.subr.bf16.mxu0 %v20855_v4  ;;  %v20899_v43 = vld [vmem:[%s22890_s26 + $0x14a0] ss:$16 sps:$4 sm:$0xff]  }
 0x6da   : > { %15319 = vmatprep.subr.bf16.mxu1 %v20858_v50  ;;  %v20902_v4 = vld [vmem:[%s22890_s26 + $0x16a0] ss:$16 sps:$4 sm:$0xff]  }
 0x6dc   : > { %15279 = vmatpush2.bf16.msra.mxu0 %v20853_v47 }
 0x6dd   : > { %15320 = vmatpush2.bf16.msra.mxu1 %v20856_v54  ;;  %15280 = vmatprep.subr.bf16.mxu0 %v20861_v56 }
 0x6de   : > { %15321 = vmatprep.subr.bf16.mxu1 %v20864_v57  ;;  %v20910_v57 = vld [vmem:[%s22890_s26 + $0x1684] ss:$16 sps:$4 sm:$0xff]  }
 0x6e0   : > { %15281 = vmatpush2.bf16.msra.mxu0 %v20859_v62  ;;  %v20905_v62 = vld [vmem:[%s22890_s26 + $0x1480] ss:$16 sps:$4 sm:$0xff]  }
 0x6e1   : > { %15322 = vmatpush2.bf16.msra.mxu1 %v20862_v27  ;;  %15282 = vmatprep.subr.bf16.mxu0 %v20867_v63  ;;  %v20908_v27 = vld [vmem:[%s22890_s26 + $0x1680] ss:$16 sps:$4 sm:$0xff]   ;;  %v20913_v63 = vld [vmem:[%s22890_s26 + $0x1464] ss:$16 sps:$4 sm:$0xff]  }
 0x6e2   : > { %15323 = vmatprep.subr.bf16.mxu1 %v20870_v0  ;;  %v20916_v0 = vld [vmem:[%s22890_s26 + $0x1664] ss:$16 sps:$4 sm:$0xff]  }
 0x6e4   : > { %15283 = vmatpush2.bf16.msra.mxu0 %v20865_v6  ;;  %v20911_v6 = vld [vmem:[%s22890_s26 + $0x1460] ss:$16 sps:$4 sm:$0xff]  }
 0x6e5   : > { %15324 = vmatpush2.bf16.msra.mxu1 %v20868_v7  ;;  %15284 = vmatprep.subr.bf16.mxu0 %v20873_v8  ;;  %v20914_v7 = vld [vmem:[%s22890_s26 + $0x1660] ss:$16 sps:$4 sm:$0xff]   ;;  %v20919_v8 = vld [vmem:[%s22890_s26 + $0x1444] ss:$16 sps:$4 sm:$0xff]  }
 0x6e6   : > { %15325 = vmatprep.subr.bf16.mxu1 %v20876_v10  ;;  %v20922_v10 = vld [vmem:[%s22890_s26 + $0x1644] ss:$16 sps:$4 sm:$0xff]  }
 0x6e8   : > { %15285 = vmatpush2.bf16.msra.mxu0 %v20871_v11  ;;  %v20917_v11 = vld [vmem:[%s22890_s26 + $0x1440] ss:$16 sps:$4 sm:$0xff]  }
 0x6e9   : > { %15326 = vmatpush2.bf16.msra.mxu1 %v20874_v12  ;;  %15286 = vmatprep.subr.bf16.mxu0 %v20879_v13  ;;  %v20920_v12 = vld [vmem:[%s22890_s26 + $0x1640] ss:$16 sps:$4 sm:$0xff]   ;;  %v20925_v13 = vld [vmem:[%s22890_s26 + $0x1424] ss:$16 sps:$4 sm:$0xff]  }
 0x6ea   : > { %15327 = vmatprep.subr.bf16.mxu1 %v20882_v14  ;;  %v20928_v14 = vld [vmem:[%s22890_s26 + $0x1624] ss:$16 sps:$4 sm:$0xff]  }
 0x6ec   : > { %15287 = vmatpush2.bf16.msra.mxu0 %v20877_v17  ;;  %v20923_v17 = vld [vmem:[%s22890_s26 + $0x1420] ss:$16 sps:$4 sm:$0xff]  }
 0x6ed   : > { %15328 = vmatpush2.bf16.msra.mxu1 %v20880_v18  ;;  %15338 = vmatprep.subr.bf16.mxu0 %v20889_v35  ;;  %v20926_v18 = vld [vmem:[%s22890_s26 + $0x1620] ss:$16 sps:$4 sm:$0xff]   ;;  %v20931_v35 = vld [vmem:[%s22890_s26 + $0x1404] ss:$16 sps:$4 sm:$0xff]  }
 0x6ee   : > { %15379 = vmatprep.subr.bf16.mxu1 %v20892_v26  ;;  %v20934_v26 = vld [vmem:[%s22890_s26 + $0x1604] ss:$16 sps:$4 sm:$0xff]  }
 0x6ef   : > { %v15044_v36 = vpop.f32.mrf.mxu0  ;;  %15289 = vmatmul.mubr.bf16.vlgmr.msra.gmra.mxu0 %v23575_v30 }
 0x6f0   : > { %v15085_v37 = vpop.f32.mrf.mxu1  ;;  %15330 = vmatmul.mubr.bf16.vlgmr.msra.gmra.mxu1 %v23579_v32  ;;  %v15045_v5 = vadd.f32 %v15044_v36, %v23507_v48  ;;  %15339 = vmatpush1.bf16.msra.mxu0 %v20887_v28  ;;  %v20929_v28 = vld [vmem:[%s22890_s26 + $0x1400] ss:$16 sps:$4 sm:$0xff]   ;;  %v20943_v36 = vld [vmem:[%s22890_s26 + $0x15c4] ss:$16 sps:$4 sm:$0xff]  }
 0x6f1   : > { %15380 = vmatpush1.bf16.msra.mxu1 %v20890_v29  ;;  %v15046_v41 = vpop.f32.mrf.mxu0  ;;  %15340 = vmatprep.subr.bf16.mxu0 %v20895_v16  ;;  %v20932_v29 = vld [vmem:[%s22890_s26 + $0x1600] ss:$16 sps:$4 sm:$0xff]   ;;  %v20937_v16 = vld [vmem:[%s22890_s26 + $0x15e4] ss:$16 sps:$4 sm:$0xff]  }
 0x6f2   : > { %v15087_v9 = vpop.f32.mrf.mxu1  ;;  %15381 = vmatprep.subr.bf16.mxu1 %v20898_v52  ;;  %v23602_v42 = vadd.f32 %v15085_v37, %v15045_v5  ;;  %v15047_v49 = vadd.f32 %v15046_v41, %v23511_v55  ;;  %15370 = vmatprep.mubr.bf16.mxu0 %v23591_v44  ;;  %v20907_v55 = vld [vmem:[%s22890_s26 + $0x1484] ss:$16 sps:$4 sm:$0xff]   ;;  %v20941_v5 = vld [vmem:[%s22890_s26 + $0x15c0] ss:$16 sps:$4 sm:$0xff]  }
 0x6f3   : > { %15411 = vmatprep.mubr.bf16.mxu1 %v23595_v40  ;;  %v15048_v48 = vpop.f32.mrf.mxu0  ;;  %v20940_v52 = vld [vmem:[%s22890_s26 + $0x17e4] ss:$16 sps:$4 sm:$0xff]   ;;  %v20944_v41 = vld [vmem:[%s22890_s26 + $0x17c0] ss:$16 sps:$4 sm:$0xff]  }
 0x6f4   : > { %v15089_v50 = vpop.f32.mrf.mxu1  ;;  %v23609_v47 = vadd.f32 %v15087_v9, %v15047_v49  ;;  %15341 = vmatpush1.bf16.msra.mxu0 %v20893_v34  ;;  %v20935_v34 = vld [vmem:[%s22890_s26 + $0x15e0] ss:$16 sps:$4 sm:$0xff]   ;;  %v20946_v37 = vld [vmem:[%s22890_s26 + $0x17c4] ss:$16 sps:$4 sm:$0xff]  }
 0x6f5   : > { %15382 = vmatpush1.bf16.msra.mxu1 %v20896_v19  ;;  %v15049_v54 = vpop.f32.mrf.mxu0  ;;  %15342 = vmatprep.subr.bf16.mxu0 %v20901_v20  ;;  %v20938_v19 = vld [vmem:[%s22890_s26 + $0x17e0] ss:$16 sps:$4 sm:$0xff]   ;;  %v20949_v9 = vld [vmem:[%s22890_s26 + $0x15a4] ss:$16 sps:$4 sm:$0xff]  }
 0x6f6   : > { %v15090_v56 = vpop.f32.mrf.mxu1  ;;  %15383 = vmatprep.subr.bf16.mxu1 %v20904_v22  ;;  %v20952_v20 = vld [vmem:[%s22890_s26 + $0x17a4] ss:$16 sps:$4 sm:$0xff]   ;;  %v20947_v22 = vld [vmem:[%s22890_s26 + $0x15a0] ss:$16 sps:$4 sm:$0xff]  }
 0x6f7   : > { %v20950_v49 = vld [vmem:[%s22890_s26 + $0x17a0] ss:$16 sps:$4 sm:$0xff]   ;;  %v20961_v54 = vld [vmem:[%s22890_s26 + $0x1564] ss:$16 sps:$4 sm:$0xff]  }
 0x6f8   : > { %15343 = vmatpush1.bf16.msra.mxu0 %v20899_v43  ;;  %v20955_v43 = vld [vmem:[%s22890_s26 + $0x1584] ss:$16 sps:$4 sm:$0xff]   ;;  %v20953_v48 = vld [vmem:[%s22890_s26 + $0x1580] ss:$16 sps:$4 sm:$0xff]  }
 0x6f9   : > { %15384 = vmatpush1.bf16.msra.mxu1 %v20902_v4  ;;  %15344 = vmatprep.subr.bf16.mxu0 %v20907_v55  ;;  %v20958_v4 = vld [vmem:[%s22890_s26 + $0x1784] ss:$16 sps:$4 sm:$0xff]   ;;  %v20956_v50 = vld [vmem:[%s22890_s26 + $0x1780] ss:$16 sps:$4 sm:$0xff]  }
 0x6fa   : > { %15385 = vmatprep.subr.bf16.mxu1 %v20910_v57  ;;  %v20964_v56 = vld [vmem:[%s22890_s26 + $0x1764] ss:$16 sps:$4 sm:$0xff]   ;;  %v20959_v55 = vld [vmem:[%s22890_s26 + $0x1560] ss:$16 sps:$4 sm:$0xff]  }
 0x6fb   : > { %v20962_v57 = vld [vmem:[%s22890_s26 + $0x1760] ss:$16 sps:$4 sm:$0xff]  }
 0x6fc   : > { %15345 = vmatpush1.bf16.msra.mxu0 %v20905_v62  ;;  %v20967_v62 = vld [vmem:[%s22890_s26 + $0x1544] ss:$16 sps:$4 sm:$0xff]  }
 0x6fd   : > { %15386 = vmatpush1.bf16.msra.mxu1 %v20908_v27  ;;  %15346 = vmatprep.subr.bf16.mxu0 %v20913_v63  ;;  %v20970_v27 = vld [vmem:[%s22890_s26 + $0x1744] ss:$16 sps:$4 sm:$0xff]   ;;  %v20965_v63 = vld [vmem:[%s22890_s26 + $0x1540] ss:$16 sps:$4 sm:$0xff]  }
 0x6fe   : > { %15387 = vmatprep.subr.bf16.mxu1 %v20916_v0  ;;  %v20968_v0 = vld [vmem:[%s22890_s26 + $0x1740] ss:$16 sps:$4 sm:$0xff]  }
 0x700   : > { %15347 = vmatpush1.bf16.msra.mxu0 %v20911_v6  ;;  %v20973_v6 = vld [vmem:[%s22890_s26 + $0x1524] ss:$16 sps:$4 sm:$0xff]  }
 0x701   : > { %15388 = vmatpush1.bf16.msra.mxu1 %v20914_v7  ;;  %15348 = vmatprep.subr.bf16.mxu0 %v20919_v8  ;;  %v20976_v7 = vld [vmem:[%s22890_s26 + $0x1724] ss:$16 sps:$4 sm:$0xff]   ;;  %v20971_v8 = vld [vmem:[%s22890_s26 + $0x1520] ss:$16 sps:$4 sm:$0xff]  }
 0x702   : > { %15389 = vmatprep.subr.bf16.mxu1 %v20922_v10  ;;  %v20974_v10 = vld [vmem:[%s22890_s26 + $0x1720] ss:$16 sps:$4 sm:$0xff]  }
 0x704   : > { %15349 = vmatpush1.bf16.msra.mxu0 %v20917_v11  ;;  %v20979_v11 = vld [vmem:[%s22890_s26 + $0x1504] ss:$16 sps:$4 sm:$0xff]  }
 0x705   : > { %15390 = vmatpush1.bf16.msra.mxu1 %v20920_v12  ;;  %15350 = vmatprep.subr.bf16.mxu0 %v20925_v13  ;;  %v20982_v12 = vld [vmem:[%s22890_s26 + $0x1704] ss:$16 sps:$4 sm:$0xff]   ;;  %v20977_v13 = vld [vmem:[%s22890_s26 + $0x1500] ss:$16 sps:$4 sm:$0xff]  }
 0x706   : > { %15391 = vmatprep.subr.bf16.mxu1 %v20928_v14  ;;  %v20980_v14 = vld [vmem:[%s22890_s26 + $0x1700] ss:$16 sps:$4 sm:$0xff]  }
 0x708   : > { %15351 = vmatpush1.bf16.msra.mxu0 %v20923_v17  ;;  %v20989_v17 = vld [vmem:[%s22890_s26 + $0x18e4] ss:$16 sps:$4 sm:$0xff]  }
 0x709   : > { %15392 = vmatpush1.bf16.msra.mxu1 %v20926_v18  ;;  %15352 = vmatprep.subr.bf16.mxu0 %v20931_v35  ;;  %v20992_v18 = vld [vmem:[%s22890_s26 + $0x1ae4] ss:$16 sps:$4 sm:$0xff]   ;;  %v20987_v35 = vld [vmem:[%s22890_s26 + $0x18e0] ss:$16 sps:$4 sm:$0xff]  }
 0x70a   : > { %15393 = vmatprep.subr.bf16.mxu1 %v20934_v26  ;;  %v20990_v26 = vld [vmem:[%s22890_s26 + $0x1ae0] ss:$16 sps:$4 sm:$0xff]  }
 0x70c   : > { %15353 = vmatpush1.bf16.msra.mxu0 %v20929_v28  ;;  %v23669_v28 = vcombine.low %v23581_v59, %v23581_v59 }
 0x70d   : > { %15394 = vmatpush1.bf16.msra.mxu1 %v20932_v29  ;;  %15354 = vmatprep.subr.bf16.mxu0 %v20937_v16  ;;  %v23673_v29 = vcombine.low %v23583_v33, %v23583_v33  ;;  %v23675_v16 = vld [vmem:[#allocation2 + $0x60] sm:$0xff] }
 0x70e   : > { %15395 = vmatprep.subr.bf16.mxu1 %v20940_v52  ;;  %v23677_v52 = vld [vmem:[#allocation2 + $0x70] sm:$0xff]  ;;  %v23685_v59 = vcombine.high %v23675_v16, %v23675_v16 }
 0x70f   : > { %v23689_v33 = vcombine.high %v23677_v52, %v23677_v52 }
 0x710   : > { %15355 = vmatpush2.bf16.msra.mxu0 %v20935_v34  ;;  %v20995_v34 = vld [vmem:[%s22890_s26 + $0x18c4] ss:$16 sps:$4 sm:$0xff]  }
 0x711   : > { %15396 = vmatpush2.bf16.msra.mxu1 %v20938_v19  ;;  %15356 = vmatprep.subr.bf16.mxu0 %v20943_v36  ;;  %v20998_v19 = vld [vmem:[%s22890_s26 + $0x1ac4] ss:$16 sps:$4 sm:$0xff]   ;;  %v20993_v36 = vld [vmem:[%s22890_s26 + $0x18c0] ss:$16 sps:$4 sm:$0xff]  }
 0x712   : > { %15397 = vmatprep.subr.bf16.mxu1 %v20946_v37  ;;  %v20996_v37 = vld [vmem:[%s22890_s26 + $0x1ac0] ss:$16 sps:$4 sm:$0xff]  }
 0x714   : > { %15357 = vmatpush2.bf16.msra.mxu0 %v20941_v5 }
 0x715   : > { %15398 = vmatpush2.bf16.msra.mxu1 %v20944_v41  ;;  %15358 = vmatprep.subr.bf16.mxu0 %v20949_v9 }
 0x716   : > { %15399 = vmatprep.subr.bf16.mxu1 %v20952_v20 }
 0x718   : > { %15359 = vmatpush2.bf16.msra.mxu0 %v20947_v22 }
 0x719   : > { %15400 = vmatpush2.bf16.msra.mxu1 %v20950_v49  ;;  %15360 = vmatprep.subr.bf16.mxu0 %v20955_v43  ;;  %v21001_v49 = vld [vmem:[%s22890_s26 + $0x18a4] ss:$16 sps:$4 sm:$0xff]  }
 0x71a   : > { %15401 = vmatprep.subr.bf16.mxu1 %v20958_v4  ;;  %v21004_v43 = vld [vmem:[%s22890_s26 + $0x1aa4] ss:$16 sps:$4 sm:$0xff]  }
 0x71c   : > { %15361 = vmatpush2.bf16.msra.mxu0 %v20953_v48 }
 0x71d   : > { %15402 = vmatpush2.bf16.msra.mxu1 %v20956_v50  ;;  %15362 = vmatprep.subr.bf16.mxu0 %v20961_v54  ;;  %v20999_v50 = vld [vmem:[%s22890_s26 + $0x18a0] ss:$16 sps:$4 sm:$0xff]  }
 0x71e   : > { %15403 = vmatprep.subr.bf16.mxu1 %v20964_v56  ;;  %v21002_v54 = vld [vmem:[%s22890_s26 + $0x1aa0] ss:$16 sps:$4 sm:$0xff]  }
 0x720   : > { %15363 = vmatpush2.bf16.msra.mxu0 %v20959_v55 }
 0x721   : > { %15404 = vmatpush2.bf16.msra.mxu1 %v20962_v57  ;;  %15364 = vmatprep.subr.bf16.mxu0 %v20967_v62 }
 0x722   : > { %15405 = vmatprep.subr.bf16.mxu1 %v20970_v27  ;;  %v21010_v27 = vld [vmem:[%s22890_s26 + $0x1a84] ss:$16 sps:$4 sm:$0xff]  }
 0x724   : > { %15365 = vmatpush2.bf16.msra.mxu0 %v20965_v63  ;;  %v21005_v63 = vld [vmem:[%s22890_s26 + $0x1880] ss:$16 sps:$4 sm:$0xff]  }
 0x725   : > { %15406 = vmatpush2.bf16.msra.mxu1 %v20968_v0  ;;  %15366 = vmatprep.subr.bf16.mxu0 %v20973_v6  ;;  %v21008_v0 = vld [vmem:[%s22890_s26 + $0x1a80] ss:$16 sps:$4 sm:$0xff]   ;;  %v21013_v6 = vld [vmem:[%s22890_s26 + $0x1864] ss:$16 sps:$4 sm:$0xff]  }
 0x726   : > { %15407 = vmatprep.subr.bf16.mxu1 %v20976_v7  ;;  %v21016_v7 = vld [vmem:[%s22890_s26 + $0x1a64] ss:$16 sps:$4 sm:$0xff]  }
 0x728   : > { %15367 = vmatpush2.bf16.msra.mxu0 %v20971_v8  ;;  %v21011_v8 = vld [vmem:[%s22890_s26 + $0x1860] ss:$16 sps:$4 sm:$0xff]  }
 0x729   : > { %15408 = vmatpush2.bf16.msra.mxu1 %v20974_v10  ;;  %15368 = vmatprep.subr.bf16.mxu0 %v20979_v11  ;;  %v21014_v10 = vld [vmem:[%s22890_s26 + $0x1a60] ss:$16 sps:$4 sm:$0xff]   ;;  %v21019_v11 = vld [vmem:[%s22890_s26 + $0x1844] ss:$16 sps:$4 sm:$0xff]  }
 0x72a   : > { %15409 = vmatprep.subr.bf16.mxu1 %v20982_v12  ;;  %v21022_v12 = vld [vmem:[%s22890_s26 + $0x1a44] ss:$16 sps:$4 sm:$0xff]  }
 0x72c   : > { %15369 = vmatpush2.bf16.msra.mxu0 %v20977_v13  ;;  %v21017_v13 = vld [vmem:[%s22890_s26 + $0x1840] ss:$16 sps:$4 sm:$0xff]  }
 0x72d   : > { %15410 = vmatpush2.bf16.msra.mxu1 %v20980_v14  ;;  %15420 = vmatprep.subr.bf16.mxu0 %v20989_v17  ;;  %v21020_v14 = vld [vmem:[%s22890_s26 + $0x1a40] ss:$16 sps:$4 sm:$0xff]   ;;  %v21025_v17 = vld [vmem:[%s22890_s26 + $0x1824] ss:$16 sps:$4 sm:$0xff]  }
 0x72e   : > { %15461 = vmatprep.subr.bf16.mxu1 %v20992_v18  ;;  %v21028_v18 = vld [vmem:[%s22890_s26 + $0x1a24] ss:$16 sps:$4 sm:$0xff]  }
 0x72f   : > { %v15126_v5 = vpop.f32.mrf.mxu0  ;;  %15371 = vmatmul.mubr.bf16.vlgmr.msra.gmra.mxu0 %v23669_v28 }
 0x730   : > { %v15167_v41 = vpop.f32.mrf.mxu1  ;;  %15412 = vmatmul.mubr.bf16.vlgmr.msra.gmra.mxu1 %v23673_v29  ;;  %v15127_v9 = vadd.f32 %v15126_v5, %v23602_v42  ;;  %15421 = vmatpush1.bf16.msra.mxu0 %v20987_v35  ;;  %v21023_v35 = vld [vmem:[%s22890_s26 + $0x1820] ss:$16 sps:$4 sm:$0xff]   ;;  %v21037_v5 = vld [vmem:[%s22890_s26 + $0x19e4] ss:$16 sps:$4 sm:$0xff]  }
 0x731   : > { %15462 = vmatpush1.bf16.msra.mxu1 %v20990_v26  ;;  %v15128_v20 = vpop.f32.mrf.mxu0  ;;  %15422 = vmatprep.subr.bf16.mxu0 %v20995_v34  ;;  %v21026_v26 = vld [vmem:[%s22890_s26 + $0x1a20] ss:$16 sps:$4 sm:$0xff]   ;;  %v21031_v34 = vld [vmem:[%s22890_s26 + $0x1804] ss:$16 sps:$4 sm:$0xff]  }
 0x732   : > { %v15169_v22 = vpop.f32.mrf.mxu1  ;;  %15463 = vmatprep.subr.bf16.mxu1 %v20998_v19  ;;  %v23696_v4 = vadd.f32 %v15167_v41, %v15127_v9  ;;  %v15129_v48 = vadd.f32 %v15128_v20, %v23609_v47  ;;  %15452 = vmatprep.mubr.bf16.mxu0 %v23685_v59  ;;  %v21007_v47 = vld [vmem:[%s22890_s26 + $0x1884] ss:$16 sps:$4 sm:$0xff]   ;;  %v21035_v9 = vld [vmem:[%s22890_s26 + $0x19e0] ss:$16 sps:$4 sm:$0xff]  }
 0x733   : > { %15493 = vmatprep.mubr.bf16.mxu1 %v23689_v33  ;;  %v15130_v42 = vpop.f32.mrf.mxu0  ;;  %v21034_v19 = vld [vmem:[%s22890_s26 + $0x1a04] ss:$16 sps:$4 sm:$0xff]   ;;  %v21038_v20 = vld [vmem:[%s22890_s26 + $0x1be0] ss:$16 sps:$4 sm:$0xff]  }
 0x734   : > { %v15171_v56 = vpop.f32.mrf.mxu1  ;;  %v23703_v55 = vadd.f32 %v15169_v22, %v15129_v48  ;;  %15423 = vmatpush1.bf16.msra.mxu0 %v20993_v36  ;;  %v21029_v36 = vld [vmem:[%s22890_s26 + $0x1800] ss:$16 sps:$4 sm:$0xff]   ;;  %v21040_v41 = vld [vmem:[%s22890_s26 + $0x1be4] ss:$16 sps:$4 sm:$0xff]  }
 0x735   : > { %15464 = vmatpush1.bf16.msra.mxu1 %v20996_v37  ;;  %v15131_v57 = vpop.f32.mrf.mxu0  ;;  %15424 = vmatprep.subr.bf16.mxu0 %v21001_v49  ;;  %v21032_v37 = vld [vmem:[%s22890_s26 + $0x1a00] ss:$16 sps:$4 sm:$0xff]   ;;  %v21043_v22 = vld [vmem:[%s22890_s26 + $0x19c4] ss:$16 sps:$4 sm:$0xff]  }
 0x736   : > { %v15172_v62 = vpop.f32.mrf.mxu1  ;;  %15465 = vmatprep.subr.bf16.mxu1 %v21004_v43  ;;  %v21046_v49 = vld [vmem:[%s22890_s26 + $0x1bc4] ss:$16 sps:$4 sm:$0xff]   ;;  %v21041_v43 = vld [vmem:[%s22890_s26 + $0x19c0] ss:$16 sps:$4 sm:$0xff]  }
 0x737   : > { %v21044_v48 = vld [vmem:[%s22890_s26 + $0x1bc0] ss:$16 sps:$4 sm:$0xff]   ;;  %v21055_v57 = vld [vmem:[%s22890_s26 + $0x1984] ss:$16 sps:$4 sm:$0xff]  }
 0x738   : > { %15425 = vmatpush1.bf16.msra.mxu0 %v20999_v50  ;;  %v21049_v50 = vld [vmem:[%s22890_s26 + $0x19a4] ss:$16 sps:$4 sm:$0xff]   ;;  %v21047_v42 = vld [vmem:[%s22890_s26 + $0x19a0] ss:$16 sps:$4 sm:$0xff]  }
 0x739   : > { %15466 = vmatpush1.bf16.msra.mxu1 %v21002_v54  ;;  %15426 = vmatprep.subr.bf16.mxu0 %v21007_v47  ;;  %v21052_v54 = vld [vmem:[%s22890_s26 + $0x1ba4] ss:$16 sps:$4 sm:$0xff]   ;;  %v21050_v56 = vld [vmem:[%s22890_s26 + $0x1ba0] ss:$16 sps:$4 sm:$0xff]  }
 0x73a   : > { %15467 = vmatprep.subr.bf16.mxu1 %v21010_v27  ;;  %v21058_v62 = vld [vmem:[%s22890_s26 + $0x1b84] ss:$16 sps:$4 sm:$0xff]   ;;  %v21053_v47 = vld [vmem:[%s22890_s26 + $0x1980] ss:$16 sps:$4 sm:$0xff]  }
 0x73b   : > { %v21056_v27 = vld [vmem:[%s22890_s26 + $0x1b80] ss:$16 sps:$4 sm:$0xff]  }
 0x73c   : > { %15427 = vmatpush1.bf16.msra.mxu0 %v21005_v63  ;;  %v21061_v63 = vld [vmem:[%s22890_s26 + $0x1964] ss:$16 sps:$4 sm:$0xff]  }
 0x73d   : > { %15468 = vmatpush1.bf16.msra.mxu1 %v21008_v0  ;;  %15428 = vmatprep.subr.bf16.mxu0 %v21013_v6  ;;  %v21064_v0 = vld [vmem:[%s22890_s26 + $0x1b64] ss:$16 sps:$4 sm:$0xff]   ;;  %v21059_v6 = vld [vmem:[%s22890_s26 + $0x1960] ss:$16 sps:$4 sm:$0xff]  }
 0x73e   : > { %15469 = vmatprep.subr.bf16.mxu1 %v21016_v7  ;;  %v21062_v7 = vld [vmem:[%s22890_s26 + $0x1b60] ss:$16 sps:$4 sm:$0xff]  }
 0x740   : > { %15429 = vmatpush1.bf16.msra.mxu0 %v21011_v8  ;;  %v21067_v8 = vld [vmem:[%s22890_s26 + $0x1944] ss:$16 sps:$4 sm:$0xff]  }
 0x741   : > { %15470 = vmatpush1.bf16.msra.mxu1 %v21014_v10  ;;  %15430 = vmatprep.subr.bf16.mxu0 %v21019_v11  ;;  %v21070_v10 = vld [vmem:[%s22890_s26 + $0x1b44] ss:$16 sps:$4 sm:$0xff]   ;;  %v21065_v11 = vld [vmem:[%s22890_s26 + $0x1940] ss:$16 sps:$4 sm:$0xff]  }
 0x742   : > { %15471 = vmatprep.subr.bf16.mxu1 %v21022_v12  ;;  %v21068_v12 = vld [vmem:[%s22890_s26 + $0x1b40] ss:$16 sps:$4 sm:$0xff]  }
 0x744   : > { %15431 = vmatpush1.bf16.msra.mxu0 %v21017_v13  ;;  %v21073_v13 = vld [vmem:[%s22890_s26 + $0x1924] ss:$16 sps:$4 sm:$0xff]  }
 0x745   : > { %15472 = vmatpush1.bf16.msra.mxu1 %v21020_v14  ;;  %15432 = vmatprep.subr.bf16.mxu0 %v21025_v17  ;;  %v21076_v14 = vld [vmem:[%s22890_s26 + $0x1b24] ss:$16 sps:$4 sm:$0xff]   ;;  %v21071_v17 = vld [vmem:[%s22890_s26 + $0x1920] ss:$16 sps:$4 sm:$0xff]  }
 0x746   : > { %15473 = vmatprep.subr.bf16.mxu1 %v21028_v18  ;;  %v21074_v18 = vld [vmem:[%s22890_s26 + $0x1b20] ss:$16 sps:$4 sm:$0xff]  }
 0x748   : > { %15433 = vmatpush1.bf16.msra.mxu0 %v21023_v35  ;;  %v21079_v35 = vld [vmem:[%s22890_s26 + $0x1904] ss:$16 sps:$4 sm:$0xff]  }
 0x749   : > { %15474 = vmatpush1.bf16.msra.mxu1 %v21026_v26  ;;  %15434 = vmatprep.subr.bf16.mxu0 %v21031_v34  ;;  %v21082_v26 = vld [vmem:[%s22890_s26 + $0x1b04] ss:$16 sps:$4 sm:$0xff]   ;;  %v21077_v34 = vld [vmem:[%s22890_s26 + $0x1900] ss:$16 sps:$4 sm:$0xff]  }
 0x74a   : > { %15475 = vmatprep.subr.bf16.mxu1 %v21034_v19  ;;  %v21080_v19 = vld [vmem:[%s22890_s26 + $0x1b00] ss:$16 sps:$4 sm:$0xff]  }
 0x74c   : > { %15435 = vmatpush1.bf16.msra.mxu0 %v21029_v36  ;;  %v21089_v36 = vld [vmem:[%s22890_s26 + $0x1ce4] ss:$16 sps:$4 sm:$0xff]  }
 0x74d   : > { %15476 = vmatpush1.bf16.msra.mxu1 %v21032_v37  ;;  %15436 = vmatprep.subr.bf16.mxu0 %v21037_v5  ;;  %v21092_v37 = vld [vmem:[%s22890_s26 + $0x1ee4] ss:$16 sps:$4 sm:$0xff]   ;;  %v23759_v5 = vld [vmem:[#allocation2 + $0x78] sm:$0xff] }
 0x74e   : > { %15477 = vmatprep.subr.bf16.mxu1 %v21040_v41  ;;  %v23761_v41 = vld [vmem:[#allocation2 + $0x28] sm:$0xff] }
 0x750   : > { %15437 = vmatpush2.bf16.msra.mxu0 %v21035_v9  ;;  %v21087_v9 = vld [vmem:[%s22890_s26 + $0x1ce0] ss:$16 sps:$4 sm:$0xff]  }
 0x751   : > { %15478 = vmatpush2.bf16.msra.mxu1 %v21038_v20  ;;  %15438 = vmatprep.subr.bf16.mxu0 %v21043_v22  ;;  %v21090_v20 = vld [vmem:[%s22890_s26 + $0x1ee0] ss:$16 sps:$4 sm:$0xff]   ;;  %v23767_v22 = vcombine.low %v23675_v16, %v23675_v16  ;;  %v23783_v16 = vcombine.high %v23761_v41, %v23761_v41 }
 0x752   : > { %15479 = vmatprep.subr.bf16.mxu1 %v21046_v49  ;;  %v23771_v49 = vcombine.low %v23677_v52, %v23677_v52 }
 0x754   : > { %15439 = vmatpush2.bf16.msra.mxu0 %v21041_v43  ;;  %v21095_v43 = vld [vmem:[%s22890_s26 + $0x1cc4] ss:$16 sps:$4 sm:$0xff]  }
 0x755   : > { %15480 = vmatpush2.bf16.msra.mxu1 %v21044_v48  ;;  %15440 = vmatprep.subr.bf16.mxu0 %v21049_v50  ;;  %v21098_v48 = vld [vmem:[%s22890_s26 + $0x1ec4] ss:$16 sps:$4 sm:$0xff]   ;;  %v21093_v50 = vld [vmem:[%s22890_s26 + $0x1cc0] ss:$16 sps:$4 sm:$0xff]  }
 0x756   : > { %15481 = vmatprep.subr.bf16.mxu1 %v21052_v54  ;;  %v21096_v54 = vld [vmem:[%s22890_s26 + $0x1ec0] ss:$16 sps:$4 sm:$0xff]  }
 0x758   : > { %15441 = vmatpush2.bf16.msra.mxu0 %v21047_v42  ;;  %v23779_v42 = vcombine.high %v23759_v5, %v23759_v5 }
 0x759   : > { %15482 = vmatpush2.bf16.msra.mxu1 %v21050_v56  ;;  %15442 = vmatprep.subr.bf16.mxu0 %v21055_v57 }
 0x75a   : > { %15483 = vmatprep.subr.bf16.mxu1 %v21058_v62 }
 0x75c   : > { %15443 = vmatpush2.bf16.msra.mxu0 %v21053_v47 }
 0x75d   : > { %15484 = vmatpush2.bf16.msra.mxu1 %v21056_v27  ;;  %15444 = vmatprep.subr.bf16.mxu0 %v21061_v63  ;;  %v21101_v27 = vld [vmem:[%s22890_s26 + $0x1ca4] ss:$16 sps:$4 sm:$0xff]  }
 0x75e   : > { %15485 = vmatprep.subr.bf16.mxu1 %v21064_v0  ;;  %v21104_v63 = vld [vmem:[%s22890_s26 + $0x1ea4] ss:$16 sps:$4 sm:$0xff]  }
 0x760   : > { %15445 = vmatpush2.bf16.msra.mxu0 %v21059_v6 }
 0x761   : > { %15486 = vmatpush2.bf16.msra.mxu1 %v21062_v7  ;;  %15446 = vmatprep.subr.bf16.mxu0 %v21067_v8  ;;  %v21099_v7 = vld [vmem:[%s22890_s26 + $0x1ca0] ss:$16 sps:$4 sm:$0xff]  }
 0x762   : > { %15487 = vmatprep.subr.bf16.mxu1 %v21070_v10  ;;  %v21102_v8 = vld [vmem:[%s22890_s26 + $0x1ea0] ss:$16 sps:$4 sm:$0xff]  }
 0x764   : > { %15447 = vmatpush2.bf16.msra.mxu0 %v21065_v11 }
 0x765   : > { %15488 = vmatpush2.bf16.msra.mxu1 %v21068_v12  ;;  %15448 = vmatprep.subr.bf16.mxu0 %v21073_v13 }
 0x766   : > { %15489 = vmatprep.subr.bf16.mxu1 %v21076_v14  ;;  %v21110_v14 = vld [vmem:[%s22890_s26 + $0x1e84] ss:$16 sps:$4 sm:$0xff]  }
 0x768   : > { %15449 = vmatpush2.bf16.msra.mxu0 %v21071_v17  ;;  %v21105_v17 = vld [vmem:[%s22890_s26 + $0x1c80] ss:$16 sps:$4 sm:$0xff]  }
 0x769   : > { %15490 = vmatpush2.bf16.msra.mxu1 %v21074_v18  ;;  %15450 = vmatprep.subr.bf16.mxu0 %v21079_v35  ;;  %v21108_v18 = vld [vmem:[%s22890_s26 + $0x1e80] ss:$16 sps:$4 sm:$0xff]   ;;  %v21113_v35 = vld [vmem:[%s22890_s26 + $0x1c64] ss:$16 sps:$4 sm:$0xff]  }
 0x76a   : > { %15491 = vmatprep.subr.bf16.mxu1 %v21082_v26  ;;  %v21116_v26 = vld [vmem:[%s22890_s26 + $0x1e64] ss:$16 sps:$4 sm:$0xff]  }
 0x76c   : > { %15451 = vmatpush2.bf16.msra.mxu0 %v21077_v34  ;;  %v21111_v34 = vld [vmem:[%s22890_s26 + $0x1c60] ss:$16 sps:$4 sm:$0xff]  }
 0x76d   : > { %15492 = vmatpush2.bf16.msra.mxu1 %v21080_v19  ;;  %15502 = vmatprep.subr.bf16.mxu0 %v21089_v36  ;;  %v21114_v19 = vld [vmem:[%s22890_s26 + $0x1e60] ss:$16 sps:$4 sm:$0xff]   ;;  %v21119_v36 = vld [vmem:[%s22890_s26 + $0x1c44] ss:$16 sps:$4 sm:$0xff]  }
 0x76e   : > { %15543 = vmatprep.subr.bf16.mxu1 %v21092_v37  ;;  %v21122_v37 = vld [vmem:[%s22890_s26 + $0x1e44] ss:$16 sps:$4 sm:$0xff]  }
 0x76f   : > { %v15208_v52 = vpop.f32.mrf.mxu0  ;;  %15453 = vmatmul.mubr.bf16.vlgmr.msra.gmra.mxu0 %v23767_v22 }
 0x770   : > { %v15249_v56 = vpop.f32.mrf.mxu1  ;;  %15494 = vmatmul.mubr.bf16.vlgmr.msra.gmra.mxu1 %v23771_v49  ;;  %v15209_v57 = vadd.f32 %v15208_v52, %v23696_v4  ;;  %15503 = vmatpush1.bf16.msra.mxu0 %v21087_v9  ;;  %v21117_v9 = vld [vmem:[%s22890_s26 + $0x1c40] ss:$16 sps:$4 sm:$0xff]   ;;  %v21131_v52 = vld [vmem:[%s22890_s26 + $0x1c04] ss:$16 sps:$4 sm:$0xff]  }
 0x771   : > { %15544 = vmatpush1.bf16.msra.mxu1 %v21090_v20  ;;  %v15210_v62 = vpop.f32.mrf.mxu0  ;;  %15504 = vmatprep.subr.bf16.mxu0 %v21095_v43  ;;  %v21120_v20 = vld [vmem:[%s22890_s26 + $0x1e40] ss:$16 sps:$4 sm:$0xff]   ;;  %v21125_v43 = vld [vmem:[%s22890_s26 + $0x1c24] ss:$16 sps:$4 sm:$0xff]  }
 0x772   : > { %v15251_v47 = vpop.f32.mrf.mxu1  ;;  %15545 = vmatprep.subr.bf16.mxu1 %v21098_v48  ;;  %v23790_v0 = vadd.f32 %v15249_v56, %v15209_v57  ;;  %v15211_v6 = vadd.f32 %v15210_v62, %v23703_v55  ;;  %15534 = vmatprep.mubr.bf16.mxu0 %v23779_v42  ;;  %v21107_v55 = vld [vmem:[%s22890_s26 + $0x1c84] ss:$16 sps:$4 sm:$0xff]   ;;  %v21129_v57 = vld [vmem:[%s22890_s26 + $0x1c00] ss:$16 sps:$4 sm:$0xff]  }
 0x773   : > { %15575 = vmatprep.mubr.bf16.mxu1 %v23783_v16  ;;  %v15212_v4 = vpop.f32.mrf.mxu0  ;;  %v21128_v48 = vld [vmem:[%s22890_s26 + $0x1e24] ss:$16 sps:$4 sm:$0xff]   ;;  %v21132_v62 = vld [vmem:[%s22890_s26 + $0x1e00] ss:$16 sps:$4 sm:$0xff]  }
 0x774   : > { %v15253_v10 = vpop.f32.mrf.mxu1  ;;  %v23797_v11 = vadd.f32 %v15251_v47, %v15211_v6  ;;  %15505 = vmatpush1.bf16.msra.mxu0 %v21093_v50  ;;  %v21123_v50 = vld [vmem:[%s22890_s26 + $0x1c20] ss:$16 sps:$4 sm:$0xff]   ;;  %v21134_v56 = vld [vmem:[%s22890_s26 + $0x1e04] ss:$16 sps:$4 sm:$0xff]  }
 0x775   : > { %15546 = vmatpush1.bf16.msra.mxu1 %v21096_v54  ;;  %v15213_v12 = vpop.f32.mrf.mxu0  ;;  %15506 = vmatprep.subr.bf16.mxu0 %v21101_v27  ;;  %v21126_v54 = vld [vmem:[%s22890_s26 + $0x1e20] ss:$16 sps:$4 sm:$0xff]   ;;  %v21137_v47 = vld [vmem:[%s22890_s26 + $0x1de4] ss:$16 sps:$4 sm:$0xff]  }
 0x776   : > { %v15254_v13 = vpop.f32.mrf.mxu1  ;;  %15547 = vmatprep.subr.bf16.mxu1 %v21104_v63  ;;  %v21140_v27 = vld [vmem:[%s22890_s26 + $0x1fe4] ss:$16 sps:$4 sm:$0xff]   ;;  %v21135_v63 = vld [vmem:[%s22890_s26 + $0x1de0] ss:$16 sps:$4 sm:$0xff]  }
 0x777   : > { %v21138_v6 = vld [vmem:[%s22890_s26 + $0x1fe0] ss:$16 sps:$4 sm:$0xff]   ;;  %v21149_v12 = vld [vmem:[%s22890_s26 + $0x1da4] ss:$16 sps:$4 sm:$0xff]  }
 0x778   : > { %15507 = vmatpush1.bf16.msra.mxu0 %v21099_v7  ;;  %v21143_v7 = vld [vmem:[%s22890_s26 + $0x1dc4] ss:$16 sps:$4 sm:$0xff]   ;;  %v21141_v4 = vld [vmem:[%s22890_s26 + $0x1dc0] ss:$16 sps:$4 sm:$0xff]  }
 0x779   : > { %15548 = vmatpush1.bf16.msra.mxu1 %v21102_v8  ;;  %15508 = vmatprep.subr.bf16.mxu0 %v21107_v55  ;;  %v21146_v8 = vld [vmem:[%s22890_s26 + $0x1fc4] ss:$16 sps:$4 sm:$0xff]   ;;  %v21144_v10 = vld [vmem:[%s22890_s26 + $0x1fc0] ss:$16 sps:$4 sm:$0xff]  }
 0x77a   : > { %15549 = vmatprep.subr.bf16.mxu1 %v21110_v14  ;;  %v21152_v13 = vld [vmem:[%s22890_s26 + $0x1fa4] ss:$16 sps:$4 sm:$0xff]   ;;  %v21147_v55 = vld [vmem:[%s22890_s26 + $0x1da0] ss:$16 sps:$4 sm:$0xff]  }
 0x77b   : > { %v21150_v14 = vld [vmem:[%s22890_s26 + $0x1fa0] ss:$16 sps:$4 sm:$0xff]  }
 0x77c   : > { %15509 = vmatpush1.bf16.msra.mxu0 %v21105_v17  ;;  %v21155_v17 = vld [vmem:[%s22890_s26 + $0x1d84] ss:$16 sps:$4 sm:$0xff]  }
 0x77d   : > { %15550 = vmatpush1.bf16.msra.mxu1 %v21108_v18  ;;  %15510 = vmatprep.subr.bf16.mxu0 %v21113_v35  ;;  %v21158_v18 = vld [vmem:[%s22890_s26 + $0x1f84] ss:$16 sps:$4 sm:$0xff]   ;;  %v21153_v35 = vld [vmem:[%s22890_s26 + $0x1d80] ss:$16 sps:$4 sm:$0xff]  }
 0x77e   : > { %15551 = vmatprep.subr.bf16.mxu1 %v21116_v26  ;;  %v21156_v26 = vld [vmem:[%s22890_s26 + $0x1f80] ss:$16 sps:$4 sm:$0xff]  }
 0x780   : > { %15511 = vmatpush1.bf16.msra.mxu0 %v21111_v34  ;;  %v21161_v34 = vld [vmem:[%s22890_s26 + $0x1d64] ss:$16 sps:$4 sm:$0xff]  }
 0x781   : > { %15552 = vmatpush1.bf16.msra.mxu1 %v21114_v19  ;;  %15512 = vmatprep.subr.bf16.mxu0 %v21119_v36  ;;  %v21164_v19 = vld [vmem:[%s22890_s26 + $0x1f64] ss:$16 sps:$4 sm:$0xff]   ;;  %v21159_v36 = vld [vmem:[%s22890_s26 + $0x1d60] ss:$16 sps:$4 sm:$0xff]  }
 0x782   : > { %15553 = vmatprep.subr.bf16.mxu1 %v21122_v37  ;;  %v21162_v37 = vld [vmem:[%s22890_s26 + $0x1f60] ss:$16 sps:$4 sm:$0xff]  }
 0x784   : > { %15513 = vmatpush1.bf16.msra.mxu0 %v21117_v9  ;;  %v21167_v9 = vld [vmem:[%s22890_s26 + $0x1d44] ss:$16 sps:$4 sm:$0xff]  }
 0x785   : > { %15554 = vmatpush1.bf16.msra.mxu1 %v21120_v20  ;;  %15514 = vmatprep.subr.bf16.mxu0 %v21125_v43  ;;  %v21170_v20 = vld [vmem:[%s22890_s26 + $0x1f44] ss:$16 sps:$4 sm:$0xff]   ;;  %v21165_v43 = vld [vmem:[%s22890_s26 + $0x1d40] ss:$16 sps:$4 sm:$0xff]  }
 0x786   : > { %15555 = vmatprep.subr.bf16.mxu1 %v21128_v48  ;;  %v21168_v48 = vld [vmem:[%s22890_s26 + $0x1f40] ss:$16 sps:$4 sm:$0xff]  }
 0x788   : > { %15515 = vmatpush1.bf16.msra.mxu0 %v21123_v50  ;;  %v21173_v50 = vld [vmem:[%s22890_s26 + $0x1d24] ss:$16 sps:$4 sm:$0xff]  }
 0x789   : > { %15556 = vmatpush1.bf16.msra.mxu1 %v21126_v54  ;;  %15516 = vmatprep.subr.bf16.mxu0 %v21131_v52  ;;  %v21176_v54 = vld [vmem:[%s22890_s26 + $0x1f24] ss:$16 sps:$4 sm:$0xff]   ;;  %v21171_v52 = vld [vmem:[%s22890_s26 + $0x1d20] ss:$16 sps:$4 sm:$0xff]  }
 0x78a   : > { %15557 = vmatprep.subr.bf16.mxu1 %v21134_v56  ;;  %v21174_v56 = vld [vmem:[%s22890_s26 + $0x1f20] ss:$16 sps:$4 sm:$0xff]  }
 0x78c   : > { %15517 = vmatpush1.bf16.msra.mxu0 %v21129_v57  ;;  %v21179_v57 = vld [vmem:[%s22890_s26 + $0x1d04] ss:$16 sps:$4 sm:$0xff]  }
 0x78d   : > { %15558 = vmatpush1.bf16.msra.mxu1 %v21132_v62  ;;  %15518 = vmatprep.subr.bf16.mxu0 %v21137_v47  ;;  %v21182_v62 = vld [vmem:[%s22890_s26 + $0x1f04] ss:$16 sps:$4 sm:$0xff]   ;;  %v21177_v47 = vld [vmem:[%s22890_s26 + $0x1d00] ss:$16 sps:$4 sm:$0xff]  }
 0x78e   : > { %15559 = vmatprep.subr.bf16.mxu1 %v21140_v27  ;;  %v21180_v27 = vld [vmem:[%s22890_s26 + $0x1f00] ss:$16 sps:$4 sm:$0xff]  }
 0x790   : > { %15519 = vmatpush2.bf16.msra.mxu0 %v21135_v63  ;;  %v21189_v63 = vld [vmem:[%s22890_s26 + $0xec] ss:$16 sps:$4 sm:$0xff]  }
 0x791   : > { %15560 = vmatpush2.bf16.msra.mxu1 %v21138_v6  ;;  %15520 = vmatprep.subr.bf16.mxu0 %v21143_v7  ;;  %v21192_v6 = vld [vmem:[%s22890_s26 + $0x2ec] ss:$16 sps:$4 sm:$0xff]   ;;  %v21187_v7 = vld [vmem:[%s22890_s26 + $0xe8] ss:$16 sps:$4 sm:$0xff]  }
 0x792   : > { %15561 = vmatprep.subr.bf16.mxu1 %v21146_v8  ;;  %v21190_v8 = vld [vmem:[%s22890_s26 + $0x2e8] ss:$16 sps:$4 sm:$0xff]  }
 0x794   : > { %15521 = vmatpush2.bf16.msra.mxu0 %v21141_v4  ;;  %v23857_v4 = vcombine.low %v23759_v5, %v23759_v5 }
 0x795   : > { %15562 = vmatpush2.bf16.msra.mxu1 %v21144_v10  ;;  %15522 = vmatprep.subr.bf16.mxu0 %v21149_v12  ;;  %v23861_v10 = vcombine.low %v23761_v41, %v23761_v41  ;;  %v21195_v12 = vld [vmem:[%s22890_s26 + $0xcc] ss:$16 sps:$4 sm:$0xff]  }
 0x796   : > { %15563 = vmatprep.subr.bf16.mxu1 %v21152_v13  ;;  %v21198_v13 = vld [vmem:[%s22890_s26 + $0x2cc] ss:$16 sps:$4 sm:$0xff]  }
 0x798   : > { %15523 = vmatpush2.bf16.msra.mxu0 %v21147_v55  ;;  %v21193_v55 = vld [vmem:[%s22890_s26 + $0xc8] ss:$16 sps:$4 sm:$0xff]  }
 0x799   : > { %15564 = vmatpush2.bf16.msra.mxu1 %v21150_v14  ;;  %15524 = vmatprep.subr.bf16.mxu0 %v21155_v17  ;;  %v21196_v14 = vld [vmem:[%s22890_s26 + $0x2c8] ss:$16 sps:$4 sm:$0xff]  }
 0x79a   : > { %15565 = vmatprep.subr.bf16.mxu1 %v21158_v18 }
 0x79c   : > { %15525 = vmatpush2.bf16.msra.mxu0 %v21153_v35 }
 0x79d   : > { %15566 = vmatpush2.bf16.msra.mxu1 %v21156_v26  ;;  %15526 = vmatprep.subr.bf16.mxu0 %v21161_v34  ;;  %v21201_v26 = vld [vmem:[%s22890_s26 + $0xac] ss:$16 sps:$4 sm:$0xff]  }
 0x79e   : > { %15567 = vmatprep.subr.bf16.mxu1 %v21164_v19  ;;  %v21204_v34 = vld [vmem:[%s22890_s26 + $0x2ac] ss:$16 sps:$4 sm:$0xff]  }
 0x7a0   : > { %15527 = vmatpush2.bf16.msra.mxu0 %v21159_v36 }
 0x7a1   : > { %15568 = vmatpush2.bf16.msra.mxu1 %v21162_v37  ;;  %15528 = vmatprep.subr.bf16.mxu0 %v21167_v9  ;;  %v21199_v37 = vld [vmem:[%s22890_s26 + $0xa8] ss:$16 sps:$4 sm:$0xff]  }
 0x7a2   : > { %15569 = vmatprep.subr.bf16.mxu1 %v21170_v20  ;;  %v21202_v9 = vld [vmem:[%s22890_s26 + $0x2a8] ss:$16 sps:$4 sm:$0xff]  }
 0x7a4   : > { %15529 = vmatpush2.bf16.msra.mxu0 %v21165_v43 }
 0x7a5   : > { %15570 = vmatpush2.bf16.msra.mxu1 %v21168_v48  ;;  %15530 = vmatprep.subr.bf16.mxu0 %v21173_v50 }
 0x7a6   : > { %15571 = vmatprep.subr.bf16.mxu1 %v21176_v54  ;;  %v21208_v54 = vld [vmem:[%s22890_s26 + $0x288] ss:$16 sps:$4 sm:$0xff]  }
 0x7a8   : > { %15531 = vmatpush2.bf16.msra.mxu0 %v21171_v52  ;;  %v21213_v52 = vld [vmem:[%s22890_s26 + $0x6c] ss:$16 sps:$4 sm:$0xff]  }
 0x7a9   : > { %15572 = vmatpush2.bf16.msra.mxu1 %v21174_v56  ;;  %15532 = vmatprep.subr.bf16.mxu0 %v21179_v57  ;;  %v21216_v56 = vld [vmem:[%s22890_s26 + $0x26c] ss:$16 sps:$4 sm:$0xff]   ;;  %v21211_v57 = vld [vmem:[%s22890_s26 + $0x68] ss:$16 sps:$4 sm:$0xff]  }
 0x7aa   : > { %15573 = vmatprep.subr.bf16.mxu1 %v21182_v62  ;;  %v21214_v62 = vld [vmem:[%s22890_s26 + $0x268] ss:$16 sps:$4 sm:$0xff]  }
 0x7ac   : > { %15533 = vmatpush2.bf16.msra.mxu0 %v21177_v47  ;;  %v21219_v47 = vld [vmem:[%s22890_s26 + $0x4c] ss:$16 sps:$4 sm:$0xff]  }
 0x7ad   : > { %15574 = vmatpush2.bf16.msra.mxu1 %v21180_v27  ;;  %15584 = vmatprep.subr.bf16.mxu0 %v21189_v63  ;;  %v21222_v27 = vld [vmem:[%s22890_s26 + $0x24c] ss:$16 sps:$4 sm:$0xff]   ;;  %v21217_v63 = vld [vmem:[%s22890_s26 + $0x48] ss:$16 sps:$4 sm:$0xff]  }
 0x7ae   : > { %15625 = vmatprep.subr.bf16.mxu1 %v21192_v6  ;;  %v21220_v6 = vld [vmem:[%s22890_s26 + $0x248] ss:$16 sps:$4 sm:$0xff]  }
 0x7af   : > { %v15290_v17 = vpop.f32.mrf.mxu0  ;;  %15535 = vmatmul.mubr.bf16.vlgmr.msra.gmra.mxu0 %v23857_v4 }
 0x7b0   : > { %v15331_v18 = vpop.f32.mrf.mxu1  ;;  %15576 = vmatmul.mubr.bf16.vlgmr.msra.gmra.mxu1 %v23861_v10  ;;  %v15291_v5 = vadd.f32 %v15290_v17, %v23790_v0  ;;  %15585 = vmatpush1.bf16.msra.mxu0 %v21187_v7  ;;  %v21225_v7 = vld [vmem:[%s22890_s26 + $0x2c] ss:$16 sps:$4 sm:$0xff]   ;;  %v21229_v17 = vld [vmem:[%s22890_s26 + $0x8] ss:$16 sps:$4 sm:$0xff]  }
 0x7b1   : > { %15626 = vmatpush1.bf16.msra.mxu1 %v21190_v8  ;;  %v15292_v41 = vpop.f32.mrf.mxu0  ;;  %15586 = vmatprep.subr.bf16.mxu0 %v21195_v12  ;;  %v21228_v8 = vld [vmem:[%s22890_s26 + $0x22c] ss:$16 sps:$4 sm:$0xff]   ;;  %v21223_v12 = vld [vmem:[%s22890_s26 + $0x28] ss:$16 sps:$4 sm:$0xff]  }
 0x7b2   : > { %v15333_v35 = vpop.f32.mrf.mxu1  ;;  %15627 = vmatprep.subr.bf16.mxu1 %v21198_v13  ;;  %v23872_v19 = vadd.f32 %v15331_v18, %v15291_v5  ;;  %v15293_v36 = vadd.f32 %v15292_v41, %v23797_v11  ;;  %15616 = vmatprep.mubr.bf16.mxu0 %v23193_v21  ;;  %v21207_v11 = vld [vmem:[%s22890_s26 + $0x8c] ss:$16 sps:$4 sm:$0xff]   ;;  %v21226_v13 = vld [vmem:[%s22890_s26 + $0x228] ss:$16 sps:$4 sm:$0xff]  }
 0x7b3   : > { %15657 = vmatprep.mubr.bf16.mxu1 %v23197_v53  ;;  %v15294_v0 = vpop.f32.mrf.mxu0  ;;  %v21210_v21 = vld [vmem:[%s22890_s26 + $0x28c] ss:$16 sps:$4 sm:$0xff]   ;;  %v21205_v53 = vld [vmem:[%s22890_s26 + $0x88] ss:$16 sps:$4 sm:$0xff]  }
 0x7b4   : > { %v15335_v20 = vpop.f32.mrf.mxu1  ;;  %v23879_v43 = vadd.f32 %v15333_v35, %v15293_v36  ;;  %15587 = vmatpush1.bf16.msra.mxu0 %v21193_v55  ;;  %v21231_v55 = vld [vmem:[%s22890_s26 + $0xc] ss:$16 sps:$4 sm:$0xff]   ;;  %v21232_v18 = vld [vmem:[%s22890_s26 + $0x208] ss:$16 sps:$4 sm:$0xff]  }
 0x7b5   : > { %15628 = vmatpush1.bf16.msra.mxu1 %v21196_v14  ;;  %v15295_v48 = vpop.f32.mrf.mxu0  ;;  %15588 = vmatprep.subr.bf16.mxu0 %v21201_v26  ;;  %v21234_v14 = vld [vmem:[%s22890_s26 + $0x20c] ss:$16 sps:$4 sm:$0xff]   ;;  %v21235_v35 = vld [vmem:[%s22890_s26 + $0x1e8] ss:$16 sps:$4 sm:$0xff]  }
 0x7b6   : > { %v15336_v50 = vpop.f32.mrf.mxu1  ;;  %15629 = vmatprep.subr.bf16.mxu1 %v21204_v34  ;;  %v21237_v5 = vld [vmem:[%s22890_s26 + $0x1ec] ss:$16 sps:$4 sm:$0xff]   ;;  %v21238_v26 = vld [vmem:[%s22890_s26 + $0x3e8] ss:$16 sps:$4 sm:$0xff]  }
 0x7b7   : > { %v21240_v41 = vld [vmem:[%s22890_s26 + $0x3ec] ss:$16 sps:$4 sm:$0xff]   ;;  %v21247_v48 = vld [vmem:[%s22890_s26 + $0x1a8] ss:$16 sps:$4 sm:$0xff]  }
 0x7b8   : > { %15589 = vmatpush1.bf16.msra.mxu0 %v21199_v37  ;;  %v21243_v34 = vld [vmem:[%s22890_s26 + $0x1cc] ss:$16 sps:$4 sm:$0xff]   ;;  %v21241_v37 = vld [vmem:[%s22890_s26 + $0x1c8] ss:$16 sps:$4 sm:$0xff]  }
 0x7b9   : > { %15630 = vmatpush1.bf16.msra.mxu1 %v21202_v9  ;;  %15590 = vmatprep.subr.bf16.mxu0 %v21207_v11  ;;  %v21246_v36 = vld [vmem:[%s22890_s26 + $0x3cc] ss:$16 sps:$4 sm:$0xff]   ;;  %v21244_v9 = vld [vmem:[%s22890_s26 + $0x3c8] ss:$16 sps:$4 sm:$0xff]  }
 0x7ba   : > { %15631 = vmatprep.subr.bf16.mxu1 %v21210_v21  ;;  %v21249_v0 = vld [vmem:[%s22890_s26 + $0x1ac] ss:$16 sps:$4 sm:$0xff]   ;;  %v21250_v50 = vld [vmem:[%s22890_s26 + $0x3a8] ss:$16 sps:$4 sm:$0xff]  }
 0x7bb   : > { %v21252_v20 = vld [vmem:[%s22890_s26 + $0x3ac] ss:$16 sps:$4 sm:$0xff]  }
 0x7bc   : > { %15591 = vmatpush1.bf16.msra.mxu0 %v21205_v53  ;;  %v21255_v11 = vld [vmem:[%s22890_s26 + $0x18c] ss:$16 sps:$4 sm:$0xff]   ;;  %v21253_v53 = vld [vmem:[%s22890_s26 + $0x188] ss:$16 sps:$4 sm:$0xff]  }
 0x7bd   : > { %15632 = vmatpush1.bf16.msra.mxu1 %v21208_v54  ;;  %15592 = vmatprep.subr.bf16.mxu0 %v21213_v52  ;;  %v21258_v21 = vld [vmem:[%s22890_s26 + $0x38c] ss:$16 sps:$4 sm:$0xff]   ;;  %v21256_v54 = vld [vmem:[%s22890_s26 + $0x388] ss:$16 sps:$4 sm:$0xff]  }
 0x7be   : > { %15633 = vmatprep.subr.bf16.mxu1 %v21216_v56  ;;  %v21261_v52 = vld [vmem:[%s22890_s26 + $0x16c] ss:$16 sps:$4 sm:$0xff]  }
 0x7bf   : > { %v21264_v56 = vld [vmem:[%s22890_s26 + $0x36c] ss:$16 sps:$4 sm:$0xff]  }
 0x7c0   : > { %15593 = vmatpush1.bf16.msra.mxu0 %v21211_v57  ;;  %v21259_v57 = vld [vmem:[%s22890_s26 + $0x168] ss:$16 sps:$4 sm:$0xff]  }
 0x7c1   : > { %15634 = vmatpush1.bf16.msra.mxu1 %v21214_v62  ;;  %15594 = vmatprep.subr.bf16.mxu0 %v21219_v47  ;;  %v21262_v62 = vld [vmem:[%s22890_s26 + $0x368] ss:$16 sps:$4 sm:$0xff]   ;;  %v21267_v47 = vld [vmem:[%s22890_s26 + $0x14c] ss:$16 sps:$4 sm:$0xff]  }
 0x7c2   : > { %15635 = vmatprep.subr.bf16.mxu1 %v21222_v27  ;;  %v21270_v27 = vld [vmem:[%s22890_s26 + $0x34c] ss:$16 sps:$4 sm:$0xff]  }
 0x7c4   : > { %15595 = vmatpush1.bf16.msra.mxu0 %v21217_v63  ;;  %v21265_v63 = vld [vmem:[%s22890_s26 + $0x148] ss:$16 sps:$4 sm:$0xff]  }
 0x7c5   : > { %15636 = vmatpush1.bf16.msra.mxu1 %v21220_v6  ;;  %15596 = vmatprep.subr.bf16.mxu0 %v21225_v7  ;;  %v21268_v6 = vld [vmem:[%s22890_s26 + $0x348] ss:$16 sps:$4 sm:$0xff]   ;;  %v21273_v7 = vld [vmem:[%s22890_s26 + $0x12c] ss:$16 sps:$4 sm:$0xff]  }
 0x7c6   : > { %15637 = vmatprep.subr.bf16.mxu1 %v21228_v8  ;;  %v21276_v8 = vld [vmem:[%s22890_s26 + $0x32c] ss:$16 sps:$4 sm:$0xff]  }
 0x7c8   : > { %15597 = vmatpush1.bf16.msra.mxu0 %v21223_v12  ;;  %v21271_v12 = vld [vmem:[%s22890_s26 + $0x128] ss:$16 sps:$4 sm:$0xff]  }
 0x7c9   : > { %15638 = vmatpush1.bf16.msra.mxu1 %v21226_v13  ;;  %15598 = vmatprep.subr.bf16.mxu0 %v21231_v55  ;;  %v21274_v13 = vld [vmem:[%s22890_s26 + $0x328] ss:$16 sps:$4 sm:$0xff]   ;;  %v21279_v55 = vld [vmem:[%s22890_s26 + $0x10c] ss:$16 sps:$4 sm:$0xff]  }
 0x7ca   : > { %15639 = vmatprep.subr.bf16.mxu1 %v21234_v14  ;;  %v21282_v14 = vld [vmem:[%s22890_s26 + $0x30c] ss:$16 sps:$4 sm:$0xff]  }
 0x7cc   : > { %15599 = vmatpush1.bf16.msra.mxu0 %v21229_v17  ;;  %v21277_v17 = vld [vmem:[%s22890_s26 + $0x108] ss:$16 sps:$4 sm:$0xff]  }
 0x7cd   : > { %15640 = vmatpush1.bf16.msra.mxu1 %v21232_v18  ;;  %15600 = vmatprep.subr.bf16.mxu0 %v21237_v5  ;;  %v21280_v18 = vld [vmem:[%s22890_s26 + $0x308] ss:$16 sps:$4 sm:$0xff]   ;;  %v21285_v5 = vld [vmem:[%s22890_s26 + $0x4ec] ss:$16 sps:$4 sm:$0xff]  }
 0x7ce   : > { %15641 = vmatprep.subr.bf16.mxu1 %v21240_v41  ;;  %v21288_v41 = vld [vmem:[%s22890_s26 + $0x6ec] ss:$16 sps:$4 sm:$0xff]  }
 0x7d0   : > { %15601 = vmatpush2.bf16.msra.mxu0 %v21235_v35  ;;  %v21283_v35 = vld [vmem:[%s22890_s26 + $0x4e8] ss:$16 sps:$4 sm:$0xff]  }
 0x7d1   : > { %15642 = vmatpush2.bf16.msra.mxu1 %v21238_v26  ;;  %15602 = vmatprep.subr.bf16.mxu0 %v21243_v34  ;;  %v21286_v26 = vld [vmem:[%s22890_s26 + $0x6e8] ss:$16 sps:$4 sm:$0xff]   ;;  %v21291_v34 = vld [vmem:[%s22890_s26 + $0x4cc] ss:$16 sps:$4 sm:$0xff]  }
 0x7d2   : > { %15643 = vmatprep.subr.bf16.mxu1 %v21246_v36  ;;  %v21294_v36 = vld [vmem:[%s22890_s26 + $0x6cc] ss:$16 sps:$4 sm:$0xff]  }
 0x7d4   : > { %15603 = vmatpush2.bf16.msra.mxu0 %v21241_v37  ;;  %v21289_v37 = vld [vmem:[%s22890_s26 + $0x4c8] ss:$16 sps:$4 sm:$0xff]  }
 0x7d5   : > { %15644 = vmatpush2.bf16.msra.mxu1 %v21244_v9  ;;  %15604 = vmatprep.subr.bf16.mxu0 %v21249_v0  ;;  %v21292_v9 = vld [vmem:[%s22890_s26 + $0x6c8] ss:$16 sps:$4 sm:$0xff]  }
 0x7d6   : > { %15645 = vmatprep.subr.bf16.mxu1 %v21252_v20 }
 0x7d8   : > { %15605 = vmatpush2.bf16.msra.mxu0 %v21247_v48 }
 0x7d9   : > { %15646 = vmatpush2.bf16.msra.mxu1 %v21250_v50  ;;  %15606 = vmatprep.subr.bf16.mxu0 %v21255_v11 }
 0x7da   : > { %15647 = vmatprep.subr.bf16.mxu1 %v21258_v21  ;;  %v21297_v21 = vld [vmem:[%s22890_s26 + $0x4ac] ss:$16 sps:$4 sm:$0xff]  }
 0x7dc   : > { %15607 = vmatpush2.bf16.msra.mxu0 %v21253_v53  ;;  %v21300_v53 = vld [vmem:[%s22890_s26 + $0x6ac] ss:$16 sps:$4 sm:$0xff]  }
 0x7dd   : > { %15648 = vmatpush2.bf16.msra.mxu1 %v21256_v54  ;;  %15608 = vmatprep.subr.bf16.mxu0 %v21261_v52  ;;  %v21295_v52 = vld [vmem:[%s22890_s26 + $0x4a8] ss:$16 sps:$4 sm:$0xff]  }
 0x7de   : > { %15649 = vmatprep.subr.bf16.mxu1 %v21264_v56  ;;  %v21298_v56 = vld [vmem:[%s22890_s26 + $0x6a8] ss:$16 sps:$4 sm:$0xff]  }
 0x7e0   : > { %15609 = vmatpush2.bf16.msra.mxu0 %v21259_v57 }
 0x7e1   : > { %15650 = vmatpush2.bf16.msra.mxu1 %v21262_v62  ;;  %15610 = vmatprep.subr.bf16.mxu0 %v21267_v47 }
 0x7e2   : > { %15651 = vmatprep.subr.bf16.mxu1 %v21270_v27  ;;  %v21304_v27 = vld [vmem:[%s22890_s26 + $0x688] ss:$16 sps:$4 sm:$0xff]  }
 0x7e4   : > { %15611 = vmatpush2.bf16.msra.mxu0 %v21265_v63  ;;  %v21309_v63 = vld [vmem:[%s22890_s26 + $0x46c] ss:$16 sps:$4 sm:$0xff]  }
 0x7e5   : > { %15652 = vmatpush2.bf16.msra.mxu1 %v21268_v6  ;;  %15612 = vmatprep.subr.bf16.mxu0 %v21273_v7  ;;  %v21312_v6 = vld [vmem:[%s22890_s26 + $0x66c] ss:$16 sps:$4 sm:$0xff]   ;;  %v21307_v7 = vld [vmem:[%s22890_s26 + $0x468] ss:$16 sps:$4 sm:$0xff]  }
 0x7e6   : > { %15653 = vmatprep.subr.bf16.mxu1 %v21276_v8  ;;  %v21310_v8 = vld [vmem:[%s22890_s26 + $0x668] ss:$16 sps:$4 sm:$0xff]  }
 0x7e8   : > { %15613 = vmatpush2.bf16.msra.mxu0 %v21271_v12  ;;  %v21315_v12 = vld [vmem:[%s22890_s26 + $0x44c] ss:$16 sps:$4 sm:$0xff]  }
 0x7e9   : > { %15654 = vmatpush2.bf16.msra.mxu1 %v21274_v13  ;;  %15614 = vmatprep.subr.bf16.mxu0 %v21279_v55  ;;  %v21318_v13 = vld [vmem:[%s22890_s26 + $0x64c] ss:$16 sps:$4 sm:$0xff]   ;;  %v21313_v55 = vld [vmem:[%s22890_s26 + $0x448] ss:$16 sps:$4 sm:$0xff]  }
 0x7ea   : > { %15655 = vmatprep.subr.bf16.mxu1 %v21282_v14  ;;  %v21316_v14 = vld [vmem:[%s22890_s26 + $0x648] ss:$16 sps:$4 sm:$0xff]  }
 0x7ec   : > { %15615 = vmatpush2.bf16.msra.mxu0 %v21277_v17  ;;  %v21321_v17 = vld [vmem:[%s22890_s26 + $0x42c] ss:$16 sps:$4 sm:$0xff]  }
 0x7ed   : > { %15656 = vmatpush2.bf16.msra.mxu1 %v21280_v18  ;;  %15666 = vmatprep.subr.bf16.mxu0 %v21285_v5  ;;  %v21324_v18 = vld [vmem:[%s22890_s26 + $0x62c] ss:$16 sps:$4 sm:$0xff]   ;;  %v21319_v5 = vld [vmem:[%s22890_s26 + $0x428] ss:$16 sps:$4 sm:$0xff]  }
 0x7ee   : > { %15707 = vmatprep.subr.bf16.mxu1 %v21288_v41  ;;  %v21322_v41 = vld [vmem:[%s22890_s26 + $0x628] ss:$16 sps:$4 sm:$0xff]  }
 0x7ef   : > { %v15372_v0 = vpop.f32.mrf.mxu0  ;;  %15617 = vmatmul.mubr.bf16.vlgmr.msra.gmra.mxu0 %v23219_v45 }
 0x7f0   : > { %v15413_v20 = vpop.f32.mrf.mxu1  ;;  %15658 = vmatmul.mubr.bf16.vlgmr.msra.gmra.mxu1 %v23221_v46  ;;  %v15373_v48 = vadd.f32 %v15372_v0, %v23872_v19  ;;  %15667 = vmatpush1.bf16.msra.mxu0 %v21283_v35  ;;  %v21327_v35 = vld [vmem:[%s22890_s26 + $0x40c] ss:$16 sps:$4 sm:$0xff]   ;;  %v21331_v0 = vld [vmem:[%s22890_s26 + $0x5e8] ss:$16 sps:$4 sm:$0xff]  }
 0x7f1   : > { %15708 = vmatpush1.bf16.msra.mxu1 %v21286_v26  ;;  %v15374_v50 = vpop.f32.mrf.mxu0  ;;  %15668 = vmatprep.subr.bf16.mxu0 %v21291_v34  ;;  %v21330_v26 = vld [vmem:[%s22890_s26 + $0x60c] ss:$16 sps:$4 sm:$0xff]   ;;  %v21325_v34 = vld [vmem:[%s22890_s26 + $0x408] ss:$16 sps:$4 sm:$0xff]  }
 0x7f2   : > { %v15415_v11 = vpop.f32.mrf.mxu1  ;;  %15709 = vmatprep.subr.bf16.mxu1 %v21294_v36  ;;  %v23946_v54 = vadd.f32 %v15413_v20, %v15373_v48  ;;  %v15375_v45 = vadd.f32 %v15374_v50, %v23879_v43  ;;  %15698 = vmatprep.mubr.bf16.mxu0 %v23257_v51  ;;  %v21303_v51 = vld [vmem:[%s22890_s26 + $0x48c] ss:$16 sps:$4 sm:$0xff]   ;;  %v21328_v36 = vld [vmem:[%s22890_s26 + $0x608] ss:$16 sps:$4 sm:$0xff]  }
 0x7f3   : > { %15739 = vmatprep.mubr.bf16.mxu1 %v23261_v23  ;;  %v15376_v46 = vpop.f32.mrf.mxu0  ;;  %v21306_v43 = vld [vmem:[%s22890_s26 + $0x68c] ss:$16 sps:$4 sm:$0xff]   ;;  %v21301_v23 = vld [vmem:[%s22890_s26 + $0x488] ss:$16 sps:$4 sm:$0xff]  }
 0x7f4   : > { %v15417_v19 = vpop.f32.mrf.mxu1  ;;  %v23953_v57 = vadd.f32 %v15415_v11, %v15375_v45  ;;  %15669 = vmatpush1.bf16.msra.mxu0 %v21289_v37  ;;  %v21333_v37 = vld [vmem:[%s22890_s26 + $0x5ec] ss:$16 sps:$4 sm:$0xff]   ;;  %v21334_v20 = vld [vmem:[%s22890_s26 + $0x7e8] ss:$16 sps:$4 sm:$0xff]  }
 0x7f5   : > { %15710 = vmatpush1.bf16.msra.mxu1 %v21292_v9  ;;  %v15377_v62 = vpop.f32.mrf.mxu0  ;;  %15670 = vmatprep.subr.bf16.mxu0 %v21297_v21  ;;  %v21336_v9 = vld [vmem:[%s22890_s26 + $0x7ec] ss:$16 sps:$4 sm:$0xff]   ;;  %v21337_v11 = vld [vmem:[%s22890_s26 + $0x5c8] ss:$16 sps:$4 sm:$0xff]  }
 0x7f6   : > { %v15418_v47 = vpop.f32.mrf.mxu1  ;;  %15711 = vmatprep.subr.bf16.mxu1 %v21300_v53  ;;  %v21339_v48 = vld [vmem:[%s22890_s26 + $0x5cc] ss:$16 sps:$4 sm:$0xff]   ;;  %v21340_v21 = vld [vmem:[%s22890_s26 + $0x7c8] ss:$16 sps:$4 sm:$0xff]  }
 0x7f7   : > { %v21342_v50 = vld [vmem:[%s22890_s26 + $0x7cc] ss:$16 sps:$4 sm:$0xff]   ;;  %v21343_v46 = vld [vmem:[%s22890_s26 + $0x5a8] ss:$16 sps:$4 sm:$0xff]  }
 0x7f8   : > { %15671 = vmatpush1.bf16.msra.mxu0 %v21295_v52  ;;  %v21345_v53 = vld [vmem:[%s22890_s26 + $0x5ac] ss:$16 sps:$4 sm:$0xff]   ;;  %v21346_v19 = vld [vmem:[%s22890_s26 + $0x7a8] ss:$16 sps:$4 sm:$0xff]  }
 0x7f9   : > { %15712 = vmatpush1.bf16.msra.mxu1 %v21298_v56  ;;  %15672 = vmatprep.subr.bf16.mxu0 %v21303_v51  ;;  %v21348_v45 = vld [vmem:[%s22890_s26 + $0x7ac] ss:$16 sps:$4 sm:$0xff]   ;;  %v21349_v62 = vld [vmem:[%s22890_s26 + $0x588] ss:$16 sps:$4 sm:$0xff]  }
 0x7fa   : > { %15713 = vmatprep.subr.bf16.mxu1 %v21306_v43  ;;  %v21351_v52 = vld [vmem:[%s22890_s26 + $0x58c] ss:$16 sps:$4 sm:$0xff]   ;;  %v21352_v47 = vld [vmem:[%s22890_s26 + $0x788] ss:$16 sps:$4 sm:$0xff]  }
 0x7fb   : > { %v21354_v56 = vld [vmem:[%s22890_s26 + $0x78c] ss:$16 sps:$4 sm:$0xff]  }
 0x7fc   : > { %15673 = vmatpush1.bf16.msra.mxu0 %v21301_v23  ;;  %v21357_v51 = vld [vmem:[%s22890_s26 + $0x56c] ss:$16 sps:$4 sm:$0xff]   ;;  %v21355_v23 = vld [vmem:[%s22890_s26 + $0x568] ss:$16 sps:$4 sm:$0xff]  }
 0x7fd   : > { %15714 = vmatpush1.bf16.msra.mxu1 %v21304_v27  ;;  %15674 = vmatprep.subr.bf16.mxu0 %v21309_v63  ;;  %v21360_v43 = vld [vmem:[%s22890_s26 + $0x76c] ss:$16 sps:$4 sm:$0xff]   ;;  %v21358_v27 = vld [vmem:[%s22890_s26 + $0x768] ss:$16 sps:$4 sm:$0xff]  }
 0x7fe   : > { %15715 = vmatprep.subr.bf16.mxu1 %v21312_v6  ;;  %v21363_v63 = vld [vmem:[%s22890_s26 + $0x54c] ss:$16 sps:$4 sm:$0xff]  }
 0x7ff   : > { %v21366_v6 = vld [vmem:[%s22890_s26 + $0x74c] ss:$16 sps:$4 sm:$0xff]  }
 0x800   : > { %15675 = vmatpush1.bf16.msra.mxu0 %v21307_v7  ;;  %v21361_v7 = vld [vmem:[%s22890_s26 + $0x548] ss:$16 sps:$4 sm:$0xff]  }
 0x801   : > { %15716 = vmatpush1.bf16.msra.mxu1 %v21310_v8  ;;  %15676 = vmatprep.subr.bf16.mxu0 %v21315_v12  ;;  %v21364_v8 = vld [vmem:[%s22890_s26 + $0x748] ss:$16 sps:$4 sm:$0xff]   ;;  %v21369_v12 = vld [vmem:[%s22890_s26 + $0x52c] ss:$16 sps:$4 sm:$0xff]  }
 0x802   : > { %15717 = vmatprep.subr.bf16.mxu1 %v21318_v13  ;;  %v21372_v13 = vld [vmem:[%s22890_s26 + $0x72c] ss:$16 sps:$4 sm:$0xff]  }
 0x804   : > { %15677 = vmatpush1.bf16.msra.mxu0 %v21313_v55  ;;  %v21367_v55 = vld [vmem:[%s22890_s26 + $0x528] ss:$16 sps:$4 sm:$0xff]  }
 0x805   : > { %15718 = vmatpush1.bf16.msra.mxu1 %v21316_v14  ;;  %15678 = vmatprep.subr.bf16.mxu0 %v21321_v17  ;;  %v21370_v14 = vld [vmem:[%s22890_s26 + $0x728] ss:$16 sps:$4 sm:$0xff]   ;;  %v21375_v17 = vld [vmem:[%s22890_s26 + $0x50c] ss:$16 sps:$4 sm:$0xff]  }
 0x806   : > { %15719 = vmatprep.subr.bf16.mxu1 %v21324_v18  ;;  %v21378_v18 = vld [vmem:[%s22890_s26 + $0x70c] ss:$16 sps:$4 sm:$0xff]  }
 0x808   : > { %15679 = vmatpush1.bf16.msra.mxu0 %v21319_v5  ;;  %v21373_v5 = vld [vmem:[%s22890_s26 + $0x508] ss:$16 sps:$4 sm:$0xff]  }
 0x809   : > { %15720 = vmatpush1.bf16.msra.mxu1 %v21322_v41  ;;  %15680 = vmatprep.subr.bf16.mxu0 %v21327_v35  ;;  %v21376_v41 = vld [vmem:[%s22890_s26 + $0x708] ss:$16 sps:$4 sm:$0xff]   ;;  %v21381_v35 = vld [vmem:[%s22890_s26 + $0x8ec] ss:$16 sps:$4 sm:$0xff]  }
 0x80a   : > { %15721 = vmatprep.subr.bf16.mxu1 %v21330_v26  ;;  %v21384_v26 = vld [vmem:[%s22890_s26 + $0xaec] ss:$16 sps:$4 sm:$0xff]  }
 0x80c   : > { %15681 = vmatpush1.bf16.msra.mxu0 %v21325_v34  ;;  %v21379_v34 = vld [vmem:[%s22890_s26 + $0x8e8] ss:$16 sps:$4 sm:$0xff]  }
 0x80d   : > { %15722 = vmatpush1.bf16.msra.mxu1 %v21328_v36  ;;  %15682 = vmatprep.subr.bf16.mxu0 %v21333_v37  ;;  %v21382_v36 = vld [vmem:[%s22890_s26 + $0xae8] ss:$16 sps:$4 sm:$0xff]   ;;  %v21387_v37 = vld [vmem:[%s22890_s26 + $0x8cc] ss:$16 sps:$4 sm:$0xff]  }
 0x80e   : > { %15723 = vmatprep.subr.bf16.mxu1 %v21336_v9  ;;  %v21390_v9 = vld [vmem:[%s22890_s26 + $0xacc] ss:$16 sps:$4 sm:$0xff]  }
 0x810   : > { %15683 = vmatpush2.bf16.msra.mxu0 %v21331_v0  ;;  %v21385_v0 = vld [vmem:[%s22890_s26 + $0x8c8] ss:$16 sps:$4 sm:$0xff]  }
 0x811   : > { %15724 = vmatpush2.bf16.msra.mxu1 %v21334_v20  ;;  %15684 = vmatprep.subr.bf16.mxu0 %v21339_v48  ;;  %v21388_v20 = vld [vmem:[%s22890_s26 + $0xac8] ss:$16 sps:$4 sm:$0xff]  }
 0x812   : > { %15725 = vmatprep.subr.bf16.mxu1 %v21342_v50 }
 0x814   : > { %15685 = vmatpush2.bf16.msra.mxu0 %v21337_v11 }
 0x815   : > { %15726 = vmatpush2.bf16.msra.mxu1 %v21340_v21  ;;  %15686 = vmatprep.subr.bf16.mxu0 %v21345_v53  ;;  %v21393_v53 = vld [vmem:[%s22890_s26 + $0x8ac] ss:$16 sps:$4 sm:$0xff]  }
 0x816   : > { %15727 = vmatprep.subr.bf16.mxu1 %v21348_v45  ;;  %v21396_v45 = vld [vmem:[%s22890_s26 + $0xaac] ss:$16 sps:$4 sm:$0xff]  }
 0x818   : > { %15687 = vmatpush2.bf16.msra.mxu0 %v21343_v46  ;;  %v21391_v46 = vld [vmem:[%s22890_s26 + $0x8a8] ss:$16 sps:$4 sm:$0xff]  }
 0x819   : > { %15728 = vmatpush2.bf16.msra.mxu1 %v21346_v19  ;;  %15688 = vmatprep.subr.bf16.mxu0 %v21351_v52  ;;  %v21394_v19 = vld [vmem:[%s22890_s26 + $0xaa8] ss:$16 sps:$4 sm:$0xff]  }
 0x81a   : > { %15729 = vmatprep.subr.bf16.mxu1 %v21354_v56 }
 0x81c   : > { %15689 = vmatpush2.bf16.msra.mxu0 %v21349_v62  ;;  %v21399_v62 = vld [vmem:[%s22890_s26 + $0x88c] ss:$16 sps:$4 sm:$0xff]  }
 0x81d   : > { %15730 = vmatpush2.bf16.msra.mxu1 %v21352_v47  ;;  %15690 = vmatprep.subr.bf16.mxu0 %v21357_v51  ;;  %v21402_v47 = vld [vmem:[%s22890_s26 + $0xa8c] ss:$16 sps:$4 sm:$0xff]  }
 0x81e   : > { %15731 = vmatprep.subr.bf16.mxu1 %v21360_v43  ;;  %v21405_v51 = vld [vmem:[%s22890_s26 + $0x86c] ss:$16 sps:$4 sm:$0xff]  }
 0x81f   : > { %v21408_v43 = vld [vmem:[%s22890_s26 + $0xa6c] ss:$16 sps:$4 sm:$0xff]  }
 0x820   : > { %15691 = vmatpush2.bf16.msra.mxu0 %v21355_v23  ;;  %v21403_v23 = vld [vmem:[%s22890_s26 + $0x868] ss:$16 sps:$4 sm:$0xff]  }
 0x821   : > { %15732 = vmatpush2.bf16.msra.mxu1 %v21358_v27  ;;  %15692 = vmatprep.subr.bf16.mxu0 %v21363_v63  ;;  %v21406_v27 = vld [vmem:[%s22890_s26 + $0xa68] ss:$16 sps:$4 sm:$0xff]   ;;  %v21411_v63 = vld [vmem:[%s22890_s26 + $0x84c] ss:$16 sps:$4 sm:$0xff]  }
 0x822   : > { %15733 = vmatprep.subr.bf16.mxu1 %v21366_v6  ;;  %v21414_v6 = vld [vmem:[%s22890_s26 + $0xa4c] ss:$16 sps:$4 sm:$0xff]  }
 0x824   : > { %15693 = vmatpush2.bf16.msra.mxu0 %v21361_v7  ;;  %v21409_v7 = vld [vmem:[%s22890_s26 + $0x848] ss:$16 sps:$4 sm:$0xff]  }
 0x825   : > { %15734 = vmatpush2.bf16.msra.mxu1 %v21364_v8  ;;  %15694 = vmatprep.subr.bf16.mxu0 %v21369_v12  ;;  %v21412_v8 = vld [vmem:[%s22890_s26 + $0xa48] ss:$16 sps:$4 sm:$0xff]   ;;  %v21417_v12 = vld [vmem:[%s22890_s26 + $0x82c] ss:$16 sps:$4 sm:$0xff]  }
 0x826   : > { %15735 = vmatprep.subr.bf16.mxu1 %v21372_v13  ;;  %v21420_v13 = vld [vmem:[%s22890_s26 + $0xa2c] ss:$16 sps:$4 sm:$0xff]  }
 0x828   : > { %15695 = vmatpush2.bf16.msra.mxu0 %v21367_v55  ;;  %v21415_v55 = vld [vmem:[%s22890_s26 + $0x828] ss:$16 sps:$4 sm:$0xff]  }
 0x829   : > { %15736 = vmatpush2.bf16.msra.mxu1 %v21370_v14  ;;  %15696 = vmatprep.subr.bf16.mxu0 %v21375_v17  ;;  %v21418_v14 = vld [vmem:[%s22890_s26 + $0xa28] ss:$16 sps:$4 sm:$0xff]   ;;  %v21423_v17 = vld [vmem:[%s22890_s26 + $0x80c] ss:$16 sps:$4 sm:$0xff]  }
 0x82a   : > { %15737 = vmatprep.subr.bf16.mxu1 %v21378_v18  ;;  %v21426_v18 = vld [vmem:[%s22890_s26 + $0xa0c] ss:$16 sps:$4 sm:$0xff]  }
 0x82c   : > { %15697 = vmatpush2.bf16.msra.mxu0 %v21373_v5  ;;  %v21421_v5 = vld [vmem:[%s22890_s26 + $0x808] ss:$16 sps:$4 sm:$0xff]  }
 0x82d   : > { %15738 = vmatpush2.bf16.msra.mxu1 %v21376_v41  ;;  %15748 = vmatprep.subr.bf16.mxu0 %v21381_v35  ;;  %v21424_v41 = vld [vmem:[%s22890_s26 + $0xa08] ss:$16 sps:$4 sm:$0xff]   ;;  %v21429_v35 = vld [vmem:[%s22890_s26 + $0x9ec] ss:$16 sps:$4 sm:$0xff]  }
 0x82e   : > { %15789 = vmatprep.subr.bf16.mxu1 %v21384_v26  ;;  %v21432_v26 = vld [vmem:[%s22890_s26 + $0xbec] ss:$16 sps:$4 sm:$0xff]  }
 0x82f   : > { %v24015_v48 = vpop.f32.mrf.mxu0  ;;  %15699 = vmatmul.mubr.bf16.vlgmr.msra.gmra.mxu0 %v23305_v60 }
 0x830   : > { %v24017_v50 = vpop.f32.mrf.mxu1  ;;  %15740 = vmatmul.mubr.bf16.vlgmr.msra.gmra.mxu1 %v23309_v61  ;;  %15749 = vmatpush1.bf16.msra.mxu0 %v21379_v34  ;;  %v21427_v34 = vld [vmem:[%s22890_s26 + $0x9e8] ss:$16 sps:$4 sm:$0xff]  }
 0x831   : > { %15790 = vmatpush1.bf16.msra.mxu1 %v21382_v36  ;;  %v24021_v11 = vpop.f32.mrf.mxu0  ;;  %15750 = vmatprep.subr.bf16.mxu0 %v21387_v37  ;;  %v21430_v36 = vld [vmem:[%s22890_s26 + $0xbe8] ss:$16 sps:$4 sm:$0xff]   ;;  %v21435_v37 = vld [vmem:[%s22890_s26 + $0x9cc] ss:$16 sps:$4 sm:$0xff]  }
 0x832   : > { %v24023_v21 = vpop.f32.mrf.mxu1  ;;  %15791 = vmatprep.subr.bf16.mxu1 %v21390_v9  ;;  %15780 = vmatprep.mubr.bf16.mxu0 %v23321_v2  ;;  %v21397_v2 = vld [vmem:[%s22890_s26 + $0x888] ss:$16 sps:$4 sm:$0xff]   ;;  %v21438_v9 = vld [vmem:[%s22890_s26 + $0xbcc] ss:$16 sps:$4 sm:$0xff]  }
 0x833   : > { %15821 = vmatprep.mubr.bf16.mxu1 %v23325_v3  ;;  %v15458_v60 = vpop.f32.mrf.mxu0  ;;  %v21400_v3 = vld [vmem:[%s22890_s26 + $0xa88] ss:$16 sps:$4 sm:$0xff]  }
 0x834   : > { %v15499_v61 = vpop.f32.mrf.mxu1  ;;  %15751 = vmatpush1.bf16.msra.mxu0 %v21385_v0  ;;  %v21433_v0 = vld [vmem:[%s22890_s26 + $0x9c8] ss:$16 sps:$4 sm:$0xff]  }
 0x835   : > { %15792 = vmatpush1.bf16.msra.mxu1 %v21388_v20  ;;  %v15459_v52 = vpop.f32.mrf.mxu0  ;;  %15752 = vmatprep.subr.bf16.mxu0 %v21393_v53  ;;  %v21436_v20 = vld [vmem:[%s22890_s26 + $0xbc8] ss:$16 sps:$4 sm:$0xff]   ;;  %v21441_v53 = vld [vmem:[%s22890_s26 + $0x9ac] ss:$16 sps:$4 sm:$0xff]  }
 0x836   : > { %v15500_v56 = vpop.f32.mrf.mxu1  ;;  %15793 = vmatprep.subr.bf16.mxu1 %v21396_v45  ;;  %v21444_v45 = vld [vmem:[%s22890_s26 + $0xbac] ss:$16 sps:$4 sm:$0xff]   ;;  %v21442_v60 = vld [vmem:[%s22890_s26 + $0xba8] ss:$16 sps:$4 sm:$0xff]  }
 0x837   : > { %v21447_v61 = vld [vmem:[%s22890_s26 + $0x98c] ss:$16 sps:$4 sm:$0xff]   ;;  %v21445_v52 = vld [vmem:[%s22890_s26 + $0x988] ss:$16 sps:$4 sm:$0xff]  }
 0x838   : > { %15753 = vmatpush1.bf16.msra.mxu0 %v21391_v46  ;;  %v21439_v46 = vld [vmem:[%s22890_s26 + $0x9a8] ss:$16 sps:$4 sm:$0xff]  }
 0x839   : > { %15794 = vmatpush1.bf16.msra.mxu1 %v21394_v19  ;;  %15754 = vmatprep.subr.bf16.mxu0 %v21399_v62  ;;  %v21450_v19 = vld [vmem:[%s22890_s26 + $0xb8c] ss:$16 sps:$4 sm:$0xff]   ;;  %v21448_v56 = vld [vmem:[%s22890_s26 + $0xb88] ss:$16 sps:$4 sm:$0xff]  }
 0x83a   : > { %15795 = vmatprep.subr.bf16.mxu1 %v21402_v47  ;;  %v21453_v62 = vld [vmem:[%s22890_s26 + $0x96c] ss:$16 sps:$4 sm:$0xff]  }
 0x83b   : > { %v21456_v47 = vld [vmem:[%s22890_s26 + $0xb6c] ss:$16 sps:$4 sm:$0xff]  }
 0x83c   : > { %15755 = vmatpush1.bf16.msra.mxu0 %v21397_v2  ;;  %v21451_v2 = vld [vmem:[%s22890_s26 + $0x968] ss:$16 sps:$4 sm:$0xff]  }
 0x83d   : > { %15796 = vmatpush1.bf16.msra.mxu1 %v21400_v3  ;;  %15756 = vmatprep.subr.bf16.mxu0 %v21405_v51  ;;  %v21454_v3 = vld [vmem:[%s22890_s26 + $0xb68] ss:$16 sps:$4 sm:$0xff]   ;;  %v21459_v51 = vld [vmem:[%s22890_s26 + $0x94c] ss:$16 sps:$4 sm:$0xff]  }
 0x83e   : > { %15797 = vmatprep.subr.bf16.mxu1 %v21408_v43  ;;  %v21462_v43 = vld [vmem:[%s22890_s26 + $0xb4c] ss:$16 sps:$4 sm:$0xff]  }
 0x840   : > { %15757 = vmatpush1.bf16.msra.mxu0 %v21403_v23  ;;  %v21457_v23 = vld [vmem:[%s22890_s26 + $0x948] ss:$16 sps:$4 sm:$0xff]  }
 0x841   : > { %15798 = vmatpush1.bf16.msra.mxu1 %v21406_v27  ;;  %15758 = vmatprep.subr.bf16.mxu0 %v21411_v63  ;;  %v21460_v27 = vld [vmem:[%s22890_s26 + $0xb48] ss:$16 sps:$4 sm:$0xff]   ;;  %v21465_v63 = vld [vmem:[%s22890_s26 + $0x92c] ss:$16 sps:$4 sm:$0xff]  }
 0x842   : > { %15799 = vmatprep.subr.bf16.mxu1 %v21414_v6  ;;  %v21468_v6 = vld [vmem:[%s22890_s26 + $0xb2c] ss:$16 sps:$4 sm:$0xff]  }
 0x844   : > { %15759 = vmatpush1.bf16.msra.mxu0 %v21409_v7  ;;  %v21463_v7 = vld [vmem:[%s22890_s26 + $0x928] ss:$16 sps:$4 sm:$0xff]  }
 0x845   : > { %15800 = vmatpush1.bf16.msra.mxu1 %v21412_v8  ;;  %15760 = vmatprep.subr.bf16.mxu0 %v21417_v12  ;;  %v21466_v8 = vld [vmem:[%s22890_s26 + $0xb28] ss:$16 sps:$4 sm:$0xff]   ;;  %v16242_v12 = vlaneseq }
 0x846   : > { %15801 = vmatprep.subr.bf16.mxu1 %v21420_v13  ;;  %v21471_v13 = vld [vmem:[%s22890_s26 + $0x90c] ss:$16 sps:$4 sm:$0xff]  }
 0x848   : > { %15761 = vmatpush1.bf16.msra.mxu0 %v21415_v55  ;;  %v21474_v55 = vld [vmem:[%s22890_s26 + $0xb0c] ss:$16 sps:$4 sm:$0xff]  }
 0x849   : > { %15802 = vmatpush1.bf16.msra.mxu1 %v21418_v14  ;;  %15762 = vmatprep.subr.bf16.mxu0 %v21423_v17  ;;  %v21469_v14 = vld [vmem:[%s22890_s26 + $0x908] ss:$16 sps:$4 sm:$0xff]  }
 0x84a   : > { %15803 = vmatprep.subr.bf16.mxu1 %v21426_v18  ;;  %v21472_v17 = vld [vmem:[%s22890_s26 + $0xb08] ss:$16 sps:$4 sm:$0xff]   ;;  %v24083_v18 = vshrl.u32 %v16242_v12, 7 }
 0x84c   : > { %15763 = vmatpush1.bf16.msra.mxu0 %v21421_v5  ;;  %v21477_v5 = vld [vmem:[%s22890_s26 + $0xcec] ss:$16 sps:$4 sm:$0xff]  }
 0x84d   : > { %15804 = vmatpush1.bf16.msra.mxu1 %v21424_v41  ;;  %15764 = vmatprep.subr.bf16.mxu0 %v21429_v35  ;;  %v21480_v41 = vld [vmem:[%s22890_s26 + $0xeec] ss:$16 sps:$4 sm:$0xff]   ;;  %v15455_v35 = vadd.f32 %v24015_v48, %v23946_v54  ;;  %v24102_v48 = vsub.s32 1, %v24083_v18 }
 0x84e   : > { %15805 = vmatprep.subr.bf16.mxu1 %v21432_v26  ;;  %v21475_v26 = vld [vmem:[%s22890_s26 + $0xce8] ss:$16 sps:$4 sm:$0xff]  }
 0x84f   : > { %v20010_v54 = vld [vmem:[%s22896_s16 + $0x1] ss:$2 sm:$0xf] }
 0x850   : > { %15765 = vmatpush2.bf16.msra.mxu0 %v21427_v34  ;;  %v15457_v34 = vadd.f32 %v24021_v11, %v23953_v57 }
 0x851   : > { %15806 = vmatpush2.bf16.msra.mxu1 %v21430_v36  ;;  %15766 = vmatprep.subr.bf16.mxu0 %v21435_v37  ;;  %v16240_v36 = vld [vmem:[%s22896_s16] ss:$2 sm:$0xf]  ;;  %v24094_v37 = vsub.s32 0, %v24083_v18 }
 0x852   : > { %15807 = vmatprep.subr.bf16.mxu1 %v21438_v9  ;;  %v21478_v9 = vld [vmem:[%s22890_s26 + $0xee8] ss:$16 sps:$4 sm:$0xff]  }
 0x854   : > { %15767 = vmatpush2.bf16.msra.mxu0 %v21433_v0  ;;  %v21483_v0 = vld [vmem:[%s22890_s26 + $0xccc] ss:$16 sps:$4 sm:$0xff]  }
 0x855   : > { %15808 = vmatpush2.bf16.msra.mxu1 %v21436_v20  ;;  %15768 = vmatprep.subr.bf16.mxu0 %v21441_v53  ;;  %v21486_v20 = vld [vmem:[%s22890_s26 + $0xecc] ss:$16 sps:$4 sm:$0xff]   ;;  %v15496_v53 = vadd.f32 %v24017_v50, %v15455_v35  ;;  %v21481_v50 = vld [vmem:[%s22890_s26 + $0xcc8] ss:$16 sps:$4 sm:$0xff]  }
 0x856   : > { %15809 = vmatprep.subr.bf16.mxu1 %v21444_v45  ;;  %v15498_v45 = vadd.f32 %v24023_v21, %v15457_v34  ;;  %v16249_v21 = vrot.slane %v16240_v36, %v24102_v48  ;;  %v21502_v34 = vld [vmem:[%s22890_s26 + $0xe68] ss:$16 sps:$4 sm:$0xff]  }
 0x858   : > { %15769 = vmatpush2.bf16.msra.mxu0 %v21439_v46 }
 0x859   : > { %15810 = vmatpush2.bf16.msra.mxu1 %v21442_v60  ;;  %15770 = vmatprep.subr.bf16.mxu0 %v21447_v61  ;;  %v16245_v60 = vrot.slane %v16240_v36, %v24094_v37  ;;  %v21484_v61 = vld [vmem:[%s22890_s26 + $0xec8] ss:$16 sps:$4 sm:$0xff]   ;;  %v21507_v36 = vld [vmem:[%s22890_s26 + $0xc4c] ss:$16 sps:$4 sm:$0xff]  }
 0x85a   : > { %15811 = vmatprep.subr.bf16.mxu1 %v21450_v19  ;;  %v16272_v19 = vrot.slane %v20010_v54, %v24094_v37 }
 0x85c   : > { %15771 = vmatpush2.bf16.msra.mxu0 %v21445_v52 }
 0x85d   : > { %15812 = vmatpush2.bf16.msra.mxu1 %v21448_v56  ;;  %15772 = vmatprep.subr.bf16.mxu0 %v21453_v62  ;;  %v21492_v62 = vld [vmem:[%s22890_s26 + $0xeac] ss:$16 sps:$4 sm:$0xff]  }
 0x85e   : > { %15813 = vmatprep.subr.bf16.mxu1 %v21456_v47 }
 0x860   : > { %15773 = vmatpush2.bf16.msra.mxu0 %v21451_v2 }
 0x861   : > { %15814 = vmatpush2.bf16.msra.mxu1 %v21454_v3  ;;  %15774 = vmatprep.subr.bf16.mxu0 %v21459_v51 }
 0x862   : > { %15815 = vmatprep.subr.bf16.mxu1 %v21462_v43 }
 0x864   : > { %15775 = vmatpush2.bf16.msra.mxu0 %v21457_v23  ;;  %v16276_v23 = vrot.slane %v20010_v54, %v24102_v48  ;;  %v21516_v54 = vld [vmem:[%s22890_s26 + $0xe2c] ss:$16 sps:$4 sm:$0xff]  }
 0x865   : > { %15816 = vmatpush2.bf16.msra.mxu1 %v21460_v27  ;;  %15776 = vmatprep.subr.bf16.mxu0 %v21465_v63  ;;  %v21487_v27 = vld [vmem:[%s22890_s26 + $0xca8] ss:$16 sps:$4 sm:$0xff]  }
 0x866   : > { %15817 = vmatprep.subr.bf16.mxu1 %v21468_v6  ;;  %v21490_v63 = vld [vmem:[%s22890_s26 + $0xea8] ss:$16 sps:$4 sm:$0xff]  }
 0x868   : > { %15777 = vmatpush2.bf16.msra.mxu0 %v21463_v7 }
 0x869   : > { %15818 = vmatpush2.bf16.msra.mxu1 %v21466_v8  ;;  %15778 = vmatprep.subr.bf16.mxu0 %v21471_v13 }
 0x86a   : > { %15819 = vmatprep.subr.bf16.mxu1 %v21474_v55 }
 0x86c   : > { %15779 = vmatpush2.bf16.msra.mxu0 %v21469_v14  ;;  %v21493_v14 = vld [vmem:[%s22890_s26 + $0xc88] ss:$16 sps:$4 sm:$0xff]  }
 0x86d   : > { %15820 = vmatpush2.bf16.msra.mxu1 %v21472_v17  ;;  %15830 = vmatprep.subr.bf16.mxu0 %v21477_v5  ;;  %v21496_v17 = vld [vmem:[%s22890_s26 + $0xe88] ss:$16 sps:$4 sm:$0xff]   ;;  %v21501_v5 = vld [vmem:[%s22890_s26 + $0xc6c] ss:$16 sps:$4 sm:$0xff]  }
 0x86e   : > { %15871 = vmatprep.subr.bf16.mxu1 %v21480_v41  ;;  %v21504_v41 = vld [vmem:[%s22890_s26 + $0xe6c] ss:$16 sps:$4 sm:$0xff]  }
 0x86f   : > { %v15536_v57 = vpop.f32.mrf.mxu0  ;;  %15781 = vmatmul.mubr.bf16.vlgmr.msra.gmra.mxu0 %v23395_v24  ;;  %v21489_v24 = vld [vmem:[%s22890_s26 + $0xcac] ss:$16 sps:$4 sm:$0xff]  }
 0x870   : > { %v15577_v11 = vpop.f32.mrf.mxu1  ;;  %15822 = vmatmul.mubr.bf16.vlgmr.msra.gmra.mxu1 %v23399_v58  ;;  %v15537_v46 = vadd.f32 %v15536_v57, %v15496_v53  ;;  %15831 = vmatpush1.bf16.msra.mxu0 %v21475_v26  ;;  %v21499_v26 = vld [vmem:[%s22890_s26 + $0xc68] ss:$16 sps:$4 sm:$0xff]   ;;  %v21513_v53 = vld [vmem:[%s22890_s26 + $0xc2c] ss:$16 sps:$4 sm:$0xff]  }
 0x871   : > { %15872 = vmatpush1.bf16.msra.mxu1 %v21478_v9  ;;  %v15538_v52 = vpop.f32.mrf.mxu0  ;;  %15832 = vmatprep.subr.bf16.mxu0 %v21483_v0  ;;  %v21510_v9 = vld [vmem:[%s22890_s26 + $0xe4c] ss:$16 sps:$4 sm:$0xff]   ;;  %v21505_v0 = vld [vmem:[%s22890_s26 + $0xc48] ss:$16 sps:$4 sm:$0xff]  }
 0x872   : > { %v15579_v56 = vpop.f32.mrf.mxu1  ;;  %15873 = vmatprep.subr.bf16.mxu1 %v21486_v20  ;;  %v15578_v58 = vadd.f32 %v15577_v11, %v15537_v46  ;;  %v15539_v47 = vadd.f32 %v15538_v52, %v15498_v45  ;;  %15862 = vmatprep.mubr.bf16.mxu0 %v23409_v1  ;;  %v21495_v1 = vld [vmem:[%s22890_s26 + $0xc8c] ss:$16 sps:$4 sm:$0xff]   ;;  %v21508_v20 = vld [vmem:[%s22890_s26 + $0xe48] ss:$16 sps:$4 sm:$0xff]  }
 0x873   : > { %15903 = vmatprep.mubr.bf16.mxu1 %v23413_v31  ;;  %v15540_v2 = vpop.f32.mrf.mxu0  ;;  %v21498_v31 = vld [vmem:[%s22890_s26 + $0xe8c] ss:$16 sps:$4 sm:$0xff]   ;;  %v21511_v57 = vld [vmem:[%s22890_s26 + $0xc28] ss:$16 sps:$4 sm:$0xff]  }
 0x874   : > { %v15581_v3 = vpop.f32.mrf.mxu1  ;;  %v16262_v51 = vmul.f32 %v16245_v60, %v15578_v58  ;;  %v15580_v43 = vadd.f32 %v15579_v56, %v15539_v47  ;;  %15833 = vmatpush1.bf16.msra.mxu0 %v21481_v50  ;;  %v21514_v11 = vld [vmem:[%s22890_s26 + $0xe28] ss:$16 sps:$4 sm:$0xff]   ;;  %v21519_v45 = vld [vmem:[%s22890_s26 + $0xc0c] ss:$16 sps:$4 sm:$0xff]  }
 0x875   : > { %15874 = vmatpush1.bf16.msra.mxu1 %v21484_v61  ;;  %v15541_v6 = vpop.f32.mrf.mxu0  ;;  %15834 = vmatprep.subr.bf16.mxu0 %v21489_v24  ;;  %v21522_v46 = vld [vmem:[%s22890_s26 + $0xe0c] ss:$16 sps:$4 sm:$0xff]   ;;  %v21517_v60 = vld [vmem:[%s22890_s26 + $0xc08] ss:$16 sps:$4 sm:$0xff]  }
 0x876   : > { %v15582_v7 = vpop.f32.mrf.mxu1  ;;  %15875 = vmatprep.subr.bf16.mxu1 %v21492_v62  ;;  %v16289_v8 = vadd.f32 %v16272_v19, %v16262_v51  ;;  %v16263_v12 = vmul.f32 %v16249_v21, %v15580_v43  ;;  %v21520_v50 = vld [vmem:[%s22890_s26 + $0xe08] ss:$16 sps:$4 sm:$0xff]   ;;  %v21525_v61 = vld [vmem:[%s22890_s26 + $0xdec] ss:$16 sps:$4 sm:$0xff]  }
 0x877   : > { %v21528_v19 = vld [vmem:[%s22890_s26 + $0xfec] ss:$16 sps:$4 sm:$0xff]   ;;  %v21523_v52 = vld [vmem:[%s22890_s26 + $0xde8] ss:$16 sps:$4 sm:$0xff]  }
 0x878   : > { %v16293_v13 = vmax.f32 %v16289_v8, 0.0  ;;  %v16290_v55 = vadd.f32 %v16276_v23, %v16263_v12  ;;  %15835 = vmatpush1.bf16.msra.mxu0 %v21487_v27  ;;  %v21526_v56 = vld [vmem:[%s22890_s26 + $0xfe8] ss:$16 sps:$4 sm:$0xff]   ;;  %v21531_v24 = vld [vmem:[%s22890_s26 + $0xdcc] ss:$16 sps:$4 sm:$0xff]  }
 0x879   : > { %15876 = vmatpush1.bf16.msra.mxu1 %v21490_v63  ;;  %15836 = vmatprep.subr.bf16.mxu0 %v21495_v1  ;;  %v21534_v62 = vld [vmem:[%s22890_s26 + $0xfcc] ss:$16 sps:$4 sm:$0xff]   ;;  %v21529_v58 = vld [vmem:[%s22890_s26 + $0xdc8] ss:$16 sps:$4 sm:$0xff]  }
 0x87a   : > { %15877 = vmatprep.subr.bf16.mxu1 %v21498_v31  ;;  %16297 = vst [vmem:[%s22913_s3] sm:$0xff] %v16293_v13  ;;  %v16294_v35 = vmax.f32 %v16290_v55, 0.0  ;;  %v21532_v47 = vld [vmem:[%s22890_s26 + $0xfc8] ss:$16 sps:$4 sm:$0xff]   ;;  %v21537_v21 = vld [vmem:[%s22890_s26 + $0xdac] ss:$16 sps:$4 sm:$0xff]  }
 0x87b   : > { %v21540_v2 = vld [vmem:[%s22890_s26 + $0xfac] ss:$16 sps:$4 sm:$0xff]   ;;  %v21535_v3 = vld [vmem:[%s22890_s26 + $0xda8] ss:$16 sps:$4 sm:$0xff]  }
 0x87c   : > { %16298 = vst [vmem:[%s22913_s3 + $0x8] sm:$0xff] %v16294_v35  ;;  %15837 = vmatpush1.bf16.msra.mxu0 %v21493_v14  ;;  %v21538_v51 = vld [vmem:[%s22890_s26 + $0xfa8] ss:$16 sps:$4 sm:$0xff]   ;;  %v21543_v43 = vld [vmem:[%s22890_s26 + $0xd8c] ss:$16 sps:$4 sm:$0xff]  }
 0x87d   : > { %15878 = vmatpush1.bf16.msra.mxu1 %v21496_v17  ;;  %15838 = vmatprep.subr.bf16.mxu0 %v21501_v5  ;;  %v21546_v23 = vld [vmem:[%s22890_s26 + $0xf8c] ss:$16 sps:$4 sm:$0xff]   ;;  %v21541_v27 = vld [vmem:[%s22890_s26 + $0xd88] ss:$16 sps:$4 sm:$0xff]  }
 0x87e   : > { %15879 = vmatprep.subr.bf16.mxu1 %v21504_v41  ;;  %v21544_v63 = vld [vmem:[%s22890_s26 + $0xf88] ss:$16 sps:$4 sm:$0xff]   ;;  %v21549_v6 = vld [vmem:[%s22890_s26 + $0xd6c] ss:$16 sps:$4 sm:$0xff]  }
 0x87f   : > { %v21552_v7 = vld [vmem:[%s22890_s26 + $0xf6c] ss:$16 sps:$4 sm:$0xff]   ;;  %v21547_v1 = vld [vmem:[%s22890_s26 + $0xd68] ss:$16 sps:$4 sm:$0xff]  }
 0x880   : > { %15839 = vmatpush1.bf16.msra.mxu0 %v21499_v26  ;;  %v21550_v31 = vld [vmem:[%s22890_s26 + $0xf68] ss:$16 sps:$4 sm:$0xff]   ;;  %v21555_v8 = vld [vmem:[%s22890_s26 + $0xd4c] ss:$16 sps:$4 sm:$0xff]  }
 0x881   : > { %15880 = vmatpush1.bf16.msra.mxu1 %v21502_v34  ;;  %15840 = vmatprep.subr.bf16.mxu0 %v21507_v36  ;;  %v21558_v12 = vld [vmem:[%s22890_s26 + $0xf4c] ss:$16 sps:$4 sm:$0xff]   ;;  %v21553_v13 = vld [vmem:[%s22890_s26 + $0xd48] ss:$16 sps:$4 sm:$0xff]  }
 0x882   : > { %15881 = vmatprep.subr.bf16.mxu1 %v21510_v9  ;;  %v21556_v55 = vld [vmem:[%s22890_s26 + $0xf48] ss:$16 sps:$4 sm:$0xff]   ;;  %v21561_v14 = vld [vmem:[%s22890_s26 + $0xd2c] ss:$16 sps:$4 sm:$0xff]  }
 0x883   : > { %v21564_v17 = vld [vmem:[%s22890_s26 + $0xf2c] ss:$16 sps:$4 sm:$0xff]   ;;  %v21559_v5 = vld [vmem:[%s22890_s26 + $0xd28] ss:$16 sps:$4 sm:$0xff]  }
 0x884   : > { %15841 = vmatpush1.bf16.msra.mxu0 %v21505_v0  ;;  %v21562_v41 = vld [vmem:[%s22890_s26 + $0xf28] ss:$16 sps:$4 sm:$0xff]   ;;  %v21567_v35 = vld [vmem:[%s22890_s26 + $0xd0c] ss:$16 sps:$4 sm:$0xff]  }
 0x885   : > { %15882 = vmatpush1.bf16.msra.mxu1 %v21508_v20  ;;  %15842 = vmatprep.subr.bf16.mxu0 %v21513_v53  ;;  %v21570_v26 = vld [vmem:[%s22890_s26 + $0xf0c] ss:$16 sps:$4 sm:$0xff]   ;;  %v21565_v34 = vld [vmem:[%s22890_s26 + $0xd08] ss:$16 sps:$4 sm:$0xff]  }
 0x886   : > { %15883 = vmatprep.subr.bf16.mxu1 %v21516_v54  ;;  %v21568_v36 = vld [vmem:[%s22890_s26 + $0xf08] ss:$16 sps:$4 sm:$0xff]   ;;  %v21573_v9 = vld [vmem:[%s22890_s26 + $0x10ec] ss:$16 sps:$4 sm:$0xff]  }
 0x887   : > { %v21576_v0 = vld [vmem:[%s22890_s26 + $0x12ec] ss:$16 sps:$4 sm:$0xff]   ;;  %v21571_v20 = vld [vmem:[%s22890_s26 + $0x10e8] ss:$16 sps:$4 sm:$0xff]  }
 0x888   : > { %15843 = vmatpush1.bf16.msra.mxu0 %v21511_v57  ;;  %v21574_v53 = vld [vmem:[%s22890_s26 + $0x12e8] ss:$16 sps:$4 sm:$0xff]   ;;  %v21579_v54 = vld [vmem:[%s22890_s26 + $0x10cc] ss:$16 sps:$4 sm:$0xff]  }
 0x889   : > { %15884 = vmatpush1.bf16.msra.mxu1 %v21514_v11  ;;  %15844 = vmatprep.subr.bf16.mxu0 %v21519_v45  ;;  %v21582_v57 = vld [vmem:[%s22890_s26 + $0x12cc] ss:$16 sps:$4 sm:$0xff]  }
 0x88a   : > { %15885 = vmatprep.subr.bf16.mxu1 %v21522_v46 }
 0x88c   : > { %15845 = vmatpush1.bf16.msra.mxu0 %v21517_v60  ;;  %v21577_v60 = vld [vmem:[%s22890_s26 + $0x10c8] ss:$16 sps:$4 sm:$0xff]  }
 0x88d   : > { %15886 = vmatpush1.bf16.msra.mxu1 %v21520_v50  ;;  %15846 = vmatprep.subr.bf16.mxu0 %v21525_v61  ;;  %v21580_v50 = vld [vmem:[%s22890_s26 + $0x12c8] ss:$16 sps:$4 sm:$0xff]  }
 0x88e   : > { %15887 = vmatprep.subr.bf16.mxu1 %v21528_v19 }
 0x890   : > { %15847 = vmatpush2.bf16.msra.mxu0 %v21523_v52  ;;  %v21585_v52 = vld [vmem:[%s22890_s26 + $0x10ac] ss:$16 sps:$4 sm:$0xff]  }
 0x891   : > { %15888 = vmatpush2.bf16.msra.mxu1 %v21526_v56  ;;  %15848 = vmatprep.subr.bf16.mxu0 %v21531_v24  ;;  %v21588_v56 = vld [vmem:[%s22890_s26 + $0x12ac] ss:$16 sps:$4 sm:$0xff]  }
 0x892   : > { %15889 = vmatprep.subr.bf16.mxu1 %v21534_v62  ;;  %v21583_v62 = vld [vmem:[%s22890_s26 + $0x10a8] ss:$16 sps:$4 sm:$0xff]  }
 0x894   : > { %15849 = vmatpush2.bf16.msra.mxu0 %v21529_v58  ;;  %v21586_v58 = vld [vmem:[%s22890_s26 + $0x12a8] ss:$16 sps:$4 sm:$0xff]  }
 0x895   : > { %15890 = vmatpush2.bf16.msra.mxu1 %v21532_v47  ;;  %15850 = vmatprep.subr.bf16.mxu0 %v21537_v21 }
 0x896   : > { %15891 = vmatprep.subr.bf16.mxu1 %v21540_v2  ;;  %v21591_v2 = vld [vmem:[%s22890_s26 + $0x108c] ss:$16 sps:$4 sm:$0xff]  }
 0x898   : > { %15851 = vmatpush2.bf16.msra.mxu0 %v21535_v3  ;;  %v21592_v3 = vld [vmem:[%s22890_s26 + $0x1288] ss:$16 sps:$4 sm:$0xff]  }
 0x899   : > { %15892 = vmatpush2.bf16.msra.mxu1 %v21538_v51  ;;  %15852 = vmatprep.subr.bf16.mxu0 %v21543_v43  ;;  %v21597_v51 = vld [vmem:[%s22890_s26 + $0x106c] ss:$16 sps:$4 sm:$0xff]  }
 0x89a   : > { %15893 = vmatprep.subr.bf16.mxu1 %v21546_v23  ;;  %v21600_v43 = vld [vmem:[%s22890_s26 + $0x126c] ss:$16 sps:$4 sm:$0xff]   ;;  %v21595_v23 = vld [vmem:[%s22890_s26 + $0x1068] ss:$16 sps:$4 sm:$0xff]  }
 0x89c   : > { %15853 = vmatpush2.bf16.msra.mxu0 %v21541_v27  ;;  %v21598_v27 = vld [vmem:[%s22890_s26 + $0x1268] ss:$16 sps:$4 sm:$0xff]  }
 0x89d   : > { %15894 = vmatpush2.bf16.msra.mxu1 %v21544_v63  ;;  %15854 = vmatprep.subr.bf16.mxu0 %v21549_v6  ;;  %v21603_v63 = vld [vmem:[%s22890_s26 + $0x104c] ss:$16 sps:$4 sm:$0xff]  }
 0x89e   : > { %15895 = vmatprep.subr.bf16.mxu1 %v21552_v7  ;;  %v21606_v6 = vld [vmem:[%s22890_s26 + $0x124c] ss:$16 sps:$4 sm:$0xff]   ;;  %v21601_v7 = vld [vmem:[%s22890_s26 + $0x1048] ss:$16 sps:$4 sm:$0xff]  }
 0x8a0   : > { %15855 = vmatpush2.bf16.msra.mxu0 %v21547_v1  ;;  %v21604_v1 = vld [vmem:[%s22890_s26 + $0x1248] ss:$16 sps:$4 sm:$0xff]  }
 0x8a1   : > { %15896 = vmatpush2.bf16.msra.mxu1 %v21550_v31  ;;  %15856 = vmatprep.subr.bf16.mxu0 %v21555_v8  ;;  %v21609_v31 = vld [vmem:[%s22890_s26 + $0x102c] ss:$16 sps:$4 sm:$0xff]  }
 0x8a2   : > { %15897 = vmatprep.subr.bf16.mxu1 %v21558_v12  ;;  %v21612_v8 = vld [vmem:[%s22890_s26 + $0x122c] ss:$16 sps:$4 sm:$0xff]   ;;  %v21607_v12 = vld [vmem:[%s22890_s26 + $0x1028] ss:$16 sps:$4 sm:$0xff]  }
 0x8a4   : > { %15857 = vmatpush2.bf16.msra.mxu0 %v21553_v13  ;;  %v21610_v13 = vld [vmem:[%s22890_s26 + $0x1228] ss:$16 sps:$4 sm:$0xff]  }
 0x8a5   : > { %15898 = vmatpush2.bf16.msra.mxu1 %v21556_v55  ;;  %15858 = vmatprep.subr.bf16.mxu0 %v21561_v14  ;;  %v21615_v55 = vld [vmem:[%s22890_s26 + $0x100c] ss:$16 sps:$4 sm:$0xff]  }
 0x8a6   : > { %15899 = vmatprep.subr.bf16.mxu1 %v21564_v17  ;;  %v21618_v14 = vld [vmem:[%s22890_s26 + $0x120c] ss:$16 sps:$4 sm:$0xff]   ;;  %v21613_v17 = vld [vmem:[%s22890_s26 + $0x1008] ss:$16 sps:$4 sm:$0xff]  }
 0x8a8   : > { %15859 = vmatpush2.bf16.msra.mxu0 %v21559_v5  ;;  %v21616_v5 = vld [vmem:[%s22890_s26 + $0x1208] ss:$16 sps:$4 sm:$0xff]  }
 0x8a9   : > { %15900 = vmatpush2.bf16.msra.mxu1 %v21562_v41  ;;  %15860 = vmatprep.subr.bf16.mxu0 %v21567_v35  ;;  %v21621_v41 = vld [vmem:[%s22890_s26 + $0x11ec] ss:$16 sps:$4 sm:$0xff]  }
 0x8aa   : > { %15901 = vmatprep.subr.bf16.mxu1 %v21570_v26  ;;  %v21624_v35 = vld [vmem:[%s22890_s26 + $0x13ec] ss:$16 sps:$4 sm:$0xff]   ;;  %v21619_v26 = vld [vmem:[%s22890_s26 + $0x11e8] ss:$16 sps:$4 sm:$0xff]  }
 0x8ac   : > { %15861 = vmatpush2.bf16.msra.mxu0 %v21565_v34  ;;  %v21622_v34 = vld [vmem:[%s22890_s26 + $0x13e8] ss:$16 sps:$4 sm:$0xff]  }
 0x8ad   : > { %15902 = vmatpush2.bf16.msra.mxu1 %v21568_v36  ;;  %15912 = vmatprep.subr.bf16.mxu0 %v21573_v9  ;;  %v21627_v36 = vld [vmem:[%s22890_s26 + $0x11cc] ss:$16 sps:$4 sm:$0xff]  }
 0x8ae   : > { %15953 = vmatprep.subr.bf16.mxu1 %v21576_v0  ;;  %v21630_v9 = vld [vmem:[%s22890_s26 + $0x13cc] ss:$16 sps:$4 sm:$0xff]   ;;  %v21625_v0 = vld [vmem:[%s22890_s26 + $0x11c8] ss:$16 sps:$4 sm:$0xff]  }
 0x8af   : > { %v15618_v11 = vpop.f32.mrf.mxu0  ;;  %15863 = vmatmul.mubr.bf16.vlgmr.msra.gmra.mxu0 %v23483_v38 }
 0x8b0   : > { %v15659_v45 = vpop.f32.mrf.mxu1  ;;  %15904 = vmatmul.mubr.bf16.vlgmr.msra.gmra.mxu1 %v23487_v39  ;;  %15913 = vmatpush1.bf16.msra.mxu0 %v21571_v20  ;;  %v21628_v20 = vld [vmem:[%s22890_s26 + $0x13c8] ss:$16 sps:$4 sm:$0xff]  }
 0x8b1   : > { %v24181_v46 = vadd.f32 %v15659_v45, %v15618_v11  ;;  %15954 = vmatpush1.bf16.msra.mxu1 %v21574_v53  ;;  %v15620_v61 = vpop.f32.mrf.mxu0  ;;  %15914 = vmatprep.subr.bf16.mxu0 %v21579_v54  ;;  %v21633_v53 = vld [vmem:[%s22890_s26 + $0x11ac] ss:$16 sps:$4 sm:$0xff]   ;;  %v21634_v11 = vld [vmem:[%s22890_s26 + $0x13a8] ss:$16 sps:$4 sm:$0xff]  }
 0x8b2   : > { %v15661_v19 = vpop.f32.mrf.mxu1  ;;  %15955 = vmatprep.subr.bf16.mxu1 %v21582_v57  ;;  %15944 = vmatprep.mubr.bf16.mxu0 %v23497_v25  ;;  %v21594_v25 = vld [vmem:[%s22890_s26 + $0x128c] ss:$16 sps:$4 sm:$0xff]   ;;  %v21631_v57 = vld [vmem:[%s22890_s26 + $0x11a8] ss:$16 sps:$4 sm:$0xff]  }
 0x8b3   : > { %v24187_v24 = vadd.f32 %v15661_v19, %v15620_v61  ;;  %15985 = vmatprep.mubr.bf16.mxu1 %v23501_v15  ;;  %v15622_v38 = vpop.f32.mrf.mxu0  ;;  %v21589_v15 = vld [vmem:[%s22890_s26 + $0x1088] ss:$16 sps:$4 sm:$0xff]   ;;  %v21636_v54 = vld [vmem:[%s22890_s26 + $0x13ac] ss:$16 sps:$4 sm:$0xff]  }
 0x8b4   : > { %v15663_v39 = vpop.f32.mrf.mxu1  ;;  %15915 = vmatpush1.bf16.msra.mxu0 %v21577_v60  ;;  %v21639_v45 = vld [vmem:[%s22890_s26 + $0x118c] ss:$16 sps:$4 sm:$0xff]   ;;  %v21640_v61 = vld [vmem:[%s22890_s26 + $0x1388] ss:$16 sps:$4 sm:$0xff]  }
 0x8b5   : > { %15956 = vmatpush1.bf16.msra.mxu1 %v21580_v50  ;;  %v15623_v47 = vpop.f32.mrf.mxu0  ;;  %15916 = vmatprep.subr.bf16.mxu0 %v21585_v52  ;;  %v21642_v60 = vld [vmem:[%s22890_s26 + $0x138c] ss:$16 sps:$4 sm:$0xff]   ;;  %v21637_v50 = vld [vmem:[%s22890_s26 + $0x1188] ss:$16 sps:$4 sm:$0xff]  }
 0x8b6   : > { %v15664_v21 = vpop.f32.mrf.mxu1  ;;  %15957 = vmatprep.subr.bf16.mxu1 %v21588_v56  ;;  %v21645_v19 = vld [vmem:[%s22890_s26 + $0x116c] ss:$16 sps:$4 sm:$0xff]   ;;  %v21643_v56 = vld [vmem:[%s22890_s26 + $0x1168] ss:$16 sps:$4 sm:$0xff]  }
 0x8b7   : > { %v21648_v52 = vld [vmem:[%s22890_s26 + $0x136c] ss:$16 sps:$4 sm:$0xff]   ;;  %v21646_v38 = vld [vmem:[%s22890_s26 + $0x1368] ss:$16 sps:$4 sm:$0xff]  }
 0x8b8   : > { %15917 = vmatpush1.bf16.msra.mxu0 %v21583_v62  ;;  %v21651_v39 = vld [vmem:[%s22890_s26 + $0x114c] ss:$16 sps:$4 sm:$0xff]   ;;  %v21652_v47 = vld [vmem:[%s22890_s26 + $0x1348] ss:$16 sps:$4 sm:$0xff]  }
 0x8b9   : > { %15958 = vmatpush1.bf16.msra.mxu1 %v21586_v58  ;;  %15918 = vmatprep.subr.bf16.mxu0 %v21591_v2  ;;  %v21654_v62 = vld [vmem:[%s22890_s26 + $0x134c] ss:$16 sps:$4 sm:$0xff]   ;;  %v21649_v58 = vld [vmem:[%s22890_s26 + $0x1148] ss:$16 sps:$4 sm:$0xff]  }
 0x8ba   : > { %15959 = vmatprep.subr.bf16.mxu1 %v21594_v25  ;;  %v21657_v21 = vld [vmem:[%s22890_s26 + $0x112c] ss:$16 sps:$4 sm:$0xff]   ;;  %v21655_v25 = vld [vmem:[%s22890_s26 + $0x1128] ss:$16 sps:$4 sm:$0xff]  }
 0x8bb   : > { %v21660_v2 = vld [vmem:[%s22890_s26 + $0x132c] ss:$16 sps:$4 sm:$0xff]  }
 0x8bc   : > { %15919 = vmatpush1.bf16.msra.mxu0 %v21589_v15  ;;  %v21658_v15 = vld [vmem:[%s22890_s26 + $0x1328] ss:$16 sps:$4 sm:$0xff]  }
 0x8bd   : > { %15960 = vmatpush1.bf16.msra.mxu1 %v21592_v3  ;;  %15920 = vmatprep.subr.bf16.mxu0 %v21597_v51  ;;  %v21663_v3 = vld [vmem:[%s22890_s26 + $0x110c] ss:$16 sps:$4 sm:$0xff]  }
 0x8be   : > { %15961 = vmatprep.subr.bf16.mxu1 %v21600_v43  ;;  %v21666_v51 = vld [vmem:[%s22890_s26 + $0x130c] ss:$16 sps:$4 sm:$0xff]   ;;  %v21661_v43 = vld [vmem:[%s22890_s26 + $0x1108] ss:$16 sps:$4 sm:$0xff]  }
 0x8c0   : > { %15921 = vmatpush1.bf16.msra.mxu0 %v21595_v23  ;;  %v21664_v23 = vld [vmem:[%s22890_s26 + $0x1308] ss:$16 sps:$4 sm:$0xff]  }
 0x8c1   : > { %15962 = vmatpush1.bf16.msra.mxu1 %v21598_v27  ;;  %15922 = vmatprep.subr.bf16.mxu0 %v21603_v63  ;;  %v21669_v27 = vld [vmem:[%s22890_s26 + $0x14ec] ss:$16 sps:$4 sm:$0xff]  }
 0x8c2   : > { %15963 = vmatprep.subr.bf16.mxu1 %v21606_v6  ;;  %v21672_v63 = vld [vmem:[%s22890_s26 + $0x16ec] ss:$16 sps:$4 sm:$0xff]   ;;  %v21667_v6 = vld [vmem:[%s22890_s26 + $0x14e8] ss:$16 sps:$4 sm:$0xff]  }
 0x8c4   : > { %15923 = vmatpush1.bf16.msra.mxu0 %v21601_v7  ;;  %v21670_v7 = vld [vmem:[%s22890_s26 + $0x16e8] ss:$16 sps:$4 sm:$0xff]  }
 0x8c5   : > { %15964 = vmatpush1.bf16.msra.mxu1 %v21604_v1  ;;  %15924 = vmatprep.subr.bf16.mxu0 %v21609_v31  ;;  %v21675_v1 = vld [vmem:[%s22890_s26 + $0x14cc] ss:$16 sps:$4 sm:$0xff]  }
 0x8c6   : > { %15965 = vmatprep.subr.bf16.mxu1 %v21612_v8  ;;  %v21678_v31 = vld [vmem:[%s22890_s26 + $0x16cc] ss:$16 sps:$4 sm:$0xff]  }
 0x8c8   : > { %15925 = vmatpush1.bf16.msra.mxu0 %v21607_v12 }
 0x8c9   : > { %15966 = vmatpush1.bf16.msra.mxu1 %v21610_v13  ;;  %15926 = vmatprep.subr.bf16.mxu0 %v21615_v55  ;;  %v21673_v55 = vld [vmem:[%s22890_s26 + $0x14c8] ss:$16 sps:$4 sm:$0xff]  }
 0x8ca   : > { %15967 = vmatprep.subr.bf16.mxu1 %v21618_v14  ;;  %v21676_v14 = vld [vmem:[%s22890_s26 + $0x16c8] ss:$16 sps:$4 sm:$0xff]  }
 0x8cc   : > { %15927 = vmatpush1.bf16.msra.mxu0 %v21613_v17 }
 0x8cd   : > { %15968 = vmatpush1.bf16.msra.mxu1 %v21616_v5  ;;  %15928 = vmatprep.subr.bf16.mxu0 %v21621_v41  ;;  %v21681_v41 = vld [vmem:[%s22890_s26 + $0x14ac] ss:$16 sps:$4 sm:$0xff]  }
 0x8ce   : > { %15969 = vmatprep.subr.bf16.mxu1 %v21624_v35  ;;  %v21684_v35 = vld [vmem:[%s22890_s26 + $0x16ac] ss:$16 sps:$4 sm:$0xff]  }
 0x8d0   : > { %15929 = vmatpush2.bf16.msra.mxu0 %v21619_v26 }
 0x8d1   : > { %15970 = vmatpush2.bf16.msra.mxu1 %v21622_v34  ;;  %15930 = vmatprep.subr.bf16.mxu0 %v21627_v36  ;;  %v21679_v36 = vld [vmem:[%s22890_s26 + $0x14a8] ss:$16 sps:$4 sm:$0xff]  }
 0x8d2   : > { %15971 = vmatprep.subr.bf16.mxu1 %v21630_v9  ;;  %v21682_v9 = vld [vmem:[%s22890_s26 + $0x16a8] ss:$16 sps:$4 sm:$0xff]  }
 0x8d4   : > { %15931 = vmatpush2.bf16.msra.mxu0 %v21625_v0 }
 0x8d5   : > { %15972 = vmatpush2.bf16.msra.mxu1 %v21628_v20  ;;  %15932 = vmatprep.subr.bf16.mxu0 %v21633_v53  ;;  %v21688_v53 = vld [vmem:[%s22890_s26 + $0x1688] ss:$16 sps:$4 sm:$0xff]  }
 0x8d6   : > { %15973 = vmatprep.subr.bf16.mxu1 %v21636_v54  ;;  %v21693_v54 = vld [vmem:[%s22890_s26 + $0x146c] ss:$16 sps:$4 sm:$0xff]  }
 0x8d8   : > { %15933 = vmatpush2.bf16.msra.mxu0 %v21631_v57  ;;  %v21696_v57 = vld [vmem:[%s22890_s26 + $0x166c] ss:$16 sps:$4 sm:$0xff]  }
 0x8d9   : > { %15974 = vmatpush2.bf16.msra.mxu1 %v21634_v11  ;;  %15934 = vmatprep.subr.bf16.mxu0 %v21639_v45  ;;  %v21691_v11 = vld [vmem:[%s22890_s26 + $0x1468] ss:$16 sps:$4 sm:$0xff]  }
 0x8da   : > { %15975 = vmatprep.subr.bf16.mxu1 %v21642_v60  ;;  %v21694_v45 = vld [vmem:[%s22890_s26 + $0x1668] ss:$16 sps:$4 sm:$0xff]   ;;  %v21699_v60 = vld [vmem:[%s22890_s26 + $0x144c] ss:$16 sps:$4 sm:$0xff]  }
 0x8dc   : > { %15935 = vmatpush2.bf16.msra.mxu0 %v21637_v50  ;;  %v21702_v50 = vld [vmem:[%s22890_s26 + $0x164c] ss:$16 sps:$4 sm:$0xff]  }
 0x8dd   : > { %15976 = vmatpush2.bf16.msra.mxu1 %v21640_v61  ;;  %15936 = vmatprep.subr.bf16.mxu0 %v21645_v19  ;;  %v21697_v61 = vld [vmem:[%s22890_s26 + $0x1448] ss:$16 sps:$4 sm:$0xff]  }
 0x8de   : > { %15977 = vmatprep.subr.bf16.mxu1 %v21648_v52  ;;  %v21700_v19 = vld [vmem:[%s22890_s26 + $0x1648] ss:$16 sps:$4 sm:$0xff]   ;;  %v21705_v52 = vld [vmem:[%s22890_s26 + $0x142c] ss:$16 sps:$4 sm:$0xff]  }
 0x8e0   : > { %15937 = vmatpush2.bf16.msra.mxu0 %v21643_v56  ;;  %v21708_v56 = vld [vmem:[%s22890_s26 + $0x162c] ss:$16 sps:$4 sm:$0xff]  }
 0x8e1   : > { %15978 = vmatpush2.bf16.msra.mxu1 %v21646_v38  ;;  %15938 = vmatprep.subr.bf16.mxu0 %v21651_v39  ;;  %v21703_v38 = vld [vmem:[%s22890_s26 + $0x1428] ss:$16 sps:$4 sm:$0xff]  }
 0x8e2   : > { %15979 = vmatprep.subr.bf16.mxu1 %v21654_v62  ;;  %v21706_v39 = vld [vmem:[%s22890_s26 + $0x1628] ss:$16 sps:$4 sm:$0xff]   ;;  %v21711_v62 = vld [vmem:[%s22890_s26 + $0x140c] ss:$16 sps:$4 sm:$0xff]  }
 0x8e4   : > { %15939 = vmatpush2.bf16.msra.mxu0 %v21649_v58  ;;  %v21714_v58 = vld [vmem:[%s22890_s26 + $0x160c] ss:$16 sps:$4 sm:$0xff]  }
 0x8e5   : > { %15980 = vmatpush2.bf16.msra.mxu1 %v21652_v47  ;;  %15940 = vmatprep.subr.bf16.mxu0 %v21657_v21  ;;  %v21709_v47 = vld [vmem:[%s22890_s26 + $0x1408] ss:$16 sps:$4 sm:$0xff]  }
 0x8e6   : > { %15981 = vmatprep.subr.bf16.mxu1 %v21660_v2  ;;  %v21712_v21 = vld [vmem:[%s22890_s26 + $0x1608] ss:$16 sps:$4 sm:$0xff]   ;;  %v21717_v2 = vld [vmem:[%s22890_s26 + $0x15ec] ss:$16 sps:$4 sm:$0xff]  }
 0x8e8   : > { %15941 = vmatpush2.bf16.msra.mxu0 %v21655_v25  ;;  %v21720_v25 = vld [vmem:[%s22890_s26 + $0x17ec] ss:$16 sps:$4 sm:$0xff]  }
 0x8e9   : > { %15982 = vmatpush2.bf16.msra.mxu1 %v21658_v15  ;;  %15942 = vmatprep.subr.bf16.mxu0 %v21663_v3  ;;  %v21715_v15 = vld [vmem:[%s22890_s26 + $0x15e8] ss:$16 sps:$4 sm:$0xff]  }
 0x8ea   : > { %15983 = vmatprep.subr.bf16.mxu1 %v21666_v51  ;;  %v21718_v3 = vld [vmem:[%s22890_s26 + $0x17e8] ss:$16 sps:$4 sm:$0xff]   ;;  %v21723_v51 = vld [vmem:[%s22890_s26 + $0x15cc] ss:$16 sps:$4 sm:$0xff]  }
 0x8ec   : > { %15943 = vmatpush2.bf16.msra.mxu0 %v21661_v43  ;;  %v21726_v43 = vld [vmem:[%s22890_s26 + $0x17cc] ss:$16 sps:$4 sm:$0xff]  }
 0x8ed   : > { %15984 = vmatpush2.bf16.msra.mxu1 %v21664_v23  ;;  %15994 = vmatprep.subr.bf16.mxu0 %v21669_v27  ;;  %v21721_v23 = vld [vmem:[%s22890_s26 + $0x15c8] ss:$16 sps:$4 sm:$0xff]  }
 0x8ee   : > { %16035 = vmatprep.subr.bf16.mxu1 %v21672_v63  ;;  %v21724_v27 = vld [vmem:[%s22890_s26 + $0x17c8] ss:$16 sps:$4 sm:$0xff]   ;;  %v21729_v63 = vld [vmem:[%s22890_s26 + $0x15ac] ss:$16 sps:$4 sm:$0xff]  }
 0x8ef   : > { %v15700_v8 = vpop.f32.mrf.mxu0  ;;  %15945 = vmatmul.mubr.bf16.vlgmr.msra.gmra.mxu0 %v23575_v30 }
 0x8f0   : > { %v15741_v12 = vpop.f32.mrf.mxu1  ;;  %15986 = vmatmul.mubr.bf16.vlgmr.msra.gmra.mxu1 %v23579_v32  ;;  %v15701_v13 = vadd.f32 %v15700_v8, %v24181_v46  ;;  %15995 = vmatpush1.bf16.msra.mxu0 %v21667_v6  ;;  %v21732_v6 = vld [vmem:[%s22890_s26 + $0x17ac] ss:$16 sps:$4 sm:$0xff]  }
 0x8f1   : > { %16036 = vmatpush1.bf16.msra.mxu1 %v21670_v7  ;;  %v15702_v17 = vpop.f32.mrf.mxu0  ;;  %15996 = vmatprep.subr.bf16.mxu0 %v21675_v1  ;;  %v21727_v7 = vld [vmem:[%s22890_s26 + $0x15a8] ss:$16 sps:$4 sm:$0xff]   ;;  %v21738_v8 = vld [vmem:[%s22890_s26 + $0x178c] ss:$16 sps:$4 sm:$0xff]  }
 0x8f2   : > { %v15743_v5 = vpop.f32.mrf.mxu1  ;;  %16037 = vmatprep.subr.bf16.mxu1 %v21678_v31  ;;  %v24258_v26 = vadd.f32 %v15741_v12, %v15701_v13  ;;  %v15703_v30 = vadd.f32 %v15702_v17, %v24187_v24  ;;  %16026 = vmatprep.mubr.bf16.mxu0 %v23591_v44  ;;  %v21687_v44 = vld [vmem:[%s22890_s26 + $0x148c] ss:$16 sps:$4 sm:$0xff]   ;;  %v21685_v24 = vld [vmem:[%s22890_s26 + $0x1488] ss:$16 sps:$4 sm:$0xff]  }
 0x8f3   : > { %16067 = vmatprep.mubr.bf16.mxu1 %v23595_v40  ;;  %v15704_v32 = vpop.f32.mrf.mxu0  ;;  %v21690_v40 = vld [vmem:[%s22890_s26 + $0x168c] ss:$16 sps:$4 sm:$0xff]   ;;  %v21730_v1 = vld [vmem:[%s22890_s26 + $0x17a8] ss:$16 sps:$4 sm:$0xff]  }
 0x8f4   : > { %v15745_v46 = vpop.f32.mrf.mxu1  ;;  %v24263_v34 = vadd.f32 %v15743_v5, %v15703_v30  ;;  %15997 = vmatpush1.bf16.msra.mxu0 %v21673_v55  ;;  %v21735_v31 = vld [vmem:[%s22890_s26 + $0x158c] ss:$16 sps:$4 sm:$0xff]   ;;  %v21733_v12 = vld [vmem:[%s22890_s26 + $0x1588] ss:$16 sps:$4 sm:$0xff]  }
 0x8f5   : > { %16038 = vmatpush1.bf16.msra.mxu1 %v21676_v14  ;;  %v15705_v0 = vpop.f32.mrf.mxu0  ;;  %15998 = vmatprep.subr.bf16.mxu0 %v21681_v41  ;;  %v21736_v13 = vld [vmem:[%s22890_s26 + $0x1788] ss:$16 sps:$4 sm:$0xff]   ;;  %v21741_v55 = vld [vmem:[%s22890_s26 + $0x156c] ss:$16 sps:$4 sm:$0xff]  }
 0x8f6   : > { %v15746_v20 = vpop.f32.mrf.mxu1  ;;  %16039 = vmatprep.subr.bf16.mxu1 %v21684_v35  ;;  %v21744_v14 = vld [vmem:[%s22890_s26 + $0x176c] ss:$16 sps:$4 sm:$0xff]   ;;  %v21739_v17 = vld [vmem:[%s22890_s26 + $0x1568] ss:$16 sps:$4 sm:$0xff]  }
 0x8f7   : > { %v21742_v5 = vld [vmem:[%s22890_s26 + $0x1768] ss:$16 sps:$4 sm:$0xff]   ;;  %v21747_v41 = vld [vmem:[%s22890_s26 + $0x154c] ss:$16 sps:$4 sm:$0xff]  }
 0x8f8   : > { %15999 = vmatpush1.bf16.msra.mxu0 %v21679_v36  ;;  %v21750_v35 = vld [vmem:[%s22890_s26 + $0x174c] ss:$16 sps:$4 sm:$0xff]   ;;  %v21745_v30 = vld [vmem:[%s22890_s26 + $0x1548] ss:$16 sps:$4 sm:$0xff]  }
 0x8f9   : > { %16040 = vmatpush1.bf16.msra.mxu1 %v21682_v9  ;;  %16000 = vmatprep.subr.bf16.mxu0 %v21687_v44  ;;  %v21748_v32 = vld [vmem:[%s22890_s26 + $0x1748] ss:$16 sps:$4 sm:$0xff]   ;;  %v21753_v46 = vld [vmem:[%s22890_s26 + $0x152c] ss:$16 sps:$4 sm:$0xff]  }
 0x8fa   : > { %16041 = vmatprep.subr.bf16.mxu1 %v21690_v40  ;;  %v21756_v36 = vld [vmem:[%s22890_s26 + $0x172c] ss:$16 sps:$4 sm:$0xff]   ;;  %v21751_v9 = vld [vmem:[%s22890_s26 + $0x1528] ss:$16 sps:$4 sm:$0xff]  }
 0x8fb   : > { %v21754_v0 = vld [vmem:[%s22890_s26 + $0x1728] ss:$16 sps:$4 sm:$0xff]   ;;  %v21759_v20 = vld [vmem:[%s22890_s26 + $0x150c] ss:$16 sps:$4 sm:$0xff]  }
 0x8fc   : > { %16001 = vmatpush1.bf16.msra.mxu0 %v21685_v24  ;;  %v21762_v44 = vld [vmem:[%s22890_s26 + $0x170c] ss:$16 sps:$4 sm:$0xff]   ;;  %v21757_v40 = vld [vmem:[%s22890_s26 + $0x1508] ss:$16 sps:$4 sm:$0xff]  }
 0x8fd   : > { %16042 = vmatpush1.bf16.msra.mxu1 %v21688_v53  ;;  %16002 = vmatprep.subr.bf16.mxu0 %v21693_v54  ;;  %v21760_v24 = vld [vmem:[%s22890_s26 + $0x1708] ss:$16 sps:$4 sm:$0xff]   ;;  %v21765_v53 = vld [vmem:[%s22890_s26 + $0x18ec] ss:$16 sps:$4 sm:$0xff]  }
 0x8fe   : > { %16043 = vmatprep.subr.bf16.mxu1 %v21696_v57  ;;  %v21768_v54 = vld [vmem:[%s22890_s26 + $0x1aec] ss:$16 sps:$4 sm:$0xff]   ;;  %v21763_v57 = vld [vmem:[%s22890_s26 + $0x18e8] ss:$16 sps:$4 sm:$0xff]  }
 0x900   : > { %16003 = vmatpush1.bf16.msra.mxu0 %v21691_v11  ;;  %v21766_v11 = vld [vmem:[%s22890_s26 + $0x1ae8] ss:$16 sps:$4 sm:$0xff]  }
 0x901   : > { %16044 = vmatpush1.bf16.msra.mxu1 %v21694_v45  ;;  %16004 = vmatprep.subr.bf16.mxu0 %v21699_v60  ;;  %v21771_v45 = vld [vmem:[%s22890_s26 + $0x18cc] ss:$16 sps:$4 sm:$0xff]  }
 0x902   : > { %16045 = vmatprep.subr.bf16.mxu1 %v21702_v50  ;;  %v21774_v60 = vld [vmem:[%s22890_s26 + $0x1acc] ss:$16 sps:$4 sm:$0xff]  }
 0x904   : > { %16005 = vmatpush1.bf16.msra.mxu0 %v21697_v61 }
 0x905   : > { %16046 = vmatpush1.bf16.msra.mxu1 %v21700_v19  ;;  %16006 = vmatprep.subr.bf16.mxu0 %v21705_v52  ;;  %v21769_v52 = vld [vmem:[%s22890_s26 + $0x18c8] ss:$16 sps:$4 sm:$0xff]  }
 0x906   : > { %16047 = vmatprep.subr.bf16.mxu1 %v21708_v56  ;;  %v21772_v56 = vld [vmem:[%s22890_s26 + $0x1ac8] ss:$16 sps:$4 sm:$0xff]  }
 0x908   : > { %16007 = vmatpush1.bf16.msra.mxu0 %v21703_v38 }
 0x909   : > { %16048 = vmatpush1.bf16.msra.mxu1 %v21706_v39  ;;  %16008 = vmatprep.subr.bf16.mxu0 %v21711_v62  ;;  %v21777_v62 = vld [vmem:[%s22890_s26 + $0x18ac] ss:$16 sps:$4 sm:$0xff]  }
 0x90a   : > { %16049 = vmatprep.subr.bf16.mxu1 %v21714_v58  ;;  %v21780_v58 = vld [vmem:[%s22890_s26 + $0x1aac] ss:$16 sps:$4 sm:$0xff]  }
 0x90c   : > { %16009 = vmatpush1.bf16.msra.mxu0 %v21709_v47 }
 0x90d   : > { %16050 = vmatpush1.bf16.msra.mxu1 %v21712_v21  ;;  %16010 = vmatprep.subr.bf16.mxu0 %v21717_v2  ;;  %v21775_v2 = vld [vmem:[%s22890_s26 + $0x18a8] ss:$16 sps:$4 sm:$0xff]  }
 0x90e   : > { %16051 = vmatprep.subr.bf16.mxu1 %v21720_v25  ;;  %v21778_v25 = vld [vmem:[%s22890_s26 + $0x1aa8] ss:$16 sps:$4 sm:$0xff]  }
 0x910   : > { %16011 = vmatpush2.bf16.msra.mxu0 %v21715_v15 }
 0x911   : > { %16052 = vmatpush2.bf16.msra.mxu1 %v21718_v3  ;;  %16012 = vmatprep.subr.bf16.mxu0 %v21723_v51  ;;  %v21784_v51 = vld [vmem:[%s22890_s26 + $0x1a88] ss:$16 sps:$4 sm:$0xff]  }
 0x912   : > { %16053 = vmatprep.subr.bf16.mxu1 %v21726_v43  ;;  %v21789_v43 = vld [vmem:[%s22890_s26 + $0x186c] ss:$16 sps:$4 sm:$0xff]  }
 0x914   : > { %16013 = vmatpush2.bf16.msra.mxu0 %v21721_v23  ;;  %v21792_v23 = vld [vmem:[%s22890_s26 + $0x1a6c] ss:$16 sps:$4 sm:$0xff]  }
 0x915   : > { %16054 = vmatpush2.bf16.msra.mxu1 %v21724_v27  ;;  %16014 = vmatprep.subr.bf16.mxu0 %v21729_v63  ;;  %v21787_v27 = vld [vmem:[%s22890_s26 + $0x1868] ss:$16 sps:$4 sm:$0xff]  }
 0x916   : > { %16055 = vmatprep.subr.bf16.mxu1 %v21732_v6  ;;  %v21790_v63 = vld [vmem:[%s22890_s26 + $0x1a68] ss:$16 sps:$4 sm:$0xff]   ;;  %v21795_v6 = vld [vmem:[%s22890_s26 + $0x184c] ss:$16 sps:$4 sm:$0xff]  }
 0x918   : > { %16015 = vmatpush2.bf16.msra.mxu0 %v21727_v7  ;;  %v21798_v7 = vld [vmem:[%s22890_s26 + $0x1a4c] ss:$16 sps:$4 sm:$0xff]  }
 0x919   : > { %16056 = vmatpush2.bf16.msra.mxu1 %v21730_v1  ;;  %16016 = vmatprep.subr.bf16.mxu0 %v21735_v31  ;;  %v21793_v1 = vld [vmem:[%s22890_s26 + $0x1848] ss:$16 sps:$4 sm:$0xff]  }
 0x91a   : > { %16057 = vmatprep.subr.bf16.mxu1 %v21738_v8  ;;  %v21796_v31 = vld [vmem:[%s22890_s26 + $0x1a48] ss:$16 sps:$4 sm:$0xff]   ;;  %v21801_v8 = vld [vmem:[%s22890_s26 + $0x182c] ss:$16 sps:$4 sm:$0xff]  }
 0x91c   : > { %16017 = vmatpush2.bf16.msra.mxu0 %v21733_v12  ;;  %v21804_v12 = vld [vmem:[%s22890_s26 + $0x1a2c] ss:$16 sps:$4 sm:$0xff]  }
 0x91d   : > { %16058 = vmatpush2.bf16.msra.mxu1 %v21736_v13  ;;  %16018 = vmatprep.subr.bf16.mxu0 %v21741_v55  ;;  %v21799_v13 = vld [vmem:[%s22890_s26 + $0x1828] ss:$16 sps:$4 sm:$0xff]  }
 0x91e   : > { %16059 = vmatprep.subr.bf16.mxu1 %v21744_v14  ;;  %v21802_v55 = vld [vmem:[%s22890_s26 + $0x1a28] ss:$16 sps:$4 sm:$0xff]   ;;  %v21807_v14 = vld [vmem:[%s22890_s26 + $0x180c] ss:$16 sps:$4 sm:$0xff]  }
 0x920   : > { %16019 = vmatpush2.bf16.msra.mxu0 %v21739_v17  ;;  %v21810_v17 = vld [vmem:[%s22890_s26 + $0x1a0c] ss:$16 sps:$4 sm:$0xff]  }
 0x921   : > { %16060 = vmatpush2.bf16.msra.mxu1 %v21742_v5  ;;  %16020 = vmatprep.subr.bf16.mxu0 %v21747_v41  ;;  %v21805_v5 = vld [vmem:[%s22890_s26 + $0x1808] ss:$16 sps:$4 sm:$0xff]  }
 0x922   : > { %16061 = vmatprep.subr.bf16.mxu1 %v21750_v35  ;;  %v21808_v41 = vld [vmem:[%s22890_s26 + $0x1a08] ss:$16 sps:$4 sm:$0xff]   ;;  %v21813_v35 = vld [vmem:[%s22890_s26 + $0x19ec] ss:$16 sps:$4 sm:$0xff]  }
 0x924   : > { %16021 = vmatpush2.bf16.msra.mxu0 %v21745_v30  ;;  %v21816_v30 = vld [vmem:[%s22890_s26 + $0x1bec] ss:$16 sps:$4 sm:$0xff]  }
 0x925   : > { %16062 = vmatpush2.bf16.msra.mxu1 %v21748_v32  ;;  %16022 = vmatprep.subr.bf16.mxu0 %v21753_v46  ;;  %v21811_v32 = vld [vmem:[%s22890_s26 + $0x19e8] ss:$16 sps:$4 sm:$0xff]  }
 0x926   : > { %16063 = vmatprep.subr.bf16.mxu1 %v21756_v36  ;;  %v21814_v46 = vld [vmem:[%s22890_s26 + $0x1be8] ss:$16 sps:$4 sm:$0xff]   ;;  %v21819_v36 = vld [vmem:[%s22890_s26 + $0x19cc] ss:$16 sps:$4 sm:$0xff]  }
 0x928   : > { %16023 = vmatpush2.bf16.msra.mxu0 %v21751_v9  ;;  %v21822_v9 = vld [vmem:[%s22890_s26 + $0x1bcc] ss:$16 sps:$4 sm:$0xff]  }
 0x929   : > { %16064 = vmatpush2.bf16.msra.mxu1 %v21754_v0  ;;  %16024 = vmatprep.subr.bf16.mxu0 %v21759_v20  ;;  %v21817_v0 = vld [vmem:[%s22890_s26 + $0x19c8] ss:$16 sps:$4 sm:$0xff]  }
 0x92a   : > { %16065 = vmatprep.subr.bf16.mxu1 %v21762_v44  ;;  %v21820_v20 = vld [vmem:[%s22890_s26 + $0x1bc8] ss:$16 sps:$4 sm:$0xff]   ;;  %v21825_v44 = vld [vmem:[%s22890_s26 + $0x19ac] ss:$16 sps:$4 sm:$0xff]  }
 0x92c   : > { %16025 = vmatpush2.bf16.msra.mxu0 %v21757_v40  ;;  %v21828_v40 = vld [vmem:[%s22890_s26 + $0x1bac] ss:$16 sps:$4 sm:$0xff]  }
 0x92d   : > { %16066 = vmatpush2.bf16.msra.mxu1 %v21760_v24  ;;  %16076 = vmatprep.subr.bf16.mxu0 %v21765_v53  ;;  %v21823_v24 = vld [vmem:[%s22890_s26 + $0x19a8] ss:$16 sps:$4 sm:$0xff]  }
 0x92e   : > { %16117 = vmatprep.subr.bf16.mxu1 %v21768_v54  ;;  %v21826_v53 = vld [vmem:[%s22890_s26 + $0x1ba8] ss:$16 sps:$4 sm:$0xff]   ;;  %v21831_v54 = vld [vmem:[%s22890_s26 + $0x198c] ss:$16 sps:$4 sm:$0xff]  }
 0x92f   : > { %v15782_v50 = vpop.f32.mrf.mxu0  ;;  %16027 = vmatmul.mubr.bf16.vlgmr.msra.gmra.mxu0 %v23669_v28 }
 0x930   : > { %v15823_v61 = vpop.f32.mrf.mxu1  ;;  %16068 = vmatmul.mubr.bf16.vlgmr.msra.gmra.mxu1 %v23673_v29  ;;  %v15783_v19 = vadd.f32 %v15782_v50, %v24258_v26  ;;  %16077 = vmatpush1.bf16.msra.mxu0 %v21763_v57  ;;  %v21834_v57 = vld [vmem:[%s22890_s26 + $0x1b8c] ss:$16 sps:$4 sm:$0xff]  }
 0x931   : > { %16118 = vmatpush1.bf16.msra.mxu1 %v21766_v11  ;;  %v15784_v38 = vpop.f32.mrf.mxu0  ;;  %16078 = vmatprep.subr.bf16.mxu0 %v21771_v45  ;;  %v21829_v11 = vld [vmem:[%s22890_s26 + $0x1988] ss:$16 sps:$4 sm:$0xff]   ;;  %v21840_v50 = vld [vmem:[%s22890_s26 + $0x1b6c] ss:$16 sps:$4 sm:$0xff]  }
 0x932   : > { %v15825_v39 = vpop.f32.mrf.mxu1  ;;  %16119 = vmatprep.subr.bf16.mxu1 %v21774_v60  ;;  %v24332_v47 = vadd.f32 %v15823_v61, %v15783_v19  ;;  %v15785_v28 = vadd.f32 %v15784_v38, %v24263_v34  ;;  %16108 = vmatprep.mubr.bf16.mxu0 %v23685_v59  ;;  %v21783_v59 = vld [vmem:[%s22890_s26 + $0x188c] ss:$16 sps:$4 sm:$0xff]   ;;  %v21781_v34 = vld [vmem:[%s22890_s26 + $0x1888] ss:$16 sps:$4 sm:$0xff]  }
 0x933   : > { %16149 = vmatprep.mubr.bf16.mxu1 %v23689_v33  ;;  %v15786_v29 = vpop.f32.mrf.mxu0  ;;  %v21786_v33 = vld [vmem:[%s22890_s26 + $0x1a8c] ss:$16 sps:$4 sm:$0xff]   ;;  %v21832_v45 = vld [vmem:[%s22890_s26 + $0x1b88] ss:$16 sps:$4 sm:$0xff]  }
 0x934   : > { %v15827_v26 = vpop.f32.mrf.mxu1  ;;  %v24337_v21 = vadd.f32 %v15825_v39, %v15785_v28  ;;  %16079 = vmatpush1.bf16.msra.mxu0 %v21769_v52  ;;  %v21837_v60 = vld [vmem:[%s22890_s26 + $0x196c] ss:$16 sps:$4 sm:$0xff]   ;;  %v21835_v61 = vld [vmem:[%s22890_s26 + $0x1968] ss:$16 sps:$4 sm:$0xff]  }
 0x935   : > { %16120 = vmatpush1.bf16.msra.mxu1 %v21772_v56  ;;  %v15787_v15 = vpop.f32.mrf.mxu0  ;;  %16080 = vmatprep.subr.bf16.mxu0 %v21777_v62  ;;  %v21838_v19 = vld [vmem:[%s22890_s26 + $0x1b68] ss:$16 sps:$4 sm:$0xff]   ;;  %v21843_v52 = vld [vmem:[%s22890_s26 + $0x194c] ss:$16 sps:$4 sm:$0xff]  }
 0x936   : > { %v15828_v3 = vpop.f32.mrf.mxu1  ;;  %16121 = vmatprep.subr.bf16.mxu1 %v21780_v58  ;;  %v21846_v56 = vld [vmem:[%s22890_s26 + $0x1b4c] ss:$16 sps:$4 sm:$0xff]   ;;  %v21841_v38 = vld [vmem:[%s22890_s26 + $0x1948] ss:$16 sps:$4 sm:$0xff]  }
 0x937   : > { %v21844_v39 = vld [vmem:[%s22890_s26 + $0x1b48] ss:$16 sps:$4 sm:$0xff]   ;;  %v21849_v62 = vld [vmem:[%s22890_s26 + $0x192c] ss:$16 sps:$4 sm:$0xff]  }
 0x938   : > { %16081 = vmatpush1.bf16.msra.mxu0 %v21775_v2  ;;  %v21852_v58 = vld [vmem:[%s22890_s26 + $0x1b2c] ss:$16 sps:$4 sm:$0xff]   ;;  %v21847_v28 = vld [vmem:[%s22890_s26 + $0x1928] ss:$16 sps:$4 sm:$0xff]  }
 0x939   : > { %16122 = vmatpush1.bf16.msra.mxu1 %v21778_v25  ;;  %16082 = vmatprep.subr.bf16.mxu0 %v21783_v59  ;;  %v21850_v29 = vld [vmem:[%s22890_s26 + $0x1b28] ss:$16 sps:$4 sm:$0xff]   ;;  %v21855_v26 = vld [vmem:[%s22890_s26 + $0x190c] ss:$16 sps:$4 sm:$0xff]  }
 0x93a   : > { %16123 = vmatprep.subr.bf16.mxu1 %v21786_v33  ;;  %v21858_v2 = vld [vmem:[%s22890_s26 + $0x1b0c] ss:$16 sps:$4 sm:$0xff]   ;;  %v21853_v25 = vld [vmem:[%s22890_s26 + $0x1908] ss:$16 sps:$4 sm:$0xff]  }
 0x93b   : > { %v21856_v15 = vld [vmem:[%s22890_s26 + $0x1b08] ss:$16 sps:$4 sm:$0xff]   ;;  %v21861_v3 = vld [vmem:[%s22890_s26 + $0x1cec] ss:$16 sps:$4 sm:$0xff]  }
 0x93c   : > { %16083 = vmatpush1.bf16.msra.mxu0 %v21781_v34  ;;  %v21864_v59 = vld [vmem:[%s22890_s26 + $0x1eec] ss:$16 sps:$4 sm:$0xff]   ;;  %v21859_v33 = vld [vmem:[%s22890_s26 + $0x1ce8] ss:$16 sps:$4 sm:$0xff]  }
 0x93d   : > { %16124 = vmatpush1.bf16.msra.mxu1 %v21784_v51  ;;  %16084 = vmatprep.subr.bf16.mxu0 %v21789_v43  ;;  %v21862_v34 = vld [vmem:[%s22890_s26 + $0x1ee8] ss:$16 sps:$4 sm:$0xff]   ;;  %v21867_v51 = vld [vmem:[%s22890_s26 + $0x1ccc] ss:$16 sps:$4 sm:$0xff]  }
 0x93e   : > { %16125 = vmatprep.subr.bf16.mxu1 %v21792_v23  ;;  %v21870_v43 = vld [vmem:[%s22890_s26 + $0x1ecc] ss:$16 sps:$4 sm:$0xff]  }
 0x940   : > { %16085 = vmatpush1.bf16.msra.mxu0 %v21787_v27 }
 0x941   : > { %16126 = vmatpush1.bf16.msra.mxu1 %v21790_v63  ;;  %16086 = vmatprep.subr.bf16.mxu0 %v21795_v6  ;;  %v21865_v6 = vld [vmem:[%s22890_s26 + $0x1cc8] ss:$16 sps:$4 sm:$0xff]  }
 0x942   : > { %16127 = vmatprep.subr.bf16.mxu1 %v21798_v7  ;;  %v21868_v7 = vld [vmem:[%s22890_s26 + $0x1ec8] ss:$16 sps:$4 sm:$0xff]  }
 0x944   : > { %16087 = vmatpush1.bf16.msra.mxu0 %v21793_v1 }
 0x945   : > { %16128 = vmatpush1.bf16.msra.mxu1 %v21796_v31  ;;  %16088 = vmatprep.subr.bf16.mxu0 %v21801_v8  ;;  %v21873_v8 = vld [vmem:[%s22890_s26 + $0x1cac] ss:$16 sps:$4 sm:$0xff]  }
 0x946   : > { %16129 = vmatprep.subr.bf16.mxu1 %v21804_v12  ;;  %v21876_v12 = vld [vmem:[%s22890_s26 + $0x1eac] ss:$16 sps:$4 sm:$0xff]  }
 0x948   : > { %16089 = vmatpush1.bf16.msra.mxu0 %v21799_v13 }
 0x949   : > { %16130 = vmatpush1.bf16.msra.mxu1 %v21802_v55  ;;  %16090 = vmatprep.subr.bf16.mxu0 %v21807_v14  ;;  %v21871_v14 = vld [vmem:[%s22890_s26 + $0x1ca8] ss:$16 sps:$4 sm:$0xff]  }
 0x94a   : > { %16131 = vmatprep.subr.bf16.mxu1 %v21810_v17  ;;  %v21874_v17 = vld [vmem:[%s22890_s26 + $0x1ea8] ss:$16 sps:$4 sm:$0xff]  }
 0x94c   : > { %16091 = vmatpush1.bf16.msra.mxu0 %v21805_v5 }
 0x94d   : > { %16132 = vmatpush1.bf16.msra.mxu1 %v21808_v41  ;;  %16092 = vmatprep.subr.bf16.mxu0 %v21813_v35  ;;  %v21880_v35 = vld [vmem:[%s22890_s26 + $0x1e88] ss:$16 sps:$4 sm:$0xff]  }
 0x94e   : > { %16133 = vmatprep.subr.bf16.mxu1 %v21816_v30  ;;  %v21885_v30 = vld [vmem:[%s22890_s26 + $0x1c6c] ss:$16 sps:$4 sm:$0xff]  }
 0x950   : > { %16093 = vmatpush2.bf16.msra.mxu0 %v21811_v32  ;;  %v21888_v32 = vld [vmem:[%s22890_s26 + $0x1e6c] ss:$16 sps:$4 sm:$0xff]  }
 0x951   : > { %16134 = vmatpush2.bf16.msra.mxu1 %v21814_v46  ;;  %16094 = vmatprep.subr.bf16.mxu0 %v21819_v36  ;;  %v21883_v46 = vld [vmem:[%s22890_s26 + $0x1c68] ss:$16 sps:$4 sm:$0xff]  }
 0x952   : > { %16135 = vmatprep.subr.bf16.mxu1 %v21822_v9  ;;  %v21886_v36 = vld [vmem:[%s22890_s26 + $0x1e68] ss:$16 sps:$4 sm:$0xff]   ;;  %v21891_v9 = vld [vmem:[%s22890_s26 + $0x1c4c] ss:$16 sps:$4 sm:$0xff]  }
 0x954   : > { %16095 = vmatpush2.bf16.msra.mxu0 %v21817_v0  ;;  %v21894_v0 = vld [vmem:[%s22890_s26 + $0x1e4c] ss:$16 sps:$4 sm:$0xff]  }
 0x955   : > { %16136 = vmatpush2.bf16.msra.mxu1 %v21820_v20  ;;  %16096 = vmatprep.subr.bf16.mxu0 %v21825_v44  ;;  %v21889_v20 = vld [vmem:[%s22890_s26 + $0x1c48] ss:$16 sps:$4 sm:$0xff]  }
 0x956   : > { %16137 = vmatprep.subr.bf16.mxu1 %v21828_v40  ;;  %v21892_v44 = vld [vmem:[%s22890_s26 + $0x1e48] ss:$16 sps:$4 sm:$0xff]   ;;  %v21897_v40 = vld [vmem:[%s22890_s26 + $0x1c2c] ss:$16 sps:$4 sm:$0xff]  }
 0x958   : > { %16097 = vmatpush2.bf16.msra.mxu0 %v21823_v24  ;;  %v21900_v24 = vld [vmem:[%s22890_s26 + $0x1e2c] ss:$16 sps:$4 sm:$0xff]  }
 0x959   : > { %16138 = vmatpush2.bf16.msra.mxu1 %v21826_v53  ;;  %16098 = vmatprep.subr.bf16.mxu0 %v21831_v54  ;;  %v21895_v53 = vld [vmem:[%s22890_s26 + $0x1c28] ss:$16 sps:$4 sm:$0xff]  }
 0x95a   : > { %16139 = vmatprep.subr.bf16.mxu1 %v21834_v57  ;;  %v21898_v54 = vld [vmem:[%s22890_s26 + $0x1e28] ss:$16 sps:$4 sm:$0xff]   ;;  %v21903_v57 = vld [vmem:[%s22890_s26 + $0x1c0c] ss:$16 sps:$4 sm:$0xff]  }
 0x95c   : > { %16099 = vmatpush2.bf16.msra.mxu0 %v21829_v11  ;;  %v21906_v11 = vld [vmem:[%s22890_s26 + $0x1e0c] ss:$16 sps:$4 sm:$0xff]  }
 0x95d   : > { %16140 = vmatpush2.bf16.msra.mxu1 %v21832_v45  ;;  %16100 = vmatprep.subr.bf16.mxu0 %v21837_v60  ;;  %v21901_v45 = vld [vmem:[%s22890_s26 + $0x1c08] ss:$16 sps:$4 sm:$0xff]  }
 0x95e   : > { %16141 = vmatprep.subr.bf16.mxu1 %v21840_v50  ;;  %v21904_v60 = vld [vmem:[%s22890_s26 + $0x1e08] ss:$16 sps:$4 sm:$0xff]   ;;  %v21909_v50 = vld [vmem:[%s22890_s26 + $0x1dec] ss:$16 sps:$4 sm:$0xff]  }
 0x960   : > { %16101 = vmatpush2.bf16.msra.mxu0 %v21835_v61  ;;  %v21912_v61 = vld [vmem:[%s22890_s26 + $0x1fec] ss:$16 sps:$4 sm:$0xff]  }
 0x961   : > { %16142 = vmatpush2.bf16.msra.mxu1 %v21838_v19  ;;  %16102 = vmatprep.subr.bf16.mxu0 %v21843_v52  ;;  %v21907_v19 = vld [vmem:[%s22890_s26 + $0x1de8] ss:$16 sps:$4 sm:$0xff]  }
 0x962   : > { %16143 = vmatprep.subr.bf16.mxu1 %v21846_v56  ;;  %v21910_v52 = vld [vmem:[%s22890_s26 + $0x1fe8] ss:$16 sps:$4 sm:$0xff]   ;;  %v21915_v56 = vld [vmem:[%s22890_s26 + $0x1dcc] ss:$16 sps:$4 sm:$0xff]  }
 0x964   : > { %16103 = vmatpush2.bf16.msra.mxu0 %v21841_v38  ;;  %v21918_v38 = vld [vmem:[%s22890_s26 + $0x1fcc] ss:$16 sps:$4 sm:$0xff]  }
 0x965   : > { %16144 = vmatpush2.bf16.msra.mxu1 %v21844_v39  ;;  %16104 = vmatprep.subr.bf16.mxu0 %v21849_v62  ;;  %v21913_v39 = vld [vmem:[%s22890_s26 + $0x1dc8] ss:$16 sps:$4 sm:$0xff]  }
 0x966   : > { %16145 = vmatprep.subr.bf16.mxu1 %v21852_v58  ;;  %v21916_v62 = vld [vmem:[%s22890_s26 + $0x1fc8] ss:$16 sps:$4 sm:$0xff]   ;;  %v21921_v58 = vld [vmem:[%s22890_s26 + $0x1dac] ss:$16 sps:$4 sm:$0xff]  }
 0x968   : > { %16105 = vmatpush2.bf16.msra.mxu0 %v21847_v28  ;;  %v21924_v28 = vld [vmem:[%s22890_s26 + $0x1fac] ss:$16 sps:$4 sm:$0xff]  }
 0x969   : > { %16146 = vmatpush2.bf16.msra.mxu1 %v21850_v29  ;;  %16106 = vmatprep.subr.bf16.mxu0 %v21855_v26  ;;  %v21919_v29 = vld [vmem:[%s22890_s26 + $0x1da8] ss:$16 sps:$4 sm:$0xff]  }
 0x96a   : > { %16147 = vmatprep.subr.bf16.mxu1 %v21858_v2  ;;  %v21922_v26 = vld [vmem:[%s22890_s26 + $0x1fa8] ss:$16 sps:$4 sm:$0xff]   ;;  %v21927_v2 = vld [vmem:[%s22890_s26 + $0x1d8c] ss:$16 sps:$4 sm:$0xff]  }
 0x96c   : > { %16107 = vmatpush2.bf16.msra.mxu0 %v21853_v25  ;;  %v21930_v25 = vld [vmem:[%s22890_s26 + $0x1f8c] ss:$16 sps:$4 sm:$0xff]  }
 0x96d   : > { %16148 = vmatpush2.bf16.msra.mxu1 %v21856_v15  ;;  %16158 = vmatprep.subr.bf16.mxu0 %v21861_v3  ;;  %v21925_v15 = vld [vmem:[%s22890_s26 + $0x1d88] ss:$16 sps:$4 sm:$0xff]  }
 0x96e   : > { %16199 = vmatprep.subr.bf16.mxu1 %v21864_v59  ;;  %v21928_v3 = vld [vmem:[%s22890_s26 + $0x1f88] ss:$16 sps:$4 sm:$0xff]   ;;  %v21933_v59 = vld [vmem:[%s22890_s26 + $0x1d6c] ss:$16 sps:$4 sm:$0xff]  }
 0x96f   : > { %v15864_v23 = vpop.f32.mrf.mxu0  ;;  %16109 = vmatmul.mubr.bf16.vlgmr.msra.gmra.mxu0 %v23767_v22 }
 0x970   : > { %v15905_v27 = vpop.f32.mrf.mxu1  ;;  %16150 = vmatmul.mubr.bf16.vlgmr.msra.gmra.mxu1 %v23771_v49  ;;  %v15865_v63 = vadd.f32 %v15864_v23, %v24332_v47  ;;  %16159 = vmatpush1.bf16.msra.mxu0 %v21859_v33  ;;  %v21936_v33 = vld [vmem:[%s22890_s26 + $0x1f6c] ss:$16 sps:$4 sm:$0xff]  }
 0x971   : > { %16200 = vmatpush1.bf16.msra.mxu1 %v21862_v34  ;;  %v15866_v1 = vpop.f32.mrf.mxu0  ;;  %16160 = vmatprep.subr.bf16.mxu0 %v21867_v51  ;;  %v21931_v34 = vld [vmem:[%s22890_s26 + $0x1d68] ss:$16 sps:$4 sm:$0xff]   ;;  %v21942_v23 = vld [vmem:[%s22890_s26 + $0x1f4c] ss:$16 sps:$4 sm:$0xff]  }
 0x972   : > { %v15907_v31 = vpop.f32.mrf.mxu1  ;;  %16201 = vmatprep.subr.bf16.mxu1 %v21870_v43  ;;  %v24406_v13 = vadd.f32 %v15905_v27, %v15865_v63  ;;  %v15867_v22 = vadd.f32 %v15866_v1, %v24337_v21  ;;  %16190 = vmatprep.mubr.bf16.mxu0 %v23779_v42  ;;  %v21879_v42 = vld [vmem:[%s22890_s26 + $0x1c8c] ss:$16 sps:$4 sm:$0xff]   ;;  %v21877_v21 = vld [vmem:[%s22890_s26 + $0x1c88] ss:$16 sps:$4 sm:$0xff]  }
 0x973   : > { %16231 = vmatprep.mubr.bf16.mxu1 %v23783_v16  ;;  %v15868_v49 = vpop.f32.mrf.mxu0  ;;  %v21882_v16 = vld [vmem:[%s22890_s26 + $0x1e8c] ss:$16 sps:$4 sm:$0xff]   ;;  %v21934_v51 = vld [vmem:[%s22890_s26 + $0x1f68] ss:$16 sps:$4 sm:$0xff]  }
 0x974   : > { %v15909_v47 = vpop.f32.mrf.mxu1  ;;  %v24411_v55 = vadd.f32 %v15907_v31, %v15867_v22  ;;  %16161 = vmatpush1.bf16.msra.mxu0 %v21865_v6  ;;  %v21939_v43 = vld [vmem:[%s22890_s26 + $0x1d4c] ss:$16 sps:$4 sm:$0xff]   ;;  %v21937_v27 = vld [vmem:[%s22890_s26 + $0x1d48] ss:$16 sps:$4 sm:$0xff]  }
 0x975   : > { %16202 = vmatpush1.bf16.msra.mxu1 %v21868_v7  ;;  %v15869_v5 = vpop.f32.mrf.mxu0  ;;  %16162 = vmatprep.subr.bf16.mxu0 %v21873_v8  ;;  %v21940_v63 = vld [vmem:[%s22890_s26 + $0x1f48] ss:$16 sps:$4 sm:$0xff]   ;;  %v21945_v6 = vld [vmem:[%s22890_s26 + $0x1d2c] ss:$16 sps:$4 sm:$0xff]   ;;  %v21957_v47 = vld [vmem:[%s22899_s29 + $0xe4] ss:$16 sps:$4 sm:$0xff]  }
 0x976   : > { %v15910_v41 = vpop.f32.mrf.mxu1  ;;  %16203 = vmatprep.subr.bf16.mxu1 %v21876_v12  ;;  %v21948_v7 = vld [vmem:[%s22890_s26 + $0x1f2c] ss:$16 sps:$4 sm:$0xff]   ;;  %v21943_v1 = vld [vmem:[%s22890_s26 + $0x1d28] ss:$16 sps:$4 sm:$0xff]  }
 0x977   : > { %v21946_v31 = vld [vmem:[%s22890_s26 + $0x1f28] ss:$16 sps:$4 sm:$0xff]   ;;  %v21951_v8 = vld [vmem:[%s22890_s26 + $0x1d0c] ss:$16 sps:$4 sm:$0xff]  }
 0x978   : > { %16163 = vmatpush1.bf16.msra.mxu0 %v21871_v14  ;;  %v21954_v12 = vld [vmem:[%s22890_s26 + $0x1f0c] ss:$16 sps:$4 sm:$0xff]   ;;  %v21949_v22 = vld [vmem:[%s22890_s26 + $0x1d08] ss:$16 sps:$4 sm:$0xff]   ;;  %v21955_v14 = vld [vmem:[%s22899_s29 + $0xe0] ss:$16 sps:$4 sm:$0xff]  }
 0x979   : > { %16204 = vmatpush1.bf16.msra.mxu1 %v21874_v17  ;;  %16164 = vmatprep.subr.bf16.mxu0 %v21879_v42  ;;  %v21952_v49 = vld [vmem:[%s22890_s26 + $0x1f08] ss:$16 sps:$4 sm:$0xff]   ;;  %v21960_v17 = vld [vmem:[%s22899_s29 + $0xc4] ss:$16 sps:$4 sm:$0xff]  }
 0x97a   : > { %16205 = vmatprep.subr.bf16.mxu1 %v21882_v16  ;;  %v22147_v5 = vld [vmem:[%s22913_s3 + $0x8] sm:$0xff] }
 0x97b   : > { %v24471_v41 = vpack.c.bf16 %v22147_v5, %v22147_v5  ;;  %v21994_v5 = vld [vmem:[%s22899_s29 + $0x140] ss:$16 sps:$4 sm:$0xff]  }
 0x97c   : > { %16165 = vmatpush1.bf16.msra.mxu0 %v21877_v21 }
 0x97d   : > { %16206 = vmatpush1.bf16.msra.mxu1 %v21880_v35  ;;  %16166 = vmatprep.subr.bf16.mxu0 %v21885_v30  ;;  %v21958_v35 = vld [vmem:[%s22899_s29 + $0xc0] ss:$16 sps:$4 sm:$0xff]  }
 0x97e   : > { %16207 = vmatprep.subr.bf16.mxu1 %v21888_v32 }
 0x980   : > { %16167 = vmatpush1.bf16.msra.mxu0 %v21883_v46  ;;  %v21963_v46 = vld [vmem:[%s22899_s29 + $0xa4] ss:$16 sps:$4 sm:$0xff]  }
 0x981   : > { %16208 = vmatpush1.bf16.msra.mxu1 %v21886_v36  ;;  %16168 = vmatprep.subr.bf16.mxu0 %v21891_v9 }
 0x982   : > { %16209 = vmatprep.subr.bf16.mxu1 %v21894_v0  ;;  %v21961_v0 = vld [vmem:[%s22899_s29 + $0xa0] ss:$16 sps:$4 sm:$0xff]  }
 0x984   : > { %16169 = vmatpush1.bf16.msra.mxu0 %v21889_v20 }
 0x985   : > { %16210 = vmatpush1.bf16.msra.mxu1 %v21892_v44  ;;  %16170 = vmatprep.subr.bf16.mxu0 %v21897_v40  ;;  %v21966_v40 = vld [vmem:[%s22899_s29 + $0x84] ss:$16 sps:$4 sm:$0xff]  }
 0x986   : > { %16211 = vmatprep.subr.bf16.mxu1 %v21900_v24  ;;  %v22051_v24 = vld [vmem:[%s22899_s29 + $0x2e0] ss:$16 sps:$4 sm:$0xff]  }
 0x988   : > { %16171 = vmatpush1.bf16.msra.mxu0 %v21895_v53  ;;  %v22053_v53 = vld [vmem:[%s22899_s29 + $0x2e4] ss:$16 sps:$4 sm:$0xff]  }
 0x989   : > { %16212 = vmatpush1.bf16.msra.mxu1 %v21898_v54  ;;  %16172 = vmatprep.subr.bf16.mxu0 %v21903_v57  ;;  %v22056_v54 = vld [vmem:[%s22899_s29 + $0x2c4] ss:$16 sps:$4 sm:$0xff]   ;;  %v22054_v57 = vld [vmem:[%s22899_s29 + $0x2c0] ss:$16 sps:$4 sm:$0xff]  }
 0x98a   : > { %16213 = vmatprep.subr.bf16.mxu1 %v21906_v11  ;;  %v21969_v11 = vld [vmem:[%s22899_s29 + $0x64] ss:$16 sps:$4 sm:$0xff]  }
 0x98c   : > { %16173 = vmatpush1.bf16.msra.mxu0 %v21901_v45  ;;  %v22059_v45 = vld [vmem:[%s22899_s29 + $0x2a4] ss:$16 sps:$4 sm:$0xff]  }
 0x98d   : > { %16214 = vmatpush1.bf16.msra.mxu1 %v21904_v60  ;;  %16174 = vmatprep.subr.bf16.mxu0 %v21909_v50  ;;  %v21967_v60 = vld [vmem:[%s22899_s29 + $0x60] ss:$16 sps:$4 sm:$0xff]  }
 0x98e   : > { %16215 = vmatprep.subr.bf16.mxu1 %v21912_v61  ;;  %v22057_v50 = vld [vmem:[%s22899_s29 + $0x2a0] ss:$16 sps:$4 sm:$0xff]   ;;  %v21972_v61 = vld [vmem:[%s22899_s29 + $0x44] ss:$16 sps:$4 sm:$0xff]  }
 0x990   : > { %16175 = vmatpush2.bf16.msra.mxu0 %v21907_v19  ;;  %v22062_v19 = vld [vmem:[%s22899_s29 + $0x284] ss:$16 sps:$4 sm:$0xff]  }
 0x991   : > { %16216 = vmatpush2.bf16.msra.mxu1 %v21910_v52  ;;  %16176 = vmatprep.subr.bf16.mxu0 %v21915_v56  ;;  %v21970_v52 = vld [vmem:[%s22899_s29 + $0x40] ss:$16 sps:$4 sm:$0xff]  }
 0x992   : > { %16217 = vmatprep.subr.bf16.mxu1 %v21918_v38  ;;  %v22060_v56 = vld [vmem:[%s22899_s29 + $0x280] ss:$16 sps:$4 sm:$0xff]   ;;  %v21975_v38 = vld [vmem:[%s22899_s29 + $0x24] ss:$16 sps:$4 sm:$0xff]  }
 0x994   : > { %16177 = vmatpush2.bf16.msra.mxu0 %v21913_v39  ;;  %v22065_v39 = vld [vmem:[%s22899_s29 + $0x264] ss:$16 sps:$4 sm:$0xff]  }
 0x995   : > { %16218 = vmatpush2.bf16.msra.mxu1 %v21916_v62  ;;  %16178 = vmatprep.subr.bf16.mxu0 %v21921_v58  ;;  %v21973_v62 = vld [vmem:[%s22899_s29 + $0x20] ss:$16 sps:$4 sm:$0xff]  }
 0x996   : > { %16219 = vmatprep.subr.bf16.mxu1 %v21924_v28  ;;  %v22063_v58 = vld [vmem:[%s22899_s29 + $0x260] ss:$16 sps:$4 sm:$0xff]   ;;  %v21978_v28 = vld [vmem:[%s22899_s29 + $0x4] ss:$16 sps:$4 sm:$0xff]  }
 0x998   : > { %16179 = vmatpush2.bf16.msra.mxu0 %v21919_v29  ;;  %v22068_v29 = vld [vmem:[%s22899_s29 + $0x244] ss:$16 sps:$4 sm:$0xff]  }
 0x999   : > { %16220 = vmatpush2.bf16.msra.mxu1 %v21922_v26  ;;  %16180 = vmatprep.subr.bf16.mxu0 %v21927_v2  ;;  %v21976_v26 = vld [vmem:[%s22899_s29] ss:$16 sps:$4 sm:$0xff]  }
 0x99a   : > { %16221 = vmatprep.subr.bf16.mxu1 %v21930_v25  ;;  %v22066_v2 = vld [vmem:[%s22899_s29 + $0x240] ss:$16 sps:$4 sm:$0xff]   ;;  %v21981_v25 = vld [vmem:[%s22899_s29 + $0x1e4] ss:$16 sps:$4 sm:$0xff]  }
 0x99c   : > { %16181 = vmatpush2.bf16.msra.mxu0 %v21925_v15  ;;  %v22071_v15 = vld [vmem:[%s22899_s29 + $0x224] ss:$16 sps:$4 sm:$0xff]  }
 0x99d   : > { %16222 = vmatpush2.bf16.msra.mxu1 %v21928_v3  ;;  %16182 = vmatprep.subr.bf16.mxu0 %v21933_v59  ;;  %v21979_v3 = vld [vmem:[%s22899_s29 + $0x1e0] ss:$16 sps:$4 sm:$0xff]  }
 0x99e   : > { %16223 = vmatprep.subr.bf16.mxu1 %v21936_v33  ;;  %v22069_v59 = vld [vmem:[%s22899_s29 + $0x220] ss:$16 sps:$4 sm:$0xff]   ;;  %v21984_v33 = vld [vmem:[%s22899_s29 + $0x1c4] ss:$16 sps:$4 sm:$0xff]  }
 0x9a0   : > { %16183 = vmatpush2.bf16.msra.mxu0 %v21931_v34  ;;  %v22074_v34 = vld [vmem:[%s22899_s29 + $0x204] ss:$16 sps:$4 sm:$0xff]  }
 0x9a1   : > { %16224 = vmatpush2.bf16.msra.mxu1 %v21934_v51  ;;  %16184 = vmatprep.subr.bf16.mxu0 %v21939_v43  ;;  %v21982_v51 = vld [vmem:[%s22899_s29 + $0x1c0] ss:$16 sps:$4 sm:$0xff]  }
 0x9a2   : > { %16225 = vmatprep.subr.bf16.mxu1 %v21942_v23  ;;  %v22072_v43 = vld [vmem:[%s22899_s29 + $0x200] ss:$16 sps:$4 sm:$0xff]   ;;  %v21987_v23 = vld [vmem:[%s22899_s29 + $0x1a4] ss:$16 sps:$4 sm:$0xff]  }
 0x9a4   : > { %16185 = vmatpush2.bf16.msra.mxu0 %v21937_v27  ;;  %v22077_v27 = vld [vmem:[%s22899_s29 + $0x3e4] ss:$16 sps:$4 sm:$0xff]  }
 0x9a5   : > { %16226 = vmatpush2.bf16.msra.mxu1 %v21940_v63  ;;  %16186 = vmatprep.subr.bf16.mxu0 %v21945_v6  ;;  %v21985_v63 = vld [vmem:[%s22899_s29 + $0x1a0] ss:$16 sps:$4 sm:$0xff]  }
 0x9a6   : > { %16227 = vmatprep.subr.bf16.mxu1 %v21948_v7  ;;  %v22075_v6 = vld [vmem:[%s22899_s29 + $0x3e0] ss:$16 sps:$4 sm:$0xff]   ;;  %v21990_v7 = vld [vmem:[%s22899_s29 + $0x184] ss:$16 sps:$4 sm:$0xff]  }
 0x9a8   : > { %16187 = vmatpush2.bf16.msra.mxu0 %v21943_v1  ;;  %v22080_v1 = vld [vmem:[%s22899_s29 + $0x3c4] ss:$16 sps:$4 sm:$0xff]  }
 0x9a9   : > { %16228 = vmatpush2.bf16.msra.mxu1 %v21946_v31  ;;  %16188 = vmatprep.subr.bf16.mxu0 %v21951_v8  ;;  %v21988_v31 = vld [vmem:[%s22899_s29 + $0x180] ss:$16 sps:$4 sm:$0xff]  }
 0x9aa   : > { %16229 = vmatprep.subr.bf16.mxu1 %v21954_v12  ;;  %v22078_v8 = vld [vmem:[%s22899_s29 + $0x3c0] ss:$16 sps:$4 sm:$0xff]   ;;  %v21993_v12 = vld [vmem:[%s22899_s29 + $0x164] ss:$16 sps:$4 sm:$0xff]  }
 0x9ac   : > { %16189 = vmatpush2.bf16.msra.mxu0 %v21949_v22  ;;  %v22083_v22 = vld [vmem:[%s22899_s29 + $0x3a4] ss:$16 sps:$4 sm:$0xff]  }
 0x9ad   : > { %16230 = vmatpush2.bf16.msra.mxu1 %v21952_v49  ;;  %17077 = vmatprep.subr.bf16.mxu0 %v21957_v47  ;;  %v21991_v49 = vld [vmem:[%s22899_s29 + $0x160] ss:$16 sps:$4 sm:$0xff]  }
 0x9ae   : > { %17118 = vmatprep.subr.bf16.mxu1 %v22053_v53  ;;  %v22081_v47 = vld [vmem:[%s22899_s29 + $0x3a0] ss:$16 sps:$4 sm:$0xff]   ;;  %v22006_v53 = vld [vmem:[%s22899_s29 + $0xc8] ss:$16 sps:$4 sm:$0xff]  }
 0x9af   : > { %v15946_v42 = vpop.f32.mrf.mxu0  ;;  %16191 = vmatmul.mubr.bf16.vlgmr.msra.gmra.mxu0 %v23857_v4 }
 0x9b0   : > { %v15987_v16 = vpop.f32.mrf.mxu1  ;;  %16232 = vmatmul.mubr.bf16.vlgmr.msra.gmra.mxu1 %v23861_v10  ;;  %v15947_v21 = vadd.f32 %v15946_v42, %v24406_v13  ;;  %17078 = vmatpush1.bf16.msra.mxu0 %v21955_v14  ;;  %v21996_v14 = vld [vmem:[%s22899_s29 + $0x144] ss:$16 sps:$4 sm:$0xff]   ;;  %v22084_v42 = vld [vmem:[%s22899_s29 + $0x380] ss:$16 sps:$4 sm:$0xff]  }
 0x9b1   : > { %17109 = vmatprep.mubr.bf16.mxu0 %v24471_v41  ;;  %v15948_v30 = vpop.f32.mrf.mxu0  ;;  %17079 = vmatprep.subr.bf16.mxu0 %v21960_v17  ;;  %v22086_v17 = vld [vmem:[%s22899_s29 + $0x384] ss:$16 sps:$4 sm:$0xff]  }
 0x9b2   : > { %v15989_v32 = vpop.f32.mrf.mxu1  ;;  %v24479_v36 = vadd.f32 %v15987_v16, %v15947_v21  ;;  %v15949_v4 = vadd.f32 %v15948_v30, %v24411_v55  ;;  %v21964_v55 = vld [vmem:[%s22899_s29 + $0x80] ss:$16 sps:$4 sm:$0xff]   ;;  %17119 = vmatpush1.bf16.msra.mxu1 %v22051_v24  ;;  %v21999_v16 = vld [vmem:[%s22899_s29 + $0x124] ss:$16 sps:$4 sm:$0xff]  }
 0x9b3   : > { %v15950_v10 = vpop.f32.mrf.mxu0  ;;  %17120 = vmatprep.subr.bf16.mxu1 %v22056_v54  ;;  %v22089_v21 = vld [vmem:[%s22899_s29 + $0x364] ss:$16 sps:$4 sm:$0xff]   ;;  %v22087_v30 = vld [vmem:[%s22899_s29 + $0x360] ss:$16 sps:$4 sm:$0xff]  }
 0x9b4   : > { %v15991_v13 = vpop.f32.mrf.mxu1  ;;  %v24482_v9 = vadd.f32 %v15989_v32, %v15949_v4  ;;  %17080 = vmatpush1.bf16.msra.mxu0 %v21958_v35  ;;  %v21997_v35 = vld [vmem:[%s22899_s29 + $0x120] ss:$16 sps:$4 sm:$0xff]   ;;  %v22002_v32 = vld [vmem:[%s22899_s29 + $0x104] ss:$16 sps:$4 sm:$0xff]   ;;  %v22005_v4 = vld [vmem:[%s22899_s29 + $0xec] ss:$16 sps:$4 sm:$0xff]  }
 0x9b5   : > { %v15951_v20 = vpop.f32.mrf.mxu0  ;;  %17081 = vmatprep.subr.bf16.mxu0 %v21963_v46  ;;  %v22000_v46 = vld [vmem:[%s22899_s29 + $0x100] ss:$16 sps:$4 sm:$0xff]   ;;  %v22003_v10 = vld [vmem:[%s22899_s29 + $0xe8] ss:$16 sps:$4 sm:$0xff]   ;;  %v22092_v54 = vld [vmem:[%s22899_s29 + $0x344] ss:$16 sps:$4 sm:$0xff]  }
 0x9b6   : > { %v15992_v44 = vpop.f32.mrf.mxu1  ;;  %17121 = vmatpush1.bf16.msra.mxu1 %v22054_v57  ;;  %v22148_v13 = vld [vmem:[%s22913_s3] sm:$0xff] }
 0x9b7   : > { %17122 = vmatprep.subr.bf16.mxu1 %v22059_v45  ;;  %v22008_v20 = vld [vmem:[%s22899_s29 + $0xcc] ss:$16 sps:$4 sm:$0xff]   ;;  %v22090_v45 = vld [vmem:[%s22899_s29 + $0x340] ss:$16 sps:$4 sm:$0xff]  }
 0x9b8   : > { %17082 = vmatpush1.bf16.msra.mxu0 %v21961_v0  ;;  %v24540_v0 = vpack.c.bf16 %v22148_v13, %v22148_v13  ;;  %v24591_v13 = vsub.s32 2, %v24083_v18 }
 0x9b9   : > { %17083 = vmatprep.subr.bf16.mxu0 %v21966_v40 }
 0x9ba   : > { %17123 = vmatpush1.bf16.msra.mxu1 %v22057_v50 }
 0x9bb   : > { %17124 = vmatprep.subr.bf16.mxu1 %v22062_v19  ;;  %v22009_v19 = vld [vmem:[%s22899_s29 + $0xa8] ss:$16 sps:$4 sm:$0xff]  }
 0x9bc   : > { %17084 = vmatpush1.bf16.msra.mxu0 %v21964_v55 }
 0x9bd   : > { %17085 = vmatprep.subr.bf16.mxu0 %v21969_v11  ;;  %v22011_v11 = vld [vmem:[%s22899_s29 + $0xac] ss:$16 sps:$4 sm:$0xff]  }
 0x9be   : > { %17125 = vmatpush1.bf16.msra.mxu1 %v22060_v56 }
 0x9bf   : > { %17126 = vmatprep.subr.bf16.mxu1 %v22065_v39  ;;  %v22014_v39 = vld [vmem:[%s22899_s29 + $0x8c] ss:$16 sps:$4 sm:$0xff]  }
 0x9c0   : > { %17086 = vmatpush1.bf16.msra.mxu0 %v21967_v60 }
 0x9c1   : > { %17087 = vmatprep.subr.bf16.mxu0 %v21972_v61 }
 0x9c2   : > { %17127 = vmatpush1.bf16.msra.mxu1 %v22063_v58  ;;  %v22098_v58 = vld [vmem:[%s22899_s29 + $0x304] ss:$16 sps:$4 sm:$0xff]  }
 0x9c3   : > { %17128 = vmatprep.subr.bf16.mxu1 %v22068_v29  ;;  %v22096_v29 = vld [vmem:[%s22899_s29 + $0x300] ss:$16 sps:$4 sm:$0xff]  }
 0x9c4   : > { %17088 = vmatpush1.bf16.msra.mxu0 %v21970_v52  ;;  %v22095_v52 = vld [vmem:[%s22899_s29 + $0x324] ss:$16 sps:$4 sm:$0xff]  }
 0x9c5   : > { %17089 = vmatprep.subr.bf16.mxu0 %v21975_v38 }
 0x9c6   : > { %17129 = vmatpush1.bf16.msra.mxu1 %v22066_v2  ;;  %v22101_v2 = vld [vmem:[%s22899_s29 + $0x2ec] ss:$16 sps:$4 sm:$0xff]  }
 0x9c7   : > { %17130 = vmatprep.subr.bf16.mxu1 %v22071_v15  ;;  %v22018_v15 = vld [vmem:[%s22899_s29 + $0x48] ss:$16 sps:$4 sm:$0xff]  }
 0x9c8   : > { %17090 = vmatpush1.bf16.msra.mxu0 %v21973_v62  ;;  %v22012_v62 = vld [vmem:[%s22899_s29 + $0x88] ss:$16 sps:$4 sm:$0xff]  }
 0x9c9   : > { %17091 = vmatprep.subr.bf16.mxu0 %v21978_v28  ;;  %v22017_v28 = vld [vmem:[%s22899_s29 + $0x6c] ss:$16 sps:$4 sm:$0xff]  }
 0x9ca   : > { %17131 = vmatpush1.bf16.msra.mxu1 %v22069_v59  ;;  %v22021_v59 = vld [vmem:[%s22899_s29 + $0x28] ss:$16 sps:$4 sm:$0xff]  }
 0x9cb   : > { %17132 = vmatprep.subr.bf16.mxu1 %v22074_v34  ;;  %v22024_v34 = vld [vmem:[%s22899_s29 + $0x8] ss:$16 sps:$4 sm:$0xff]  }
 0x9cc   : > { %17092 = vmatpush1.bf16.msra.mxu0 %v21976_v26  ;;  %v22015_v26 = vld [vmem:[%s22899_s29 + $0x68] ss:$16 sps:$4 sm:$0xff]  }
 0x9cd   : > { %17093 = vmatprep.subr.bf16.mxu0 %v21981_v25  ;;  %v22020_v25 = vld [vmem:[%s22899_s29 + $0x4c] ss:$16 sps:$4 sm:$0xff]  }
 0x9ce   : > { %17133 = vmatpush1.bf16.msra.mxu1 %v22072_v43  ;;  %v22027_v43 = vld [vmem:[%s22899_s29 + $0x1e8] ss:$16 sps:$4 sm:$0xff]  }
 0x9cf   : > { %17134 = vmatprep.subr.bf16.mxu1 %v22077_v27  ;;  %v22030_v27 = vld [vmem:[%s22899_s29 + $0x1c8] ss:$16 sps:$4 sm:$0xff]  }
 0x9d0   : > { %17094 = vmatpush2.bf16.msra.mxu0 %v21979_v3  ;;  %v22023_v3 = vld [vmem:[%s22899_s29 + $0x2c] ss:$16 sps:$4 sm:$0xff]  }
 0x9d1   : > { %17095 = vmatprep.subr.bf16.mxu0 %v21984_v33  ;;  %v22026_v33 = vld [vmem:[%s22899_s29 + $0xc] ss:$16 sps:$4 sm:$0xff]  }
 0x9d2   : > { %17135 = vmatpush2.bf16.msra.mxu1 %v22075_v6  ;;  %v22033_v6 = vld [vmem:[%s22899_s29 + $0x1a8] ss:$16 sps:$4 sm:$0xff]  }
 0x9d3   : > { %17136 = vmatprep.subr.bf16.mxu1 %v22080_v1  ;;  %v22036_v1 = vld [vmem:[%s22899_s29 + $0x188] ss:$16 sps:$4 sm:$0xff]  }
 0x9d4   : > { %17096 = vmatpush2.bf16.msra.mxu0 %v21982_v51  ;;  %v22029_v51 = vld [vmem:[%s22899_s29 + $0x1ec] ss:$16 sps:$4 sm:$0xff]  }
 0x9d5   : > { %17097 = vmatprep.subr.bf16.mxu0 %v21987_v23  ;;  %v22032_v23 = vld [vmem:[%s22899_s29 + $0x1cc] ss:$16 sps:$4 sm:$0xff]  }
 0x9d6   : > { %17137 = vmatpush2.bf16.msra.mxu1 %v22078_v8  ;;  %v22039_v8 = vld [vmem:[%s22899_s29 + $0x168] ss:$16 sps:$4 sm:$0xff]  }
 0x9d7   : > { %17138 = vmatprep.subr.bf16.mxu1 %v22083_v22  ;;  %v22042_v22 = vld [vmem:[%s22899_s29 + $0x148] ss:$16 sps:$4 sm:$0xff]  }
 0x9d8   : > { %17098 = vmatpush2.bf16.msra.mxu0 %v21985_v63  ;;  %v22035_v63 = vld [vmem:[%s22899_s29 + $0x1ac] ss:$16 sps:$4 sm:$0xff]  }
 0x9d9   : > { %17099 = vmatprep.subr.bf16.mxu0 %v21990_v7  ;;  %v22038_v7 = vld [vmem:[%s22899_s29 + $0x18c] ss:$16 sps:$4 sm:$0xff]  }
 0x9da   : > { %17139 = vmatpush2.bf16.msra.mxu1 %v22081_v47  ;;  %v22045_v47 = vld [vmem:[%s22899_s29 + $0x128] ss:$16 sps:$4 sm:$0xff]  }
 0x9db   : > { %17140 = vmatprep.subr.bf16.mxu1 %v22086_v17  ;;  %v22048_v17 = vld [vmem:[%s22899_s29 + $0x108] ss:$16 sps:$4 sm:$0xff]  }
 0x9dc   : > { %17100 = vmatpush2.bf16.msra.mxu0 %v21988_v31  ;;  %v22041_v31 = vld [vmem:[%s22899_s29 + $0x16c] ss:$16 sps:$4 sm:$0xff]  }
 0x9dd   : > { %17101 = vmatprep.subr.bf16.mxu0 %v21993_v12  ;;  %v22044_v12 = vld [vmem:[%s22899_s29 + $0x14c] ss:$16 sps:$4 sm:$0xff]  }
 0x9de   : > { %17141 = vmatpush2.bf16.msra.mxu1 %v22084_v42 }
 0x9df   : > { %17142 = vmatprep.subr.bf16.mxu1 %v22089_v21 }
 0x9e0   : > { %17102 = vmatpush2.bf16.msra.mxu0 %v21991_v49  ;;  %v22047_v49 = vld [vmem:[%s22899_s29 + $0x12c] ss:$16 sps:$4 sm:$0xff]  }
 0x9e1   : > { %17103 = vmatprep.subr.bf16.mxu0 %v21996_v14  ;;  %v22050_v14 = vld [vmem:[%s22899_s29 + $0x10c] ss:$16 sps:$4 sm:$0xff]  }
 0x9e2   : > { %17143 = vmatpush2.bf16.msra.mxu1 %v22087_v30 }
 0x9e3   : > { %17144 = vmatprep.subr.bf16.mxu1 %v22092_v54  ;;  %v22149_v54 = vld [vmem:[%s22896_s16] ss:$2 sm:$0xf] }
 0x9e4   : > { %17104 = vmatpush2.bf16.msra.mxu0 %v21994_v5 }
 0x9e5   : > { %17105 = vmatprep.subr.bf16.mxu0 %v21999_v16 }
 0x9e6   : > { %17145 = vmatpush2.bf16.msra.mxu1 %v22090_v45 }
 0x9e7   : > { %17146 = vmatprep.subr.bf16.mxu1 %v22095_v52 }
 0x9e8   : > { %17106 = vmatpush2.bf16.msra.mxu0 %v21997_v35 }
 0x9e9   : > { %17107 = vmatprep.subr.bf16.mxu0 %v22002_v32 }
 0x9ec   : > { %17108 = vmatpush2.bf16.msra.mxu0 %v22000_v46 }
 0x9ed   : > { %17159 = vmatprep.subr.bf16.mxu0 %v22005_v4 }
 0x9ef   : > { %v16028_v44 = vpop.f32.mrf.mxu0  ;;  %17110 = vmatmul.mubr.bf16.vlgmr.msra.gmra.mxu0 %v24540_v0 }
 0x9f0   : > { %v16069_v40 = vpop.f32.mrf.mxu1  ;;  %v16029_v24 = vadd.f32 %v16028_v44, %v24479_v36  ;;  %17160 = vmatpush1.bf16.msra.mxu0 %v22003_v10  ;;  %17191 = vmatprep.mubr.bf16.mxu0 %v24471_v41  ;;  %v24594_v44 = vsub.s32 3, %v24083_v18 }
 0x9f1   : > { %v16030_v55 = vpop.f32.mrf.mxu0  ;;  %17161 = vmatprep.subr.bf16.mxu0 %v22008_v20 }
 0x9f2   : > { %v16071_v57 = vpop.f32.mrf.mxu1  ;;  %v24550_v60 = vadd.f32 %v16069_v40, %v16029_v24  ;;  %v16031_v50 = vadd.f32 %v16030_v55, %v24482_v9  ;;  %v22093_v9 = vld [vmem:[%s22899_s29 + $0x320] ss:$16 sps:$4 sm:$0xff]   ;;  %v16253_v55 = vrot.slane %v22149_v54, %v24591_v13 }
 0x9f3   : > { %v16032_v36 = vpop.f32.mrf.mxu0  ;;  %17147 = vmatpush2.bf16.msra.mxu1 %v22093_v9 }
 0x9f4   : > { %v16073_v41 = vpop.f32.mrf.mxu1  ;;  %v24553_v61 = vadd.f32 %v16071_v57, %v16031_v50  ;;  %17162 = vmatpush1.bf16.msra.mxu0 %v22006_v53  ;;  %17148 = vmatprep.subr.bf16.mxu1 %v22098_v58 }
 0x9f5   : > { %v16033_v56 = vpop.f32.mrf.mxu0  ;;  %17163 = vmatprep.subr.bf16.mxu0 %v22011_v11  ;;  %v16257_v41 = vrot.slane %v22149_v54, %v24594_v44 }
 0x9f6   : > { %v16074_v38 = vpop.f32.mrf.mxu1 }
 0x9f7   : > { %17149 = vmatpush2.bf16.msra.mxu1 %v22096_v29 }
 0x9f8   : > { %17164 = vmatpush1.bf16.msra.mxu0 %v22009_v19  ;;  %17200 = vmatprep.subr.bf16.mxu1 %v22101_v2  ;;  %v22099_v2 = vld [vmem:[%s22899_s29 + $0x2e8] ss:$16 sps:$4 sm:$0xff]  }
 0x9f9   : > { %17165 = vmatprep.subr.bf16.mxu0 %v22014_v39 }
 0x9fc   : > { %17166 = vmatpush1.bf16.msra.mxu0 %v22012_v62 }
 0x9fd   : > { %17167 = vmatprep.subr.bf16.mxu0 %v22017_v28 }
 0xa00   : > { %17168 = vmatpush1.bf16.msra.mxu0 %v22015_v26 }
 0xa01   : > { %17169 = vmatprep.subr.bf16.mxu0 %v22020_v25 }
 0xa04   : > { %17170 = vmatpush1.bf16.msra.mxu0 %v22018_v15  ;;  %v22104_v15 = vld [vmem:[%s22899_s29 + $0x2cc] ss:$16 sps:$4 sm:$0xff]  }
 0xa05   : > { %17171 = vmatprep.subr.bf16.mxu0 %v22023_v3  ;;  %v22102_v3 = vld [vmem:[%s22899_s29 + $0x2c8] ss:$16 sps:$4 sm:$0xff]  }
 0xa08   : > { %17172 = vmatpush1.bf16.msra.mxu0 %v22021_v59  ;;  %v22107_v59 = vld [vmem:[%s22899_s29 + $0x2ac] ss:$16 sps:$4 sm:$0xff]  }
 0xa09   : > { %17173 = vmatprep.subr.bf16.mxu0 %v22026_v33  ;;  %v22105_v33 = vld [vmem:[%s22899_s29 + $0x2a8] ss:$16 sps:$4 sm:$0xff]  }
 0xa0c   : > { %17174 = vmatpush1.bf16.msra.mxu0 %v22024_v34  ;;  %v22110_v34 = vld [vmem:[%s22899_s29 + $0x28c] ss:$16 sps:$4 sm:$0xff]  }
 0xa0d   : > { %17175 = vmatprep.subr.bf16.mxu0 %v22029_v51  ;;  %v22108_v51 = vld [vmem:[%s22899_s29 + $0x288] ss:$16 sps:$4 sm:$0xff]  }
 0xa10   : > { %17176 = vmatpush2.bf16.msra.mxu0 %v22027_v43  ;;  %v22113_v43 = vld [vmem:[%s22899_s29 + $0x26c] ss:$16 sps:$4 sm:$0xff]  }
 0xa11   : > { %17177 = vmatprep.subr.bf16.mxu0 %v22032_v23  ;;  %v22111_v23 = vld [vmem:[%s22899_s29 + $0x268] ss:$16 sps:$4 sm:$0xff]  }
 0xa14   : > { %17178 = vmatpush2.bf16.msra.mxu0 %v22030_v27  ;;  %v22116_v27 = vld [vmem:[%s22899_s29 + $0x24c] ss:$16 sps:$4 sm:$0xff]  }
 0xa15   : > { %17179 = vmatprep.subr.bf16.mxu0 %v22035_v63  ;;  %v22114_v63 = vld [vmem:[%s22899_s29 + $0x248] ss:$16 sps:$4 sm:$0xff]  }
 0xa18   : > { %17180 = vmatpush2.bf16.msra.mxu0 %v22033_v6  ;;  %v22119_v6 = vld [vmem:[%s22899_s29 + $0x22c] ss:$16 sps:$4 sm:$0xff]  }
 0xa19   : > { %17181 = vmatprep.subr.bf16.mxu0 %v22038_v7  ;;  %v22117_v7 = vld [vmem:[%s22899_s29 + $0x228] ss:$16 sps:$4 sm:$0xff]  }
 0xa1c   : > { %17182 = vmatpush2.bf16.msra.mxu0 %v22036_v1  ;;  %v22122_v1 = vld [vmem:[%s22899_s29 + $0x20c] ss:$16 sps:$4 sm:$0xff]  }
 0xa1d   : > { %17183 = vmatprep.subr.bf16.mxu0 %v22041_v31  ;;  %v22120_v31 = vld [vmem:[%s22899_s29 + $0x208] ss:$16 sps:$4 sm:$0xff]  }
 0xa20   : > { %17184 = vmatpush2.bf16.msra.mxu0 %v22039_v8  ;;  %v22125_v8 = vld [vmem:[%s22899_s29 + $0x3ec] ss:$16 sps:$4 sm:$0xff]  }
 0xa21   : > { %17185 = vmatprep.subr.bf16.mxu0 %v22044_v12  ;;  %v22123_v12 = vld [vmem:[%s22899_s29 + $0x3e8] ss:$16 sps:$4 sm:$0xff]  }
 0xa24   : > { %17186 = vmatpush2.bf16.msra.mxu0 %v22042_v22  ;;  %v22128_v22 = vld [vmem:[%s22899_s29 + $0x3cc] ss:$16 sps:$4 sm:$0xff]  }
 0xa25   : > { %17187 = vmatprep.subr.bf16.mxu0 %v22047_v49  ;;  %v22126_v49 = vld [vmem:[%s22899_s29 + $0x3c8] ss:$16 sps:$4 sm:$0xff]  }
 0xa28   : > { %17188 = vmatpush2.bf16.msra.mxu0 %v22045_v47  ;;  %v22131_v47 = vld [vmem:[%s22899_s29 + $0x3ac] ss:$16 sps:$4 sm:$0xff]  }
 0xa29   : > { %17189 = vmatprep.subr.bf16.mxu0 %v22050_v14  ;;  %v22129_v14 = vld [vmem:[%s22899_s29 + $0x3a8] ss:$16 sps:$4 sm:$0xff]  }
 0xa2c   : > { %17190 = vmatpush2.bf16.msra.mxu0 %v22048_v17  ;;  %v22134_v17 = vld [vmem:[%s22899_s29 + $0x38c] ss:$16 sps:$4 sm:$0xff]  }
 0xa2f   : > { %v16110_v5 = vpop.f32.mrf.mxu0  ;;  %17192 = vmatmul.mubr.bf16.vlgmr.msra.gmra.mxu0 %v24540_v0 }
 0xa30   : > { %v16151_v42 = vpop.f32.mrf.mxu1  ;;  %v16111_v4 = vadd.f32 %v16110_v5, %v24550_v60  ;;  %v22150_v60 = vld [vmem:[%s22896_s16 + $0x1] ss:$2 sm:$0xf] }
 0xa31   : > { %v16112_v16 = vpop.f32.mrf.mxu0  ;;  %v16280_v50 = vrot.slane %v22150_v60, %v24591_v13  ;;  %v16284_v56 = vrot.slane %v22150_v60, %v24594_v44  ;;  %v22132_v5 = vld [vmem:[%s22899_s29 + $0x388] ss:$16 sps:$4 sm:$0xff]   ;;  %v16302_v60 = vld [vmem:[#allocation3] sm:$0xff] }
 0xa32   : > { %v16153_v21 = vpop.f32.mrf.mxu1  ;;  %v16113_v10 = vadd.f32 %v16112_v16, %v24553_v61  ;;  %v16152_v20 = vadd.f32 %v16151_v42, %v16111_v4  ;;  %v22137_v42 = vld [vmem:[%s22899_s29 + $0x36c] ss:$16 sps:$4 sm:$0xff]   ;;  %v22135_v16 = vld [vmem:[%s22899_s29 + $0x368] ss:$16 sps:$4 sm:$0xff]  }
 0xa33   : > { %v16114_v35 = vpop.f32.mrf.mxu0 }
 0xa34   : > { %v16155_v30 = vpop.f32.mrf.mxu1  ;;  %v16154_v24 = vadd.f32 %v16153_v21, %v16113_v10  ;;  %v22140_v21 = vld [vmem:[%s22899_s29 + $0x34c] ss:$16 sps:$4 sm:$0xff]   ;;  %v22141_v10 = vld [vmem:[%s22899_s29 + $0x328] ss:$16 sps:$4 sm:$0xff]  }
 0xa35   : > { %v16115_v32 = vpop.f32.mrf.mxu0  ;;  %v22138_v30 = vld [vmem:[%s22899_s29 + $0x348] ss:$16 sps:$4 sm:$0xff]  }
 0xa36   : > { %v16156_v46 = vpop.f32.mrf.mxu1 }
 0xa37   : > { %v22143_v46 = vld [vmem:[%s22899_s29 + $0x32c] ss:$16 sps:$4 sm:$0xff]  }
 0xa6f   : > { %v16192_v0 = vpop.f32.mrf.mxu0 }
 0xa70   : > { %v16233_v40 = vpop.f32.mrf.mxu1  ;;  %v16193_v53 = vadd.f32 %v16192_v0, %v16152_v20  ;;  %v22146_v0 = vld [vmem:[%s22899_s29 + $0x30c] ss:$16 sps:$4 sm:$0xff]  }
 0xa71   : > { %v16194_v57 = vpop.f32.mrf.mxu0 }
 0xa72   : > { %v16235_v11 = vpop.f32.mrf.mxu1  ;;  %v16234_v45 = vadd.f32 %v16233_v40, %v16193_v53  ;;  %v16195_v36 = vadd.f32 %v16194_v57, %v16154_v24  ;;  %v22144_v40 = vld [vmem:[%s22899_s29 + $0x308] ss:$16 sps:$4 sm:$0xff]  }
 0xa73   : > { %v16196_v18 = vpop.f32.mrf.mxu0  ;;  %v16301_v57 = vld [vmem:[#allocation3 + $0x8] sm:$0xff] }
 0xa74   : > { %v16237_v61 = vpop.f32.mrf.mxu1  ;;  %v16264_v19 = vmul.f32 %v16253_v55, %v16234_v45  ;;  %v16236_v52 = vadd.f32 %v16235_v11, %v16195_v36 }
 0xa75   : > { %v16197_v38 = vpop.f32.mrf.mxu0 }
 0xa76   : > { %v16238_v39 = vpop.f32.mrf.mxu1  ;;  %v16291_v9 = vadd.f32 %v16280_v50, %v16264_v19  ;;  %v16265_v62 = vmul.f32 %v16257_v41, %v16236_v52  ;;  %v16303_v52 = vld [vmem:[#allocation3 + $0x10] sm:$0xff] }
 0xa77   : > { %v16304_v39 = vld [vmem:[#allocation3 + $0x18] sm:$0xff] }
 0xa78   : > { %v16295_v58 = vmax.f32 %v16291_v9, 0.0  ;;  %v16292_v28 = vadd.f32 %v16284_v56, %v16265_v62 }
 0xa7a   : > { %16299 = vst [vmem:[%s22913_s3 + $0x10] sm:$0xff] %v16295_v58  ;;  %v16296_v29 = vmax.f32 %v16292_v28, 0.0  ;;  %v24605_v25 = vpack.c.bf16 %v16295_v58, %v16295_v58 }
 0xa7c   : > { %16300 = vst [vmem:[%s22913_s3 + $0x18] sm:$0xff] %v16296_v29  ;;  %v16308_v26 = vpack.c.bf16 %v16296_v29, %v16296_v29 }
 0xa7e   : > { %17150 = vmatprep.mubr.bf16.mxu1 %v16308_v26 }
 0xa7f   : > { %17151 = vmatmul.mubr.bf16.vlgmr.msra.gmra.mxu1 %v24605_v25 }
 0xa80   : > { %17201 = vmatpush1.bf16.msra.mxu1 %v22099_v2  ;;  %17232 = vmatprep.mubr.bf16.mxu1 %v16308_v26 }
 0xa81   : > { %17202 = vmatprep.subr.bf16.mxu1 %v22104_v15 }
 0xa84   : > { %17203 = vmatpush1.bf16.msra.mxu1 %v22102_v3 }
 0xa85   : > { %17204 = vmatprep.subr.bf16.mxu1 %v22107_v59 }
 0xa88   : > { %17205 = vmatpush1.bf16.msra.mxu1 %v22105_v33 }
 0xa89   : > { %17206 = vmatprep.subr.bf16.mxu1 %v22110_v34 }
 0xa8c   : > { %17207 = vmatpush1.bf16.msra.mxu1 %v22108_v51 }
 0xa8d   : > { %17208 = vmatprep.subr.bf16.mxu1 %v22113_v43 }
 0xa90   : > { %17209 = vmatpush1.bf16.msra.mxu1 %v22111_v23 }
 0xa91   : > { %17210 = vmatprep.subr.bf16.mxu1 %v22116_v27 }
 0xa94   : > { %17211 = vmatpush1.bf16.msra.mxu1 %v22114_v63 }
 0xa95   : > { %17212 = vmatprep.subr.bf16.mxu1 %v22119_v6 }
 0xa98   : > { %17213 = vmatpush1.bf16.msra.mxu1 %v22117_v7 }
 0xa99   : > { %17214 = vmatprep.subr.bf16.mxu1 %v22122_v1 }
 0xa9c   : > { %17215 = vmatpush1.bf16.msra.mxu1 %v22120_v31 }
 0xa9d   : > { %17216 = vmatprep.subr.bf16.mxu1 %v22125_v8 }
 0xaa0   : > { %17217 = vmatpush2.bf16.msra.mxu1 %v22123_v12 }
 0xaa1   : > { %17218 = vmatprep.subr.bf16.mxu1 %v22128_v22 }
 0xaa4   : > { %17219 = vmatpush2.bf16.msra.mxu1 %v22126_v49 }
 0xaa5   : > { %17220 = vmatprep.subr.bf16.mxu1 %v22131_v47 }
 0xaa8   : > { %17221 = vmatpush2.bf16.msra.mxu1 %v22129_v14 }
 0xaa9   : > { %17222 = vmatprep.subr.bf16.mxu1 %v22134_v17 }
 0xaac   : > { %17223 = vmatpush2.bf16.msra.mxu1 %v22132_v5 }
 0xaad   : > { %17224 = vmatprep.subr.bf16.mxu1 %v22137_v42 }
 0xaaf   : > { %v17111_v35 = vpop.f32.mrf.mxu0 }
 0xab0   : > { %17225 = vmatpush2.bf16.msra.mxu1 %v22135_v16 }
 0xab1   : > { %v17113_v32 = vpop.f32.mrf.mxu0  ;;  %17226 = vmatprep.subr.bf16.mxu1 %v22140_v21 }
 0xab3   : > { %v17115_v4 = vpop.f32.mrf.mxu0 }
 0xab4   : > { %17227 = vmatpush2.bf16.msra.mxu1 %v22138_v30 }
 0xab5   : > { %v17116_v20 = vpop.f32.mrf.mxu0  ;;  %17228 = vmatprep.subr.bf16.mxu1 %v22143_v46 }
 0xab8   : > { %17229 = vmatpush2.bf16.msra.mxu1 %v22141_v10 }
 0xab9   : > { %17230 = vmatprep.subr.bf16.mxu1 %v22146_v0 }
 0xabc   : > { %17231 = vmatpush2.bf16.msra.mxu1 %v22144_v40 }
 0xabf   : > { %17233 = vmatmul.mubr.bf16.vlgmr.msra.gmra.mxu1 %v24605_v25 }
 0xaef   : > { %v17193_v24 = vpop.f32.mrf.mxu0 }
 0xaf1   : > { %v17195_v53 = vpop.f32.mrf.mxu0 }
 0xaf3   : > { %v17197_v54 = vpop.f32.mrf.mxu0 }
 0xaf5   : > { %v17198_v55 = vpop.f32.mrf.mxu0 }
 0xb3f   : > { %v17152_v11 = vpop.f32.mrf.mxu1 }
 0xb40   : > { %v17153_v45 = vadd.f32 %v17152_v11, %v17111_v35 }
 0xb41   : > { %v17154_v50 = vpop.f32.mrf.mxu1 }
 0xb42   : > { %v17241_v36 = vadd.f32 %v17153_v45, %v16301_v57  ;;  %v17155_v41 = vadd.f32 %v17154_v50, %v17113_v32 }
 0xb43   : > { %v17156_v18 = vpop.f32.mrf.mxu1 }
 0xb44   : > { %17245 = vst [vmem:[#allocation3 + $0x8] sm:$0xff] %v17241_v36  ;;  %v17242_v61 = vadd.f32 %v17155_v41, %v16302_v60 }
 0xb45   : > { %v17157_v19 = vpop.f32.mrf.mxu1 }
 0xb46   : > { %17246 = vst [vmem:[#allocation3] sm:$0xff] %v17242_v61 }
 0xb7f   : > { %v17234_v56 = vpop.f32.mrf.mxu1 }
 0xb80   : > { %v17235_v38 = vadd.f32 %v17234_v56, %v17193_v24 }
 0xb81   : > { %v17236_v9 = vpop.f32.mrf.mxu1 }
 0xb82   : > { %v17243_v62 = vadd.f32 %v17235_v38, %v16303_v52  ;;  %v17237_v58 = vadd.f32 %v17236_v9, %v17195_v53  ;;  %17252 = sbr.rel (%p20139_p6) target bundleno = 3201 (0xc81), region = 96 }
 0xb83   : > { %v17238_v28 = vpop.f32.mrf.mxu1 }
 0xb84   : > { %17247 = vst [vmem:[#allocation3 + $0x10] sm:$0xff] %v17243_v62  ;;  %v17244_v29 = vadd.f32 %v17237_v58, %v16304_v39 }
 0xb85   : > { %v17239_v26 = vpop.f32.mrf.mxu1 }
 0xb86   : > { %17248 = vst [vmem:[#allocation3 + $0x18] sm:$0xff] %v17244_v29 }
 0xb87   : > { %v22151_v2 = vld [vmem:[%s24816_s7 + $0x78] sm:$0xff]   ;;  %v22155_v59 = vld [vmem:[%s24816_s7 + $0x70] sm:$0xff]   ;;  %v22159_v43 = vld [vmem:[%s24816_s7 + $0x68] sm:$0xff]   ;;  %vm17639_vm0 = vcmask 523264  }
 0xb88   : > { %v22152_v25 = vld [vmem:[%s24816_s7 + $0xf8] sm:$0xff]   ;;  %20204 = vmatprep.subr.bf16.mxu0 %v22151_v2  ;;  %v22156_v33 = vld [vmem:[%s24816_s7 + $0xf0] sm:$0xff]   ;;  %v22160_v23 = vld [vmem:[%s24816_s7 + $0xe8] sm:$0xff]  }
 0xb89   : > { %v22153_v15 = vld [vmem:[%s24816_s7 + $0x38] sm:$0xff]   ;;  %20226 = vmatprep.subr.bf16.mxu1 %v22152_v25  ;;  %v22157_v34 = vld [vmem:[%s24816_s7 + $0x30] sm:$0xff]   ;;  %v22161_v27 = vld [vmem:[%s24816_s7 + $0x28] sm:$0xff]  }
 0xb8a   : > { %v22154_v3 = vld [vmem:[%s24816_s7 + $0xb8] sm:$0xff]   ;;  %20205 = vmatpush3.bf16.msra.mxu0 %v22153_v15  ;;  %v22158_v51 = vld [vmem:[%s24816_s7 + $0xb0] sm:$0xff]   ;;  %v22162_v63 = vld [vmem:[%s24816_s7 + $0xa8] sm:$0xff]  }
 0xb8b   : > { %20227 = vmatpush3.bf16.msra.mxu1 %v22154_v3  ;;  %20206 = vmatprep.subr.bf16.mxu0 %v22155_v59  ;;  %v22163_v6 = vld [vmem:[%s24816_s7 + $0x60] sm:$0xff]   ;;  %v22167_v8 = vld [vmem:[%s24816_s7 + $0x58] sm:$0xff]   ;;  %v22171_v47 = vld [vmem:[%s24816_s7 + $0x50] sm:$0xff]  }
 0xb8c   : > { %20228 = vmatprep.subr.bf16.mxu1 %v22156_v33  ;;  %v22164_v7 = vld [vmem:[%s24816_s7 + $0xe0] sm:$0xff]   ;;  %v22168_v12 = vld [vmem:[%s24816_s7 + $0xd8] sm:$0xff]   ;;  %v22172_v14 = vld [vmem:[%s24816_s7 + $0xd0] sm:$0xff]  }
 0xb8d   : > { %v22165_v1 = vld [vmem:[%s24816_s7 + $0x20] sm:$0xff]   ;;  %v22169_v22 = vld [vmem:[%s24816_s7 + $0x18] sm:$0xff]   ;;  %v22173_v17 = vld [vmem:[%s24816_s7 + $0x10] sm:$0xff]  }
 0xb8e   : > { %20207 = vmatpush3.bf16.msra.mxu0 %v22157_v34  ;;  %v22166_v31 = vld [vmem:[%s24816_s7 + $0xa0] sm:$0xff]   ;;  %v22170_v49 = vld [vmem:[%s24816_s7 + $0x98] sm:$0xff]   ;;  %v22174_v5 = vld [vmem:[%s24816_s7 + $0x90] sm:$0xff]  }
 0xb8f   : > { %20229 = vmatpush3.bf16.msra.mxu1 %v22158_v51  ;;  %20208 = vmatprep.subr.bf16.mxu0 %v22159_v43  ;;  %v22175_v42 = vld [vmem:[%s24816_s7 + $0x48] sm:$0xff]   ;;  %v22179_v30 = vld [vmem:[%s24816_s7 + $0x40] sm:$0xff]   ;;  %v17257_v20 = vld [vmem:[#allocation15] sm:$0xf] }
 0xb90   : > { %20230 = vmatprep.subr.bf16.mxu1 %v22160_v23  ;;  %v22176_v16 = vld [vmem:[%s24816_s7 + $0xc8] sm:$0xff]   ;;  %v22180_v32 = vld [vmem:[%s24816_s7 + $0xc0] sm:$0xff]   ;;  %v17256_v0 = vld [vmem:[#allocation3 + $0x18] sm:$0xff]  ;;  %v17266_v40 = vrot.slane %v17257_v20, %v24102_v48  ;;  %v17274_v24 = vrot.slane %v17257_v20, %v24594_v44  ;;  %v17262_v54 = vrot.slane %v17257_v20, %v24094_v37  ;;  %v17270_v57 = vrot.slane %v17257_v20, %v24591_v13 }
 0xb91   : > { %v22177_v21 = vld [vmem:[%s24816_s7 + $0x8] sm:$0xff]   ;;  %v22181_v46 = vld [vmem:[%s24816_s7] sm:$0xff]   ;;  %v17255_v55 = vld [vmem:[#allocation3 + $0x10] sm:$0xff] }
 0xb92   : > { %20209 = vmatpush3.bf16.msra.mxu0 %v22161_v27  ;;  %v22178_v35 = vld [vmem:[%s24816_s7 + $0x88] sm:$0xff]   ;;  %v22182_v4 = vld [vmem:[%s24816_s7 + $0x80] sm:$0xff]   ;;  %v17282_v45 = vadd.f32 %v17274_v24, %v17256_v0  ;;  %v17281_v50 = vadd.f32 %v17270_v57, %v17255_v55  ;;  %v20140_v56 = vld [vmem:[#allocation16] ss:$0 sm:$0xff] }
 0xb93   : > { %20231 = vmatpush3.bf16.msra.mxu1 %v22162_v63  ;;  %20210 = vmatprep.subr.bf16.mxu0 %v22163_v6  ;;  %v17254_v10 = vld [vmem:[#allocation3] sm:$0xff]  ;;  %v17253_v53 = vld [vmem:[#allocation3 + $0x8] sm:$0xff] }
 0xb94   : > { %20232 = vmatprep.subr.bf16.mxu1 %v22164_v7  ;;  %v17280_v11 = vadd.f32 %v17266_v40, %v17254_v10  ;;  %v17279_v60 = vadd.f32 %v17262_v54, %v17253_v53  ;;  %v17286_v41 = vmax.f32 %v17282_v45, 0.0  ;;  %v17285_v61 = vmax.f32 %v17281_v50, 0.0 }
 0xb96   : > { %20211 = vmatpush3.bf16.msra.mxu0 %v22165_v1  ;;  %v17284_v36 = vmax.f32 %v17280_v11, 0.0  ;;  %v17283_v18 = vmax.f32 %v17279_v60, 0.0  ;;  %17290 = vst [vmem:[#allocation21 + $0x18] sm:$0xff] %v17286_v41  ;;  %v17294_v48 = vpack.c.bf16 %v17286_v41, %v17286_v41  ;;  %17289 = vst [vmem:[#allocation21 + $0x10] sm:$0xff] %v17285_v61  ;;  %v17293_v52 = vpack.c.bf16 %v17285_v61, %v17285_v61 }
 0xb97   : > { %20233 = vmatpush3.bf16.msra.mxu1 %v22166_v31  ;;  %20212 = vmatprep.subr.bf16.mxu0 %v22167_v8 }
 0xb98   : > { %20234 = vmatprep.subr.bf16.mxu1 %v22168_v12  ;;  %17288 = vst [vmem:[#allocation21 + $0x8] sm:$0xff] %v17284_v36  ;;  %v17292_v19 = vpack.c.bf16 %v17284_v36, %v17284_v36  ;;  %17287 = vst [vmem:[#allocation21] sm:$0xff] %v17283_v18  ;;  %v17291_v44 = vpack.c.bf16 %v17283_v18, %v17283_v18  ;;  %17630 = vmatprep.mubr.bf16.mxu1 %v17294_v48 }
 0xb9a   : > { %20213 = vmatpush3.bf16.msra.mxu0 %v22169_v22  ;;  %17590 = vmatprep.mubr.bf16.mxu0 %v17292_v19 }
 0xb9b   : > { %20235 = vmatpush3.bf16.msra.mxu1 %v22170_v49  ;;  %20214 = vmatprep.subr.bf16.mxu0 %v22171_v47 }
 0xb9c   : > { %20236 = vmatprep.subr.bf16.mxu1 %v22172_v14 }
 0xb9e   : > { %20215 = vmatpush3.bf16.msra.mxu0 %v22173_v17 }
 0xb9f   : > { %20237 = vmatpush3.bf16.msra.mxu1 %v22174_v5  ;;  %20216 = vmatprep.subr.bf16.mxu0 %v22175_v42 }
 0xba0   : > { %20238 = vmatprep.subr.bf16.mxu1 %v22176_v16 }
 0xba2   : > { %20217 = vmatpush3.bf16.msra.mxu0 %v22177_v21 }
 0xba3   : > { %20239 = vmatpush3.bf16.msra.mxu1 %v22178_v35  ;;  %20218 = vmatprep.subr.bf16.mxu0 %v22179_v30 }
 0xba4   : > { %20240 = vmatprep.subr.bf16.mxu1 %v22180_v32 }
 0xba6   : > { %20219 = vmatpush3.bf16.msra.mxu0 %v22181_v46 }
 0xba7   : > { %20241 = vmatpush3.bf16.msra.mxu1 %v22182_v4 }
 0xba9   : > { %17591 = vmatmul.mubr.bf16.vlgmr.msra.gmra.mxu0 %v17291_v44 }
 0xbaa   : > { %17631 = vmatmul.mubr.bf16.vlgmr.msra.gmra.mxu1 %v17293_v52 }
 0xc69   : > { %v20220_v37 = vpop.f32.mrf.mxu0 }
 0xc6a   : > { %v20242_v13 = vpop.f32.mrf.mxu1 }
 0xc6b   : > { %v20221_v38 = vpop.f32.mrf.mxu0 }
 0xc6c   : > { %v20243_v39 = vpop.f32.mrf.mxu1  ;;  %v20222_v9 = vadd.f32 %v20221_v38, %v20220_v37 }
 0xc6d   : > { %v20223_v62 = vpop.f32.mrf.mxu0  ;;  %v20244_v29 = vadd.f32 %v20243_v39, %v20242_v13 }
 0xc6e   : > { %v20245_v58 = vpop.f32.mrf.mxu1  ;;  %v17593_v28 = vadd.f32 %v20222_v9, %v20140_v56 }
 0xc6f   : > { %v20224_v26 = vpop.f32.mrf.mxu0 }
 0xc70   : > { %v20246_v2 = vpop.f32.mrf.mxu1  ;;  %v17633_v25 = vadd.f32 %v20244_v29, %v17593_v28 }
 0xc72   : > { %22183 = vtanh.f32 %v17633_v25 }
 0xc7f   : > { %v22184_v15 = vpop.eup %22183 }
 0xc80   : > { %17640 = vst.msk [vmem:[#allocation22] sm:$0xff] %vm17639_vm0, %v22184_v15 }
 0xc81 PF: > { %s20203_s13 = sshll.u32 %s22672_s27, 9  ;;  %s17667_s16 = sshll.u32 %s22913_s3, 4  ;;  %s17668_s16 = int_to_ptr.vmem [resolvable:$true] %s17667_s16 }
 0xc82   : > { %s17665_s12 = scalar_lea.hbm %s24819_s10, %s20203_s13  ;;  %s17642_s25 = scalar_lea.sflag [#allocation20], %s22886_s15 }
 0xc83   : > { %s22399_s29 = scalar_lea.vmem %s17668_s16, 512  ;;  %p24885_p8 = scmp.ne.s32.totalorder %s24859_s21, 0 }
 0xc84   : > { %p22400_p0 = scmp.ne.s32.totalorder %s17668_s16, %s22399_s29  ;;  %s22582_s20 = smov [#allocation19]  }
 0xc85   : > { %s22403_s30 = sshll.u32 %s22582_s20, 4  ;;  %s22404_s30 = int_to_ptr.vmem [resolvable:$false] %s22403_s30 }
 0xc86   : > { %p22401_p9 = pnand %p22400_p0, %p24885_p8  ;;  %s22405_s17 = scalar_lea.vmem %s22404_s30, 1024 }
 0xc87   : > { %p22406_p7 = scmp.lt.s32.totalorder %s17668_s16, %s22404_s30  ;;  %p22407_p2 = scmp.lt.s32.totalorder %s22405_s17, %s22399_s29 }
 0xc88   : > { %p22402_p4 = pneg %p22401_p9 }
 0xc89   : > { %p22408_p5 = por %p22407_p2, %p22406_p7 }
 0xc8b   : > { %p22409_p10 = pnand %p22408_p5, %p22402_p4 }
 0xc8d   : > { %22412 = shalt.err (!%p22409_p10)
}
 0xc8e   : > { %s22413_s23 = scalar_lea.hbm %s17665_s12, 512  ;;  %s22417_s0 = scalar_lea.hbm %s24819_s10, 2048 }
 0xc8f   : > { %p22414_p11 = scmp.ne.s32.totalorder %s17665_s12, %s22413_s23  ;;  %p22418_p1 = scmp.lt.s32.totalorder %s17665_s12, %s24819_s10 }
 0xc90   : > { %p22419_p13 = scmp.lt.s32.totalorder %s22417_s0, %s22413_s23 }
 0xc91   : > { %p22415_p3 = pnand %p22414_p11, %p24885_p8 }
 0xc92   : > { %p22420_p6 = por %p22419_p13, %p22418_p1 }
 0xc93   : > { %p22416_p12 = pneg %p22415_p3 }
 0xc95   : > { %p22421_p0 = pnand %p22420_p6, %p22416_p12 }
 0xc97   : > { %22424 = shalt.err (!%p22421_p0)
}
 0xc98   : > { %20276 = dma.vmem_to_hbm [thread:$0]  (%p24885_p8), %s17668_s16, 512, %s17665_s12, %s17642_s25  }
 0xc99   : > { %s22583_s6 = smov [#allocation18]   ;;  %s22584_s28 = smov [#allocation21]  }
 0xc9a   : > { %s17653_s19 = sshll.u32 %s22583_s6, 4  ;;  %s17678_s1 = sshll.u32 %s22584_s28, 4  ;;  %s17654_s19 = int_to_ptr.vmem [resolvable:$true] %s17653_s19  ;;  %s17679_s1 = int_to_ptr.vmem [resolvable:$true] %s17678_s1 }
 0xc9b   : > { %s22425_s13 = scalar_lea.vmem %s17654_s19, 4096  ;;  %p24886_p4 = scmp.eq.s32.totalorder %s22672_s27, 3 }
 0xc9c   : > { %p22426_p9 = scmp.ne.s32.totalorder %s17654_s19, %s22425_s13  ;;  %p22432_p5 = scmp.lt.s32.totalorder %s17654_s19, %s17654_s19 }
 0xc9d   : > { %p22433_p10 = scmp.lt.s32.totalorder %s22425_s13, %s22425_s13 }
 0xc9e   : > { %p22427_p7 = pnand %p22426_p9, %p24886_p4 }
 0xc9f   : > { %p22434_p11 = por %p22433_p10, %p22432_p5 }
 0xca0   : > { %p22428_p2 = pneg %p22427_p7 }
 0xca2   : > { %p22435_p3 = pnand %p22434_p11, %p22428_p2 }
 0xca4   : > { %22438 = shalt.err (!%p22435_p3)
}
 0xca5   : > { %p24887_p12 = pmov %p24886_p4  ;;  %s22449_s18 = scalar_lea.vmem %s17679_s1, 512 }
 0xca6   : > { %p22450_p8 = scmp.ne.s32.totalorder %s17679_s1, %s22449_s18  ;;  %p24888_p1 = pmov %p24886_p4 }
 0xca7   : > { %20275 = dma.vmem_to_hbm [thread:$0]  (%p24887_p12), %s17654_s19, 4096, %s24818_s9, [#allocation6]  }
 0xca8   : > { %p22451_p13 = pnand %p22450_p8, %p24888_p1  ;;  %p22456_p0 = scmp.lt.s32.totalorder %s17679_s1, %s17679_s1 }
 0xca9   : > { %p22457_p9 = scmp.lt.s32.totalorder %s22449_s18, %s22449_s18 }
 0xcaa   : > { %p22452_p6 = pneg %p22451_p13 }
 0xcab   : > { %p22458_p4 = por %p22457_p9, %p22456_p0 }
 0xcad   : > { %p22459_p7 = pnand %p22458_p4, %p22452_p6 }
 0xcaf   : > { %22462 = shalt.err (!%p22459_p7)
}
 0xcb0   : > { %p24889_p2 = pmov %p24888_p1  ;;  %s24890_s25 = sld [smem:[#allocation42_spill]] }
 0xcb1   : > { %s22585_s29 = smov [#allocation22]   ;;  %p24891_p10 = pmov %p24888_p1 }
 0xcb2   : > { %s17689_s20 = sshll.u32 %s22585_s29, 4  ;;  %s17690_s20 = int_to_ptr.vmem [resolvable:$true] %s17689_s20 }
 0xcb3   : > { %s22473_s30 = scalar_lea.vmem %s17690_s20, 128  ;;  %p22480_p12 = scmp.lt.s32.totalorder %s17690_s20, %s17690_s20 }
 0xcb4   : > { %p22474_p5 = scmp.ne.s32.totalorder %s17690_s20, %s22473_s30  ;;  %p22481_p8 = scmp.lt.s32.totalorder %s22473_s30, %s22473_s30 }
 0xcb6   : > { %20278 = dma.vmem_to_hbm [thread:$0]  (%p24889_p2), %s17679_s1, 512, %s24890_s25, [#allocation20]  }
 0xcb7   : > { %p22475_p11 = pnand %p22474_p5, %p24891_p10  ;;  %p22482_p1 = por %p22481_p8, %p22480_p12 }
 0xcb9   : > { %p22476_p3 = pneg %p22475_p11 }
 0xcbb   : > { %p22483_p13 = pnand %p22482_p1, %p22476_p3 }
 0xcbd   : > { %22486 = shalt.err (!%p22483_p13)
}
 0xcbe   : > { %p24892_p6 = pmov %p24889_p2  ;;  %s24893_s15 = sld [smem:[#allocation43_spill]] }
 0xcbf   : > { %p24894_p0 = pmov %p24889_p2 }
 0xcc4   : > { %20280 = dma.vmem_to_hbm [thread:$0]  (%p24892_p6), %s17690_s20, 128, %s24893_s15, [#allocation23]  }
 0xcc5   : > { %22538 = dma.done.wait (%p24894_p0), [#allocation6], 4096   ;;  %p24895_p9 = pmov %p24894_p0 }
 0xcc6   : > { %p24896_p4 = pmov %p24894_p0 }
 0xcc7   : > { %22540 = vsyncadd (%p24895_p9), [#allocation6], 4294963200 }
 0xcc8   : > { %22542 = dma.done.wait (%p24896_p4), [#allocation20], 512   ;;  %p24897_p7 = pmov %p24894_p0 }
 0xcc9   : > { %p24898_p2 = pmov %p24894_p0 }
 0xcca   : > { %22544 = vsyncadd (%p24897_p7), [#allocation20], 4294966784 }
 0xccb   : > { %22546 = dma.done.wait (%p24898_p2), [#allocation23], 128   ;;  %p24899_p5 = pmov %p24894_p0 }
 0xccd   : > { %22548 = vsyncadd (%p24899_p5), [#allocation23], 4294967168 }
 0xcce PF: > { %s24900_s3 = sld [smem:[#allocation37_spill]]  ;;  %p20335_p10 = scmp.ge.s32.totalorder %s22567_s24, 2 }
 0xccf   : > { %s24901_s0 = sadd.s32 4294967294, %s22567_s24  }
 0xcd0   : > { %s17713_s11 = sand.u32 1, %s24901_s0  }
 0xcd1   : > { %s17714_s14 = scalar_lea.sflag [#allocation20], %s17713_s11 }
 0xcd4   : > { %p24902_p11 = scmp.ne.s32.totalorder %s24900_s3, 0 }
 0xcd6   : > { %p20315_p3 = pnand %p20335_p10, %p24902_p11 }
 0xcd8   : > { %p20316_p12 = pneg %p20315_p3 }
 0xcda   : > { %22550 = dma.done.wait (%p20316_p12), %s17714_s14, 512  }
 0xcdb   : > { %22552 = vsyncadd (%p20316_p12), %s17714_s14, 4294966784  ;;  %s24903_s24 = sld [smem:[#allocation35_spill]]  ;;  %s24906_s21 = smov %s22559_s22 }
 0xcdc   : > { %s24904_s6 = sld [smem:[#allocation34_spill]] }
 0xcdd   : > { %s24905_s23 = sld [smem:[#allocation36_spill]] }
 0xce1   : > { %p34_p8 = scmp.ge.s32.totalorder %s24903_s24, 6  }
 0xce2   : > { %s24907_s22 = smov %s24904_s6 }
 0xce3   :  { %36 = sbr.rel (!%p34_p8) target bundleno = 19 (0x13), region = 187 }
 0xce8   :  { %17719 = vsyncpa [#allocation5], 1 }
 0xce9   :  { %17721 = vsyncpa [#allocation5 + $0x1], 1 }
 0xcea   :  { %17722 = vsyncpa [#allocation8], 1 }
 0xceb   :  { %17723 = vsyncpa [#allocation11], 1 }
 0xcec   :  { %17725 = vsyncpa [#allocation11 + $0x1], 1 }
 0xced   :  { %17726 = vsyncpa [#allocation14], 1 }
 0xcee   :  { %17728 = vsyncpa [#allocation14 + $0x1], 1 }
 0xcef   :  { %17729 = vsyncpa [#allocation17], 1 }
 0xcf0   :  { %17730 = vsyncpa [#allocation6], 1 }
 0xcf1   :  { %17732 = vsyncpa [#allocation6 + $0x1], 1 }
 0xcf2   :  { %17733 = vsyncpa [#allocation20], 1 }
 0xcf3   :  { %17735 = vsyncpa [#allocation20 + $0x1], 1 }
 0xcf4   :  { %17736 = vsyncpa [#allocation23], 1 }

</bundles_post_ra>
